<compile_context>
chip_gen: v5e
topology: v5e:2x2
jax: 0.10.0
libtpu: 0.0.40
codegen_flags: <defaults>
</compile_context>

<pallas_src>
import functools
import math

import jax
import jax.numpy as jnp
from jax import lax
from jax.experimental import pallas as pl
from jax.experimental.pallas import tpu as pltpu

EPS = 1e-5
MXU_DTYPE = jnp.bfloat16  # MXU operand dtype (f32 accumulation everywhere)


# ----------------------------------------------------------------------------
# Fused BN(eval) + ReLU + Conv3d(3x3x3, pad=1, no bias) [+ residual] kernel
# ----------------------------------------------------------------------------
def _make_fused_conv_kernel(H, W, Cin, Cout, has_residual, mxu_dtype):
    HW = H * W
    PAD = W + 1  # covers the largest in-plane row shift |(kh-1)*W + (kw-1)|

    def kernel(*refs):
        if has_residual:
            (x_ref, s_ref, b_ref, w_ref, r_ref, o_ref,
             halo_ref, acc_ref) = refs
        else:
            (x_ref, s_ref, b_ref, w_ref, o_ref,
             halo_ref, acc_ref) = refs
            r_ref = None

        d = pl.program_id(1)
        kd = pl.program_id(2)
        D = pl.num_programs(1)

        @pl.when(kd == 0)
        def _init():
            halo_ref[...] = jnp.zeros_like(halo_ref)
            acc_ref[...] = jnp.zeros_like(acc_ref)

        src_d = d + kd - 1
        valid = jnp.logical_and(src_d >= 0, src_d < D)

        @pl.when(valid)
        def _accumulate():
            # Fused BatchNorm(eval) + ReLU (f32 VPU math), staged into the
            # zero-halo VMEM buffer so the 9 in-plane taps read shifted
            # windows with correct zero padding (pad applied AFTER the ReLU,
            # exactly like PyTorch Conv3d zero padding).
            halo_ref[PAD:PAD + HW, :] = jnp.maximum(
                x_ref[0, 0] * s_ref[...] + b_ref[...], 0.0)

            # Per-output-column validity masks for the W shift (dw = -1,0,1).
            ww = lax.broadcasted_iota(jnp.int32, (HW, 1), 0) % W
            wmask = [(ww + dw >= 0) & (ww + dw < W) for dw in (-1, 0, 1)]

            acc = acc_ref[...]
            for kh in range(3):
                for kw in range(3):
                    start = PAD + (kh - 1) * W + (kw - 1)
                    tap = jnp.where(wmask[kw],
                                    halo_ref[start:start + HW, :], 0.0)
                    acc = acc + jnp.dot(tap.astype(mxu_dtype),
                                        w_ref[0, kh * 3 + kw],
                                        preferred_element_type=jnp.float32)
            acc_ref[...] = acc

        @pl.when(kd == 2)
        def _finalize():
            out = acc_ref[...]
            if has_residual:
                out = out + r_ref[0, 0]
            o_ref[0, 0] = out.astype(o_ref.dtype)

    return kernel


def bn_relu_conv3d(x, bn, w, residual=None):
    """Fused BatchNorm3d(eval)+ReLU+Conv3d(3,1,1,no bias), channels-last.

    x:        (N, D, H, W, Cin)  f32 activations (channels-last)
    bn:       dict of gamma/beta/mean/var, each (Cin,)
    w:        (Cout, Cin, 3, 3, 3)  PyTorch Conv3d weight layout
    residual: optional (N, D, H, W, Cout), added to the conv output
    returns:  (N, D, H, W, Cout) f32 channels-last
    """
    N, D, H, W, Cin = x.shape
    Cout = w.shape[0]
    HW = H * W
    PAD = W + 1

    scale = (bn["gamma"] / jnp.sqrt(bn["var"] + EPS)).astype(jnp.float32)
    shift = (bn["beta"] - bn["mean"] * scale).astype(jnp.float32)

    x4 = x.reshape(N, D, HW, Cin).astype(jnp.float32)
    # (Cout, Cin, kD, kH, kW) -> (kD, kH*3+kW, Cin, Cout), MXU operand dtype
    w_r = jnp.transpose(w, (2, 3, 4, 1, 0)).reshape(3, 9, Cin, Cout)
    w_r = w_r.astype(MXU_DTYPE)

    in_specs = [
        pl.BlockSpec((1, 1, HW, Cin),
                     lambda n, d, kd: (n, jnp.clip(d + kd - 1, 0, D - 1),
                                       0, 0)),
        pl.BlockSpec((1, Cin), lambda n, d, kd: (0, 0)),
        pl.BlockSpec((1, Cin), lambda n, d, kd: (0, 0)),
        pl.BlockSpec((1, 9, Cin, Cout), lambda n, d, kd: (kd, 0, 0, 0)),
    ]
    args = [x4, scale.reshape(1, Cin), shift.reshape(1, Cin), w_r]
    if residual is not None:
        in_specs.append(
            pl.BlockSpec((1, 1, HW, Cout), lambda n, d, kd: (n, d, 0, 0)))
        args.append(residual.reshape(N, D, HW, Cout).astype(jnp.float32))

    out = pl.pallas_call(
        _make_fused_conv_kernel(H, W, Cin, Cout, residual is not None,
                                MXU_DTYPE),
        out_shape=jax.ShapeDtypeStruct((N, D, HW, Cout), jnp.float32),
        grid=(N, D, 3),
        in_specs=in_specs,
        out_specs=pl.BlockSpec((1, 1, HW, Cout),
                               lambda n, d, kd: (n, d, 0, 0)),
        scratch_shapes=[
            pltpu.VMEM((HW + 2 * PAD, Cin), jnp.float32),  # zero-halo plane
            pltpu.VMEM((HW, Cout), jnp.float32),           # f32 accumulator
        ],
        compiler_params=pltpu.CompilerParams(
            dimension_semantics=("parallel", "parallel", "arbitrary")),
    )(*args)
    return out.reshape(N, D, H, W, Cout)


# ----------------------------------------------------------------------------
# Trilinear upsampling (align_corners=True), channels-last -- plain JAX glue
# ----------------------------------------------------------------------------
def trilinear_upsample_cl(x, new_shape):
    """x: (N, D, H, W, C) -> (N, Do, Ho, Wo, C)."""
    def resize_axis(arr, axis, in_size, out_size):
        if in_size == out_size:
            return arr
        if out_size == 1:
            pos = jnp.zeros((1,), jnp.float32)
        else:
            pos = jnp.arange(out_size, dtype=jnp.float32) * (
                (in_size - 1) / (out_size - 1))
        i0 = jnp.clip(jnp.floor(pos).astype(jnp.int32), 0, in_size - 1)
        i1 = jnp.clip(i0 + 1, 0, in_size - 1)
        t = pos - i0.astype(jnp.float32)
        a0 = jnp.take(arr, i0, axis=axis)
        a1 = jnp.take(arr, i1, axis=axis)
        shape = [1] * arr.ndim
        shape[axis] = out_size
        t = t.reshape(shape)
        return a0 * (1.0 - t) + a1 * t

    N, D, H, W, C = x.shape
    Do, Ho, Wo = new_shape
    x = resize_axis(x, 1, D, Do)
    x = resize_axis(x, 2, H, Ho)
    x = resize_axis(x, 3, W, Wo)
    return x


# ----------------------------------------------------------------------------
# Parameter initialization (deterministic, synthetic)
# ----------------------------------------------------------------------------
def init_bn(key, c):
    k1, k2, k3, k4 = jax.random.split(key, 4)
    return dict(
        gamma=jax.random.uniform(k1, (c,), jnp.float32, 0.5, 1.5),
        beta=jax.random.uniform(k2, (c,), jnp.float32, -0.1, 0.1),
        mean=jax.random.uniform(k3, (c,), jnp.float32, -0.1, 0.1),
        var=jax.random.uniform(k4, (c,), jnp.float32, 0.5, 1.5),
    )


def init_conv(key, cout, cin):
    bound = 1.0 / math.sqrt(cin * 27)
    return jax.random.uniform(key, (cout, cin, 3, 3, 3), jnp.float32,
                              -bound, bound)


def init_residual(key, ch):
    k = jax.random.split(key, 4)
    return dict(bn1=init_bn(k[0], ch), w1=init_conv(k[1], ch, ch),
                bn2=init_bn(k[2], ch), w2=init_conv(k[3], ch, ch))


def init_before_merging(key, ch, n_res):
    keys = jax.random.split(key, 2 + n_res)
    return dict(bn0=init_bn(keys[0], ch + 3),
                w0=init_conv(keys[1], ch, ch + 3),
                res=[init_residual(keys[2 + i], ch) for i in range(n_res)])


def init_merging(key, ch, n_res):
    keys = jax.random.split(key, 4 + n_res)
    return dict(bn0=init_bn(keys[0], 2 * ch),
                w0=init_conv(keys[1], 2 * ch, 2 * ch),
                bn1=init_bn(keys[2], 2 * ch),
                w1=init_conv(keys[3], ch, 2 * ch),
                res=[init_residual(keys[4 + i], ch) for i in range(n_res)])


def init_module_3d(key, ch, f7, f8):
    keys = jax.random.split(key, 8)
    return dict(
        before=[init_before_merging(keys[i], ch, f7) for i in range(4)],
        merging=[init_merging(keys[4 + i], ch, f8) for i in range(4)],
    )


# ----------------------------------------------------------------------------
# Forward passes (mirror the PyTorch module structure, channels-last inside)
# ----------------------------------------------------------------------------
def residual_fwd(p, x):
    h = bn_relu_conv3d(x, p["bn1"], p["w1"])
    # residual add fused into the second conv's finalize step
    return bn_relu_conv3d(h, p["bn2"], p["w2"], residual=x)


def before_merging_fwd(p, x):
    out = bn_relu_conv3d(x, p["bn0"], p["w0"])
    for rp in p["res"]:
        out = residual_fwd(rp, out)
    return out


def merging_3d_fwd(p, x1, x2):
    if x1 is None:  # mirrors the "not isinstance(x1, torch.Tensor)" branch
        return x2
    out = jnp.concatenate([x1, x2], axis=-1)
    out = bn_relu_conv3d(out, p["bn0"], p["w0"])
    out = bn_relu_conv3d(out, p["bn1"], p["w1"])
    for rp in p["res"]:
        out = residual_fwd(rp, out)
    return out


def module_3d_fwd(params, x1, x2, i):
    """Public API: NCDHW tensors like PyTorch; one layout conversion total."""
    x2_cl = jnp.transpose(x2, (0, 2, 3, 4, 1))
    if x1 is not None:
        x1_cl = jnp.transpose(x1, (0, 2, 3, 4, 1))
        tmp1 = trilinear_upsample_cl(x1_cl, x2_cl.shape[1:4])
    else:
        tmp1 = None
    tmp2 = before_merging_fwd(params["before"][i], x2_cl)
    out_cl = merging_3d_fwd(params["merging"][i], tmp1, tmp2)
    return jnp.transpose(out_cl, (0, 4, 1, 2, 3))


# ----------------------------------------------------------------------------
if __name__ == "__main__":
    key = jax.random.PRNGKey(0)
    kp, kx1, kx2 = jax.random.split(key, 3)

    ch = 4
    num_of_residuals_f7 = 1
    num_of_residuals_f8 = 1
    params = init_module_3d(kp, ch, num_of_residuals_f7, num_of_residuals_f8)

    # x2 has ch+3 channels (before_merging consumes ch+3); x1 has ch channels
    # at a coarser spatial resolution, upsampled to x2's (D, H, W).
    x1 = jax.random.normal(kx1, (1, ch, 2, 4, 4), jnp.float32)
    x2 = jax.random.normal(kx2, (1, ch + 3, 4, 8, 8), jnp.float32)

    fwd = jax.jit(functools.partial(module_3d_fwd, i=0))
    out = jax.block_until_ready(fwd(params, x1, x2))

    assert out.shape == (1, ch, 4, 8, 8), out.shape
    assert bool(jnp.all(jnp.isfinite(out)))
    print("KERNEL_OK")
</pallas_src>

<mosaic_0001>
module attributes {stable_mosaic.version = 11 : i64} {
  func.func @kernel(%arg0: i32, %arg1: i32, %arg2: i32, %arg3: memref<1x1x64x4xf32, #tpu.memory_space<vmem>>, %arg4: memref<1x4xf32, #tpu.memory_space<vmem>>, %arg5: memref<1x4xf32, #tpu.memory_space<vmem>>, %arg6: memref<1x9x4x4xbf16, #tpu.memory_space<vmem>>, %arg7: memref<1x1x64x4xf32, #tpu.memory_space<vmem>>, %arg8: memref<1x1x64x4xf32, #tpu.memory_space<vmem>>, %arg9: memref<82x4xf32, #tpu.memory_space<vmem>>, %arg10: memref<64x4xf32, #tpu.memory_space<vmem>>) attributes {dimension_semantics = [#tpu.dimension_semantics<parallel>, #tpu.dimension_semantics<parallel>, #tpu.dimension_semantics<arbitrary>], iteration_bounds = array<i64: 1, 4, 3>, scalar_prefetch = 0 : i64, scratch_operands = 2 : i64, tpu.core_type = #tpu.core_type<tc>, window_params = [{transform_indices = @transform_0, window_bounds = array<i64: 1, 1, 64, 4>}, {pipeline_mode = #tpu.pipeline_mode<synchronous>, transform_indices = @transform_1, window_bounds = array<i64: 1, 4>}, {pipeline_mode = #tpu.pipeline_mode<synchronous>, transform_indices = @transform_2, window_bounds = array<i64: 1, 4>}, {transform_indices = @transform_3, window_bounds = array<i64: 1, 9, 4, 4>}, {transform_indices = @transform_4, window_bounds = array<i64: 1, 1, 64, 4>}, {transform_indices = @transform_5, window_bounds = array<i64: 1, 1, 64, 4>}]} {
    %c0_i32 = arith.constant 0 : i32
    %0 = arith.cmpi eq, %arg2, %c0_i32 : i32
    %1 = arith.extui %0 : i1 to i32
    %c0_i32_0 = arith.constant 0 : i32
    %2 = arith.cmpi ne, %1, %c0_i32_0 : i32
    scf.if %2 {
      %cst = arith.constant 0.000000e+00 : f32
      %13 = vector.broadcast %cst : f32 to vector<82x4xf32>
      %c0 = arith.constant 0 : index
      %c0_4 = arith.constant 0 : index
      %14 = vector.load %arg9[%c0, %c0_4] : memref<82x4xf32, #tpu.memory_space<vmem>>, vector<82x4xf32>
      tpu.vector_store %arg9[%c0, %c0_4], %13 {strides = array<i32>} : memref<82x4xf32, #tpu.memory_space<vmem>>, vector<82x4xf32>,
      %cst_5 = arith.constant 0.000000e+00 : f32
      %15 = vector.broadcast %cst_5 : f32 to vector<64x4xf32>
      %c0_6 = arith.constant 0 : index
      %c0_7 = arith.constant 0 : index
      %16 = vector.load %arg10[%c0_6, %c0_7] : memref<64x4xf32, #tpu.memory_space<vmem>>, vector<64x4xf32>
      tpu.vector_store %arg10[%c0_6, %c0_7], %15 {strides = array<i32>} : memref<64x4xf32, #tpu.memory_space<vmem>>, vector<64x4xf32>,
    } else {
    }
    %3 = arith.addi %arg1, %arg2 : i32
    %c1_i32 = arith.constant 1 : i32
    %4 = arith.subi %3, %c1_i32 : i32
    %c0_i32_1 = arith.constant 0 : i32
    %5 = arith.cmpi sge, %4, %c0_i32_1 : i32
    %c4_i32 = arith.constant 4 : i32
    %6 = arith.cmpi slt, %4, %c4_i32 : i32
    %7 = arith.andi %5, %6 : i1
    %8 = arith.extui %7 : i1 to i32
    %c0_i32_2 = arith.constant 0 : i32
    %9 = arith.cmpi ne, %8, %c0_i32_2 : i32
    scf.if %9 {
      %c0 = arith.constant 0 : index
      %c0_4 = arith.constant 0 : index
      %c0_5 = arith.constant 0 : index
      %c0_6 = arith.constant 0 : index
      %13 = vector.load %arg3[%c0, %c0_4, %c0_5, %c0_6] : memref<1x1x64x4xf32, #tpu.memory_space<vmem>>, vector<1x1x64x4xf32>
      %14 = vector.shape_cast %13 : vector<1x1x64x4xf32> to vector<64x4xf32>
      %c0_7 = arith.constant 0 : index
      %c0_8 = arith.constant 0 : index
      %15 = vector.load %arg4[%c0_7, %c0_8] : memref<1x4xf32, #tpu.memory_space<vmem>>, vector<1x4xf32>
      %16 = vector.broadcast %15 : vector<1x4xf32> to vector<64x4xf32>
      %17 = arith.mulf %14, %16 : vector<64x4xf32>
      %c0_9 = arith.constant 0 : index
      %c0_10 = arith.constant 0 : index
      %18 = vector.load %arg5[%c0_9, %c0_10] : memref<1x4xf32, #tpu.memory_space<vmem>>, vector<1x4xf32>
      %19 = vector.broadcast %18 : vector<1x4xf32> to vector<64x4xf32>
      %20 = arith.addf %17, %19 : vector<64x4xf32>
      %cst = arith.constant 0.000000e+00 : f32
      %21 = vector.broadcast %cst : f32 to vector<64x4xf32>
      %22 = arith.maximumf %20, %21 : vector<64x4xf32>
      %c9 = arith.constant 9 : index
      %c0_11 = arith.constant 0 : index
      %23 = vector.load %arg9[%c9, %c0_11] : memref<82x4xf32, #tpu.memory_space<vmem>>, vector<64x4xf32>
      tpu.vector_store %arg9[%c9, %c0_11], %22 {strides = array<i32>} : memref<82x4xf32, #tpu.memory_space<vmem>>, vector<64x4xf32>,
      %24 = tpu.iota {dimensions = array<i32: 0>} : vector<64x1xi32>
      %c8_i32 = arith.constant 8 : i32
      %c0_i32_12 = arith.constant 0 : i32
      %25 = arith.cmpi eq, %c8_i32, %c0_i32_12 : i32
      %c1_i32_13 = arith.constant 1 : i32
      %26 = arith.select %25, %c1_i32_13, %c8_i32 : i32
      %27 = vector.broadcast %26 : i32 to vector<64x1xi32>
      %28 = arith.remsi %24, %27 : vector<64x1xi32>
      %c0_i32_14 = arith.constant 0 : i32
      %29 = vector.broadcast %c0_i32_14 : i32 to vector<64x1xi32>
      %30 = arith.cmpi ne, %28, %29 : vector<64x1xi32>
      %c0_i32_15 = arith.constant 0 : i32
      %31 = vector.broadcast %c0_i32_15 : i32 to vector<64x1xi32>
      %32 = arith.cmpi slt, %28, %31 : vector<64x1xi32>
      %c0_i32_16 = arith.constant 0 : i32
      %33 = arith.cmpi slt, %26, %c0_i32_16 : i32
      %34 = vector.broadcast %33 : i1 to vector<64x1xi1>
      %35 = vector.broadcast %34 : vector<64x1xi1> to vector<64x1xi1>
      %36 = arith.xori %32, %35 : vector<64x1xi1>
      %37 = arith.andi %36, %30 : vector<64x1xi1>
      %38 = vector.broadcast %26 : i32 to vector<64x1xi32>
      %39 = arith.addi %28, %38 : vector<64x1xi32>
      %40 = arith.select %37, %39, %28 : vector<64x1xi1>, vector<64x1xi32>
      %c-1_i32 = arith.constant -1 : i32
      %41 = vector.broadcast %c-1_i32 : i32 to vector<64x1xi32>
      %42 = arith.addi %40, %41 : vector<64x1xi32>
      %c0_i32_17 = arith.constant 0 : i32
      %43 = vector.broadcast %c0_i32_17 : i32 to vector<64x1xi32>
      %44 = arith.cmpi sge, %42, %43 : vector<64x1xi32>
      %c-1_i32_18 = arith.constant -1 : i32
      %45 = vector.broadcast %c-1_i32_18 : i32 to vector<64x1xi32>
      %46 = arith.addi %40, %45 : vector<64x1xi32>
      %c8_i32_19 = arith.constant 8 : i32
      %47 = vector.broadcast %c8_i32_19 : i32 to vector<64x1xi32>
      %48 = arith.cmpi slt, %46, %47 : vector<64x1xi32>
      %49 = arith.andi %44, %48 : vector<64x1xi1>
      %c0_i32_20 = arith.constant 0 : i32
      %50 = vector.broadcast %c0_i32_20 : i32 to vector<64x1xi32>
      %51 = arith.addi %40, %50 : vector<64x1xi32>
      %c0_i32_21 = arith.constant 0 : i32
      %52 = vector.broadcast %c0_i32_21 : i32 to vector<64x1xi32>
      %53 = arith.cmpi sge, %51, %52 : vector<64x1xi32>
      %c0_i32_22 = arith.constant 0 : i32
      %54 = vector.broadcast %c0_i32_22 : i32 to vector<64x1xi32>
      %55 = arith.addi %40, %54 : vector<64x1xi32>
      %c8_i32_23 = arith.constant 8 : i32
      %56 = vector.broadcast %c8_i32_23 : i32 to vector<64x1xi32>
      %57 = arith.cmpi slt, %55, %56 : vector<64x1xi32>
      %58 = arith.andi %53, %57 : vector<64x1xi1>
      %c1_i32_24 = arith.constant 1 : i32
      %59 = vector.broadcast %c1_i32_24 : i32 to vector<64x1xi32>
      %60 = arith.addi %40, %59 : vector<64x1xi32>
      %c0_i32_25 = arith.constant 0 : i32
      %61 = vector.broadcast %c0_i32_25 : i32 to vector<64x1xi32>
      %62 = arith.cmpi sge, %60, %61 : vector<64x1xi32>
      %c1_i32_26 = arith.constant 1 : i32
      %63 = vector.broadcast %c1_i32_26 : i32 to vector<64x1xi32>
      %64 = arith.addi %40, %63 : vector<64x1xi32>
      %c8_i32_27 = arith.constant 8 : i32
      %65 = vector.broadcast %c8_i32_27 : i32 to vector<64x1xi32>
      %66 = arith.cmpi slt, %64, %65 : vector<64x1xi32>
      %67 = arith.andi %62, %66 : vector<64x1xi1>
      %c0_28 = arith.constant 0 : index
      %c0_29 = arith.constant 0 : index
      %68 = vector.load %arg10[%c0_28, %c0_29] : memref<64x4xf32, #tpu.memory_space<vmem>>, vector<64x4xf32>
      %c0_30 = arith.constant 0 : index
      %c0_31 = arith.constant 0 : index
      %69 = vector.load %arg9[%c0_30, %c0_31] : memref<82x4xf32, #tpu.memory_space<vmem>>, vector<64x4xf32>
      %cst_32 = arith.constant 0.000000e+00 : f32
      %70 = vector.shape_cast %49 : vector<64x1xi1> to vector<64x1xi1>
      %71 = vector.broadcast %70 : vector<64x1xi1> to vector<64x4xi1>
      %72 = vector.broadcast %cst_32 : f32 to vector<64x4xf32>
      %73 = arith.select %71, %69, %72 : vector<64x4xi1>, vector<64x4xf32>
      %74 = arith.truncf %73 : vector<64x4xf32> to vector<64x4xbf16>
      %c0_33 = arith.constant 0 : index
      %c0_34 = arith.constant 0 : index
      %c0_35 = arith.constant 0 : index
      %c0_36 = arith.constant 0 : index
      %75 = vector.load %arg6[%c0_33, %c0_34, %c0_35, %c0_36] : memref<1x9x4x4xbf16, #tpu.memory_space<vmem>>, vector<1x1x4x4xbf16>
      %76 = vector.shape_cast %75 : vector<1x1x4x4xbf16> to vector<4x4xbf16>
      %cst_37 = arith.constant dense<0.000000e+00> : vector<64x4xf32>
      %77 = tpu.matmul %74, %76, %cst_37 {dimension_numbers = #tpu.dot_dimension_numbers<[1], [0], [0], [1], [0, 0, 1, 1], [], []>} : vector<64x4xbf16>, vector<4x4xbf16>, vector<64x4xf32> -> vector<64x4xf32>
      %78 = arith.addf %68, %77 : vector<64x4xf32>
      %c1 = arith.constant 1 : index
      %c0_38 = arith.constant 0 : index
      %79 = vector.load %arg9[%c1, %c0_38] : memref<82x4xf32, #tpu.memory_space<vmem>>, vector<64x4xf32>
      %cst_39 = arith.constant 0.000000e+00 : f32
      %80 = vector.shape_cast %58 : vector<64x1xi1> to vector<64x1xi1>
      %81 = vector.broadcast %80 : vector<64x1xi1> to vector<64x4xi1>
      %82 = vector.broadcast %cst_39 : f32 to vector<64x4xf32>
      %83 = arith.select %81, %79, %82 : vector<64x4xi1>, vector<64x4xf32>
      %84 = arith.truncf %83 : vector<64x4xf32> to vector<64x4xbf16>
      %c0_40 = arith.constant 0 : index
      %c1_41 = arith.constant 1 : index
      %c0_42 = arith.constant 0 : index
      %c0_43 = arith.constant 0 : index
      %85 = vector.load %arg6[%c0_40, %c1_41, %c0_42, %c0_43] : memref<1x9x4x4xbf16, #tpu.memory_space<vmem>>, vector<1x1x4x4xbf16>
      %86 = vector.shape_cast %85 : vector<1x1x4x4xbf16> to vector<4x4xbf16>
      %cst_44 = arith.constant dense<0.000000e+00> : vector<64x4xf32>
      %87 = tpu.matmul %84, %86, %cst_44 {dimension_numbers = #tpu.dot_dimension_numbers<[1], [0], [0], [1], [0, 0, 1, 1], [], []>} : vector<64x4xbf16>, vector<4x4xbf16>, vector<64x4xf32> -> vector<64x4xf32>
      %88 = arith.addf %78, %87 : vector<64x4xf32>
      %c2 = arith.constant 2 : index
      %c0_45 = arith.constant 0 : index
      %89 = vector.load %arg9[%c2, %c0_45] : memref<82x4xf32, #tpu.memory_space<vmem>>, vector<64x4xf32>
      %cst_46 = arith.constant 0.000000e+00 : f32
      %90 = vector.shape_cast %67 : vector<64x1xi1> to vector<64x1xi1>
      %91 = vector.broadcast %90 : vector<64x1xi1> to vector<64x4xi1>
      %92 = vector.broadcast %cst_46 : f32 to vector<64x4xf32>
      %93 = arith.select %91, %89, %92 : vector<64x4xi1>, vector<64x4xf32>
      %94 = arith.truncf %93 : vector<64x4xf32> to vector<64x4xbf16>
      %c0_47 = arith.constant 0 : index
      %c2_48 = arith.constant 2 : index
      %c0_49 = arith.constant 0 : index
      %c0_50 = arith.constant 0 : index
      %95 = vector.load %arg6[%c0_47, %c2_48, %c0_49, %c0_50] : memref<1x9x4x4xbf16, #tpu.memory_space<vmem>>, vector<1x1x4x4xbf16>
      %96 = vector.shape_cast %95 : vector<1x1x4x4xbf16> to vector<4x4xbf16>
      %cst_51 = arith.constant dense<0.000000e+00> : vector<64x4xf32>
      %97 = tpu.matmul %94, %96, %cst_51 {dimension_numbers = #tpu.dot_dimension_numbers<[1], [0], [0], [1], [0, 0, 1, 1], [], []>} : vector<64x4xbf16>, vector<4x4xbf16>, vector<64x4xf32> -> vector<64x4xf32>
      %98 = arith.addf %88, %97 : vector<64x4xf32>
      %c8 = arith.constant 8 : index
      %c0_52 = arith.constant 0 : index
      %99 = vector.load %arg9[%c8, %c0_52] : memref<82x4xf32, #tpu.memory_space<vmem>>, vector<64x4xf32>
      %cst_53 = arith.constant 0.000000e+00 : f32
      %100 = vector.shape_cast %49 : vector<64x1xi1> to vector<64x1xi1>
      %101 = vector.broadcast %100 : vector<64x1xi1> to vector<64x4xi1>
      %102 = vector.broadcast %cst_53 : f32 to vector<64x4xf32>
      %103 = arith.select %101, %99, %102 : vector<64x4xi1>, vector<64x4xf32>
      %104 = arith.truncf %103 : vector<64x4xf32> to vector<64x4xbf16>
      %c0_54 = arith.constant 0 : index
      %c3 = arith.constant 3 : index
      %c0_55 = arith.constant 0 : index
      %c0_56 = arith.constant 0 : index
      %105 = vector.load %arg6[%c0_54, %c3, %c0_55, %c0_56] : memref<1x9x4x4xbf16, #tpu.memory_space<vmem>>, vector<1x1x4x4xbf16>
      %106 = vector.shape_cast %105 : vector<1x1x4x4xbf16> to vector<4x4xbf16>
      %cst_57 = arith.constant dense<0.000000e+00> : vector<64x4xf32>
      %107 = tpu.matmul %104, %106, %cst_57 {dimension_numbers = #tpu.dot_dimension_numbers<[1], [0], [0], [1], [0, 0, 1, 1], [], []>} : vector<64x4xbf16>, vector<4x4xbf16>, vector<64x4xf32> -> vector<64x4xf32>
      %108 = arith.addf %98, %107 : vector<64x4xf32>
      %c9_58 = arith.constant 9 : index
      %c0_59 = arith.constant 0 : index
      %109 = vector.load %arg9[%c9_58, %c0_59] : memref<82x4xf32, #tpu.memory_space<vmem>>, vector<64x4xf32>
      %cst_60 = arith.constant 0.000000e+00 : f32
      %110 = vector.shape_cast %58 : vector<64x1xi1> to vector<64x1xi1>
      %111 = vector.broadcast %110 : vector<64x1xi1> to vector<64x4xi1>
      %112 = vector.broadcast %cst_60 : f32 to vector<64x4xf32>
      %113 = arith.select %111, %109, %112 : vector<64x4xi1>, vector<64x4xf32>
      %114 = arith.truncf %113 : vector<64x4xf32> to vector<64x4xbf16>
      %c0_61 = arith.constant 0 : index
      %c4 = arith.constant 4 : index
      %c0_62 = arith.constant 0 : index
      %c0_63 = arith.constant 0 : index
      %115 = vector.load %arg6[%c0_61, %c4, %c0_62, %c0_63] : memref<1x9x4x4xbf16, #tpu.memory_space<vmem>>, vector<1x1x4x4xbf16>
      %116 = vector.shape_cast %115 : vector<1x1x4x4xbf16> to vector<4x4xbf16>
      %cst_64 = arith.constant dense<0.000000e+00> : vector<64x4xf32>
      %117 = tpu.matmul %114, %116, %cst_64 {dimension_numbers = #tpu.dot_dimension_numbers<[1], [0], [0], [1], [0, 0, 1, 1], [], []>} : vector<64x4xbf16>, vector<4x4xbf16>, vector<64x4xf32> -> vector<64x4xf32>
      %118 = arith.addf %108, %117 : vector<64x4xf32>
      %c10 = arith.constant 10 : index
      %c0_65 = arith.constant 0 : index
      %119 = vector.load %arg9[%c10, %c0_65] : memref<82x4xf32, #tpu.memory_space<vmem>>, vector<64x4xf32>
      %cst_66 = arith.constant 0.000000e+00 : f32
      %120 = vector.shape_cast %67 : vector<64x1xi1> to vector<64x1xi1>
      %121 = vector.broadcast %120 : vector<64x1xi1> to vector<64x4xi1>
      %122 = vector.broadcast %cst_66 : f32 to vector<64x4xf32>
      %123 = arith.select %121, %119, %122 : vector<64x4xi1>, vector<64x4xf32>
      %124 = arith.truncf %123 : vector<64x4xf32> to vector<64x4xbf16>
      %c0_67 = arith.constant 0 : index
      %c5 = arith.constant 5 : index
      %c0_68 = arith.constant 0 : index
      %c0_69 = arith.constant 0 : index
      %125 = vector.load %arg6[%c0_67, %c5, %c0_68, %c0_69] : memref<1x9x4x4xbf16, #tpu.memory_space<vmem>>, vector<1x1x4x4xbf16>
      %126 = vector.shape_cast %125 : vector<1x1x4x4xbf16> to vector<4x4xbf16>
      %cst_70 = arith.constant dense<0.000000e+00> : vector<64x4xf32>
      %127 = tpu.matmul %124, %126, %cst_70 {dimension_numbers = #tpu.dot_dimension_numbers<[1], [0], [0], [1], [0, 0, 1, 1], [], []>} : vector<64x4xbf16>, vector<4x4xbf16>, vector<64x4xf32> -> vector<64x4xf32>
      %128 = arith.addf %118, %127 : vector<64x4xf32>
      %c16 = arith.constant 16 : index
      %c0_71 = arith.constant 0 : index
      %129 = vector.load %arg9[%c16, %c0_71] : memref<82x4xf32, #tpu.memory_space<vmem>>, vector<64x4xf32>
      %cst_72 = arith.constant 0.000000e+00 : f32
      %130 = vector.shape_cast %49 : vector<64x1xi1> to vector<64x1xi1>
      %131 = vector.broadcast %130 : vector<64x1xi1> to vector<64x4xi1>
      %132 = vector.broadcast %cst_72 : f32 to vector<64x4xf32>
      %133 = arith.select %131, %129, %132 : vector<64x4xi1>, vector<64x4xf32>
      %134 = arith.truncf %133 : vector<64x4xf32> to vector<64x4xbf16>
      %c0_73 = arith.constant 0 : index
      %c6 = arith.constant 6 : index
      %c0_74 = arith.constant 0 : index
      %c0_75 = arith.constant 0 : index
      %135 = vector.load %arg6[%c0_73, %c6, %c0_74, %c0_75] : memref<1x9x4x4xbf16, #tpu.memory_space<vmem>>, vector<1x1x4x4xbf16>
      %136 = vector.shape_cast %135 : vector<1x1x4x4xbf16> to vector<4x4xbf16>
      %cst_76 = arith.constant dense<0.000000e+00> : vector<64x4xf32>
      %137 = tpu.matmul %134, %136, %cst_76 {dimension_numbers = #tpu.dot_dimension_numbers<[1], [0], [0], [1], [0, 0, 1, 1], [], []>} : vector<64x4xbf16>, vector<4x4xbf16>, vector<64x4xf32> -> vector<64x4xf32>
      %138 = arith.addf %128, %137 : vector<64x4xf32>
      %c17 = arith.constant 17 : index
      %c0_77 = arith.constant 0 : index
      %139 = vector.load %arg9[%c17, %c0_77] : memref<82x4xf32, #tpu.memory_space<vmem>>, vector<64x4xf32>
      %cst_78 = arith.constant 0.000000e+00 : f32
      %140 = vector.shape_cast %58 : vector<64x1xi1> to vector<64x1xi1>
      %141 = vector.broadcast %140 : vector<64x1xi1> to vector<64x4xi1>
      %142 = vector.broadcast %cst_78 : f32 to vector<64x4xf32>
      %143 = arith.select %141, %139, %142 : vector<64x4xi1>, vector<64x4xf32>
      %144 = arith.truncf %143 : vector<64x4xf32> to vector<64x4xbf16>
      %c0_79 = arith.constant 0 : index
      %c7 = arith.constant 7 : index
      %c0_80 = arith.constant 0 : index
      %c0_81 = arith.constant 0 : index
      %145 = vector.load %arg6[%c0_79, %c7, %c0_80, %c0_81] : memref<1x9x4x4xbf16, #tpu.memory_space<vmem>>, vector<1x1x4x4xbf16>
      %146 = vector.shape_cast %145 : vector<1x1x4x4xbf16> to vector<4x4xbf16>
      %cst_82 = arith.constant dense<0.000000e+00> : vector<64x4xf32>
      %147 = tpu.matmul %144, %146, %cst_82 {dimension_numbers = #tpu.dot_dimension_numbers<[1], [0], [0], [1], [0, 0, 1, 1], [], []>} : vector<64x4xbf16>, vector<4x4xbf16>, vector<64x4xf32> -> vector<64x4xf32>
      %148 = arith.addf %138, %147 : vector<64x4xf32>
      %c18 = arith.constant 18 : index
      %c0_83 = arith.constant 0 : index
      %149 = vector.load %arg9[%c18, %c0_83] : memref<82x4xf32, #tpu.memory_space<vmem>>, vector<64x4xf32>
      %cst_84 = arith.constant 0.000000e+00 : f32
      %150 = vector.shape_cast %67 : vector<64x1xi1> to vector<64x1xi1>
      %151 = vector.broadcast %150 : vector<64x1xi1> to vector<64x4xi1>
      %152 = vector.broadcast %cst_84 : f32 to vector<64x4xf32>
      %153 = arith.select %151, %149, %152 : vector<64x4xi1>, vector<64x4xf32>
      %154 = arith.truncf %153 : vector<64x4xf32> to vector<64x4xbf16>
      %c0_85 = arith.constant 0 : index
      %c8_86 = arith.constant 8 : index
      %c0_87 = arith.constant 0 : index
      %c0_88 = arith.constant 0 : index
      %155 = vector.load %arg6[%c0_85, %c8_86, %c0_87, %c0_88] : memref<1x9x4x4xbf16, #tpu.memory_space<vmem>>, vector<1x1x4x4xbf16>
      %156 = vector.shape_cast %155 : vector<1x1x4x4xbf16> to vector<4x4xbf16>
      %cst_89 = arith.constant dense<0.000000e+00> : vector<64x4xf32>
      %157 = tpu.matmul %154, %156, %cst_89 {dimension_numbers = #tpu.dot_dimension_numbers<[1], [0], [0], [1], [0, 0, 1, 1], [], []>} : vector<64x4xbf16>, vector<4x4xbf16>, vector<64x4xf32> -> vector<64x4xf32>
      %158 = arith.addf %148, %157 : vector<64x4xf32>
      %c0_90 = arith.constant 0 : index
      %c0_91 = arith.constant 0 : index
      %159 = vector.load %arg10[%c0_90, %c0_91] : memref<64x4xf32, #tpu.memory_space<vmem>>, vector<64x4xf32>
      tpu.vector_store %arg10[%c0_90, %c0_91], %158 {strides = array<i32>} : memref<64x4xf32, #tpu.memory_space<vmem>>, vector<64x4xf32>,
    } else {
    }
    %c2_i32 = arith.constant 2 : i32
    %10 = arith.cmpi eq, %arg2, %c2_i32 : i32
    %11 = arith.extui %10 : i1 to i32
    %c0_i32_3 = arith.constant 0 : i32
    %12 = arith.cmpi ne, %11, %c0_i32_3 : i32
    scf.if %12 {
      %c0 = arith.constant 0 : index
      %c0_4 = arith.constant 0 : index
      %13 = vector.load %arg10[%c0, %c0_4] : memref<64x4xf32, #tpu.memory_space<vmem>>, vector<64x4xf32>
      %c0_5 = arith.constant 0 : index
      %c0_6 = arith.constant 0 : index
      %c0_7 = arith.constant 0 : index
      %c0_8 = arith.constant 0 : index
      %14 = vector.load %arg7[%c0_5, %c0_6, %c0_7, %c0_8] : memref<1x1x64x4xf32, #tpu.memory_space<vmem>>, vector<1x1x64x4xf32>
      %15 = vector.shape_cast %14 : vector<1x1x64x4xf32> to vector<64x4xf32>
      %16 = arith.addf %13, %15 : vector<64x4xf32>
      %c0_9 = arith.constant 0 : index
      %c0_10 = arith.constant 0 : index
      %c0_11 = arith.constant 0 : index
      %c0_12 = arith.constant 0 : index
      %17 = vector.load %arg8[%c0_9, %c0_10, %c0_11, %c0_12] : memref<1x1x64x4xf32, #tpu.memory_space<vmem>>, vector<1x1x64x4xf32>
      %18 = vector.shape_cast %17 : vector<1x1x64x4xf32> to vector<64x4xf32>
      %19 = vector.shape_cast %16 : vector<64x4xf32> to vector<1x1x64x4xf32>
      tpu.vector_store %arg8[%c0_9, %c0_10, %c0_11, %c0_12], %19 {strides = array<i32>} : memref<1x1x64x4xf32, #tpu.memory_space<vmem>>, vector<1x1x64x4xf32>,
    } else {
    }
    return
  }
  func.func @transform_0(%arg0: i32, %arg1: i32, %arg2: i32) -> (i32, i32, i32, i32) {
    %0 = arith.addi %arg1, %arg2 : i32
    %c1_i32 = arith.constant 1 : i32
    %1 = arith.subi %0, %c1_i32 : i32
    %c0_i32 = arith.constant 0 : i32
    %c3_i32 = arith.constant 3 : i32
    %2 = arith.maxsi %c0_i32, %1 : i32
    %3 = arith.minsi %c3_i32, %2 : i32
    %c0_i32_0 = arith.constant 0 : i32
    %c0_i32_1 = arith.constant 0 : i32
    %c0_i32_2 = arith.constant 0 : i32
    return %arg0, %3, %c0_i32_0, %c0_i32_1 : i32, i32, i32, i32
  }
  func.func @transform_1(%arg0: i32, %arg1: i32, %arg2: i32) -> (i32, i32) {
    %c0_i32 = arith.constant 0 : i32
    %c0_i32_0 = arith.constant 0 : i32
    %c0_i32_1 = arith.constant 0 : i32
    return %c0_i32, %c0_i32_0 : i32, i32
  }
  func.func @transform_2(%arg0: i32, %arg1: i32, %arg2: i32) -> (i32, i32) {
    %c0_i32 = arith.constant 0 : i32
    %c0_i32_0 = arith.constant 0 : i32
    %c0_i32_1 = arith.constant 0 : i32
    return %c0_i32, %c0_i32_0 : i32, i32
  }
  func.func @transform_3(%arg0: i32, %arg1: i32, %arg2: i32) -> (i32, i32, i32, i32) {
    %c0_i32 = arith.constant 0 : i32
    %c0_i32_0 = arith.constant 0 : i32
    %c0_i32_1 = arith.constant 0 : i32
    %c0_i32_2 = arith.constant 0 : i32
    return %arg2, %c0_i32, %c0_i32_0, %c0_i32_1 : i32, i32, i32, i32
  }
  func.func @transform_4(%arg0: i32, %arg1: i32, %arg2: i32) -> (i32, i32, i32, i32) {
    %c0_i32 = arith.constant 0 : i32
    %c0_i32_0 = arith.constant 0 : i32
    %c0_i32_1 = arith.constant 0 : i32
    return %arg0, %arg1, %c0_i32, %c0_i32_0 : i32, i32, i32, i32
  }
  func.func @transform_5(%arg0: i32, %arg1: i32, %arg2: i32) -> (i32, i32, i32, i32) {
    %c0_i32 = arith.constant 0 : i32
    %c0_i32_0 = arith.constant 0 : i32
    %c0_i32_1 = arith.constant 0 : i32
    return %arg0, %arg1, %c0_i32, %c0_i32_0 : i32, i32, i32, i32
  }
}

module attributes {stable_mosaic.version = 11 : i64} {
  func.func @kernel(%arg0: i32, %arg1: i32, %arg2: i32, %arg3: memref<1x1x64x7xf32, #tpu.memory_space<vmem>>, %arg4: memref<1x7xf32, #tpu.memory_space<vmem>>, %arg5: memref<1x7xf32, #tpu.memory_space<vmem>>, %arg6: memref<1x9x7x4xbf16, #tpu.memory_space<vmem>>, %arg7: memref<1x1x64x4xf32, #tpu.memory_space<vmem>>, %arg8: memref<82x7xf32, #tpu.memory_space<vmem>>, %arg9: memref<64x4xf32, #tpu.memory_space<vmem>>) attributes {dimension_semantics = [#tpu.dimension_semantics<parallel>, #tpu.dimension_semantics<parallel>, #tpu.dimension_semantics<arbitrary>], iteration_bounds = array<i64: 1, 4, 3>, scalar_prefetch = 0 : i64, scratch_operands = 2 : i64, tpu.core_type = #tpu.core_type<tc>, window_params = [{transform_indices = @transform_0, window_bounds = array<i64: 1, 1, 64, 7>}, {pipeline_mode = #tpu.pipeline_mode<synchronous>, transform_indices = @transform_1, window_bounds = array<i64: 1, 7>}, {pipeline_mode = #tpu.pipeline_mode<synchronous>, transform_indices = @transform_2, window_bounds = array<i64: 1, 7>}, {transform_indices = @transform_3, window_bounds = array<i64: 1, 9, 7, 4>}, {transform_indices = @transform_4, window_bounds = array<i64: 1, 1, 64, 4>}]} {
    %c0_i32 = arith.constant 0 : i32
    %0 = arith.cmpi eq, %arg2, %c0_i32 : i32
    %1 = arith.extui %0 : i1 to i32
    %c0_i32_0 = arith.constant 0 : i32
    %2 = arith.cmpi ne, %1, %c0_i32_0 : i32
    scf.if %2 {
      %cst = arith.constant 0.000000e+00 : f32
      %13 = vector.broadcast %cst : f32 to vector<82x7xf32>
      %c0 = arith.constant 0 : index
      %c0_4 = arith.constant 0 : index
      %14 = vector.load %arg8[%c0, %c0_4] : memref<82x7xf32, #tpu.memory_space<vmem>>, vector<82x7xf32>
      tpu.vector_store %arg8[%c0, %c0_4], %13 {strides = array<i32>} : memref<82x7xf32, #tpu.memory_space<vmem>>, vector<82x7xf32>,
      %cst_5 = arith.constant 0.000000e+00 : f32
      %15 = vector.broadcast %cst_5 : f32 to vector<64x4xf32>
      %c0_6 = arith.constant 0 : index
      %c0_7 = arith.constant 0 : index
      %16 = vector.load %arg9[%c0_6, %c0_7] : memref<64x4xf32, #tpu.memory_space<vmem>>, vector<64x4xf32>
      tpu.vector_store %arg9[%c0_6, %c0_7], %15 {strides = array<i32>} : memref<64x4xf32, #tpu.memory_space<vmem>>, vector<64x4xf32>,
    } else {
    }
    %3 = arith.addi %arg1, %arg2 : i32
    %c1_i32 = arith.constant 1 : i32
    %4 = arith.subi %3, %c1_i32 : i32
    %c0_i32_1 = arith.constant 0 : i32
    %5 = arith.cmpi sge, %4, %c0_i32_1 : i32
    %c4_i32 = arith.constant 4 : i32
    %6 = arith.cmpi slt, %4, %c4_i32 : i32
    %7 = arith.andi %5, %6 : i1
    %8 = arith.extui %7 : i1 to i32
    %c0_i32_2 = arith.constant 0 : i32
    %9 = arith.cmpi ne, %8, %c0_i32_2 : i32
    scf.if %9 {
      %c0 = arith.constant 0 : index
      %c0_4 = arith.constant 0 : index
      %c0_5 = arith.constant 0 : index
      %c0_6 = arith.constant 0 : index
      %13 = vector.load %arg3[%c0, %c0_4, %c0_5, %c0_6] : memref<1x1x64x7xf32, #tpu.memory_space<vmem>>, vector<1x1x64x7xf32>
      %14 = vector.shape_cast %13 : vector<1x1x64x7xf32> to vector<64x7xf32>
      %c0_7 = arith.constant 0 : index
      %c0_8 = arith.constant 0 : index
      %15 = vector.load %arg4[%c0_7, %c0_8] : memref<1x7xf32, #tpu.memory_space<vmem>>, vector<1x7xf32>
      %16 = vector.broadcast %15 : vector<1x7xf32> to vector<64x7xf32>
      %17 = arith.mulf %14, %16 : vector<64x7xf32>
      %c0_9 = arith.constant 0 : index
      %c0_10 = arith.constant 0 : index
      %18 = vector.load %arg5[%c0_9, %c0_10] : memref<1x7xf32, #tpu.memory_space<vmem>>, vector<1x7xf32>
      %19 = vector.broadcast %18 : vector<1x7xf32> to vector<64x7xf32>
      %20 = arith.addf %17, %19 : vector<64x7xf32>
      %cst = arith.constant 0.000000e+00 : f32
      %21 = vector.broadcast %cst : f32 to vector<64x7xf32>
      %22 = arith.maximumf %20, %21 : vector<64x7xf32>
      %c9 = arith.constant 9 : index
      %c0_11 = arith.constant 0 : index
      %23 = vector.load %arg8[%c9, %c0_11] : memref<82x7xf32, #tpu.memory_space<vmem>>, vector<64x7xf32>
      tpu.vector_store %arg8[%c9, %c0_11], %22 {strides = array<i32>} : memref<82x7xf32, #tpu.memory_space<vmem>>, vector<64x7xf32>,
      %24 = tpu.iota {dimensions = array<i32: 0>} : vector<64x1xi32>
      %c8_i32 = arith.constant 8 : i32
      %c0_i32_12 = arith.constant 0 : i32
      %25 = arith.cmpi eq, %c8_i32, %c0_i32_12 : i32
      %c1_i32_13 = arith.constant 1 : i32
      %26 = arith.select %25, %c1_i32_13, %c8_i32 : i32
      %27 = vector.broadcast %26 : i32 to vector<64x1xi32>
      %28 = arith.remsi %24, %27 : vector<64x1xi32>
      %c0_i32_14 = arith.constant 0 : i32
      %29 = vector.broadcast %c0_i32_14 : i32 to vector<64x1xi32>
      %30 = arith.cmpi ne, %28, %29 : vector<64x1xi32>
      %c0_i32_15 = arith.constant 0 : i32
      %31 = vector.broadcast %c0_i32_15 : i32 to vector<64x1xi32>
      %32 = arith.cmpi slt, %28, %31 : vector<64x1xi32>
      %c0_i32_16 = arith.constant 0 : i32
      %33 = arith.cmpi slt, %26, %c0_i32_16 : i32
      %34 = vector.broadcast %33 : i1 to vector<64x1xi1>
      %35 = vector.broadcast %34 : vector<64x1xi1> to vector<64x1xi1>
      %36 = arith.xori %32, %35 : vector<64x1xi1>
      %37 = arith.andi %36, %30 : vector<64x1xi1>
      %38 = vector.broadcast %26 : i32 to vector<64x1xi32>
      %39 = arith.addi %28, %38 : vector<64x1xi32>
      %40 = arith.select %37, %39, %28 : vector<64x1xi1>, vector<64x1xi32>
      %c-1_i32 = arith.constant -1 : i32
      %41 = vector.broadcast %c-1_i32 : i32 to vector<64x1xi32>
      %42 = arith.addi %40, %41 : vector<64x1xi32>
      %c0_i32_17 = arith.constant 0 : i32
      %43 = vector.broadcast %c0_i32_17 : i32 to vector<64x1xi32>
      %44 = arith.cmpi sge, %42, %43 : vector<64x1xi32>
      %c-1_i32_18 = arith.constant -1 : i32
      %45 = vector.broadcast %c-1_i32_18 : i32 to vector<64x1xi32>
      %46 = arith.addi %40, %45 : vector<64x1xi32>
      %c8_i32_19 = arith.constant 8 : i32
      %47 = vector.broadcast %c8_i32_19 : i32 to vector<64x1xi32>
      %48 = arith.cmpi slt, %46, %47 : vector<64x1xi32>
      %49 = arith.andi %44, %48 : vector<64x1xi1>
      %c0_i32_20 = arith.constant 0 : i32
      %50 = vector.broadcast %c0_i32_20 : i32 to vector<64x1xi32>
      %51 = arith.addi %40, %50 : vector<64x1xi32>
      %c0_i32_21 = arith.constant 0 : i32
      %52 = vector.broadcast %c0_i32_21 : i32 to vector<64x1xi32>
      %53 = arith.cmpi sge, %51, %52 : vector<64x1xi32>
      %c0_i32_22 = arith.constant 0 : i32
      %54 = vector.broadcast %c0_i32_22 : i32 to vector<64x1xi32>
      %55 = arith.addi %40, %54 : vector<64x1xi32>
      %c8_i32_23 = arith.constant 8 : i32
      %56 = vector.broadcast %c8_i32_23 : i32 to vector<64x1xi32>
      %57 = arith.cmpi slt, %55, %56 : vector<64x1xi32>
      %58 = arith.andi %53, %57 : vector<64x1xi1>
      %c1_i32_24 = arith.constant 1 : i32
      %59 = vector.broadcast %c1_i32_24 : i32 to vector<64x1xi32>
      %60 = arith.addi %40, %59 : vector<64x1xi32>
      %c0_i32_25 = arith.constant 0 : i32
      %61 = vector.broadcast %c0_i32_25 : i32 to vector<64x1xi32>
      %62 = arith.cmpi sge, %60, %61 : vector<64x1xi32>
      %c1_i32_26 = arith.constant 1 : i32
      %63 = vector.broadcast %c1_i32_26 : i32 to vector<64x1xi32>
      %64 = arith.addi %40, %63 : vector<64x1xi32>
      %c8_i32_27 = arith.constant 8 : i32
      %65 = vector.broadcast %c8_i32_27 : i32 to vector<64x1xi32>
      %66 = arith.cmpi slt, %64, %65 : vector<64x1xi32>
      %67 = arith.andi %62, %66 : vector<64x1xi1>
      %c0_28 = arith.constant 0 : index
      %c0_29 = arith.constant 0 : index
      %68 = vector.load %arg9[%c0_28, %c0_29] : memref<64x4xf32, #tpu.memory_space<vmem>>, vector<64x4xf32>
      %c0_30 = arith.constant 0 : index
      %c0_31 = arith.constant 0 : index
      %69 = vector.load %arg8[%c0_30, %c0_31] : memref<82x7xf32, #tpu.memory_space<vmem>>, vector<64x7xf32>
      %cst_32 = arith.constant 0.000000e+00 : f32
      %70 = vector.shape_cast %49 : vector<64x1xi1> to vector<64x1xi1>
      %71 = vector.broadcast %70 : vector<64x1xi1> to vector<64x7xi1>
      %72 = vector.broadcast %cst_32 : f32 to vector<64x7xf32>
      %73 = arith.select %71, %69, %72 : vector<64x7xi1>, vector<64x7xf32>
      %74 = arith.truncf %73 : vector<64x7xf32> to vector<64x7xbf16>
      %c0_33 = arith.constant 0 : index
      %c0_34 = arith.constant 0 : index
      %c0_35 = arith.constant 0 : index
      %c0_36 = arith.constant 0 : index
      %75 = vector.load %arg6[%c0_33, %c0_34, %c0_35, %c0_36] : memref<1x9x7x4xbf16, #tpu.memory_space<vmem>>, vector<1x1x7x4xbf16>
      %76 = vector.shape_cast %75 : vector<1x1x7x4xbf16> to vector<7x4xbf16>
      %cst_37 = arith.constant dense<0.000000e+00> : vector<64x4xf32>
      %77 = tpu.matmul %74, %76, %cst_37 {dimension_numbers = #tpu.dot_dimension_numbers<[1], [0], [0], [1], [0, 0, 1, 1], [], []>} : vector<64x7xbf16>, vector<7x4xbf16>, vector<64x4xf32> -> vector<64x4xf32>
      %78 = arith.addf %68, %77 : vector<64x4xf32>
      %c1 = arith.constant 1 : index
      %c0_38 = arith.constant 0 : index
      %79 = vector.load %arg8[%c1, %c0_38] : memref<82x7xf32, #tpu.memory_space<vmem>>, vector<64x7xf32>
      %cst_39 = arith.constant 0.000000e+00 : f32
      %80 = vector.shape_cast %58 : vector<64x1xi1> to vector<64x1xi1>
      %81 = vector.broadcast %80 : vector<64x1xi1> to vector<64x7xi1>
      %82 = vector.broadcast %cst_39 : f32 to vector<64x7xf32>
      %83 = arith.select %81, %79, %82 : vector<64x7xi1>, vector<64x7xf32>
      %84 = arith.truncf %83 : vector<64x7xf32> to vector<64x7xbf16>
      %c0_40 = arith.constant 0 : index
      %c1_41 = arith.constant 1 : index
      %c0_42 = arith.constant 0 : index
      %c0_43 = arith.constant 0 : index
      %85 = vector.load %arg6[%c0_40, %c1_41, %c0_42, %c0_43] : memref<1x9x7x4xbf16, #tpu.memory_space<vmem>>, vector<1x1x7x4xbf16>
      %86 = vector.shape_cast %85 : vector<1x1x7x4xbf16> to vector<7x4xbf16>
      %cst_44 = arith.constant dense<0.000000e+00> : vector<64x4xf32>
      %87 = tpu.matmul %84, %86, %cst_44 {dimension_numbers = #tpu.dot_dimension_numbers<[1], [0], [0], [1], [0, 0, 1, 1], [], []>} : vector<64x7xbf16>, vector<7x4xbf16>, vector<64x4xf32> -> vector<64x4xf32>
      %88 = arith.addf %78, %87 : vector<64x4xf32>
      %c2 = arith.constant 2 : index
      %c0_45 = arith.constant 0 : index
      %89 = vector.load %arg8[%c2, %c0_45] : memref<82x7xf32, #tpu.memory_space<vmem>>, vector<64x7xf32>
      %cst_46 = arith.constant 0.000000e+00 : f32
      %90 = vector.shape_cast %67 : vector<64x1xi1> to vector<64x1xi1>
      %91 = vector.broadcast %90 : vector<64x1xi1> to vector<64x7xi1>
      %92 = vector.broadcast %cst_46 : f32 to vector<64x7xf32>
      %93 = arith.select %91, %89, %92 : vector<64x7xi1>, vector<64x7xf32>
      %94 = arith.truncf %93 : vector<64x7xf32> to vector<64x7xbf16>
      %c0_47 = arith.constant 0 : index
      %c2_48 = arith.constant 2 : index
      %c0_49 = arith.constant 0 : index
      %c0_50 = arith.constant 0 : index
      %95 = vector.load %arg6[%c0_47, %c2_48, %c0_49, %c0_50] : memref<1x9x7x4xbf16, #tpu.memory_space<vmem>>, vector<1x1x7x4xbf16>
      %96 = vector.shape_cast %95 : vector<1x1x7x4xbf16> to vector<7x4xbf16>
      %cst_51 = arith.constant dense<0.000000e+00> : vector<64x4xf32>
      %97 = tpu.matmul %94, %96, %cst_51 {dimension_numbers = #tpu.dot_dimension_numbers<[1], [0], [0], [1], [0, 0, 1, 1], [], []>} : vector<64x7xbf16>, vector<7x4xbf16>, vector<64x4xf32> -> vector<64x4xf32>
      %98 = arith.addf %88, %97 : vector<64x4xf32>
      %c8 = arith.constant 8 : index
      %c0_52 = arith.constant 0 : index
      %99 = vector.load %arg8[%c8, %c0_52] : memref<82x7xf32, #tpu.memory_space<vmem>>, vector<64x7xf32>
      %cst_53 = arith.constant 0.000000e+00 : f32
      %100 = vector.shape_cast %49 : vector<64x1xi1> to vector<64x1xi1>
      %101 = vector.broadcast %100 : vector<64x1xi1> to vector<64x7xi1>
      %102 = vector.broadcast %cst_53 : f32 to vector<64x7xf32>
      %103 = arith.select %101, %99, %102 : vector<64x7xi1>, vector<64x7xf32>
      %104 = arith.truncf %103 : vector<64x7xf32> to vector<64x7xbf16>
      %c0_54 = arith.constant 0 : index
      %c3 = arith.constant 3 : index
      %c0_55 = arith.constant 0 : index
      %c0_56 = arith.constant 0 : index
      %105 = vector.load %arg6[%c0_54, %c3, %c0_55, %c0_56] : memref<1x9x7x4xbf16, #tpu.memory_space<vmem>>, vector<1x1x7x4xbf16>
      %106 = vector.shape_cast %105 : vector<1x1x7x4xbf16> to vector<7x4xbf16>
      %cst_57 = arith.constant dense<0.000000e+00> : vector<64x4xf32>
      %107 = tpu.matmul %104, %106, %cst_57 {dimension_numbers = #tpu.dot_dimension_numbers<[1], [0], [0], [1], [0, 0, 1, 1], [], []>} : vector<64x7xbf16>, vector<7x4xbf16>, vector<64x4xf32> -> vector<64x4xf32>
      %108 = arith.addf %98, %107 : vector<64x4xf32>
      %c9_58 = arith.constant 9 : index
      %c0_59 = arith.constant 0 : index
      %109 = vector.load %arg8[%c9_58, %c0_59] : memref<82x7xf32, #tpu.memory_space<vmem>>, vector<64x7xf32>
      %cst_60 = arith.constant 0.000000e+00 : f32
      %110 = vector.shape_cast %58 : vector<64x1xi1> to vector<64x1xi1>
      %111 = vector.broadcast %110 : vector<64x1xi1> to vector<64x7xi1>
      %112 = vector.broadcast %cst_60 : f32 to vector<64x7xf32>
      %113 = arith.select %111, %109, %112 : vector<64x7xi1>, vector<64x7xf32>
      %114 = arith.truncf %113 : vector<64x7xf32> to vector<64x7xbf16>
      %c0_61 = arith.constant 0 : index
      %c4 = arith.constant 4 : index
      %c0_62 = arith.constant 0 : index
      %c0_63 = arith.constant 0 : index
      %115 = vector.load %arg6[%c0_61, %c4, %c0_62, %c0_63] : memref<1x9x7x4xbf16, #tpu.memory_space<vmem>>, vector<1x1x7x4xbf16>
      %116 = vector.shape_cast %115 : vector<1x1x7x4xbf16> to vector<7x4xbf16>
      %cst_64 = arith.constant dense<0.000000e+00> : vector<64x4xf32>
      %117 = tpu.matmul %114, %116, %cst_64 {dimension_numbers = #tpu.dot_dimension_numbers<[1], [0], [0], [1], [0, 0, 1, 1], [], []>} : vector<64x7xbf16>, vector<7x4xbf16>, vector<64x4xf32> -> vector<64x4xf32>
      %118 = arith.addf %108, %117 : vector<64x4xf32>
      %c10 = arith.constant 10 : index
      %c0_65 = arith.constant 0 : index
      %119 = vector.load %arg8[%c10, %c0_65] : memref<82x7xf32, #tpu.memory_space<vmem>>, vector<64x7xf32>
      %cst_66 = arith.constant 0.000000e+00 : f32
      %120 = vector.shape_cast %67 : vector<64x1xi1> to vector<64x1xi1>
      %121 = vector.broadcast %120 : vector<64x1xi1> to vector<64x7xi1>
      %122 = vector.broadcast %cst_66 : f32 to vector<64x7xf32>
      %123 = arith.select %121, %119, %122 : vector<64x7xi1>, vector<64x7xf32>
      %124 = arith.truncf %123 : vector<64x7xf32> to vector<64x7xbf16>
      %c0_67 = arith.constant 0 : index
      %c5 = arith.constant 5 : index
      %c0_68 = arith.constant 0 : index
      %c0_69 = arith.constant 0 : index
      %125 = vector.load %arg6[%c0_67, %c5, %c0_68, %c0_69] : memref<1x9x7x4xbf16, #tpu.memory_space<vmem>>, vector<1x1x7x4xbf16>
      %126 = vector.shape_cast %125 : vector<1x1x7x4xbf16> to vector<7x4xbf16>
      %cst_70 = arith.constant dense<0.000000e+00> : vector<64x4xf32>
      %127 = tpu.matmul %124, %126, %cst_70 {dimension_numbers = #tpu.dot_dimension_numbers<[1], [0], [0], [1], [0, 0, 1, 1], [], []>} : vector<64x7xbf16>, vector<7x4xbf16>, vector<64x4xf32> -> vector<64x4xf32>
      %128 = arith.addf %118, %127 : vector<64x4xf32>
      %c16 = arith.constant 16 : index
      %c0_71 = arith.constant 0 : index
      %129 = vector.load %arg8[%c16, %c0_71] : memref<82x7xf32, #tpu.memory_space<vmem>>, vector<64x7xf32>
      %cst_72 = arith.constant 0.000000e+00 : f32
      %130 = vector.shape_cast %49 : vector<64x1xi1> to vector<64x1xi1>
      %131 = vector.broadcast %130 : vector<64x1xi1> to vector<64x7xi1>
      %132 = vector.broadcast %cst_72 : f32 to vector<64x7xf32>
      %133 = arith.select %131, %129, %132 : vector<64x7xi1>, vector<64x7xf32>
      %134 = arith.truncf %133 : vector<64x7xf32> to vector<64x7xbf16>
      %c0_73 = arith.constant 0 : index
      %c6 = arith.constant 6 : index
      %c0_74 = arith.constant 0 : index
      %c0_75 = arith.constant 0 : index
      %135 = vector.load %arg6[%c0_73, %c6, %c0_74, %c0_75] : memref<1x9x7x4xbf16, #tpu.memory_space<vmem>>, vector<1x1x7x4xbf16>
      %136 = vector.shape_cast %135 : vector<1x1x7x4xbf16> to vector<7x4xbf16>
      %cst_76 = arith.constant dense<0.000000e+00> : vector<64x4xf32>
      %137 = tpu.matmul %134, %136, %cst_76 {dimension_numbers = #tpu.dot_dimension_numbers<[1], [0], [0], [1], [0, 0, 1, 1], [], []>} : vector<64x7xbf16>, vector<7x4xbf16>, vector<64x4xf32> -> vector<64x4xf32>
      %138 = arith.addf %128, %137 : vector<64x4xf32>
      %c17 = arith.constant 17 : index
      %c0_77 = arith.constant 0 : index
      %139 = vector.load %arg8[%c17, %c0_77] : memref<82x7xf32, #tpu.memory_space<vmem>>, vector<64x7xf32>
      %cst_78 = arith.constant 0.000000e+00 : f32
      %140 = vector.shape_cast %58 : vector<64x1xi1> to vector<64x1xi1>
      %141 = vector.broadcast %140 : vector<64x1xi1> to vector<64x7xi1>
      %142 = vector.broadcast %cst_78 : f32 to vector<64x7xf32>
      %143 = arith.select %141, %139, %142 : vector<64x7xi1>, vector<64x7xf32>
      %144 = arith.truncf %143 : vector<64x7xf32> to vector<64x7xbf16>
      %c0_79 = arith.constant 0 : index
      %c7 = arith.constant 7 : index
      %c0_80 = arith.constant 0 : index
      %c0_81 = arith.constant 0 : index
      %145 = vector.load %arg6[%c0_79, %c7, %c0_80, %c0_81] : memref<1x9x7x4xbf16, #tpu.memory_space<vmem>>, vector<1x1x7x4xbf16>
      %146 = vector.shape_cast %145 : vector<1x1x7x4xbf16> to vector<7x4xbf16>
      %cst_82 = arith.constant dense<0.000000e+00> : vector<64x4xf32>
      %147 = tpu.matmul %144, %146, %cst_82 {dimension_numbers = #tpu.dot_dimension_numbers<[1], [0], [0], [1], [0, 0, 1, 1], [], []>} : vector<64x7xbf16>, vector<7x4xbf16>, vector<64x4xf32> -> vector<64x4xf32>
      %148 = arith.addf %138, %147 : vector<64x4xf32>
      %c18 = arith.constant 18 : index
      %c0_83 = arith.constant 0 : index
      %149 = vector.load %arg8[%c18, %c0_83] : memref<82x7xf32, #tpu.memory_space<vmem>>, vector<64x7xf32>
      %cst_84 = arith.constant 0.000000e+00 : f32
      %150 = vector.shape_cast %67 : vector<64x1xi1> to vector<64x1xi1>
      %151 = vector.broadcast %150 : vector<64x1xi1> to vector<64x7xi1>
      %152 = vector.broadcast %cst_84 : f32 to vector<64x7xf32>
      %153 = arith.select %151, %149, %152 : vector<64x7xi1>, vector<64x7xf32>
      %154 = arith.truncf %153 : vector<64x7xf32> to vector<64x7xbf16>
      %c0_85 = arith.constant 0 : index
      %c8_86 = arith.constant 8 : index
      %c0_87 = arith.constant 0 : index
      %c0_88 = arith.constant 0 : index
      %155 = vector.load %arg6[%c0_85, %c8_86, %c0_87, %c0_88] : memref<1x9x7x4xbf16, #tpu.memory_space<vmem>>, vector<1x1x7x4xbf16>
      %156 = vector.shape_cast %155 : vector<1x1x7x4xbf16> to vector<7x4xbf16>
      %cst_89 = arith.constant dense<0.000000e+00> : vector<64x4xf32>
      %157 = tpu.matmul %154, %156, %cst_89 {dimension_numbers = #tpu.dot_dimension_numbers<[1], [0], [0], [1], [0, 0, 1, 1], [], []>} : vector<64x7xbf16>, vector<7x4xbf16>, vector<64x4xf32> -> vector<64x4xf32>
      %158 = arith.addf %148, %157 : vector<64x4xf32>
      %c0_90 = arith.constant 0 : index
      %c0_91 = arith.constant 0 : index
      %159 = vector.load %arg9[%c0_90, %c0_91] : memref<64x4xf32, #tpu.memory_space<vmem>>, vector<64x4xf32>
      tpu.vector_store %arg9[%c0_90, %c0_91], %158 {strides = array<i32>} : memref<64x4xf32, #tpu.memory_space<vmem>>, vector<64x4xf32>,
    } else {
    }
    %c2_i32 = arith.constant 2 : i32
    %10 = arith.cmpi eq, %arg2, %c2_i32 : i32
    %11 = arith.extui %10 : i1 to i32
    %c0_i32_3 = arith.constant 0 : i32
    %12 = arith.cmpi ne, %11, %c0_i32_3 : i32
    scf.if %12 {
      %c0 = arith.constant 0 : index
      %c0_4 = arith.constant 0 : index
      %13 = vector.load %arg9[%c0, %c0_4] : memref<64x4xf32, #tpu.memory_space<vmem>>, vector<64x4xf32>
      %c0_5 = arith.constant 0 : index
      %c0_6 = arith.constant 0 : index
      %c0_7 = arith.constant 0 : index
      %c0_8 = arith.constant 0 : index
      %14 = vector.load %arg7[%c0_5, %c0_6, %c0_7, %c0_8] : memref<1x1x64x4xf32, #tpu.memory_space<vmem>>, vector<1x1x64x4xf32>
      %15 = vector.shape_cast %14 : vector<1x1x64x4xf32> to vector<64x4xf32>
      %16 = vector.shape_cast %13 : vector<64x4xf32> to vector<1x1x64x4xf32>
      tpu.vector_store %arg7[%c0_5, %c0_6, %c0_7, %c0_8], %16 {strides = array<i32>} : memref<1x1x64x4xf32, #tpu.memory_space<vmem>>, vector<1x1x64x4xf32>,
    } else {
    }
    return
  }
  func.func @transform_0(%arg0: i32, %arg1: i32, %arg2: i32) -> (i32, i32, i32, i32) {
    %0 = arith.addi %arg1, %arg2 : i32
    %c1_i32 = arith.constant 1 : i32
    %1 = arith.subi %0, %c1_i32 : i32
    %c0_i32 = arith.constant 0 : i32
    %c3_i32 = arith.constant 3 : i32
    %2 = arith.maxsi %c0_i32, %1 : i32
    %3 = arith.minsi %c3_i32, %2 : i32
    %c0_i32_0 = arith.constant 0 : i32
    %c0_i32_1 = arith.constant 0 : i32
    %c0_i32_2 = arith.constant 0 : i32
    return %arg0, %3, %c0_i32_0, %c0_i32_1 : i32, i32, i32, i32
  }
  func.func @transform_1(%arg0: i32, %arg1: i32, %arg2: i32) -> (i32, i32) {
    %c0_i32 = arith.constant 0 : i32
    %c0_i32_0 = arith.constant 0 : i32
    %c0_i32_1 = arith.constant 0 : i32
    return %c0_i32, %c0_i32_0 : i32, i32
  }
  func.func @transform_2(%arg0: i32, %arg1: i32, %arg2: i32) -> (i32, i32) {
    %c0_i32 = arith.constant 0 : i32
    %c0_i32_0 = arith.constant 0 : i32
    %c0_i32_1 = arith.constant 0 : i32
    return %c0_i32, %c0_i32_0 : i32, i32
  }
  func.func @transform_3(%arg0: i32, %arg1: i32, %arg2: i32) -> (i32, i32, i32, i32) {
    %c0_i32 = arith.constant 0 : i32
    %c0_i32_0 = arith.constant 0 : i32
    %c0_i32_1 = arith.constant 0 : i32
    %c0_i32_2 = arith.constant 0 : i32
    return %arg2, %c0_i32, %c0_i32_0, %c0_i32_1 : i32, i32, i32, i32
  }
  func.func @transform_4(%arg0: i32, %arg1: i32, %arg2: i32) -> (i32, i32, i32, i32) {
    %c0_i32 = arith.constant 0 : i32
    %c0_i32_0 = arith.constant 0 : i32
    %c0_i32_1 = arith.constant 0 : i32
    return %arg0, %arg1, %c0_i32, %c0_i32_0 : i32, i32, i32, i32
  }
}

module attributes {stable_mosaic.version = 11 : i64} {
  func.func @kernel(%arg0: i32, %arg1: i32, %arg2: i32, %arg3: memref<1x1x64x4xf32, #tpu.memory_space<vmem>>, %arg4: memref<1x4xf32, #tpu.memory_space<vmem>>, %arg5: memref<1x4xf32, #tpu.memory_space<vmem>>, %arg6: memref<1x9x4x4xbf16, #tpu.memory_space<vmem>>, %arg7: memref<1x1x64x4xf32, #tpu.memory_space<vmem>>, %arg8: memref<82x4xf32, #tpu.memory_space<vmem>>, %arg9: memref<64x4xf32, #tpu.memory_space<vmem>>) attributes {dimension_semantics = [#tpu.dimension_semantics<parallel>, #tpu.dimension_semantics<parallel>, #tpu.dimension_semantics<arbitrary>], iteration_bounds = array<i64: 1, 4, 3>, scalar_prefetch = 0 : i64, scratch_operands = 2 : i64, tpu.core_type = #tpu.core_type<tc>, window_params = [{transform_indices = @transform_0, window_bounds = array<i64: 1, 1, 64, 4>}, {pipeline_mode = #tpu.pipeline_mode<synchronous>, transform_indices = @transform_1, window_bounds = array<i64: 1, 4>}, {pipeline_mode = #tpu.pipeline_mode<synchronous>, transform_indices = @transform_2, window_bounds = array<i64: 1, 4>}, {transform_indices = @transform_3, window_bounds = array<i64: 1, 9, 4, 4>}, {transform_indices = @transform_4, window_bounds = array<i64: 1, 1, 64, 4>}]} {
    %c0_i32 = arith.constant 0 : i32
    %0 = arith.cmpi eq, %arg2, %c0_i32 : i32
    %1 = arith.extui %0 : i1 to i32
    %c0_i32_0 = arith.constant 0 : i32
    %2 = arith.cmpi ne, %1, %c0_i32_0 : i32
    scf.if %2 {
      %cst = arith.constant 0.000000e+00 : f32
      %13 = vector.broadcast %cst : f32 to vector<82x4xf32>
      %c0 = arith.constant 0 : index
      %c0_4 = arith.constant 0 : index
      %14 = vector.load %arg8[%c0, %c0_4] : memref<82x4xf32, #tpu.memory_space<vmem>>, vector<82x4xf32>
      tpu.vector_store %arg8[%c0, %c0_4], %13 {strides = array<i32>} : memref<82x4xf32, #tpu.memory_space<vmem>>, vector<82x4xf32>,
      %cst_5 = arith.constant 0.000000e+00 : f32
      %15 = vector.broadcast %cst_5 : f32 to vector<64x4xf32>
      %c0_6 = arith.constant 0 : index
      %c0_7 = arith.constant 0 : index
      %16 = vector.load %arg9[%c0_6, %c0_7] : memref<64x4xf32, #tpu.memory_space<vmem>>, vector<64x4xf32>
      tpu.vector_store %arg9[%c0_6, %c0_7], %15 {strides = array<i32>} : memref<64x4xf32, #tpu.memory_space<vmem>>, vector<64x4xf32>,
    } else {
    }
    %3 = arith.addi %arg1, %arg2 : i32
    %c1_i32 = arith.constant 1 : i32
    %4 = arith.subi %3, %c1_i32 : i32
    %c0_i32_1 = arith.constant 0 : i32
    %5 = arith.cmpi sge, %4, %c0_i32_1 : i32
    %c4_i32 = arith.constant 4 : i32
    %6 = arith.cmpi slt, %4, %c4_i32 : i32
    %7 = arith.andi %5, %6 : i1
    %8 = arith.extui %7 : i1 to i32
    %c0_i32_2 = arith.constant 0 : i32
    %9 = arith.cmpi ne, %8, %c0_i32_2 : i32
    scf.if %9 {
      %c0 = arith.constant 0 : index
      %c0_4 = arith.constant 0 : index
      %c0_5 = arith.constant 0 : index
      %c0_6 = arith.constant 0 : index
      %13 = vector.load %arg3[%c0, %c0_4, %c0_5, %c0_6] : memref<1x1x64x4xf32, #tpu.memory_space<vmem>>, vector<1x1x64x4xf32>
      %14 = vector.shape_cast %13 : vector<1x1x64x4xf32> to vector<64x4xf32>
      %c0_7 = arith.constant 0 : index
      %c0_8 = arith.constant 0 : index
      %15 = vector.load %arg4[%c0_7, %c0_8] : memref<1x4xf32, #tpu.memory_space<vmem>>, vector<1x4xf32>
      %16 = vector.broadcast %15 : vector<1x4xf32> to vector<64x4xf32>
      %17 = arith.mulf %14, %16 : vector<64x4xf32>
      %c0_9 = arith.constant 0 : index
      %c0_10 = arith.constant 0 : index
      %18 = vector.load %arg5[%c0_9, %c0_10] : memref<1x4xf32, #tpu.memory_space<vmem>>, vector<1x4xf32>
      %19 = vector.broadcast %18 : vector<1x4xf32> to vector<64x4xf32>
      %20 = arith.addf %17, %19 : vector<64x4xf32>
      %cst = arith.constant 0.000000e+00 : f32
      %21 = vector.broadcast %cst : f32 to vector<64x4xf32>
      %22 = arith.maximumf %20, %21 : vector<64x4xf32>
      %c9 = arith.constant 9 : index
      %c0_11 = arith.constant 0 : index
      %23 = vector.load %arg8[%c9, %c0_11] : memref<82x4xf32, #tpu.memory_space<vmem>>, vector<64x4xf32>
      tpu.vector_store %arg8[%c9, %c0_11], %22 {strides = array<i32>} : memref<82x4xf32, #tpu.memory_space<vmem>>, vector<64x4xf32>,
      %24 = tpu.iota {dimensions = array<i32: 0>} : vector<64x1xi32>
      %c8_i32 = arith.constant 8 : i32
      %c0_i32_12 = arith.constant 0 : i32
      %25 = arith.cmpi eq, %c8_i32, %c0_i32_12 : i32
      %c1_i32_13 = arith.constant 1 : i32
      %26 = arith.select %25, %c1_i32_13, %c8_i32 : i32
      %27 = vector.broadcast %26 : i32 to vector<64x1xi32>
      %28 = arith.remsi %24, %27 : vector<64x1xi32>
      %c0_i32_14 = arith.constant 0 : i32
      %29 = vector.broadcast %c0_i32_14 : i32 to vector<64x1xi32>
      %30 = arith.cmpi ne, %28, %29 : vector<64x1xi32>
      %c0_i32_15 = arith.constant 0 : i32
      %31 = vector.broadcast %c0_i32_15 : i32 to vector<64x1xi32>
      %32 = arith.cmpi slt, %28, %31 : vector<64x1xi32>
      %c0_i32_16 = arith.constant 0 : i32
      %33 = arith.cmpi slt, %26, %c0_i32_16 : i32
      %34 = vector.broadcast %33 : i1 to vector<64x1xi1>
      %35 = vector.broadcast %34 : vector<64x1xi1> to vector<64x1xi1>
      %36 = arith.xori %32, %35 : vector<64x1xi1>
      %37 = arith.andi %36, %30 : vector<64x1xi1>
      %38 = vector.broadcast %26 : i32 to vector<64x1xi32>
      %39 = arith.addi %28, %38 : vector<64x1xi32>
      %40 = arith.select %37, %39, %28 : vector<64x1xi1>, vector<64x1xi32>
      %c-1_i32 = arith.constant -1 : i32
      %41 = vector.broadcast %c-1_i32 : i32 to vector<64x1xi32>
      %42 = arith.addi %40, %41 : vector<64x1xi32>
      %c0_i32_17 = arith.constant 0 : i32
      %43 = vector.broadcast %c0_i32_17 : i32 to vector<64x1xi32>
      %44 = arith.cmpi sge, %42, %43 : vector<64x1xi32>
      %c-1_i32_18 = arith.constant -1 : i32
      %45 = vector.broadcast %c-1_i32_18 : i32 to vector<64x1xi32>
      %46 = arith.addi %40, %45 : vector<64x1xi32>
      %c8_i32_19 = arith.constant 8 : i32
      %47 = vector.broadcast %c8_i32_19 : i32 to vector<64x1xi32>
      %48 = arith.cmpi slt, %46, %47 : vector<64x1xi32>
      %49 = arith.andi %44, %48 : vector<64x1xi1>
      %c0_i32_20 = arith.constant 0 : i32
      %50 = vector.broadcast %c0_i32_20 : i32 to vector<64x1xi32>
      %51 = arith.addi %40, %50 : vector<64x1xi32>
      %c0_i32_21 = arith.constant 0 : i32
      %52 = vector.broadcast %c0_i32_21 : i32 to vector<64x1xi32>
      %53 = arith.cmpi sge, %51, %52 : vector<64x1xi32>
      %c0_i32_22 = arith.constant 0 : i32
      %54 = vector.broadcast %c0_i32_22 : i32 to vector<64x1xi32>
      %55 = arith.addi %40, %54 : vector<64x1xi32>
      %c8_i32_23 = arith.constant 8 : i32
      %56 = vector.broadcast %c8_i32_23 : i32 to vector<64x1xi32>
      %57 = arith.cmpi slt, %55, %56 : vector<64x1xi32>
      %58 = arith.andi %53, %57 : vector<64x1xi1>
      %c1_i32_24 = arith.constant 1 : i32
      %59 = vector.broadcast %c1_i32_24 : i32 to vector<64x1xi32>
      %60 = arith.addi %40, %59 : vector<64x1xi32>
      %c0_i32_25 = arith.constant 0 : i32
      %61 = vector.broadcast %c0_i32_25 : i32 to vector<64x1xi32>
      %62 = arith.cmpi sge, %60, %61 : vector<64x1xi32>
      %c1_i32_26 = arith.constant 1 : i32
      %63 = vector.broadcast %c1_i32_26 : i32 to vector<64x1xi32>
      %64 = arith.addi %40, %63 : vector<64x1xi32>
      %c8_i32_27 = arith.constant 8 : i32
      %65 = vector.broadcast %c8_i32_27 : i32 to vector<64x1xi32>
      %66 = arith.cmpi slt, %64, %65 : vector<64x1xi32>
      %67 = arith.andi %62, %66 : vector<64x1xi1>
      %c0_28 = arith.constant 0 : index
      %c0_29 = arith.constant 0 : index
      %68 = vector.load %arg9[%c0_28, %c0_29] : memref<64x4xf32, #tpu.memory_space<vmem>>, vector<64x4xf32>
      %c0_30 = arith.constant 0 : index
      %c0_31 = arith.constant 0 : index
      %69 = vector.load %arg8[%c0_30, %c0_31] : memref<82x4xf32, #tpu.memory_space<vmem>>, vector<64x4xf32>
      %cst_32 = arith.constant 0.000000e+00 : f32
      %70 = vector.shape_cast %49 : vector<64x1xi1> to vector<64x1xi1>
      %71 = vector.broadcast %70 : vector<64x1xi1> to vector<64x4xi1>
      %72 = vector.broadcast %cst_32 : f32 to vector<64x4xf32>
      %73 = arith.select %71, %69, %72 : vector<64x4xi1>, vector<64x4xf32>
      %74 = arith.truncf %73 : vector<64x4xf32> to vector<64x4xbf16>
      %c0_33 = arith.constant 0 : index
      %c0_34 = arith.constant 0 : index
      %c0_35 = arith.constant 0 : index
      %c0_36 = arith.constant 0 : index
      %75 = vector.load %arg6[%c0_33, %c0_34, %c0_35, %c0_36] : memref<1x9x4x4xbf16, #tpu.memory_space<vmem>>, vector<1x1x4x4xbf16>
      %76 = vector.shape_cast %75 : vector<1x1x4x4xbf16> to vector<4x4xbf16>
      %cst_37 = arith.constant dense<0.000000e+00> : vector<64x4xf32>
      %77 = tpu.matmul %74, %76, %cst_37 {dimension_numbers = #tpu.dot_dimension_numbers<[1], [0], [0], [1], [0, 0, 1, 1], [], []>} : vector<64x4xbf16>, vector<4x4xbf16>, vector<64x4xf32> -> vector<64x4xf32>
      %78 = arith.addf %68, %77 : vector<64x4xf32>
      %c1 = arith.constant 1 : index
      %c0_38 = arith.constant 0 : index
      %79 = vector.load %arg8[%c1, %c0_38] : memref<82x4xf32, #tpu.memory_space<vmem>>, vector<64x4xf32>
      %cst_39 = arith.constant 0.000000e+00 : f32
      %80 = vector.shape_cast %58 : vector<64x1xi1> to vector<64x1xi1>
      %81 = vector.broadcast %80 : vector<64x1xi1> to vector<64x4xi1>
      %82 = vector.broadcast %cst_39 : f32 to vector<64x4xf32>
      %83 = arith.select %81, %79, %82 : vector<64x4xi1>, vector<64x4xf32>
      %84 = arith.truncf %83 : vector<64x4xf32> to vector<64x4xbf16>
      %c0_40 = arith.constant 0 : index
      %c1_41 = arith.constant 1 : index
      %c0_42 = arith.constant 0 : index
      %c0_43 = arith.constant 0 : index
      %85 = vector.load %arg6[%c0_40, %c1_41, %c0_42, %c0_43] : memref<1x9x4x4xbf16, #tpu.memory_space<vmem>>, vector<1x1x4x4xbf16>
      %86 = vector.shape_cast %85 : vector<1x1x4x4xbf16> to vector<4x4xbf16>
      %cst_44 = arith.constant dense<0.000000e+00> : vector<64x4xf32>
      %87 = tpu.matmul %84, %86, %cst_44 {dimension_numbers = #tpu.dot_dimension_numbers<[1], [0], [0], [1], [0, 0, 1, 1], [], []>} : vector<64x4xbf16>, vector<4x4xbf16>, vector<64x4xf32> -> vector<64x4xf32>
      %88 = arith.addf %78, %87 : vector<64x4xf32>
      %c2 = arith.constant 2 : index
      %c0_45 = arith.constant 0 : index
      %89 = vector.load %arg8[%c2, %c0_45] : memref<82x4xf32, #tpu.memory_space<vmem>>, vector<64x4xf32>
      %cst_46 = arith.constant 0.000000e+00 : f32
      %90 = vector.shape_cast %67 : vector<64x1xi1> to vector<64x1xi1>
      %91 = vector.broadcast %90 : vector<64x1xi1> to vector<64x4xi1>
      %92 = vector.broadcast %cst_46 : f32 to vector<64x4xf32>
      %93 = arith.select %91, %89, %92 : vector<64x4xi1>, vector<64x4xf32>
      %94 = arith.truncf %93 : vector<64x4xf32> to vector<64x4xbf16>
      %c0_47 = arith.constant 0 : index
      %c2_48 = arith.constant 2 : index
      %c0_49 = arith.constant 0 : index
      %c0_50 = arith.constant 0 : index
      %95 = vector.load %arg6[%c0_47, %c2_48, %c0_49, %c0_50] : memref<1x9x4x4xbf16, #tpu.memory_space<vmem>>, vector<1x1x4x4xbf16>
      %96 = vector.shape_cast %95 : vector<1x1x4x4xbf16> to vector<4x4xbf16>
      %cst_51 = arith.constant dense<0.000000e+00> : vector<64x4xf32>
      %97 = tpu.matmul %94, %96, %cst_51 {dimension_numbers = #tpu.dot_dimension_numbers<[1], [0], [0], [1], [0, 0, 1, 1], [], []>} : vector<64x4xbf16>, vector<4x4xbf16>, vector<64x4xf32> -> vector<64x4xf32>
      %98 = arith.addf %88, %97 : vector<64x4xf32>
      %c8 = arith.constant 8 : index
      %c0_52 = arith.constant 0 : index
      %99 = vector.load %arg8[%c8, %c0_52] : memref<82x4xf32, #tpu.memory_space<vmem>>, vector<64x4xf32>
      %cst_53 = arith.constant 0.000000e+00 : f32
      %100 = vector.shape_cast %49 : vector<64x1xi1> to vector<64x1xi1>
      %101 = vector.broadcast %100 : vector<64x1xi1> to vector<64x4xi1>
      %102 = vector.broadcast %cst_53 : f32 to vector<64x4xf32>
      %103 = arith.select %101, %99, %102 : vector<64x4xi1>, vector<64x4xf32>
      %104 = arith.truncf %103 : vector<64x4xf32> to vector<64x4xbf16>
      %c0_54 = arith.constant 0 : index
      %c3 = arith.constant 3 : index
      %c0_55 = arith.constant 0 : index
      %c0_56 = arith.constant 0 : index
      %105 = vector.load %arg6[%c0_54, %c3, %c0_55, %c0_56] : memref<1x9x4x4xbf16, #tpu.memory_space<vmem>>, vector<1x1x4x4xbf16>
      %106 = vector.shape_cast %105 : vector<1x1x4x4xbf16> to vector<4x4xbf16>
      %cst_57 = arith.constant dense<0.000000e+00> : vector<64x4xf32>
      %107 = tpu.matmul %104, %106, %cst_57 {dimension_numbers = #tpu.dot_dimension_numbers<[1], [0], [0], [1], [0, 0, 1, 1], [], []>} : vector<64x4xbf16>, vector<4x4xbf16>, vector<64x4xf32> -> vector<64x4xf32>
      %108 = arith.addf %98, %107 : vector<64x4xf32>
      %c9_58 = arith.constant 9 : index
      %c0_59 = arith.constant 0 : index
      %109 = vector.load %arg8[%c9_58, %c0_59] : memref<82x4xf32, #tpu.memory_space<vmem>>, vector<64x4xf32>
      %cst_60 = arith.constant 0.000000e+00 : f32
      %110 = vector.shape_cast %58 : vector<64x1xi1> to vector<64x1xi1>
      %111 = vector.broadcast %110 : vector<64x1xi1> to vector<64x4xi1>
      %112 = vector.broadcast %cst_60 : f32 to vector<64x4xf32>
      %113 = arith.select %111, %109, %112 : vector<64x4xi1>, vector<64x4xf32>
      %114 = arith.truncf %113 : vector<64x4xf32> to vector<64x4xbf16>
      %c0_61 = arith.constant 0 : index
      %c4 = arith.constant 4 : index
      %c0_62 = arith.constant 0 : index
      %c0_63 = arith.constant 0 : index
      %115 = vector.load %arg6[%c0_61, %c4, %c0_62, %c0_63] : memref<1x9x4x4xbf16, #tpu.memory_space<vmem>>, vector<1x1x4x4xbf16>
      %116 = vector.shape_cast %115 : vector<1x1x4x4xbf16> to vector<4x4xbf16>
      %cst_64 = arith.constant dense<0.000000e+00> : vector<64x4xf32>
      %117 = tpu.matmul %114, %116, %cst_64 {dimension_numbers = #tpu.dot_dimension_numbers<[1], [0], [0], [1], [0, 0, 1, 1], [], []>} : vector<64x4xbf16>, vector<4x4xbf16>, vector<64x4xf32> -> vector<64x4xf32>
      %118 = arith.addf %108, %117 : vector<64x4xf32>
      %c10 = arith.constant 10 : index
      %c0_65 = arith.constant 0 : index
      %119 = vector.load %arg8[%c10, %c0_65] : memref<82x4xf32, #tpu.memory_space<vmem>>, vector<64x4xf32>
      %cst_66 = arith.constant 0.000000e+00 : f32
      %120 = vector.shape_cast %67 : vector<64x1xi1> to vector<64x1xi1>
      %121 = vector.broadcast %120 : vector<64x1xi1> to vector<64x4xi1>
      %122 = vector.broadcast %cst_66 : f32 to vector<64x4xf32>
      %123 = arith.select %121, %119, %122 : vector<64x4xi1>, vector<64x4xf32>
      %124 = arith.truncf %123 : vector<64x4xf32> to vector<64x4xbf16>
      %c0_67 = arith.constant 0 : index
      %c5 = arith.constant 5 : index
      %c0_68 = arith.constant 0 : index
      %c0_69 = arith.constant 0 : index
      %125 = vector.load %arg6[%c0_67, %c5, %c0_68, %c0_69] : memref<1x9x4x4xbf16, #tpu.memory_space<vmem>>, vector<1x1x4x4xbf16>
      %126 = vector.shape_cast %125 : vector<1x1x4x4xbf16> to vector<4x4xbf16>
      %cst_70 = arith.constant dense<0.000000e+00> : vector<64x4xf32>
      %127 = tpu.matmul %124, %126, %cst_70 {dimension_numbers = #tpu.dot_dimension_numbers<[1], [0], [0], [1], [0, 0, 1, 1], [], []>} : vector<64x4xbf16>, vector<4x4xbf16>, vector<64x4xf32> -> vector<64x4xf32>
      %128 = arith.addf %118, %127 : vector<64x4xf32>
      %c16 = arith.constant 16 : index
      %c0_71 = arith.constant 0 : index
      %129 = vector.load %arg8[%c16, %c0_71] : memref<82x4xf32, #tpu.memory_space<vmem>>, vector<64x4xf32>
      %cst_72 = arith.constant 0.000000e+00 : f32
      %130 = vector.shape_cast %49 : vector<64x1xi1> to vector<64x1xi1>
      %131 = vector.broadcast %130 : vector<64x1xi1> to vector<64x4xi1>
      %132 = vector.broadcast %cst_72 : f32 to vector<64x4xf32>
      %133 = arith.select %131, %129, %132 : vector<64x4xi1>, vector<64x4xf32>
      %134 = arith.truncf %133 : vector<64x4xf32> to vector<64x4xbf16>
      %c0_73 = arith.constant 0 : index
      %c6 = arith.constant 6 : index
      %c0_74 = arith.constant 0 : index
      %c0_75 = arith.constant 0 : index
      %135 = vector.load %arg6[%c0_73, %c6, %c0_74, %c0_75] : memref<1x9x4x4xbf16, #tpu.memory_space<vmem>>, vector<1x1x4x4xbf16>
      %136 = vector.shape_cast %135 : vector<1x1x4x4xbf16> to vector<4x4xbf16>
      %cst_76 = arith.constant dense<0.000000e+00> : vector<64x4xf32>
      %137 = tpu.matmul %134, %136, %cst_76 {dimension_numbers = #tpu.dot_dimension_numbers<[1], [0], [0], [1], [0, 0, 1, 1], [], []>} : vector<64x4xbf16>, vector<4x4xbf16>, vector<64x4xf32> -> vector<64x4xf32>
      %138 = arith.addf %128, %137 : vector<64x4xf32>
      %c17 = arith.constant 17 : index
      %c0_77 = arith.constant 0 : index
      %139 = vector.load %arg8[%c17, %c0_77] : memref<82x4xf32, #tpu.memory_space<vmem>>, vector<64x4xf32>
      %cst_78 = arith.constant 0.000000e+00 : f32
      %140 = vector.shape_cast %58 : vector<64x1xi1> to vector<64x1xi1>
      %141 = vector.broadcast %140 : vector<64x1xi1> to vector<64x4xi1>
      %142 = vector.broadcast %cst_78 : f32 to vector<64x4xf32>
      %143 = arith.select %141, %139, %142 : vector<64x4xi1>, vector<64x4xf32>
      %144 = arith.truncf %143 : vector<64x4xf32> to vector<64x4xbf16>
      %c0_79 = arith.constant 0 : index
      %c7 = arith.constant 7 : index
      %c0_80 = arith.constant 0 : index
      %c0_81 = arith.constant 0 : index
      %145 = vector.load %arg6[%c0_79, %c7, %c0_80, %c0_81] : memref<1x9x4x4xbf16, #tpu.memory_space<vmem>>, vector<1x1x4x4xbf16>
      %146 = vector.shape_cast %145 : vector<1x1x4x4xbf16> to vector<4x4xbf16>
      %cst_82 = arith.constant dense<0.000000e+00> : vector<64x4xf32>
      %147 = tpu.matmul %144, %146, %cst_82 {dimension_numbers = #tpu.dot_dimension_numbers<[1], [0], [0], [1], [0, 0, 1, 1], [], []>} : vector<64x4xbf16>, vector<4x4xbf16>, vector<64x4xf32> -> vector<64x4xf32>
      %148 = arith.addf %138, %147 : vector<64x4xf32>
      %c18 = arith.constant 18 : index
      %c0_83 = arith.constant 0 : index
      %149 = vector.load %arg8[%c18, %c0_83] : memref<82x4xf32, #tpu.memory_space<vmem>>, vector<64x4xf32>
      %cst_84 = arith.constant 0.000000e+00 : f32
      %150 = vector.shape_cast %67 : vector<64x1xi1> to vector<64x1xi1>
      %151 = vector.broadcast %150 : vector<64x1xi1> to vector<64x4xi1>
      %152 = vector.broadcast %cst_84 : f32 to vector<64x4xf32>
      %153 = arith.select %151, %149, %152 : vector<64x4xi1>, vector<64x4xf32>
      %154 = arith.truncf %153 : vector<64x4xf32> to vector<64x4xbf16>
      %c0_85 = arith.constant 0 : index
      %c8_86 = arith.constant 8 : index
      %c0_87 = arith.constant 0 : index
      %c0_88 = arith.constant 0 : index
      %155 = vector.load %arg6[%c0_85, %c8_86, %c0_87, %c0_88] : memref<1x9x4x4xbf16, #tpu.memory_space<vmem>>, vector<1x1x4x4xbf16>
      %156 = vector.shape_cast %155 : vector<1x1x4x4xbf16> to vector<4x4xbf16>
      %cst_89 = arith.constant dense<0.000000e+00> : vector<64x4xf32>
      %157 = tpu.matmul %154, %156, %cst_89 {dimension_numbers = #tpu.dot_dimension_numbers<[1], [0], [0], [1], [0, 0, 1, 1], [], []>} : vector<64x4xbf16>, vector<4x4xbf16>, vector<64x4xf32> -> vector<64x4xf32>
      %158 = arith.addf %148, %157 : vector<64x4xf32>
      %c0_90 = arith.constant 0 : index
      %c0_91 = arith.constant 0 : index
      %159 = vector.load %arg9[%c0_90, %c0_91] : memref<64x4xf32, #tpu.memory_space<vmem>>, vector<64x4xf32>
      tpu.vector_store %arg9[%c0_90, %c0_91], %158 {strides = array<i32>} : memref<64x4xf32, #tpu.memory_space<vmem>>, vector<64x4xf32>,
    } else {
    }
    %c2_i32 = arith.constant 2 : i32
    %10 = arith.cmpi eq, %arg2, %c2_i32 : i32
    %11 = arith.extui %10 : i1 to i32
    %c0_i32_3 = arith.constant 0 : i32
    %12 = arith.cmpi ne, %11, %c0_i32_3 : i32
    scf.if %12 {
      %c0 = arith.constant 0 : index
      %c0_4 = arith.constant 0 : index
      %13 = vector.load %arg9[%c0, %c0_4] : memref<64x4xf32, #tpu.memory_space<vmem>>, vector<64x4xf32>
      %c0_5 = arith.constant 0 : index
      %c0_6 = arith.constant 0 : index
      %c0_7 = arith.constant 0 : index
      %c0_8 = arith.constant 0 : index
      %14 = vector.load %arg7[%c0_5, %c0_6, %c0_7, %c0_8] : memref<1x1x64x4xf32, #tpu.memory_space<vmem>>, vector<1x1x64x4xf32>
      %15 = vector.shape_cast %14 : vector<1x1x64x4xf32> to vector<64x4xf32>
      %16 = vector.shape_cast %13 : vector<64x4xf32> to vector<1x1x64x4xf32>
      tpu.vector_store %arg7[%c0_5, %c0_6, %c0_7, %c0_8], %16 {strides = array<i32>} : memref<1x1x64x4xf32, #tpu.memory_space<vmem>>, vector<1x1x64x4xf32>,
    } else {
    }
    return
  }
  func.func @transform_0(%arg0: i32, %arg1: i32, %arg2: i32) -> (i32, i32, i32, i32) {
    %0 = arith.addi %arg1, %arg2 : i32
    %c1_i32 = arith.constant 1 : i32
    %1 = arith.subi %0, %c1_i32 : i32
    %c0_i32 = arith.constant 0 : i32
    %c3_i32 = arith.constant 3 : i32
    %2 = arith.maxsi %c0_i32, %1 : i32
    %3 = arith.minsi %c3_i32, %2 : i32
    %c0_i32_0 = arith.constant 0 : i32
    %c0_i32_1 = arith.constant 0 : i32
    %c0_i32_2 = arith.constant 0 : i32
    return %arg0, %3, %c0_i32_0, %c0_i32_1 : i32, i32, i32, i32
  }
  func.func @transform_1(%arg0: i32, %arg1: i32, %arg2: i32) -> (i32, i32) {
    %c0_i32 = arith.constant 0 : i32
    %c0_i32_0 = arith.constant 0 : i32
    %c0_i32_1 = arith.constant 0 : i32
    return %c0_i32, %c0_i32_0 : i32, i32
  }
  func.func @transform_2(%arg0: i32, %arg1: i32, %arg2: i32) -> (i32, i32) {
    %c0_i32 = arith.constant 0 : i32
    %c0_i32_0 = arith.constant 0 : i32
    %c0_i32_1 = arith.constant 0 : i32
    return %c0_i32, %c0_i32_0 : i32, i32
  }
  func.func @transform_3(%arg0: i32, %arg1: i32, %arg2: i32) -> (i32, i32, i32, i32) {
    %c0_i32 = arith.constant 0 : i32
    %c0_i32_0 = arith.constant 0 : i32
    %c0_i32_1 = arith.constant 0 : i32
    %c0_i32_2 = arith.constant 0 : i32
    return %arg2, %c0_i32, %c0_i32_0, %c0_i32_1 : i32, i32, i32, i32
  }
  func.func @transform_4(%arg0: i32, %arg1: i32, %arg2: i32) -> (i32, i32, i32, i32) {
    %c0_i32 = arith.constant 0 : i32
    %c0_i32_0 = arith.constant 0 : i32
    %c0_i32_1 = arith.constant 0 : i32
    return %arg0, %arg1, %c0_i32, %c0_i32_0 : i32, i32, i32, i32
  }
}

module attributes {stable_mosaic.version = 11 : i64} {
  func.func @kernel(%arg0: i32, %arg1: i32, %arg2: i32, %arg3: memref<1x1x64x8xf32, #tpu.memory_space<vmem>>, %arg4: memref<1x8xf32, #tpu.memory_space<vmem>>, %arg5: memref<1x8xf32, #tpu.memory_space<vmem>>, %arg6: memref<1x9x8x8xbf16, #tpu.memory_space<vmem>>, %arg7: memref<1x1x64x8xf32, #tpu.memory_space<vmem>>, %arg8: memref<82x8xf32, #tpu.memory_space<vmem>>, %arg9: memref<64x8xf32, #tpu.memory_space<vmem>>) attributes {dimension_semantics = [#tpu.dimension_semantics<parallel>, #tpu.dimension_semantics<parallel>, #tpu.dimension_semantics<arbitrary>], iteration_bounds = array<i64: 1, 4, 3>, scalar_prefetch = 0 : i64, scratch_operands = 2 : i64, tpu.core_type = #tpu.core_type<tc>, window_params = [{transform_indices = @transform_0, window_bounds = array<i64: 1, 1, 64, 8>}, {pipeline_mode = #tpu.pipeline_mode<synchronous>, transform_indices = @transform_1, window_bounds = array<i64: 1, 8>}, {pipeline_mode = #tpu.pipeline_mode<synchronous>, transform_indices = @transform_2, window_bounds = array<i64: 1, 8>}, {transform_indices = @transform_3, window_bounds = array<i64: 1, 9, 8, 8>}, {transform_indices = @transform_4, window_bounds = array<i64: 1, 1, 64, 8>}]} {
    %c0_i32 = arith.constant 0 : i32
    %0 = arith.cmpi eq, %arg2, %c0_i32 : i32
    %1 = arith.extui %0 : i1 to i32
    %c0_i32_0 = arith.constant 0 : i32
    %2 = arith.cmpi ne, %1, %c0_i32_0 : i32
    scf.if %2 {
      %cst = arith.constant 0.000000e+00 : f32
      %13 = vector.broadcast %cst : f32 to vector<82x8xf32>
      %c0 = arith.constant 0 : index
      %c0_4 = arith.constant 0 : index
      %14 = vector.load %arg8[%c0, %c0_4] : memref<82x8xf32, #tpu.memory_space<vmem>>, vector<82x8xf32>
      tpu.vector_store %arg8[%c0, %c0_4], %13 {strides = array<i32>} : memref<82x8xf32, #tpu.memory_space<vmem>>, vector<82x8xf32>,
      %cst_5 = arith.constant 0.000000e+00 : f32
      %15 = vector.broadcast %cst_5 : f32 to vector<64x8xf32>
      %c0_6 = arith.constant 0 : index
      %c0_7 = arith.constant 0 : index
      %16 = vector.load %arg9[%c0_6, %c0_7] : memref<64x8xf32, #tpu.memory_space<vmem>>, vector<64x8xf32>
      tpu.vector_store %arg9[%c0_6, %c0_7], %15 {strides = array<i32>} : memref<64x8xf32, #tpu.memory_space<vmem>>, vector<64x8xf32>,
    } else {
    }
    %3 = arith.addi %arg1, %arg2 : i32
    %c1_i32 = arith.constant 1 : i32
    %4 = arith.subi %3, %c1_i32 : i32
    %c0_i32_1 = arith.constant 0 : i32
    %5 = arith.cmpi sge, %4, %c0_i32_1 : i32
    %c4_i32 = arith.constant 4 : i32
    %6 = arith.cmpi slt, %4, %c4_i32 : i32
    %7 = arith.andi %5, %6 : i1
    %8 = arith.extui %7 : i1 to i32
    %c0_i32_2 = arith.constant 0 : i32
    %9 = arith.cmpi ne, %8, %c0_i32_2 : i32
    scf.if %9 {
      %c0 = arith.constant 0 : index
      %c0_4 = arith.constant 0 : index
      %c0_5 = arith.constant 0 : index
      %c0_6 = arith.constant 0 : index
      %13 = vector.load %arg3[%c0, %c0_4, %c0_5, %c0_6] : memref<1x1x64x8xf32, #tpu.memory_space<vmem>>, vector<1x1x64x8xf32>
      %14 = vector.shape_cast %13 : vector<1x1x64x8xf32> to vector<64x8xf32>
      %c0_7 = arith.constant 0 : index
      %c0_8 = arith.constant 0 : index
      %15 = vector.load %arg4[%c0_7, %c0_8] : memref<1x8xf32, #tpu.memory_space<vmem>>, vector<1x8xf32>
      %16 = vector.broadcast %15 : vector<1x8xf32> to vector<64x8xf32>
      %17 = arith.mulf %14, %16 : vector<64x8xf32>
      %c0_9 = arith.constant 0 : index
      %c0_10 = arith.constant 0 : index
      %18 = vector.load %arg5[%c0_9, %c0_10] : memref<1x8xf32, #tpu.memory_space<vmem>>, vector<1x8xf32>
      %19 = vector.broadcast %18 : vector<1x8xf32> to vector<64x8xf32>
      %20 = arith.addf %17, %19 : vector<64x8xf32>
      %cst = arith.constant 0.000000e+00 : f32
      %21 = vector.broadcast %cst : f32 to vector<64x8xf32>
      %22 = arith.maximumf %20, %21 : vector<64x8xf32>
      %c9 = arith.constant 9 : index
      %c0_11 = arith.constant 0 : index
      %23 = vector.load %arg8[%c9, %c0_11] : memref<82x8xf32, #tpu.memory_space<vmem>>, vector<64x8xf32>
      tpu.vector_store %arg8[%c9, %c0_11], %22 {strides = array<i32>} : memref<82x8xf32, #tpu.memory_space<vmem>>, vector<64x8xf32>,
      %24 = tpu.iota {dimensions = array<i32: 0>} : vector<64x1xi32>
      %c8_i32 = arith.constant 8 : i32
      %c0_i32_12 = arith.constant 0 : i32
      %25 = arith.cmpi eq, %c8_i32, %c0_i32_12 : i32
      %c1_i32_13 = arith.constant 1 : i32
      %26 = arith.select %25, %c1_i32_13, %c8_i32 : i32
      %27 = vector.broadcast %26 : i32 to vector<64x1xi32>
      %28 = arith.remsi %24, %27 : vector<64x1xi32>
      %c0_i32_14 = arith.constant 0 : i32
      %29 = vector.broadcast %c0_i32_14 : i32 to vector<64x1xi32>
      %30 = arith.cmpi ne, %28, %29 : vector<64x1xi32>
      %c0_i32_15 = arith.constant 0 : i32
      %31 = vector.broadcast %c0_i32_15 : i32 to vector<64x1xi32>
      %32 = arith.cmpi slt, %28, %31 : vector<64x1xi32>
      %c0_i32_16 = arith.constant 0 : i32
      %33 = arith.cmpi slt, %26, %c0_i32_16 : i32
      %34 = vector.broadcast %33 : i1 to vector<64x1xi1>
      %35 = vector.broadcast %34 : vector<64x1xi1> to vector<64x1xi1>
      %36 = arith.xori %32, %35 : vector<64x1xi1>
      %37 = arith.andi %36, %30 : vector<64x1xi1>
      %38 = vector.broadcast %26 : i32 to vector<64x1xi32>
      %39 = arith.addi %28, %38 : vector<64x1xi32>
      %40 = arith.select %37, %39, %28 : vector<64x1xi1>, vector<64x1xi32>
      %c-1_i32 = arith.constant -1 : i32
      %41 = vector.broadcast %c-1_i32 : i32 to vector<64x1xi32>
      %42 = arith.addi %40, %41 : vector<64x1xi32>
      %c0_i32_17 = arith.constant 0 : i32
      %43 = vector.broadcast %c0_i32_17 : i32 to vector<64x1xi32>
      %44 = arith.cmpi sge, %42, %43 : vector<64x1xi32>
      %c-1_i32_18 = arith.constant -1 : i32
      %45 = vector.broadcast %c-1_i32_18 : i32 to vector<64x1xi32>
      %46 = arith.addi %40, %45 : vector<64x1xi32>
      %c8_i32_19 = arith.constant 8 : i32
      %47 = vector.broadcast %c8_i32_19 : i32 to vector<64x1xi32>
      %48 = arith.cmpi slt, %46, %47 : vector<64x1xi32>
      %49 = arith.andi %44, %48 : vector<64x1xi1>
      %c0_i32_20 = arith.constant 0 : i32
      %50 = vector.broadcast %c0_i32_20 : i32 to vector<64x1xi32>
      %51 = arith.addi %40, %50 : vector<64x1xi32>
      %c0_i32_21 = arith.constant 0 : i32
      %52 = vector.broadcast %c0_i32_21 : i32 to vector<64x1xi32>
      %53 = arith.cmpi sge, %51, %52 : vector<64x1xi32>
      %c0_i32_22 = arith.constant 0 : i32
      %54 = vector.broadcast %c0_i32_22 : i32 to vector<64x1xi32>
      %55 = arith.addi %40, %54 : vector<64x1xi32>
      %c8_i32_23 = arith.constant 8 : i32
      %56 = vector.broadcast %c8_i32_23 : i32 to vector<64x1xi32>
      %57 = arith.cmpi slt, %55, %56 : vector<64x1xi32>
      %58 = arith.andi %53, %57 : vector<64x1xi1>
      %c1_i32_24 = arith.constant 1 : i32
      %59 = vector.broadcast %c1_i32_24 : i32 to vector<64x1xi32>
      %60 = arith.addi %40, %59 : vector<64x1xi32>
      %c0_i32_25 = arith.constant 0 : i32
      %61 = vector.broadcast %c0_i32_25 : i32 to vector<64x1xi32>
      %62 = arith.cmpi sge, %60, %61 : vector<64x1xi32>
      %c1_i32_26 = arith.constant 1 : i32
      %63 = vector.broadcast %c1_i32_26 : i32 to vector<64x1xi32>
      %64 = arith.addi %40, %63 : vector<64x1xi32>
      %c8_i32_27 = arith.constant 8 : i32
      %65 = vector.broadcast %c8_i32_27 : i32 to vector<64x1xi32>
      %66 = arith.cmpi slt, %64, %65 : vector<64x1xi32>
      %67 = arith.andi %62, %66 : vector<64x1xi1>
      %c0_28 = arith.constant 0 : index
      %c0_29 = arith.constant 0 : index
      %68 = vector.load %arg9[%c0_28, %c0_29] : memref<64x8xf32, #tpu.memory_space<vmem>>, vector<64x8xf32>
      %c0_30 = arith.constant 0 : index
      %c0_31 = arith.constant 0 : index
      %69 = vector.load %arg8[%c0_30, %c0_31] : memref<82x8xf32, #tpu.memory_space<vmem>>, vector<64x8xf32>
      %cst_32 = arith.constant 0.000000e+00 : f32
      %70 = vector.shape_cast %49 : vector<64x1xi1> to vector<64x1xi1>
      %71 = vector.broadcast %70 : vector<64x1xi1> to vector<64x8xi1>
      %72 = vector.broadcast %cst_32 : f32 to vector<64x8xf32>
      %73 = arith.select %71, %69, %72 : vector<64x8xi1>, vector<64x8xf32>
      %74 = arith.truncf %73 : vector<64x8xf32> to vector<64x8xbf16>
      %c0_33 = arith.constant 0 : index
      %c0_34 = arith.constant 0 : index
      %c0_35 = arith.constant 0 : index
      %c0_36 = arith.constant 0 : index
      %75 = vector.load %arg6[%c0_33, %c0_34, %c0_35, %c0_36] : memref<1x9x8x8xbf16, #tpu.memory_space<vmem>>, vector<1x1x8x8xbf16>
      %76 = vector.shape_cast %75 : vector<1x1x8x8xbf16> to vector<8x8xbf16>
      %cst_37 = arith.constant dense<0.000000e+00> : vector<64x8xf32>
      %77 = tpu.matmul %74, %76, %cst_37 {dimension_numbers = #tpu.dot_dimension_numbers<[1], [0], [0], [1], [0, 0, 1, 1], [], []>} : vector<64x8xbf16>, vector<8x8xbf16>, vector<64x8xf32> -> vector<64x8xf32>
      %78 = arith.addf %68, %77 : vector<64x8xf32>
      %c1 = arith.constant 1 : index
      %c0_38 = arith.constant 0 : index
      %79 = vector.load %arg8[%c1, %c0_38] : memref<82x8xf32, #tpu.memory_space<vmem>>, vector<64x8xf32>
      %cst_39 = arith.constant 0.000000e+00 : f32
      %80 = vector.shape_cast %58 : vector<64x1xi1> to vector<64x1xi1>
      %81 = vector.broadcast %80 : vector<64x1xi1> to vector<64x8xi1>
      %82 = vector.broadcast %cst_39 : f32 to vector<64x8xf32>
      %83 = arith.select %81, %79, %82 : vector<64x8xi1>, vector<64x8xf32>
      %84 = arith.truncf %83 : vector<64x8xf32> to vector<64x8xbf16>
      %c0_40 = arith.constant 0 : index
      %c1_41 = arith.constant 1 : index
      %c0_42 = arith.constant 0 : index
      %c0_43 = arith.constant 0 : index
      %85 = vector.load %arg6[%c0_40, %c1_41, %c0_42, %c0_43] : memref<1x9x8x8xbf16, #tpu.memory_space<vmem>>, vector<1x1x8x8xbf16>
      %86 = vector.shape_cast %85 : vector<1x1x8x8xbf16> to vector<8x8xbf16>
      %cst_44 = arith.constant dense<0.000000e+00> : vector<64x8xf32>
      %87 = tpu.matmul %84, %86, %cst_44 {dimension_numbers = #tpu.dot_dimension_numbers<[1], [0], [0], [1], [0, 0, 1, 1], [], []>} : vector<64x8xbf16>, vector<8x8xbf16>, vector<64x8xf32> -> vector<64x8xf32>
      %88 = arith.addf %78, %87 : vector<64x8xf32>
      %c2 = arith.constant 2 : index
      %c0_45 = arith.constant 0 : index
      %89 = vector.load %arg8[%c2, %c0_45] : memref<82x8xf32, #tpu.memory_space<vmem>>, vector<64x8xf32>
      %cst_46 = arith.constant 0.000000e+00 : f32
      %90 = vector.shape_cast %67 : vector<64x1xi1> to vector<64x1xi1>
      %91 = vector.broadcast %90 : vector<64x1xi1> to vector<64x8xi1>
      %92 = vector.broadcast %cst_46 : f32 to vector<64x8xf32>
      %93 = arith.select %91, %89, %92 : vector<64x8xi1>, vector<64x8xf32>
      %94 = arith.truncf %93 : vector<64x8xf32> to vector<64x8xbf16>
      %c0_47 = arith.constant 0 : index
      %c2_48 = arith.constant 2 : index
      %c0_49 = arith.constant 0 : index
      %c0_50 = arith.constant 0 : index
      %95 = vector.load %arg6[%c0_47, %c2_48, %c0_49, %c0_50] : memref<1x9x8x8xbf16, #tpu.memory_space<vmem>>, vector<1x1x8x8xbf16>
      %96 = vector.shape_cast %95 : vector<1x1x8x8xbf16> to vector<8x8xbf16>
      %cst_51 = arith.constant dense<0.000000e+00> : vector<64x8xf32>
      %97 = tpu.matmul %94, %96, %cst_51 {dimension_numbers = #tpu.dot_dimension_numbers<[1], [0], [0], [1], [0, 0, 1, 1], [], []>} : vector<64x8xbf16>, vector<8x8xbf16>, vector<64x8xf32> -> vector<64x8xf32>
      %98 = arith.addf %88, %97 : vector<64x8xf32>
      %c8 = arith.constant 8 : index
      %c0_52 = arith.constant 0 : index
      %99 = vector.load %arg8[%c8, %c0_52] : memref<82x8xf32, #tpu.memory_space<vmem>>, vector<64x8xf32>
      %cst_53 = arith.constant 0.000000e+00 : f32
      %100 = vector.shape_cast %49 : vector<64x1xi1> to vector<64x1xi1>
      %101 = vector.broadcast %100 : vector<64x1xi1> to vector<64x8xi1>
      %102 = vector.broadcast %cst_53 : f32 to vector<64x8xf32>
      %103 = arith.select %101, %99, %102 : vector<64x8xi1>, vector<64x8xf32>
      %104 = arith.truncf %103 : vector<64x8xf32> to vector<64x8xbf16>
      %c0_54 = arith.constant 0 : index
      %c3 = arith.constant 3 : index
      %c0_55 = arith.constant 0 : index
      %c0_56 = arith.constant 0 : index
      %105 = vector.load %arg6[%c0_54, %c3, %c0_55, %c0_56] : memref<1x9x8x8xbf16, #tpu.memory_space<vmem>>, vector<1x1x8x8xbf16>
      %106 = vector.shape_cast %105 : vector<1x1x8x8xbf16> to vector<8x8xbf16>
      %cst_57 = arith.constant dense<0.000000e+00> : vector<64x8xf32>
      %107 = tpu.matmul %104, %106, %cst_57 {dimension_numbers = #tpu.dot_dimension_numbers<[1], [0], [0], [1], [0, 0, 1, 1], [], []>} : vector<64x8xbf16>, vector<8x8xbf16>, vector<64x8xf32> -> vector<64x8xf32>
      %108 = arith.addf %98, %107 : vector<64x8xf32>
      %c9_58 = arith.constant 9 : index
      %c0_59 = arith.constant 0 : index
      %109 = vector.load %arg8[%c9_58, %c0_59] : memref<82x8xf32, #tpu.memory_space<vmem>>, vector<64x8xf32>
      %cst_60 = arith.constant 0.000000e+00 : f32
      %110 = vector.shape_cast %58 : vector<64x1xi1> to vector<64x1xi1>
      %111 = vector.broadcast %110 : vector<64x1xi1> to vector<64x8xi1>
      %112 = vector.broadcast %cst_60 : f32 to vector<64x8xf32>
      %113 = arith.select %111, %109, %112 : vector<64x8xi1>, vector<64x8xf32>
      %114 = arith.truncf %113 : vector<64x8xf32> to vector<64x8xbf16>
      %c0_61 = arith.constant 0 : index
      %c4 = arith.constant 4 : index
      %c0_62 = arith.constant 0 : index
      %c0_63 = arith.constant 0 : index
      %115 = vector.load %arg6[%c0_61, %c4, %c0_62, %c0_63] : memref<1x9x8x8xbf16, #tpu.memory_space<vmem>>, vector<1x1x8x8xbf16>
      %116 = vector.shape_cast %115 : vector<1x1x8x8xbf16> to vector<8x8xbf16>
      %cst_64 = arith.constant dense<0.000000e+00> : vector<64x8xf32>
      %117 = tpu.matmul %114, %116, %cst_64 {dimension_numbers = #tpu.dot_dimension_numbers<[1], [0], [0], [1], [0, 0, 1, 1], [], []>} : vector<64x8xbf16>, vector<8x8xbf16>, vector<64x8xf32> -> vector<64x8xf32>
      %118 = arith.addf %108, %117 : vector<64x8xf32>
      %c10 = arith.constant 10 : index
      %c0_65 = arith.constant 0 : index
      %119 = vector.load %arg8[%c10, %c0_65] : memref<82x8xf32, #tpu.memory_space<vmem>>, vector<64x8xf32>
      %cst_66 = arith.constant 0.000000e+00 : f32
      %120 = vector.shape_cast %67 : vector<64x1xi1> to vector<64x1xi1>
      %121 = vector.broadcast %120 : vector<64x1xi1> to vector<64x8xi1>
      %122 = vector.broadcast %cst_66 : f32 to vector<64x8xf32>
      %123 = arith.select %121, %119, %122 : vector<64x8xi1>, vector<64x8xf32>
      %124 = arith.truncf %123 : vector<64x8xf32> to vector<64x8xbf16>
      %c0_67 = arith.constant 0 : index
      %c5 = arith.constant 5 : index
      %c0_68 = arith.constant 0 : index
      %c0_69 = arith.constant 0 : index
      %125 = vector.load %arg6[%c0_67, %c5, %c0_68, %c0_69] : memref<1x9x8x8xbf16, #tpu.memory_space<vmem>>, vector<1x1x8x8xbf16>
      %126 = vector.shape_cast %125 : vector<1x1x8x8xbf16> to vector<8x8xbf16>
      %cst_70 = arith.constant dense<0.000000e+00> : vector<64x8xf32>
      %127 = tpu.matmul %124, %126, %cst_70 {dimension_numbers = #tpu.dot_dimension_numbers<[1], [0], [0], [1], [0, 0, 1, 1], [], []>} : vector<64x8xbf16>, vector<8x8xbf16>, vector<64x8xf32> -> vector<64x8xf32>
      %128 = arith.addf %118, %127 : vector<64x8xf32>
      %c16 = arith.constant 16 : index
      %c0_71 = arith.constant 0 : index
      %129 = vector.load %arg8[%c16, %c0_71] : memref<82x8xf32, #tpu.memory_space<vmem>>, vector<64x8xf32>
      %cst_72 = arith.constant 0.000000e+00 : f32
      %130 = vector.shape_cast %49 : vector<64x1xi1> to vector<64x1xi1>
      %131 = vector.broadcast %130 : vector<64x1xi1> to vector<64x8xi1>
      %132 = vector.broadcast %cst_72 : f32 to vector<64x8xf32>
      %133 = arith.select %131, %129, %132 : vector<64x8xi1>, vector<64x8xf32>
      %134 = arith.truncf %133 : vector<64x8xf32> to vector<64x8xbf16>
      %c0_73 = arith.constant 0 : index
      %c6 = arith.constant 6 : index
      %c0_74 = arith.constant 0 : index
      %c0_75 = arith.constant 0 : index
      %135 = vector.load %arg6[%c0_73, %c6, %c0_74, %c0_75] : memref<1x9x8x8xbf16, #tpu.memory_space<vmem>>, vector<1x1x8x8xbf16>
      %136 = vector.shape_cast %135 : vector<1x1x8x8xbf16> to vector<8x8xbf16>
      %cst_76 = arith.constant dense<0.000000e+00> : vector<64x8xf32>
      %137 = tpu.matmul %134, %136, %cst_76 {dimension_numbers = #tpu.dot_dimension_numbers<[1], [0], [0], [1], [0, 0, 1, 1], [], []>} : vector<64x8xbf16>, vector<8x8xbf16>, vector<64x8xf32> -> vector<64x8xf32>
      %138 = arith.addf %128, %137 : vector<64x8xf32>
      %c17 = arith.constant 17 : index
      %c0_77 = arith.constant 0 : index
      %139 = vector.load %arg8[%c17, %c0_77] : memref<82x8xf32, #tpu.memory_space<vmem>>, vector<64x8xf32>
      %cst_78 = arith.constant 0.000000e+00 : f32
      %140 = vector.shape_cast %58 : vector<64x1xi1> to vector<64x1xi1>
      %141 = vector.broadcast %140 : vector<64x1xi1> to vector<64x8xi1>
      %142 = vector.broadcast %cst_78 : f32 to vector<64x8xf32>
      %143 = arith.select %141, %139, %142 : vector<64x8xi1>, vector<64x8xf32>
      %144 = arith.truncf %143 : vector<64x8xf32> to vector<64x8xbf16>
      %c0_79 = arith.constant 0 : index
      %c7 = arith.constant 7 : index
      %c0_80 = arith.constant 0 : index
      %c0_81 = arith.constant 0 : index
      %145 = vector.load %arg6[%c0_79, %c7, %c0_80, %c0_81] : memref<1x9x8x8xbf16, #tpu.memory_space<vmem>>, vector<1x1x8x8xbf16>
      %146 = vector.shape_cast %145 : vector<1x1x8x8xbf16> to vector<8x8xbf16>
      %cst_82 = arith.constant dense<0.000000e+00> : vector<64x8xf32>
      %147 = tpu.matmul %144, %146, %cst_82 {dimension_numbers = #tpu.dot_dimension_numbers<[1], [0], [0], [1], [0, 0, 1, 1], [], []>} : vector<64x8xbf16>, vector<8x8xbf16>, vector<64x8xf32> -> vector<64x8xf32>
      %148 = arith.addf %138, %147 : vector<64x8xf32>
      %c18 = arith.constant 18 : index
      %c0_83 = arith.constant 0 : index
      %149 = vector.load %arg8[%c18, %c0_83] : memref<82x8xf32, #tpu.memory_space<vmem>>, vector<64x8xf32>
      %cst_84 = arith.constant 0.000000e+00 : f32
      %150 = vector.shape_cast %67 : vector<64x1xi1> to vector<64x1xi1>
      %151 = vector.broadcast %150 : vector<64x1xi1> to vector<64x8xi1>
      %152 = vector.broadcast %cst_84 : f32 to vector<64x8xf32>
      %153 = arith.select %151, %149, %152 : vector<64x8xi1>, vector<64x8xf32>
      %154 = arith.truncf %153 : vector<64x8xf32> to vector<64x8xbf16>
      %c0_85 = arith.constant 0 : index
      %c8_86 = arith.constant 8 : index
      %c0_87 = arith.constant 0 : index
      %c0_88 = arith.constant 0 : index
      %155 = vector.load %arg6[%c0_85, %c8_86, %c0_87, %c0_88] : memref<1x9x8x8xbf16, #tpu.memory_space<vmem>>, vector<1x1x8x8xbf16>
      %156 = vector.shape_cast %155 : vector<1x1x8x8xbf16> to vector<8x8xbf16>
      %cst_89 = arith.constant dense<0.000000e+00> : vector<64x8xf32>
      %157 = tpu.matmul %154, %156, %cst_89 {dimension_numbers = #tpu.dot_dimension_numbers<[1], [0], [0], [1], [0, 0, 1, 1], [], []>} : vector<64x8xbf16>, vector<8x8xbf16>, vector<64x8xf32> -> vector<64x8xf32>
      %158 = arith.addf %148, %157 : vector<64x8xf32>
      %c0_90 = arith.constant 0 : index
      %c0_91 = arith.constant 0 : index
      %159 = vector.load %arg9[%c0_90, %c0_91] : memref<64x8xf32, #tpu.memory_space<vmem>>, vector<64x8xf32>
      tpu.vector_store %arg9[%c0_90, %c0_91], %158 {strides = array<i32>} : memref<64x8xf32, #tpu.memory_space<vmem>>, vector<64x8xf32>,
    } else {
    }
    %c2_i32 = arith.constant 2 : i32
    %10 = arith.cmpi eq, %arg2, %c2_i32 : i32
    %11 = arith.extui %10 : i1 to i32
    %c0_i32_3 = arith.constant 0 : i32
    %12 = arith.cmpi ne, %11, %c0_i32_3 : i32
    scf.if %12 {
      %c0 = arith.constant 0 : index
      %c0_4 = arith.constant 0 : index
      %13 = vector.load %arg9[%c0, %c0_4] : memref<64x8xf32, #tpu.memory_space<vmem>>, vector<64x8xf32>
      %c0_5 = arith.constant 0 : index
      %c0_6 = arith.constant 0 : index
      %c0_7 = arith.constant 0 : index
      %c0_8 = arith.constant 0 : index
      %14 = vector.load %arg7[%c0_5, %c0_6, %c0_7, %c0_8] : memref<1x1x64x8xf32, #tpu.memory_space<vmem>>, vector<1x1x64x8xf32>
      %15 = vector.shape_cast %14 : vector<1x1x64x8xf32> to vector<64x8xf32>
      %16 = vector.shape_cast %13 : vector<64x8xf32> to vector<1x1x64x8xf32>
      tpu.vector_store %arg7[%c0_5, %c0_6, %c0_7, %c0_8], %16 {strides = array<i32>} : memref<1x1x64x8xf32, #tpu.memory_space<vmem>>, vector<1x1x64x8xf32>,
    } else {
    }
    return
  }
  func.func @transform_0(%arg0: i32, %arg1: i32, %arg2: i32) -> (i32, i32, i32, i32) {
    %0 = arith.addi %arg1, %arg2 : i32
    %c1_i32 = arith.constant 1 : i32
    %1 = arith.subi %0, %c1_i32 : i32
    %c0_i32 = arith.constant 0 : i32
    %c3_i32 = arith.constant 3 : i32
    %2 = arith.maxsi %c0_i32, %1 : i32
    %3 = arith.minsi %c3_i32, %2 : i32
    %c0_i32_0 = arith.constant 0 : i32
    %c0_i32_1 = arith.constant 0 : i32
    %c0_i32_2 = arith.constant 0 : i32
    return %arg0, %3, %c0_i32_0, %c0_i32_1 : i32, i32, i32, i32
  }
  func.func @transform_1(%arg0: i32, %arg1: i32, %arg2: i32) -> (i32, i32) {
    %c0_i32 = arith.constant 0 : i32
    %c0_i32_0 = arith.constant 0 : i32
    %c0_i32_1 = arith.constant 0 : i32
    return %c0_i32, %c0_i32_0 : i32, i32
  }
  func.func @transform_2(%arg0: i32, %arg1: i32, %arg2: i32) -> (i32, i32) {
    %c0_i32 = arith.constant 0 : i32
    %c0_i32_0 = arith.constant 0 : i32
    %c0_i32_1 = arith.constant 0 : i32
    return %c0_i32, %c0_i32_0 : i32, i32
  }
  func.func @transform_3(%arg0: i32, %arg1: i32, %arg2: i32) -> (i32, i32, i32, i32) {
    %c0_i32 = arith.constant 0 : i32
    %c0_i32_0 = arith.constant 0 : i32
    %c0_i32_1 = arith.constant 0 : i32
    %c0_i32_2 = arith.constant 0 : i32
    return %arg2, %c0_i32, %c0_i32_0, %c0_i32_1 : i32, i32, i32, i32
  }
  func.func @transform_4(%arg0: i32, %arg1: i32, %arg2: i32) -> (i32, i32, i32, i32) {
    %c0_i32 = arith.constant 0 : i32
    %c0_i32_0 = arith.constant 0 : i32
    %c0_i32_1 = arith.constant 0 : i32
    return %arg0, %arg1, %c0_i32, %c0_i32_0 : i32, i32, i32, i32
  }
}

module attributes {stable_mosaic.version = 11 : i64} {
  func.func @kernel(%arg0: i32, %arg1: i32, %arg2: i32, %arg3: memref<1x1x64x8xf32, #tpu.memory_space<vmem>>, %arg4: memref<1x8xf32, #tpu.memory_space<vmem>>, %arg5: memref<1x8xf32, #tpu.memory_space<vmem>>, %arg6: memref<1x9x8x4xbf16, #tpu.memory_space<vmem>>, %arg7: memref<1x1x64x4xf32, #tpu.memory_space<vmem>>, %arg8: memref<82x8xf32, #tpu.memory_space<vmem>>, %arg9: memref<64x4xf32, #tpu.memory_space<vmem>>) attributes {dimension_semantics = [#tpu.dimension_semantics<parallel>, #tpu.dimension_semantics<parallel>, #tpu.dimension_semantics<arbitrary>], iteration_bounds = array<i64: 1, 4, 3>, scalar_prefetch = 0 : i64, scratch_operands = 2 : i64, tpu.core_type = #tpu.core_type<tc>, window_params = [{transform_indices = @transform_0, window_bounds = array<i64: 1, 1, 64, 8>}, {pipeline_mode = #tpu.pipeline_mode<synchronous>, transform_indices = @transform_1, window_bounds = array<i64: 1, 8>}, {pipeline_mode = #tpu.pipeline_mode<synchronous>, transform_indices = @transform_2, window_bounds = array<i64: 1, 8>}, {transform_indices = @transform_3, window_bounds = array<i64: 1, 9, 8, 4>}, {transform_indices = @transform_4, window_bounds = array<i64: 1, 1, 64, 4>}]} {
    %c0_i32 = arith.constant 0 : i32
    %0 = arith.cmpi eq, %arg2, %c0_i32 : i32
    %1 = arith.extui %0 : i1 to i32
    %c0_i32_0 = arith.constant 0 : i32
    %2 = arith.cmpi ne, %1, %c0_i32_0 : i32
    scf.if %2 {
      %cst = arith.constant 0.000000e+00 : f32
      %13 = vector.broadcast %cst : f32 to vector<82x8xf32>
      %c0 = arith.constant 0 : index
      %c0_4 = arith.constant 0 : index
      %14 = vector.load %arg8[%c0, %c0_4] : memref<82x8xf32, #tpu.memory_space<vmem>>, vector<82x8xf32>
      tpu.vector_store %arg8[%c0, %c0_4], %13 {strides = array<i32>} : memref<82x8xf32, #tpu.memory_space<vmem>>, vector<82x8xf32>,
      %cst_5 = arith.constant 0.000000e+00 : f32
      %15 = vector.broadcast %cst_5 : f32 to vector<64x4xf32>
      %c0_6 = arith.constant 0 : index
      %c0_7 = arith.constant 0 : index
      %16 = vector.load %arg9[%c0_6, %c0_7] : memref<64x4xf32, #tpu.memory_space<vmem>>, vector<64x4xf32>
      tpu.vector_store %arg9[%c0_6, %c0_7], %15 {strides = array<i32>} : memref<64x4xf32, #tpu.memory_space<vmem>>, vector<64x4xf32>,
    } else {
    }
    %3 = arith.addi %arg1, %arg2 : i32
    %c1_i32 = arith.constant 1 : i32
    %4 = arith.subi %3, %c1_i32 : i32
    %c0_i32_1 = arith.constant 0 : i32
    %5 = arith.cmpi sge, %4, %c0_i32_1 : i32
    %c4_i32 = arith.constant 4 : i32
    %6 = arith.cmpi slt, %4, %c4_i32 : i32
    %7 = arith.andi %5, %6 : i1
    %8 = arith.extui %7 : i1 to i32
    %c0_i32_2 = arith.constant 0 : i32
    %9 = arith.cmpi ne, %8, %c0_i32_2 : i32
    scf.if %9 {
      %c0 = arith.constant 0 : index
      %c0_4 = arith.constant 0 : index
      %c0_5 = arith.constant 0 : index
      %c0_6 = arith.constant 0 : index
      %13 = vector.load %arg3[%c0, %c0_4, %c0_5, %c0_6] : memref<1x1x64x8xf32, #tpu.memory_space<vmem>>, vector<1x1x64x8xf32>
      %14 = vector.shape_cast %13 : vector<1x1x64x8xf32> to vector<64x8xf32>
      %c0_7 = arith.constant 0 : index
      %c0_8 = arith.constant 0 : index
      %15 = vector.load %arg4[%c0_7, %c0_8] : memref<1x8xf32, #tpu.memory_space<vmem>>, vector<1x8xf32>
      %16 = vector.broadcast %15 : vector<1x8xf32> to vector<64x8xf32>
      %17 = arith.mulf %14, %16 : vector<64x8xf32>
      %c0_9 = arith.constant 0 : index
      %c0_10 = arith.constant 0 : index
      %18 = vector.load %arg5[%c0_9, %c0_10] : memref<1x8xf32, #tpu.memory_space<vmem>>, vector<1x8xf32>
      %19 = vector.broadcast %18 : vector<1x8xf32> to vector<64x8xf32>
      %20 = arith.addf %17, %19 : vector<64x8xf32>
      %cst = arith.constant 0.000000e+00 : f32
      %21 = vector.broadcast %cst : f32 to vector<64x8xf32>
      %22 = arith.maximumf %20, %21 : vector<64x8xf32>
      %c9 = arith.constant 9 : index
      %c0_11 = arith.constant 0 : index
      %23 = vector.load %arg8[%c9, %c0_11] : memref<82x8xf32, #tpu.memory_space<vmem>>, vector<64x8xf32>
      tpu.vector_store %arg8[%c9, %c0_11], %22 {strides = array<i32>} : memref<82x8xf32, #tpu.memory_space<vmem>>, vector<64x8xf32>,
      %24 = tpu.iota {dimensions = array<i32: 0>} : vector<64x1xi32>
      %c8_i32 = arith.constant 8 : i32
      %c0_i32_12 = arith.constant 0 : i32
      %25 = arith.cmpi eq, %c8_i32, %c0_i32_12 : i32
      %c1_i32_13 = arith.constant 1 : i32
      %26 = arith.select %25, %c1_i32_13, %c8_i32 : i32
      %27 = vector.broadcast %26 : i32 to vector<64x1xi32>
      %28 = arith.remsi %24, %27 : vector<64x1xi32>
      %c0_i32_14 = arith.constant 0 : i32
      %29 = vector.broadcast %c0_i32_14 : i32 to vector<64x1xi32>
      %30 = arith.cmpi ne, %28, %29 : vector<64x1xi32>
      %c0_i32_15 = arith.constant 0 : i32
      %31 = vector.broadcast %c0_i32_15 : i32 to vector<64x1xi32>
      %32 = arith.cmpi slt, %28, %31 : vector<64x1xi32>
      %c0_i32_16 = arith.constant 0 : i32
      %33 = arith.cmpi slt, %26, %c0_i32_16 : i32
      %34 = vector.broadcast %33 : i1 to vector<64x1xi1>
      %35 = vector.broadcast %34 : vector<64x1xi1> to vector<64x1xi1>
      %36 = arith.xori %32, %35 : vector<64x1xi1>
      %37 = arith.andi %36, %30 : vector<64x1xi1>
      %38 = vector.broadcast %26 : i32 to vector<64x1xi32>
      %39 = arith.addi %28, %38 : vector<64x1xi32>
      %40 = arith.select %37, %39, %28 : vector<64x1xi1>, vector<64x1xi32>
      %c-1_i32 = arith.constant -1 : i32
      %41 = vector.broadcast %c-1_i32 : i32 to vector<64x1xi32>
      %42 = arith.addi %40, %41 : vector<64x1xi32>
      %c0_i32_17 = arith.constant 0 : i32
      %43 = vector.broadcast %c0_i32_17 : i32 to vector<64x1xi32>
      %44 = arith.cmpi sge, %42, %43 : vector<64x1xi32>
      %c-1_i32_18 = arith.constant -1 : i32
      %45 = vector.broadcast %c-1_i32_18 : i32 to vector<64x1xi32>
      %46 = arith.addi %40, %45 : vector<64x1xi32>
      %c8_i32_19 = arith.constant 8 : i32
      %47 = vector.broadcast %c8_i32_19 : i32 to vector<64x1xi32>
      %48 = arith.cmpi slt, %46, %47 : vector<64x1xi32>
      %49 = arith.andi %44, %48 : vector<64x1xi1>
      %c0_i32_20 = arith.constant 0 : i32
      %50 = vector.broadcast %c0_i32_20 : i32 to vector<64x1xi32>
      %51 = arith.addi %40, %50 : vector<64x1xi32>
      %c0_i32_21 = arith.constant 0 : i32
      %52 = vector.broadcast %c0_i32_21 : i32 to vector<64x1xi32>
      %53 = arith.cmpi sge, %51, %52 : vector<64x1xi32>
      %c0_i32_22 = arith.constant 0 : i32
      %54 = vector.broadcast %c0_i32_22 : i32 to vector<64x1xi32>
      %55 = arith.addi %40, %54 : vector<64x1xi32>
      %c8_i32_23 = arith.constant 8 : i32
      %56 = vector.broadcast %c8_i32_23 : i32 to vector<64x1xi32>
      %57 = arith.cmpi slt, %55, %56 : vector<64x1xi32>
      %58 = arith.andi %53, %57 : vector<64x1xi1>
      %c1_i32_24 = arith.constant 1 : i32
      %59 = vector.broadcast %c1_i32_24 : i32 to vector<64x1xi32>
      %60 = arith.addi %40, %59 : vector<64x1xi32>
      %c0_i32_25 = arith.constant 0 : i32
      %61 = vector.broadcast %c0_i32_25 : i32 to vector<64x1xi32>
      %62 = arith.cmpi sge, %60, %61 : vector<64x1xi32>
      %c1_i32_26 = arith.constant 1 : i32
      %63 = vector.broadcast %c1_i32_26 : i32 to vector<64x1xi32>
      %64 = arith.addi %40, %63 : vector<64x1xi32>
      %c8_i32_27 = arith.constant 8 : i32
      %65 = vector.broadcast %c8_i32_27 : i32 to vector<64x1xi32>
      %66 = arith.cmpi slt, %64, %65 : vector<64x1xi32>
      %67 = arith.andi %62, %66 : vector<64x1xi1>
      %c0_28 = arith.constant 0 : index
      %c0_29 = arith.constant 0 : index
      %68 = vector.load %arg9[%c0_28, %c0_29] : memref<64x4xf32, #tpu.memory_space<vmem>>, vector<64x4xf32>
      %c0_30 = arith.constant 0 : index
      %c0_31 = arith.constant 0 : index
      %69 = vector.load %arg8[%c0_30, %c0_31] : memref<82x8xf32, #tpu.memory_space<vmem>>, vector<64x8xf32>
      %cst_32 = arith.constant 0.000000e+00 : f32
      %70 = vector.shape_cast %49 : vector<64x1xi1> to vector<64x1xi1>
      %71 = vector.broadcast %70 : vector<64x1xi1> to vector<64x8xi1>
      %72 = vector.broadcast %cst_32 : f32 to vector<64x8xf32>
      %73 = arith.select %71, %69, %72 : vector<64x8xi1>, vector<64x8xf32>
      %74 = arith.truncf %73 : vector<64x8xf32> to vector<64x8xbf16>
      %c0_33 = arith.constant 0 : index
      %c0_34 = arith.constant 0 : index
      %c0_35 = arith.constant 0 : index
      %c0_36 = arith.constant 0 : index
      %75 = vector.load %arg6[%c0_33, %c0_34, %c0_35, %c0_36] : memref<1x9x8x4xbf16, #tpu.memory_space<vmem>>, vector<1x1x8x4xbf16>
      %76 = vector.shape_cast %75 : vector<1x1x8x4xbf16> to vector<8x4xbf16>
      %cst_37 = arith.constant dense<0.000000e+00> : vector<64x4xf32>
      %77 = tpu.matmul %74, %76, %cst_37 {dimension_numbers = #tpu.dot_dimension_numbers<[1], [0], [0], [1], [0, 0, 1, 1], [], []>} : vector<64x8xbf16>, vector<8x4xbf16>, vector<64x4xf32> -> vector<64x4xf32>
      %78 = arith.addf %68, %77 : vector<64x4xf32>
      %c1 = arith.constant 1 : index
      %c0_38 = arith.constant 0 : index
      %79 = vector.load %arg8[%c1, %c0_38] : memref<82x8xf32, #tpu.memory_space<vmem>>, vector<64x8xf32>
      %cst_39 = arith.constant 0.000000e+00 : f32
      %80 = vector.shape_cast %58 : vector<64x1xi1> to vector<64x1xi1>
      %81 = vector.broadcast %80 : vector<64x1xi1> to vector<64x8xi1>
      %82 = vector.broadcast %cst_39 : f32 to vector<64x8xf32>
      %83 = arith.select %81, %79, %82 : vector<64x8xi1>, vector<64x8xf32>
      %84 = arith.truncf %83 : vector<64x8xf32> to vector<64x8xbf16>
      %c0_40 = arith.constant 0 : index
      %c1_41 = arith.constant 1 : index
      %c0_42 = arith.constant 0 : index
      %c0_43 = arith.constant 0 : index
      %85 = vector.load %arg6[%c0_40, %c1_41, %c0_42, %c0_43] : memref<1x9x8x4xbf16, #tpu.memory_space<vmem>>, vector<1x1x8x4xbf16>
      %86 = vector.shape_cast %85 : vector<1x1x8x4xbf16> to vector<8x4xbf16>
      %cst_44 = arith.constant dense<0.000000e+00> : vector<64x4xf32>
      %87 = tpu.matmul %84, %86, %cst_44 {dimension_numbers = #tpu.dot_dimension_numbers<[1], [0], [0], [1], [0, 0, 1, 1], [], []>} : vector<64x8xbf16>, vector<8x4xbf16>, vector<64x4xf32> -> vector<64x4xf32>
      %88 = arith.addf %78, %87 : vector<64x4xf32>
      %c2 = arith.constant 2 : index
      %c0_45 = arith.constant 0 : index
      %89 = vector.load %arg8[%c2, %c0_45] : memref<82x8xf32, #tpu.memory_space<vmem>>, vector<64x8xf32>
      %cst_46 = arith.constant 0.000000e+00 : f32
      %90 = vector.shape_cast %67 : vector<64x1xi1> to vector<64x1xi1>
      %91 = vector.broadcast %90 : vector<64x1xi1> to vector<64x8xi1>
      %92 = vector.broadcast %cst_46 : f32 to vector<64x8xf32>
      %93 = arith.select %91, %89, %92 : vector<64x8xi1>, vector<64x8xf32>
      %94 = arith.truncf %93 : vector<64x8xf32> to vector<64x8xbf16>
      %c0_47 = arith.constant 0 : index
      %c2_48 = arith.constant 2 : index
      %c0_49 = arith.constant 0 : index
      %c0_50 = arith.constant 0 : index
      %95 = vector.load %arg6[%c0_47, %c2_48, %c0_49, %c0_50] : memref<1x9x8x4xbf16, #tpu.memory_space<vmem>>, vector<1x1x8x4xbf16>
      %96 = vector.shape_cast %95 : vector<1x1x8x4xbf16> to vector<8x4xbf16>
      %cst_51 = arith.constant dense<0.000000e+00> : vector<64x4xf32>
      %97 = tpu.matmul %94, %96, %cst_51 {dimension_numbers = #tpu.dot_dimension_numbers<[1], [0], [0], [1], [0, 0, 1, 1], [], []>} : vector<64x8xbf16>, vector<8x4xbf16>, vector<64x4xf32> -> vector<64x4xf32>
      %98 = arith.addf %88, %97 : vector<64x4xf32>
      %c8 = arith.constant 8 : index
      %c0_52 = arith.constant 0 : index
      %99 = vector.load %arg8[%c8, %c0_52] : memref<82x8xf32, #tpu.memory_space<vmem>>, vector<64x8xf32>
      %cst_53 = arith.constant 0.000000e+00 : f32
      %100 = vector.shape_cast %49 : vector<64x1xi1> to vector<64x1xi1>
      %101 = vector.broadcast %100 : vector<64x1xi1> to vector<64x8xi1>
      %102 = vector.broadcast %cst_53 : f32 to vector<64x8xf32>
      %103 = arith.select %101, %99, %102 : vector<64x8xi1>, vector<64x8xf32>
      %104 = arith.truncf %103 : vector<64x8xf32> to vector<64x8xbf16>
      %c0_54 = arith.constant 0 : index
      %c3 = arith.constant 3 : index
      %c0_55 = arith.constant 0 : index
      %c0_56 = arith.constant 0 : index
      %105 = vector.load %arg6[%c0_54, %c3, %c0_55, %c0_56] : memref<1x9x8x4xbf16, #tpu.memory_space<vmem>>, vector<1x1x8x4xbf16>
      %106 = vector.shape_cast %105 : vector<1x1x8x4xbf16> to vector<8x4xbf16>
      %cst_57 = arith.constant dense<0.000000e+00> : vector<64x4xf32>
      %107 = tpu.matmul %104, %106, %cst_57 {dimension_numbers = #tpu.dot_dimension_numbers<[1], [0], [0], [1], [0, 0, 1, 1], [], []>} : vector<64x8xbf16>, vector<8x4xbf16>, vector<64x4xf32> -> vector<64x4xf32>
      %108 = arith.addf %98, %107 : vector<64x4xf32>
      %c9_58 = arith.constant 9 : index
      %c0_59 = arith.constant 0 : index
      %109 = vector.load %arg8[%c9_58, %c0_59] : memref<82x8xf32, #tpu.memory_space<vmem>>, vector<64x8xf32>
      %cst_60 = arith.constant 0.000000e+00 : f32
      %110 = vector.shape_cast %58 : vector<64x1xi1> to vector<64x1xi1>
      %111 = vector.broadcast %110 : vector<64x1xi1> to vector<64x8xi1>
      %112 = vector.broadcast %cst_60 : f32 to vector<64x8xf32>
      %113 = arith.select %111, %109, %112 : vector<64x8xi1>, vector<64x8xf32>
      %114 = arith.truncf %113 : vector<64x8xf32> to vector<64x8xbf16>
      %c0_61 = arith.constant 0 : index
      %c4 = arith.constant 4 : index
      %c0_62 = arith.constant 0 : index
      %c0_63 = arith.constant 0 : index
      %115 = vector.load %arg6[%c0_61, %c4, %c0_62, %c0_63] : memref<1x9x8x4xbf16, #tpu.memory_space<vmem>>, vector<1x1x8x4xbf16>
      %116 = vector.shape_cast %115 : vector<1x1x8x4xbf16> to vector<8x4xbf16>
      %cst_64 = arith.constant dense<0.000000e+00> : vector<64x4xf32>
      %117 = tpu.matmul %114, %116, %cst_64 {dimension_numbers = #tpu.dot_dimension_numbers<[1], [0], [0], [1], [0, 0, 1, 1], [], []>} : vector<64x8xbf16>, vector<8x4xbf16>, vector<64x4xf32> -> vector<64x4xf32>
      %118 = arith.addf %108, %117 : vector<64x4xf32>
      %c10 = arith.constant 10 : index
      %c0_65 = arith.constant 0 : index
      %119 = vector.load %arg8[%c10, %c0_65] : memref<82x8xf32, #tpu.memory_space<vmem>>, vector<64x8xf32>
      %cst_66 = arith.constant 0.000000e+00 : f32
      %120 = vector.shape_cast %67 : vector<64x1xi1> to vector<64x1xi1>
      %121 = vector.broadcast %120 : vector<64x1xi1> to vector<64x8xi1>
      %122 = vector.broadcast %cst_66 : f32 to vector<64x8xf32>
      %123 = arith.select %121, %119, %122 : vector<64x8xi1>, vector<64x8xf32>
      %124 = arith.truncf %123 : vector<64x8xf32> to vector<64x8xbf16>
      %c0_67 = arith.constant 0 : index
      %c5 = arith.constant 5 : index
      %c0_68 = arith.constant 0 : index
      %c0_69 = arith.constant 0 : index
      %125 = vector.load %arg6[%c0_67, %c5, %c0_68, %c0_69] : memref<1x9x8x4xbf16, #tpu.memory_space<vmem>>, vector<1x1x8x4xbf16>
      %126 = vector.shape_cast %125 : vector<1x1x8x4xbf16> to vector<8x4xbf16>
      %cst_70 = arith.constant dense<0.000000e+00> : vector<64x4xf32>
      %127 = tpu.matmul %124, %126, %cst_70 {dimension_numbers = #tpu.dot_dimension_numbers<[1], [0], [0], [1], [0, 0, 1, 1], [], []>} : vector<64x8xbf16>, vector<8x4xbf16>, vector<64x4xf32> -> vector<64x4xf32>
      %128 = arith.addf %118, %127 : vector<64x4xf32>
      %c16 = arith.constant 16 : index
      %c0_71 = arith.constant 0 : index
      %129 = vector.load %arg8[%c16, %c0_71] : memref<82x8xf32, #tpu.memory_space<vmem>>, vector<64x8xf32>
      %cst_72 = arith.constant 0.000000e+00 : f32
      %130 = vector.shape_cast %49 : vector<64x1xi1> to vector<64x1xi1>
      %131 = vector.broadcast %130 : vector<64x1xi1> to vector<64x8xi1>
      %132 = vector.broadcast %cst_72 : f32 to vector<64x8xf32>
      %133 = arith.select %131, %129, %132 : vector<64x8xi1>, vector<64x8xf32>
      %134 = arith.truncf %133 : vector<64x8xf32> to vector<64x8xbf16>
      %c0_73 = arith.constant 0 : index
      %c6 = arith.constant 6 : index
      %c0_74 = arith.constant 0 : index
      %c0_75 = arith.constant 0 : index
      %135 = vector.load %arg6[%c0_73, %c6, %c0_74, %c0_75] : memref<1x9x8x4xbf16, #tpu.memory_space<vmem>>, vector<1x1x8x4xbf16>
      %136 = vector.shape_cast %135 : vector<1x1x8x4xbf16> to vector<8x4xbf16>
      %cst_76 = arith.constant dense<0.000000e+00> : vector<64x4xf32>
      %137 = tpu.matmul %134, %136, %cst_76 {dimension_numbers = #tpu.dot_dimension_numbers<[1], [0], [0], [1], [0, 0, 1, 1], [], []>} : vector<64x8xbf16>, vector<8x4xbf16>, vector<64x4xf32> -> vector<64x4xf32>
      %138 = arith.addf %128, %137 : vector<64x4xf32>
      %c17 = arith.constant 17 : index
      %c0_77 = arith.constant 0 : index
      %139 = vector.load %arg8[%c17, %c0_77] : memref<82x8xf32, #tpu.memory_space<vmem>>, vector<64x8xf32>
      %cst_78 = arith.constant 0.000000e+00 : f32
      %140 = vector.shape_cast %58 : vector<64x1xi1> to vector<64x1xi1>
      %141 = vector.broadcast %140 : vector<64x1xi1> to vector<64x8xi1>
      %142 = vector.broadcast %cst_78 : f32 to vector<64x8xf32>
      %143 = arith.select %141, %139, %142 : vector<64x8xi1>, vector<64x8xf32>
      %144 = arith.truncf %143 : vector<64x8xf32> to vector<64x8xbf16>
      %c0_79 = arith.constant 0 : index
      %c7 = arith.constant 7 : index
      %c0_80 = arith.constant 0 : index
      %c0_81 = arith.constant 0 : index
      %145 = vector.load %arg6[%c0_79, %c7, %c0_80, %c0_81] : memref<1x9x8x4xbf16, #tpu.memory_space<vmem>>, vector<1x1x8x4xbf16>
      %146 = vector.shape_cast %145 : vector<1x1x8x4xbf16> to vector<8x4xbf16>
      %cst_82 = arith.constant dense<0.000000e+00> : vector<64x4xf32>
      %147 = tpu.matmul %144, %146, %cst_82 {dimension_numbers = #tpu.dot_dimension_numbers<[1], [0], [0], [1], [0, 0, 1, 1], [], []>} : vector<64x8xbf16>, vector<8x4xbf16>, vector<64x4xf32> -> vector<64x4xf32>
      %148 = arith.addf %138, %147 : vector<64x4xf32>
      %c18 = arith.constant 18 : index
      %c0_83 = arith.constant 0 : index
      %149 = vector.load %arg8[%c18, %c0_83] : memref<82x8xf32, #tpu.memory_space<vmem>>, vector<64x8xf32>
      %cst_84 = arith.constant 0.000000e+00 : f32
      %150 = vector.shape_cast %67 : vector<64x1xi1> to vector<64x1xi1>
      %151 = vector.broadcast %150 : vector<64x1xi1> to vector<64x8xi1>
      %152 = vector.broadcast %cst_84 : f32 to vector<64x8xf32>
      %153 = arith.select %151, %149, %152 : vector<64x8xi1>, vector<64x8xf32>
      %154 = arith.truncf %153 : vector<64x8xf32> to vector<64x8xbf16>
      %c0_85 = arith.constant 0 : index
      %c8_86 = arith.constant 8 : index
      %c0_87 = arith.constant 0 : index
      %c0_88 = arith.constant 0 : index
      %155 = vector.load %arg6[%c0_85, %c8_86, %c0_87, %c0_88] : memref<1x9x8x4xbf16, #tpu.memory_space<vmem>>, vector<1x1x8x4xbf16>
      %156 = vector.shape_cast %155 : vector<1x1x8x4xbf16> to vector<8x4xbf16>
      %cst_89 = arith.constant dense<0.000000e+00> : vector<64x4xf32>
      %157 = tpu.matmul %154, %156, %cst_89 {dimension_numbers = #tpu.dot_dimension_numbers<[1], [0], [0], [1], [0, 0, 1, 1], [], []>} : vector<64x8xbf16>, vector<8x4xbf16>, vector<64x4xf32> -> vector<64x4xf32>
      %158 = arith.addf %148, %157 : vector<64x4xf32>
      %c0_90 = arith.constant 0 : index
      %c0_91 = arith.constant 0 : index
      %159 = vector.load %arg9[%c0_90, %c0_91] : memref<64x4xf32, #tpu.memory_space<vmem>>, vector<64x4xf32>
      tpu.vector_store %arg9[%c0_90, %c0_91], %158 {strides = array<i32>} : memref<64x4xf32, #tpu.memory_space<vmem>>, vector<64x4xf32>,
    } else {
    }
    %c2_i32 = arith.constant 2 : i32
    %10 = arith.cmpi eq, %arg2, %c2_i32 : i32
    %11 = arith.extui %10 : i1 to i32
    %c0_i32_3 = arith.constant 0 : i32
    %12 = arith.cmpi ne, %11, %c0_i32_3 : i32
    scf.if %12 {
      %c0 = arith.constant 0 : index
      %c0_4 = arith.constant 0 : index
      %13 = vector.load %arg9[%c0, %c0_4] : memref<64x4xf32, #tpu.memory_space<vmem>>, vector<64x4xf32>
      %c0_5 = arith.constant 0 : index
      %c0_6 = arith.constant 0 : index
      %c0_7 = arith.constant 0 : index
      %c0_8 = arith.constant 0 : index
      %14 = vector.load %arg7[%c0_5, %c0_6, %c0_7, %c0_8] : memref<1x1x64x4xf32, #tpu.memory_space<vmem>>, vector<1x1x64x4xf32>
      %15 = vector.shape_cast %14 : vector<1x1x64x4xf32> to vector<64x4xf32>
      %16 = vector.shape_cast %13 : vector<64x4xf32> to vector<1x1x64x4xf32>
      tpu.vector_store %arg7[%c0_5, %c0_6, %c0_7, %c0_8], %16 {strides = array<i32>} : memref<1x1x64x4xf32, #tpu.memory_space<vmem>>, vector<1x1x64x4xf32>,
    } else {
    }
    return
  }
  func.func @transform_0(%arg0: i32, %arg1: i32, %arg2: i32) -> (i32, i32, i32, i32) {
    %0 = arith.addi %arg1, %arg2 : i32
    %c1_i32 = arith.constant 1 : i32
    %1 = arith.subi %0, %c1_i32 : i32
    %c0_i32 = arith.constant 0 : i32
    %c3_i32 = arith.constant 3 : i32
    %2 = arith.maxsi %c0_i32, %1 : i32
    %3 = arith.minsi %c3_i32, %2 : i32
    %c0_i32_0 = arith.constant 0 : i32
    %c0_i32_1 = arith.constant 0 : i32
    %c0_i32_2 = arith.constant 0 : i32
    return %arg0, %3, %c0_i32_0, %c0_i32_1 : i32, i32, i32, i32
  }
  func.func @transform_1(%arg0: i32, %arg1: i32, %arg2: i32) -> (i32, i32) {
    %c0_i32 = arith.constant 0 : i32
    %c0_i32_0 = arith.constant 0 : i32
    %c0_i32_1 = arith.constant 0 : i32
    return %c0_i32, %c0_i32_0 : i32, i32
  }
  func.func @transform_2(%arg0: i32, %arg1: i32, %arg2: i32) -> (i32, i32) {
    %c0_i32 = arith.constant 0 : i32
    %c0_i32_0 = arith.constant 0 : i32
    %c0_i32_1 = arith.constant 0 : i32
    return %c0_i32, %c0_i32_0 : i32, i32
  }
  func.func @transform_3(%arg0: i32, %arg1: i32, %arg2: i32) -> (i32, i32, i32, i32) {
    %c0_i32 = arith.constant 0 : i32
    %c0_i32_0 = arith.constant 0 : i32
    %c0_i32_1 = arith.constant 0 : i32
    %c0_i32_2 = arith.constant 0 : i32
    return %arg2, %c0_i32, %c0_i32_0, %c0_i32_1 : i32, i32, i32, i32
  }
  func.func @transform_4(%arg0: i32, %arg1: i32, %arg2: i32) -> (i32, i32, i32, i32) {
    %c0_i32 = arith.constant 0 : i32
    %c0_i32_0 = arith.constant 0 : i32
    %c0_i32_1 = arith.constant 0 : i32
    return %arg0, %arg1, %c0_i32, %c0_i32_0 : i32, i32, i32, i32
  }
}

</mosaic_0001>

<bundles_post_ra>
// kernel: module_3d_fwd.9
= control target key start
LH: loop header
LB: loop body
LE: loop exit
PB: predicated region body
PF: predicated region fallthrough
CT: control target
= control target key end

     0   :  { %s1744_s18 = smov 0   ;;  %s1746_s19 = smov 0   ;;  %s2287_s0 = inlined_call_operand.vmem [shape: f32[1,4,64,4], index: 0, kind: input, shape index: {}]   ;;  %s2288_s1 = inlined_call_operand.vmem [shape: f32[1,4], index: 1, kind: input, shape index: {}]   ;;  %s2289_s2 = inlined_call_operand.vmem [shape: f32[1,4], index: 2, kind: input, shape index: {}]   ;;  %s2290_s3 = inlined_call_operand.vmem [shape: bf16[3,9,4,4], index: 3, kind: input, shape index: {}]   ;;  %s2291_s4 = inlined_call_operand.vmem [shape: f32[1,4,64,4], index: 4, kind: input, shape index: {}]   ;;  %s2292_s5 = inlined_call_operand.vmem [shape: f32[1,4,64,4], index: 5, kind: output, shape index: {}]  }
   0x1   :  { %s1748_s20 = smov 0   ;;  %s1750_s21 = smov 0  }
   0x2   :  { %s1752_s22 = smov 0  }
   0x3 LB: > { %s27_s23 = sadd.s32 1, %s1703_s20  ;;  %s30_s24 = sadd.s32 1, %s1707_s21  ;;  %s1711_s22 = sphi %s1752_s22, %s15_s22   ;;  %s1707_s21 = sphi %s1750_s21, %s2296_s21   ;;  %s1703_s20 = sphi %s1748_s20, %s2295_s20   ;;  %s1699_s19 = sphi %s1746_s19, %s2294_s19   ;;  %s1695_s18 = sphi %s1744_s18, %s2293_s18  }
   0x4   : > { %p28_p0 = scmp.ge.s32.totalorder %s27_s23, 3  ;;  %p1554_p1 = scmp.ge.s32.totalorder %s1711_s22, 1 }
   0x5   : > { %p264_p2 = scmp.lt.s32.totalorder %s1711_s22, 13 }
   0x6   : > { %s2298_s23 = smov (%p28_p0, %s27_s23), 0  ;;  %s2300_s24 = smov (!%p28_p0, %s30_s24), %s1707_s21 }
   0x7   : > { %p265_p3 = pnand %p1554_p1, %p264_p2  ;;  %p32_p4 = scmp.ge.s32.totalorder %s2300_s24, 4 }
   0x8   : > { %s320_s25 = sadd.s32 (!%p265_p3), %s1695_s18, %s1699_s19  ;;  %p341_p5 = scmp.lt.s32.totalorder (!%p265_p3), %s1695_s18, 2 }
   0x9   : > { %s2302_s24 = smov (%p32_p4, %s2300_s24), 0  ;;  %268 = sbr.rel (%p265_p3) target bundleno = 371 (0x173), region = 40 }
   0xa   : > { %s1778_s26 = sadd.s32 (!%p265_p3), 4294967295, %s320_s25  ;;  %p348_p8 = scmp.lt.s32.totalorder (!%p265_p3), %s1699_s19, 3 }
   0xb   : > { %p322_p6 = scmp.gt.s32.totalorder (!%p265_p3), %s1778_s26, 0  ;;  %p1556_p7 = scmp.lt.s32.totalorder (!%p265_p3), %s1778_s26, 3 }
   0xc   : > { %p1568_p10 = scmp.ne.s32.totalorder (!%p265_p3), %s1695_s18, 0 }
   0xe   : > { %s342_s27 = scalar_select %p341_p5, %s1695_s18, 2 }
   0xf   : > { %s323_s28 = scalar_select %p322_p6, %s1778_s26, 0 }
  0x10   : > { %s1629_s29 = smul.u32 18, %s342_s27  ;;  %s2306_s19 = smov (!%p348_p8, %s1699_s19), 3 }
  0x11   : > { %s2304_s28 = smov (!%p1556_p7, %s323_s28), 3  ;;  %s1624_s8 = sshll.u32 %s2306_s19, 6 }
  0x12   : > { %s1787_s7 = scalar_lea.vmem %s2290_s3, %s1629_s29  ;;  %p328_p9 = scmp.lt.s32.totalorder %s2304_s28, 3 }
  0x13   : > { %s1792_s12 = scalar_lea.vmem %s2291_s4, %s1624_s8  ;;  %s1802_s25 = scalar_lea.vmem %s2292_s5, %s1624_s8 }
  0x14   : > { %s2308_s28 = smov (!%p328_p9, %s2304_s28), 3  ;;  %368 = sbr.rel (%p1568_p10) target bundleno = 45 (0x2d), region = 44 }
  0x15   : > { %s1623_s9 = sshll.u32 %s2308_s28, 6 }
  0x16   : > { %s1797_s15 = scalar_lea.vmem %s2287_s0, %s1623_s9 }
  0x19   : > { %vm369_vm0 = vcmask 31744   ;;  %v1713_v0 = vmov 0.0   ;;  %vm380_vm1 = vcmask 25600  }
  0x1a   : > { %370 = vst.msk [vmem:[#allocation2] sm:$0xff] %vm369_vm0, %v1713_v0 }
  0x1b   : > { %371 = vst.msk [vmem:[#allocation2 + $0x8] sm:$0xff] %vm369_vm0, %v1713_v0 }
  0x1c   : > { %372 = vst.msk [vmem:[#allocation2 + $0x10] sm:$0xff] %vm369_vm0, %v1713_v0 }
  0x1d   : > { %373 = vst.msk [vmem:[#allocation2 + $0x18] sm:$0xff] %vm369_vm0, %v1713_v0 }
  0x1e   : > { %374 = vst.msk [vmem:[#allocation2 + $0x20] sm:$0xff] %vm369_vm0, %v1713_v0 }
  0x1f   : > { %375 = vst.msk [vmem:[#allocation2 + $0x28] sm:$0xff] %vm369_vm0, %v1713_v0 }
  0x20   : > { %376 = vst.msk [vmem:[#allocation2 + $0x30] sm:$0xff] %vm369_vm0, %v1713_v0 }
  0x21   : > { %377 = vst.msk [vmem:[#allocation2 + $0x38] sm:$0xff] %vm369_vm0, %v1713_v0 }
  0x22   : > { %378 = vst.msk [vmem:[#allocation2 + $0x40] sm:$0xff] %vm369_vm0, %v1713_v0 }
  0x23   : > { %379 = vst.msk [vmem:[#allocation2 + $0x48] sm:$0xff] %vm369_vm0, %v1713_v0 }
  0x24   : > { %382 = vst.msk [vmem:[#allocation3] sm:$0xff] %vm369_vm0, %v1713_v0 }
  0x25   : > { %383 = vst.msk [vmem:[#allocation3 + $0x8] sm:$0xff] %vm369_vm0, %v1713_v0 }
  0x26   : > { %384 = vst.msk [vmem:[#allocation3 + $0x10] sm:$0xff] %vm369_vm0, %v1713_v0 }
  0x27   : > { %385 = vst.msk [vmem:[#allocation3 + $0x18] sm:$0xff] %vm369_vm0, %v1713_v0 }
  0x28   : > { %386 = vst.msk [vmem:[#allocation3 + $0x20] sm:$0xff] %vm369_vm0, %v1713_v0 }
  0x29   : > { %387 = vst.msk [vmem:[#allocation3 + $0x28] sm:$0xff] %vm369_vm0, %v1713_v0 }
  0x2a   : > { %388 = vst.msk [vmem:[#allocation3 + $0x30] sm:$0xff] %vm369_vm0, %v1713_v0 }
  0x2b   : > { %389 = vst.msk [vmem:[#allocation3 + $0x38] sm:$0xff] %vm369_vm0, %v1713_v0 }
  0x2c   : > { %381 = vst.msk [vmem:[#allocation2 + $0x50] sm:$0x3] %vm380_vm1, %v1713_v0 }
  0x2d PF: > { %p392_p11 = scmp.ge.s32.totalorder %s1778_s26, 0  ;;  %p393_p12 = scmp.lt.s32.totalorder %s1778_s26, 4 }
  0x2f   : > { %p394_p13 = pnand %p393_p12, %p392_p11 }
  0x31   : > { %397 = sbr.rel (%p394_p13) target bundleno = 353 (0x161), region = 48 }
  0x36   : > { %v684_v1 = vld [vmem:[%s1787_s7] sm:$0x3]  ;;  %vm697_vm2 = vcmask 1041408   ;;  %v399_v3 = vld [vmem:[%s1797_s15 + $0x8] sm:$0xff]  ;;  %v447_v4 = vlaneseq  ;;  %v400_v6 = vld [vmem:[%s1797_s15 + $0x10] sm:$0xff]  ;;  %vm438_vm3 = vcmask 31744  }
  0x37   : > { %v398_v2 = vld [vmem:[%s1797_s15] sm:$0xff]  ;;  %v699_v5 = vsel %vm697_vm2, %v684_v1, 0  ;;  %v401_v10 = vld [vmem:[%s1797_s15 + $0x18] sm:$0xff]  ;;  %v403_v27 = vld [vmem:[%s1797_s15 + $0x28] sm:$0xff] }
  0x38   : > { %v1833_v7 = vld [vmem:[%s2288_s1] ss:$0 sm:$0xff]  ;;  %1626 = vmatpush.bf16.msra.mxu1 %v699_v5  ;;  %1627 = vmatpush.bf16.msra.mxu2 %v699_v5  ;;  %v1840_v9 = vshrl.u32 %v447_v4, 7  ;;  %v404_v28 = vld [vmem:[%s1797_s15 + $0x30] sm:$0xff]  ;;  %v1579_v39 = vld [vmem:[%s1787_s7 + $0x4] sm:$0x3] }
  0x39   : > { %v1838_v8 = vld [vmem:[%s2289_s2] ss:$0 sm:$0xff]  ;;  %1628 = vmatpush.bf16.msra.mxu3 %v699_v5  ;;  %708 = vmatpush.bf16.msra.mxu0 %v699_v5  ;;  %v410_v11 = vmul.f32 %v1833_v7, %v398_v2  ;;  %v411_v12 = vmul.f32 %v1833_v7, %v399_v3  ;;  %v412_v13 = vmul.f32 %v1833_v7, %v400_v6  ;;  %v1584_v42 = vld [vmem:[%s1787_s7 + $0x6] sm:$0x3]  ;;  %v1574_v43 = vld [vmem:[%s1787_s7 + $0x2] sm:$0x3] }
  0x3a   : > { %v402_v14 = vld [vmem:[%s1797_s15 + $0x20] sm:$0xff]  ;;  %v1848_v15 = vadd.s32 16, %v1840_v9  ;;  %v1851_v16 = vadd.s32 24, %v1840_v9  ;;  %v413_v17 = vmul.f32 %v1833_v7, %v401_v10  ;;  %v1859_v22 = vadd.s32 32, %v1840_v9  ;;  %v1589_v48 = vld [vmem:[%s1787_s7 + $0x8] sm:$0x3] }
  0x3b   : > { %v414_v18 = vmul.f32 %v1833_v7, %v402_v14  ;;  %v422_v19 = vadd.f32 %v1838_v8, %v410_v11  ;;  %v423_v20 = vadd.f32 %v1838_v8, %v411_v12  ;;  %v424_v21 = vadd.f32 %v1838_v8, %v412_v13  ;;  %v648_v1 = vld [vmem:[#allocation2] sm:$0xff]  ;;  %v1599_v5 = vld [vmem:[%s1787_s7 + $0xc] sm:$0x3] }
  0x3c   : > { %v474_v23 = vand.u32 7, %v1848_v15  ;;  %v481_v24 = vand.u32 7, %v1851_v16  ;;  %v425_v25 = vadd.f32 %v1838_v8, %v413_v17  ;;  %v1868_v32 = vadd.s32 40, %v1840_v9 }
  0x3d   : > { %v426_v26 = vadd.f32 %v1838_v8, %v414_v18  ;;  %v430_v29 = vmax.f32 %v422_v19, 0.0  ;;  %v431_v30 = vmax.f32 %v423_v20, 0.0  ;;  %v432_v31 = vmax.f32 %v424_v21, 0.0 }
  0x3e   : > { %v433_v33 = vmax.f32 %v425_v25, 0.0  ;;  %v488_v35 = vand.u32 7, %v1859_v22  ;;  %v495_v36 = vand.u32 7, %v1868_v32  ;;  %v415_v37 = vmul.f32 %v1833_v7, %v403_v27  ;;  %v1594_v27 = vld [vmem:[%s1787_s7 + $0xa] sm:$0x3] }
  0x3f   : > { %v434_v34 = vmax.f32 %v426_v26, 0.0  ;;  %439 = vst.msk [vmem:[#allocation2 + $0x9] sm:$0xff] %vm438_vm3, %v430_v29  ;;  %v416_v38 = vmul.f32 %v1833_v7, %v404_v28  ;;  %v1878_v40 = vadd.s32 48, %v1840_v9  ;;  %v1881_v41 = vadd.s32 56, %v1840_v9  ;;  %v1609_v28 = vld [vmem:[%s1787_s7 + $0x10] sm:$0x3] }
  0x40   : > { %440 = vst.msk [vmem:[#allocation2 + $0x11] sm:$0xff] %vm438_vm3, %v431_v30  ;;  %v1888_v44 = vadd.s32 4294967295, %v474_v23  ;;  %v1892_v45 = vadd.s32 4294967295, %v481_v24  ;;  %v427_v46 = vadd.f32 %v1838_v8, %v415_v37  ;;  %v1900_v49 = vadd.s32 4294967295, %v488_v35 }
  0x41   : > { %441 = vst.msk [vmem:[#allocation2 + $0x19] sm:$0xff] %vm438_vm3, %v432_v31  ;;  %v428_v47 = vadd.f32 %v1838_v8, %v416_v38  ;;  %v502_v50 = vand.u32 7, %v1878_v40  ;;  %v879_v51 = vsel %vm697_vm2, %v1579_v39, 0  ;;  %v1905_v52 = vadd.s32 8, %v1840_v9 }
  0x42   : > { %442 = vst.msk [vmem:[#allocation2 + $0x21] sm:$0xff] %vm438_vm3, %v433_v33  ;;  %v1910_v53 = vadd.s32 4294967295, %v495_v36  ;;  %v435_v54 = vmax.f32 %v427_v46, 0.0  ;;  %v509_v56 = vand.u32 7, %v1881_v41  ;;  %888 = vmatpush.bf16.msrb.mxu2 %v879_v51  ;;  %v460_v58 = vand.u32 7, %v1840_v9 }
  0x43   : > { %443 = vst.msk [vmem:[#allocation2 + $0x29] sm:$0xff] %vm438_vm3, %v434_v34  ;;  %v436_v55 = vmax.f32 %v428_v47, 0.0  ;;  %v1915_v57 = vadd.s32 4294967295, %v502_v50  ;;  %v467_v59 = vand.u32 7, %v1905_v52  ;;  %vm562_vm4 = vcmp.ge.s32.totalorder %v1888_v44, 0 }
  0x44   : > { %444 = vst.msk [vmem:[#allocation2 + $0x31] sm:$0xff] %vm438_vm3, %v435_v54  ;;  %v953_v60 = vsel %vm697_vm2, %v1584_v42, 0  ;;  %v789_v61 = vsel %vm697_vm2, %v1574_v43, 0  ;;  %v1027_v62 = vsel %vm697_vm2, %v1589_v48, 0  ;;  %vm563_vm5 = vcmp.ge.s32.totalorder %v1892_v45, 0  ;;  %v738_v54 = vld [vmem:[#allocation2 + $0x1] sm:$0xff] }
  0x45   : > { %445 = vst.msk [vmem:[#allocation2 + $0x39] sm:$0xff] %vm438_vm3, %v436_v55  ;;  %v1926_v63 = vadd.s32 4294967295, %v460_v58  ;;  %v1928_v0 = vadd.s32 4294967295, %v467_v59  ;;  %962 = vmatpush.bf16.msrb.mxu3 %v953_v60  ;;  %798 = vmatpush.bf16.msrb.mxu1 %v789_v61  ;;  %vm564_vm6 = vcmp.ge.s32.totalorder %v1900_v49, 0  ;;  %vm565_vm7 = vcmp.ge.s32.totalorder %v1910_v53, 0 }
  0x46   : > { %v649_v2 = vld [vmem:[#allocation2 + $0x8] sm:$0xff]  ;;  %v1934_v4 = vadd.s32 4294967295, %v509_v56  ;;  %1036 = vmatpush.bf16.msrb.mxu0 %v1027_v62  ;;  %vm566_vm8 = vcmp.ge.s32.totalorder %v1915_v57, 0  ;;  %v1175_v31 = vsel %vm697_vm2, %v1599_v5, 0  ;;  %v1101_v39 = vsel %vm697_vm2, %v1594_v27, 0 }
  0x47   : > { %v650_v3 = vld [vmem:[#allocation2 + $0x10] sm:$0xff]  ;;  %vm560_vm9 = vcmp.ge.s32.totalorder %v1926_v63, 0  ;;  %vm561_vm10 = vcmp.ge.s32.totalorder %v1928_v0, 0  ;;  %v1604_v33 = vld [vmem:[%s1787_s7 + $0xe] sm:$0x3]  ;;  %v1323_v42 = vsel %vm697_vm2, %v1609_v28, 0 }
  0x48   : > { %v1937_v6 = vld [vmem:[#allocation2 + $0x18] sm:$0xff]  ;;  %v674_v9 = vsel %vm562_vm4, %v650_v3, 0.0  ;;  %v672_v12 = vsel %vm560_vm9, %v648_v1, 0.0  ;;  %v673_v13 = vsel %vm561_vm10, %v649_v2, 0.0  ;;  %v1955_v14 = vsel %vm560_vm9, %v650_v3, 0.0  ;;  %v828_v51 = vld [vmem:[#allocation2 + $0x2] sm:$0xff] }
  0x49   : > { %v675_v10 = vsel %vm563_vm5, %v1937_v6, 0.0  ;;  %v1947_v11 = vld [vmem:[#allocation2 + $0x20] sm:$0xff]  ;;  %v680_v20 = vpack.c.bf16 %v673_v13, %v672_v12  ;;  %v1965_v21 = vsel %vm561_vm10, %v1937_v6, 0.0  ;;  %vm567_vm11 = vcmp.ge.s32.totalorder %v1934_v4, 0  ;;  %v2000_v52 = vld [vmem:[#allocation2 + $0xa] sm:$0xff]  ;;  %v405_v12 = vld [vmem:[%s1797_s15 + $0x38] sm:$0xff] }
  0x4a   : > { %v681_v17 = vpack.c.bf16 %v675_v10, %v674_v9  ;;  %v1957_v18 = vld [vmem:[#allocation2 + $0x28] sm:$0xff]  ;;  %v676_v19 = vsel %vm564_vm6, %v1947_v11, 0.0  ;;  %v1156_v26 = vpack.c.bf16 %v1965_v21, %v1955_v14  ;;  %v1249_v46 = vsel %vm697_vm2, %v1604_v33, 0  ;;  %v993_v60 = vld [vmem:[#allocation2 + $0x11] sm:$0xff] }
  0x4b   : > { %v677_v25 = vsel %vm565_vm7, %v1957_v18, 0.0  ;;  %v1976_v30 = vld [vmem:[#allocation2 + $0x30] sm:$0xff]  ;;  %1570 = vmatmul.msk.bf16.vlgmr.msra.gmra.mxu0 %vm438_vm3, %v680_v20  ;;  %v1993_v47 = vadd.s32 1, %v460_v58  ;;  %v1995_v48 = vadd.s32 1, %v467_v59  ;;  %v926_v5 = vsel %vm560_vm9, %v649_v2, 0.0 }
  0x4c   : > { %1571 = vmatmul.msk.bf16.vlgmr.msra.gmra.mxu1 %vm438_vm3, %v681_v17  ;;  %v682_v29 = vpack.c.bf16 %v677_v25, %v676_v19  ;;  %v1981_v34 = vld [vmem:[#allocation2 + $0x38] sm:$0xff]  ;;  %v678_v37 = vsel %vm566_vm8, %v1976_v30, 0.0  ;;  %1332 = vmatpush.bf16.msra.mxu0 %v1323_v42  ;;  %v739_v55 = vld [vmem:[#allocation2 + $0x9] sm:$0xff]  ;;  %v927_v9 = vsel %vm561_vm10, %v650_v3, 0.0  ;;  %v2017_v13 = vadd.s32 1, %v474_v23  ;;  %v995_v19 = vld [vmem:[#allocation2 + $0x21] sm:$0xff] }
  0x4d   : > { %v679_v38 = vsel %vm567_vm11, %v1981_v34, 0.0  ;;  %1110 = vmatpush.bf16.msra.mxu1 %v1101_v39  ;;  %vm624_vm12 = vcmp.lt.s32.totalorder %v1993_v47, 8  ;;  %vm625_vm13 = vcmp.lt.s32.totalorder %v1995_v48, 8  ;;  %v770_v61 = vpack.c.bf16 %v739_v55, %v738_v54  ;;  %v830_v2 = vld [vmem:[#allocation2 + $0x12] sm:$0xff]  ;;  %v2028_v3 = vld [vmem:[#allocation2 + $0x1a] sm:$0xff]  ;;  %v833_v33 = vld [vmem:[#allocation2 + $0x2a] sm:$0xff] }
  0x4e   : > { %1572 = vmatmul.msk.bf16.vlgmr.msra.gmra.mxu2 %vm438_vm3, %v682_v29  ;;  %v683_v43 = vpack.c.bf16 %v679_v38, %v678_v37  ;;  %v852_v58 = vsel %vm624_vm12, %v828_v51, 0.0  ;;  %v853_v59 = vsel %vm625_vm13, %v2000_v52, 0.0  ;;  %v1008_v62 = vpack.c.bf16 %v993_v60, %v739_v55  ;;  %v741_v23 = vld [vmem:[#allocation2 + $0x19] sm:$0xff]  ;;  %v743_v37 = vld [vmem:[#allocation2 + $0x29] sm:$0xff]  ;;  %v997_v38 = vld [vmem:[#allocation2 + $0x31] sm:$0xff] }
  0x4f   : > { %1184 = vmatpush.bf16.msra.mxu2 %v1175_v31  ;;  %v860_v1 = vpack.c.bf16 %v853_v59, %v852_v58  ;;  %v934_v10 = vpack.c.bf16 %v927_v9, %v926_v5  ;;  %v2021_v17 = vadd.s32 1, %v481_v24  ;;  %v417_v63 = vmul.f32 %v1833_v7, %v405_v12  ;;  %v834_v55 = vld [vmem:[#allocation2 + $0x32] sm:$0xff] }
  0x50   : > { %1573 = vmatmul.msk.bf16.vlgmr.msra.gmra.mxu3 %vm438_vm3, %v683_v43  ;;  %vm626_vm14 = vcmp.lt.s32.totalorder %v2017_v13, 8  ;;  %v1009_v24 = vpack.c.bf16 %v995_v19, %v741_v23  ;;  %v928_v25 = vsel %vm562_vm4, %v1937_v6, 0.0  ;;  %v929_v27 = vsel %vm563_vm5, %v1947_v11, 0.0  ;;  %v832_v6 = vld [vmem:[#allocation2 + $0x22] sm:$0xff]  ;;  %v745_v58 = vld [vmem:[#allocation2 + $0x39] sm:$0xff] }
  0x51   : > { %1258 = vmatpush.bf16.msra.mxu3 %v1249_v46  ;;  %v429_v0 = vadd.f32 %v1838_v8, %v417_v63  ;;  %vm627_vm15 = vcmp.lt.s32.totalorder %v2021_v17, 8  ;;  %v854_v16 = vsel %vm626_vm14, %v830_v2, 0.0  ;;  %v771_v8 = vpack.c.bf16 %v741_v23, %v993_v60 }
  0x52   : > { %v855_v7 = vsel %vm627_vm15, %v2028_v3, 0.0  ;;  %v935_v28 = vpack.c.bf16 %v929_v27, %v928_v25  ;;  %v2047_v29 = vadd.s32 1, %v488_v35  ;;  %v2051_v31 = vadd.s32 1, %v495_v36 }
  0x53   : > { %v437_v15 = vmax.f32 %v429_v0, 0.0  ;;  %v861_v20 = vpack.c.bf16 %v855_v7, %v854_v16  ;;  %v772_v35 = vpack.c.bf16 %v743_v37, %v995_v19  ;;  %v1010_v32 = vpack.c.bf16 %v997_v38, %v743_v37 }
  0x54   : > { %vm628_vm0 = vcmp.lt.s32.totalorder %v2047_v29, 8  ;;  %vm629_vm1 = vcmp.lt.s32.totalorder %v2051_v31, 8  ;;  %v930_v42 = vsel %vm564_vm6, %v1957_v18, 0.0  ;;  %v931_v43 = vsel %vm565_vm7, %v1976_v30, 0.0 }
  0x55   : > { %446 = vst.msk [vmem:[#allocation2 + $0x41] sm:$0xff] %vm438_vm3, %v437_v15  ;;  %v856_v39 = vsel %vm628_vm0, %v832_v6, 0.0  ;;  %v857_v22 = vsel %vm629_vm1, %v833_v33, 0.0  ;;  %v936_v46 = vpack.c.bf16 %v931_v43, %v930_v42  ;;  %v2071_v51 = vadd.s32 1, %v502_v50 }
  0x56   : > { %v862_v36 = vpack.c.bf16 %v857_v22, %v856_v39  ;;  %v2075_v54 = vadd.s32 1, %v509_v56  ;;  %v773_v56 = vpack.c.bf16 %v745_v58, %v997_v38  ;;  %v1075_v12 = vsel %vm625_vm13, %v830_v2, 0.0  ;;  %v1221_v38 = vld [vmem:[#allocation2 + $0x49] sm:$0xff] }
  0x57   : > { %vm630_vm2 = vcmp.lt.s32.totalorder %v2071_v51, 8  ;;  %v1296_v63 = vsel %vm624_vm12, %v830_v2, 0.0  ;;  %v1297_v0 = vsel %vm625_vm13, %v2028_v3, 0.0  ;;  %v1076_v47 = vsel %vm626_vm14, %v2028_v3, 0.0 }
  0x58   : > { %vm631_vm9 = vcmp.lt.s32.totalorder %v2075_v54, 8  ;;  %v858_v40 = vsel %vm630_vm2, %v834_v55, 0.0  ;;  %v1304_v23 = vpack.c.bf16 %v1297_v0, %v1296_v63  ;;  %v1077_v48 = vsel %vm627_vm15, %v832_v6, 0.0 }
  0x59   : > { %v1299_v2 = vsel %vm627_vm15, %v833_v33, 0.0  ;;  %v1150_v14 = vsel %vm562_vm4, %v1947_v11, 0.0  ;;  %v1151_v21 = vsel %vm563_vm5, %v1957_v18, 0.0  ;;  %v1078_v13 = vsel %vm628_vm0, %v833_v33, 0.0 }
  0x5a   : > { %v1157_v3 = vpack.c.bf16 %v1151_v21, %v1150_v14  ;;  %v1079_v44 = vsel %vm629_vm1, %v834_v55, 0.0  ;;  %v1300_v45 = vsel %vm628_vm0, %v834_v55, 0.0  ;;  %v1152_v18 = vsel %vm564_vm6, %v1976_v30, 0.0 }
  0x5b   : > { %1590 = vmatmul.msk.bf16.vlgmr.msrb.gmra.mxu0 %vm438_vm3, %v1008_v62  ;;  %v1153_v17 = vsel %vm565_vm7, %v1981_v34, 0.0  ;;  %v1084_v16 = vpack.c.bf16 %v1079_v44, %v1078_v13  ;;  %v641_v44 = vld [vmem:[#allocation3 + $0x8] sm:$0xff] }
  0x5c   : > { %1575 = vmatmul.msk.bf16.vlgmr.msrb.gmra.mxu1 %vm438_vm3, %v770_v61  ;;  %v835_v60 = vld [vmem:[#allocation2 + $0x3a] sm:$0xff]  ;;  %v1147_v25 = vld [vmem:[#allocation2 + $0x48] sm:$0xff] }
  0x5d   : > { %v2080_v59 = vld [vmem:[#allocation2 + $0x41] sm:$0xff]  ;;  %v859_v50 = vsel %vm631_vm9, %v835_v60, 0.0  ;;  %v1301_v11 = vsel %vm629_vm1, %v835_v60, 0.0  ;;  %v1080_v49 = vsel %vm630_vm2, %v835_v60, 0.0 }
  0x5e   : > { %1580 = vmatmul.msk.bf16.vlgmr.msrb.gmra.mxu2 %vm438_vm3, %v860_v1  ;;  %v925_v41 = vld [vmem:[#allocation2 + $0x40] sm:$0xff]  ;;  %v1011_v61 = vpack.c.bf16 %v2080_v59, %v745_v58  ;;  %v863_v62 = vpack.c.bf16 %v859_v50, %v858_v40  ;;  %v932_v1 = vsel %vm566_vm8, %v1981_v34, 0.0  ;;  %v1306_v7 = vpack.c.bf16 %v1301_v11, %v1300_v45 }
  0x5f   : > { %v933_v5 = vsel %vm567_vm11, %v925_v41, 0.0  ;;  %v1154_v27 = vsel %vm566_vm8, %v925_v41, 0.0  ;;  %v1233_v39 = vpack.c.bf16 %v1221_v38, %v2080_v59 }
  0x60   : > { %1585 = vmatmul.msk.bf16.vlgmr.msrb.gmra.mxu3 %vm438_vm3, %v934_v10  ;;  %v937_v9 = vpack.c.bf16 %v933_v5, %v932_v1  ;;  %v1074_v10 = vsel %vm624_vm12, %v2000_v52, 0.0  ;;  %v1298_v52 = vsel %vm626_vm14, %v832_v6, 0.0 }
  0x61   : > { %v1082_v15 = vpack.c.bf16 %v1075_v12, %v1074_v10  ;;  %v1305_v19 = vpack.c.bf16 %v1299_v2, %v1298_v52  ;;  %v640_v52 = vld [vmem:[#allocation3] sm:$0xff] }
  0x6b   : > { %1591 = vmatmul.msk.bf16.gmra.mxu0 %vm438_vm3, %v1009_v24  ;;  %v1073_v24 = vld [vmem:[#allocation2 + $0x42] sm:$0xff] }
  0x6c   : > { %1576 = vmatmul.msk.bf16.gmra.mxu1 %vm438_vm3, %v771_v8  ;;  %v1081_v53 = vsel %vm631_vm9, %v1073_v24, 0.0  ;;  %v1302_v30 = vsel %vm630_vm2, %v1073_v24, 0.0 }
  0x6d   : > { %v1085_v29 = vpack.c.bf16 %v1081_v53, %v1080_v49 }
  0x6e   : > { %1581 = vmatmul.msk.bf16.gmra.mxu2 %vm438_vm3, %v861_v20  ;;  %v1295_v20 = vld [vmem:[#allocation2 + $0x4a] sm:$0xff] }
  0x6f   : > { %v1303_v34 = vsel %vm631_vm9, %v1295_v20, 0.0 }
  0x70   : > { %1586 = vmatmul.msk.bf16.gmra.mxu3 %vm438_vm3, %v935_v28  ;;  %v1155_v28 = vsel %vm567_vm11, %v1147_v25, 0.0  ;;  %v1307_v31 = vpack.c.bf16 %v1303_v34, %v1302_v30  ;;  %v642_v25 = vld [vmem:[#allocation3 + $0x10] sm:$0xff] }
  0x71   : > { %v1159_v37 = vpack.c.bf16 %v1155_v28, %v1154_v27 }
  0x7b   : > { %1592 = vmatmul.msk.bf16.gmra.mxu0 %vm438_vm3, %v1010_v32 }
  0x7c   : > { %1577 = vmatmul.msk.bf16.gmra.mxu1 %vm438_vm3, %v772_v35 }
  0x7e   : > { %1582 = vmatmul.msk.bf16.gmra.mxu2 %vm438_vm3, %v862_v36 }
  0x80   : > { %1587 = vmatmul.msk.bf16.gmra.mxu3 %vm438_vm3, %v936_v46 }
  0x8b   : > { %1593 = vmatmul.msk.bf16.gmra.mxu0 %vm438_vm3, %v1011_v61 }
  0x8c   : > { %1578 = vmatmul.msk.bf16.gmra.mxu1 %vm438_vm3, %v773_v56 }
  0x8e   : > { %1583 = vmatmul.msk.bf16.gmra.mxu2 %vm438_vm3, %v863_v62 }
  0x90   : > { %1588 = vmatmul.msk.bf16.gmra.mxu3 %vm438_vm3, %v937_v9 }
  0x9b   : > { %1610 = vmatmul.msk.bf16.vlgmr.msra.gmra.mxu0 %vm438_vm3, %v1304_v23 }
  0x9c   : > { %1595 = vmatmul.msk.bf16.vlgmr.msra.gmra.mxu1 %vm438_vm3, %v1082_v15 }
  0x9e   : > { %1600 = vmatmul.msk.bf16.vlgmr.msra.gmra.mxu2 %vm438_vm3, %v1156_v26  ;;  %v1083_v26 = vpack.c.bf16 %v1077_v48, %v1076_v47 }
  0xa0   : > { %1605 = vmatmul.msk.bf16.vlgmr.msra.gmra.mxu3 %vm438_vm3, %v771_v8  ;;  %v1158_v8 = vpack.c.bf16 %v1153_v17, %v1152_v18 }
  0xab   : > { %1611 = vmatmul.msk.bf16.gmra.mxu0 %vm438_vm3, %v1305_v19 }
  0xac   : > { %1596 = vmatmul.msk.bf16.gmra.mxu1 %vm438_vm3, %v1083_v26 }
  0xae   : > { %1601 = vmatmul.msk.bf16.gmra.mxu2 %vm438_vm3, %v1157_v3 }
  0xb0   : > { %1606 = vmatmul.msk.bf16.gmra.mxu3 %vm438_vm3, %v772_v35 }
  0xbb   : > { %1612 = vmatmul.msk.bf16.gmra.mxu0 %vm438_vm3, %v1306_v7 }
  0xbc   : > { %1597 = vmatmul.msk.bf16.gmra.mxu1 %vm438_vm3, %v1084_v16 }
  0xbe   : > { %1602 = vmatmul.msk.bf16.gmra.mxu2 %vm438_vm3, %v1158_v8 }
  0xc0   : > { %1607 = vmatmul.msk.bf16.gmra.mxu3 %vm438_vm3, %v773_v56 }
  0xc8   : > { %v710_v33 = vpop.f32.mrf.mxu0 }
  0xc9   : > { %v2162_v6 = vpop.f32.mrf.mxu1  ;;  %v730_v21 = vadd.f32 %v710_v33, %v640_v52 }
  0xca   : > { %v732_v34 = vadd.f32 %v2162_v6, %v642_v25 }
  0xcb   : > { %1613 = vmatmul.msk.bf16.gmra.mxu0 %vm438_vm3, %v1307_v31 }
  0xcc   : > { %1598 = vmatmul.msk.bf16.gmra.mxu1 %vm438_vm3, %v1085_v29 }
  0xce   : > { %1603 = vmatmul.msk.bf16.gmra.mxu2 %vm438_vm3, %v1159_v37 }
  0xd0   : > { %1608 = vmatmul.msk.bf16.gmra.mxu3 %vm438_vm3, %v1233_v39  ;;  %v712_v22 = vpop.f32.mrf.mxu0 }
  0xd1   : > { %v2169_v57 = vpop.f32.mrf.mxu2  ;;  %v2171_v4 = vpop.f32.mrf.mxu1  ;;  %v731_v18 = vadd.f32 %v712_v22, %v641_v44  ;;  %v643_v22 = vld [vmem:[#allocation3 + $0x18] sm:$0xff] }
  0xd3   : > { %v2173_v35 = vpop.f32.mrf.mxu3 }
  0xd8   : > { %v1038_v42 = vpop.f32.mrf.mxu0 }
  0xd9   : > { %v2175_v32 = vpop.f32.mrf.mxu2  ;;  %v800_v36 = vpop.f32.mrf.mxu1 }
  0xda   : > { %v820_v19 = vadd.f32 %v800_v36, %v730_v21 }
  0xdb   : > { %v2177_v43 = vpop.f32.mrf.mxu3 }
  0xe0   : > { %v1040_v54 = vpop.f32.mrf.mxu0 }
  0xe1   : > { %v890_v46 = vpop.f32.mrf.mxu2  ;;  %v802_v51 = vpop.f32.mrf.mxu1 }
  0xe2   : > { %v910_v13 = vadd.f32 %v890_v46, %v820_v19  ;;  %v821_v7 = vadd.f32 %v802_v51, %v731_v18 }
  0xe3   : > { %v964_v55 = vpop.f32.mrf.mxu3 }
  0xe4   : > { %v984_v17 = vadd.f32 %v964_v55, %v910_v13  ;;  %v733_v55 = vadd.f32 %v2171_v4, %v643_v22 }
  0xe6   : > { %v1058_v20 = vadd.f32 %v1038_v42, %v984_v17 }
  0xe8   : > { %v2179_v59 = vpop.f32.mrf.mxu0 }
  0xe9   : > { %v892_v60 = vpop.f32.mrf.mxu2  ;;  %v805_v58 = vpop.f32.mrf.mxu1 }
  0xea   : > { %v911_v24 = vadd.f32 %v892_v60, %v821_v7  ;;  %v822_v31 = vadd.f32 %v805_v58, %v732_v34 }
  0xeb   : > { %v966_v40 = vpop.f32.mrf.mxu3 }
  0xec   : > { %v985_v27 = vadd.f32 %v966_v40, %v911_v24 }
  0xee   : > { %v1059_v39 = vadd.f32 %v1040_v54, %v985_v27 }
  0xf0   : > { %v2181_v56 = vpop.f32.mrf.mxu0 }
  0xf1   : > { %v895_v50 = vpop.f32.mrf.mxu2  ;;  %v807_v41 = vpop.f32.mrf.mxu1 }
  0xf2   : > { %v912_v38 = vadd.f32 %v895_v50, %v822_v31  ;;  %v823_v6 = vadd.f32 %v807_v41, %v733_v55  ;;  %v644_v50 = vld [vmem:[#allocation3 + $0x20] sm:$0xff] }
  0xf3   : > { %v969_v61 = vpop.f32.mrf.mxu3  ;;  %v734_v17 = vadd.f32 %v2169_v57, %v644_v50 }
  0xf4   : > { %v986_v60 = vadd.f32 %v969_v61, %v912_v38 }
  0xf6   : > { %v1060_v13 = vadd.f32 %v2179_v59, %v986_v60 }
  0xf8   : > { %v2185_v5 = vpop.f32.mrf.mxu0 }
  0xf9   : > { %v897_v62 = vpop.f32.mrf.mxu2  ;;  %v2183_v1 = vpop.f32.mrf.mxu1 }
  0xfa   : > { %v913_v58 = vadd.f32 %v897_v62, %v823_v6  ;;  %v824_v61 = vadd.f32 %v2183_v1, %v734_v17 }
  0xfb   : > { %v971_v9 = vpop.f32.mrf.mxu3 }
 0x100   : > { %v2191_v63 = vpop.f32.mrf.mxu0 }
 0x101   : > { %v2187_v10 = vpop.f32.mrf.mxu2  ;;  %v2189_v12 = vpop.f32.mrf.mxu1 }
 0x102   : > { %v914_v24 = vadd.f32 %v2187_v10, %v824_v61 }
 0x103   : > { %v2193_v0 = vpop.f32.mrf.mxu3 }
 0x108   : > { %v2199_v47 = vpop.f32.mrf.mxu0 }
 0x109   : > { %v2195_v15 = vpop.f32.mrf.mxu2  ;;  %v2197_v23 = vpop.f32.mrf.mxu1 }
 0x10b   : > { %v2201_v48 = vpop.f32.mrf.mxu3 }
 0x110   : > { %v2207_v26 = vpop.f32.mrf.mxu0 }
 0x111   : > { %v2203_v2 = vpop.f32.mrf.mxu2  ;;  %v2205_v14 = vpop.f32.mrf.mxu1 }
 0x113   : > { %v2209_v3 = vpop.f32.mrf.mxu3 }
 0x118   : > { %v1334_v16 = vpop.f32.mrf.mxu0 }
 0x119   : > { %v2211_v45 = vpop.f32.mrf.mxu2  ;;  %v1112_v11 = vpop.f32.mrf.mxu1 }
 0x11a   : > { %v1132_v49 = vadd.f32 %v1112_v11, %v1058_v20  ;;  %v645_v20 = vld [vmem:[#allocation3 + $0x28] sm:$0xff] }
 0x11b   : > { %v2213_v8 = vpop.f32.mrf.mxu3  ;;  %v735_v57 = vadd.f32 %v2175_v32, %v645_v20 }
 0x11d   : > { %v825_v1 = vadd.f32 %v2189_v12, %v735_v57 }
 0x11f   : > { %v915_v10 = vadd.f32 %v2195_v15, %v825_v1 }
 0x120   : > { %v1336_v29 = vpop.f32.mrf.mxu0 }
 0x121   : > { %v1186_v53 = vpop.f32.mrf.mxu2  ;;  %v1114_v30 = vpop.f32.mrf.mxu1 }
 0x122   : > { %v1206_v28 = vadd.f32 %v1186_v53, %v1132_v49  ;;  %v1133_v46 = vadd.f32 %v1114_v30, %v1059_v39 }
 0x123   : > { %v1260_v33 = vpop.f32.mrf.mxu3 }
 0x124   : > { %v1280_v37 = vadd.f32 %v1260_v33, %v1206_v28 }
 0x126   : > { %v1354_v36 = vadd.f32 %v1334_v16, %v1280_v37  ;;  %v987_v16 = vadd.f32 %v971_v9, %v913_v58  ;;  %v988_v9 = vadd.f32 %v2193_v0, %v914_v24  ;;  %v989_v0 = vadd.f32 %v2201_v48, %v915_v10 }
 0x128   : > { %1362 = vst.msk [vmem:[#allocation3] sm:$0xff] %vm438_vm3, %v1354_v36  ;;  %v1339_v21 = vpop.f32.mrf.mxu0  ;;  %v1061_v62 = vadd.f32 %v2181_v56, %v987_v16  ;;  %v1062_v56 = vadd.f32 %v2185_v5, %v988_v9  ;;  %v1063_v5 = vadd.f32 %v2191_v63, %v989_v0 }
 0x129   : > { %v1188_v42 = vpop.f32.mrf.mxu2  ;;  %v1117_v51 = vpop.f32.mrf.mxu1 }
 0x12a   : > { %v1207_v52 = vadd.f32 %v1188_v42, %v1133_v46  ;;  %v1134_v44 = vadd.f32 %v1117_v51, %v1060_v13  ;;  %v647_v42 = vld [vmem:[#allocation3 + $0x38] sm:$0xff] }
 0x12b   : > { %v1262_v40 = vpop.f32.mrf.mxu3 }
 0x12c   : > { %v1281_v19 = vadd.f32 %v1262_v40, %v1207_v52  ;;  %v737_v52 = vadd.f32 %v2177_v43, %v647_v42 }
 0x12e   : > { %v1355_v54 = vadd.f32 %v1336_v29, %v1281_v19  ;;  %v646_v29 = vld [vmem:[#allocation3 + $0x30] sm:$0xff] }
 0x12f   : > { %v736_v32 = vadd.f32 %v2173_v35, %v646_v29 }
 0x130   : > { %1363 = vst.msk [vmem:[#allocation3 + $0x8] sm:$0xff] %vm438_vm3, %v1355_v54  ;;  %v1341_v59 = vpop.f32.mrf.mxu0 }
 0x131   : > { %v1191_v11 = vpop.f32.mrf.mxu2  ;;  %v1119_v18 = vpop.f32.mrf.mxu1  ;;  %v826_v12 = vadd.f32 %v2197_v23, %v736_v32  ;;  %v827_v23 = vadd.f32 %v2205_v14, %v737_v52 }
 0x132   : > { %v1208_v4 = vadd.f32 %v1191_v11, %v1134_v44  ;;  %v1135_v49 = vadd.f32 %v1119_v18, %v1061_v62 }
 0x133   : > { %v1265_v41 = vpop.f32.mrf.mxu3  ;;  %v916_v15 = vadd.f32 %v2203_v2, %v826_v12  ;;  %v917_v2 = vadd.f32 %v2211_v45, %v827_v23 }
 0x134   : > { %v1282_v7 = vadd.f32 %v1265_v41, %v1208_v4 }
 0x135   : > { %v990_v35 = vadd.f32 %v2209_v3, %v916_v15  ;;  %v991_v43 = vadd.f32 %v2213_v8, %v917_v2 }
 0x136   : > { %v1356_v25 = vadd.f32 %v1339_v21, %v1282_v7 }
 0x137   : > { %v1064_v63 = vadd.f32 %v2199_v47, %v990_v35  ;;  %v1065_v14 = vadd.f32 %v2207_v26, %v991_v43 }
 0x138   : > { %1364 = vst.msk [vmem:[#allocation3 + $0x10] sm:$0xff] %vm438_vm3, %v1356_v25  ;;  %v1344_v37 = vpop.f32.mrf.mxu0 }
 0x139   : > { %v1193_v53 = vpop.f32.mrf.mxu2  ;;  %v1122_v30 = vpop.f32.mrf.mxu1 }
 0x13a   : > { %v1209_v34 = vadd.f32 %v1193_v53, %v1135_v49  ;;  %v1136_v33 = vadd.f32 %v1122_v30, %v1062_v56 }
 0x13b   : > { %v1267_v27 = vpop.f32.mrf.mxu3 }
 0x13c   : > { %v1283_v28 = vadd.f32 %v1267_v27, %v1209_v34 }
 0x13e   : > { %v1357_v31 = vadd.f32 %v1341_v59, %v1283_v28 }
 0x140   : > { %1365 = vst.msk [vmem:[#allocation3 + $0x18] sm:$0xff] %vm438_vm3, %v1357_v31  ;;  %v1346_v48 = vpop.f32.mrf.mxu0 }
 0x141   : > { %v1196_v38 = vpop.f32.mrf.mxu2  ;;  %v1124_v39 = vpop.f32.mrf.mxu1 }
 0x142   : > { %v1210_v22 = vadd.f32 %v1196_v38, %v1136_v33  ;;  %v1137_v55 = vadd.f32 %v1124_v39, %v1063_v5 }
 0x143   : > { %v1270_v36 = vpop.f32.mrf.mxu3 }
 0x144   : > { %v1284_v46 = vadd.f32 %v1270_v36, %v1210_v22 }
 0x146   : > { %v1358_v51 = vadd.f32 %v1344_v37, %v1284_v46 }
 0x148   : > { %1366 = vst.msk [vmem:[#allocation3 + $0x20] sm:$0xff] %vm438_vm3, %v1358_v51  ;;  %v1349_v3 = vpop.f32.mrf.mxu0 }
 0x149   : > { %v1198_v60 = vpop.f32.mrf.mxu2  ;;  %v1127_v40 = vpop.f32.mrf.mxu1 }
 0x14a   : > { %v1211_v6 = vadd.f32 %v1198_v60, %v1137_v55  ;;  %v1138_v13 = vadd.f32 %v1127_v40, %v1064_v63 }
 0x14b   : > { %v1272_v21 = vpop.f32.mrf.mxu3 }
 0x14c   : > { %v1285_v19 = vadd.f32 %v1272_v21, %v1211_v6 }
 0x14e   : > { %v1359_v58 = vadd.f32 %v1346_v48, %v1285_v19 }
 0x150   : > { %1367 = vst.msk [vmem:[#allocation3 + $0x28] sm:$0xff] %vm438_vm3, %v1359_v58  ;;  %v1351_v41 = vpop.f32.mrf.mxu0 }
 0x151   : > { %v1201_v50 = vpop.f32.mrf.mxu2  ;;  %v1129_v18 = vpop.f32.mrf.mxu1 }
 0x152   : > { %v1212_v54 = vadd.f32 %v1201_v50, %v1138_v13  ;;  %v1139_v16 = vadd.f32 %v1129_v18, %v1065_v14 }
 0x153   : > { %v1275_v44 = vpop.f32.mrf.mxu3 }
 0x154   : > { %v1286_v11 = vadd.f32 %v1275_v44, %v1212_v54 }
 0x156   : > { %v1360_v17 = vadd.f32 %v1349_v3, %v1286_v11 }
 0x158   : > { %1368 = vst.msk [vmem:[#allocation3 + $0x30] sm:$0xff] %vm438_vm3, %v1360_v17 }
 0x159   : > { %v1203_v45 = vpop.f32.mrf.mxu2 }
 0x15a   : > { %v1213_v47 = vadd.f32 %v1203_v45, %v1139_v16 }
 0x15b   : > { %v1277_v4 = vpop.f32.mrf.mxu3 }
 0x15c   : > { %v1287_v61 = vadd.f32 %v1277_v4, %v1213_v47 }
 0x15e   : > { %v1361_v7 = vadd.f32 %v1351_v41, %v1287_v61 }
 0x160   : > { %1369 = vst.msk [vmem:[#allocation3 + $0x38] sm:$0xff] %vm438_vm3, %v1361_v7 }
 0x161 PF: > { %p1614_p0 = scmp.ne.s32.totalorder %s1695_s18, 2 }
 0x163   : > { %1373 = sbr.rel (%p1614_p0) target bundleno = 371 (0x173), region = 52 }
 0x168   : > { %v1374_v8 = vld [vmem:[#allocation3] sm:$0xff]  ;;  %v1382_v26 = vld [vmem:[%s1792_s12] sm:$0xff]  ;;  %vm1398_vm4 = vcmask 31744   ;;  %v1383_v59 = vld [vmem:[%s1792_s12 + $0x8] sm:$0xff] }
 0x169   : > { %v1375_v24 = vld [vmem:[#allocation3 + $0x8] sm:$0xff]  ;;  %v1390_v62 = vadd.f32 %v1382_v26, %v1374_v8  ;;  %v1376_v20 = vld [vmem:[#allocation3 + $0x10] sm:$0xff]  ;;  %v1384_v25 = vld [vmem:[%s1792_s12 + $0x10] sm:$0xff] }
 0x16a   : > { %v1391_v49 = vadd.f32 %v1383_v59, %v1375_v24  ;;  %v1392_v53 = vadd.f32 %v1384_v25, %v1376_v20  ;;  %v1377_v30 = vld [vmem:[#allocation3 + $0x18] sm:$0xff]  ;;  %v1385_v57 = vld [vmem:[%s1792_s12 + $0x18] sm:$0xff]  ;;  %v1386_v1 = vld [vmem:[%s1792_s12 + $0x20] sm:$0xff] }
 0x16b   : > { %v1378_v9 = vld [vmem:[#allocation3 + $0x20] sm:$0xff]  ;;  %1399 = vst.msk [vmem:[%s1802_s25] sm:$0xff] %vm1398_vm4, %v1390_v62  ;;  %v1393_v34 = vadd.f32 %v1385_v57, %v1377_v30  ;;  %v1379_v27 = vld [vmem:[#allocation3 + $0x28] sm:$0xff]  ;;  %v1387_v28 = vld [vmem:[%s1792_s12 + $0x28] sm:$0xff] }
 0x16c   : > { %1400 = vst.msk [vmem:[%s1802_s25 + $0x8] sm:$0xff] %vm1398_vm4, %v1391_v49  ;;  %v1394_v10 = vadd.f32 %v1386_v1, %v1378_v9  ;;  %v1395_v56 = vadd.f32 %v1387_v28, %v1379_v27  ;;  %v1380_v29 = vld [vmem:[#allocation3 + $0x30] sm:$0xff]  ;;  %v1388_v31 = vld [vmem:[%s1792_s12 + $0x30] sm:$0xff]  ;;  %v1389_v38 = vld [vmem:[%s1792_s12 + $0x38] sm:$0xff] }
 0x16d   : > { %v1381_v33 = vld [vmem:[#allocation3 + $0x38] sm:$0xff]  ;;  %1401 = vst.msk [vmem:[%s1802_s25 + $0x10] sm:$0xff] %vm1398_vm4, %v1392_v53  ;;  %v1396_v37 = vadd.f32 %v1388_v31, %v1380_v29 }
 0x16e   : > { %1402 = vst.msk [vmem:[%s1802_s25 + $0x18] sm:$0xff] %vm1398_vm4, %v1393_v34  ;;  %v1397_v39 = vadd.f32 %v1389_v38, %v1381_v33 }
 0x16f   : > { %1403 = vst.msk [vmem:[%s1802_s25 + $0x20] sm:$0xff] %vm1398_vm4, %v1394_v10 }
 0x170   : > { %1404 = vst.msk [vmem:[%s1802_s25 + $0x28] sm:$0xff] %vm1398_vm4, %v1395_v56 }
 0x171   : > { %1405 = vst.msk [vmem:[%s1802_s25 + $0x30] sm:$0xff] %vm1398_vm4, %v1396_v37 }
 0x172   : > { %1406 = vst.msk [vmem:[%s1802_s25 + $0x38] sm:$0xff] %vm1398_vm4, %v1397_v39 }
 0x173 PF: > { %s15_s22 = sadd.s32 1, %s1711_s22   ;;  %s2293_s18 = smov %s1703_s20 }
 0x174   : > { %p12_p1 = scmp.ge.s32.totalorder %s15_s22, 14   ;;  %s2294_s19 = smov %s1707_s21 }
 0x175   : > { %s2295_s20 = smov %s2298_s23  ;;  %s2296_s21 = smov %s2302_s24 }
 0x176   :  { %14 = sbr.rel (!%p12_p1) target bundleno = 3 (0x3), region = 96 }

// kernel: module_3d_fwd.8
= control target key start
LH: loop header
LB: loop body
LE: loop exit
PB: predicated region body
PF: predicated region fallthrough
CT: control target
= control target key end

     0   :  { %s1638_s15 = smov 0   ;;  %s1640_s16 = smov 0   ;;  %s2160_s0 = inlined_call_operand.vmem [shape: f32[1,4,64,4], index: 0, kind: input, shape index: {}]   ;;  %s2161_s1 = inlined_call_operand.vmem [shape: f32[1,4], index: 1, kind: input, shape index: {}]   ;;  %s2162_s2 = inlined_call_operand.vmem [shape: f32[1,4], index: 2, kind: input, shape index: {}]   ;;  %s2163_s3 = inlined_call_operand.vmem [shape: bf16[3,9,4,4], index: 3, kind: input, shape index: {}]   ;;  %s2164_s4 = inlined_call_operand.vmem [shape: f32[1,4,64,4], index: 4, kind: output, shape index: {}]  }
   0x1   :  { %s1642_s17 = smov 0   ;;  %s1644_s18 = smov 0  }
   0x2   :  { %s1646_s19 = smov 0  }
   0x3 LB: > { %s26_s20 = sadd.s32 1, %s1602_s17  ;;  %s29_s21 = sadd.s32 1, %s1606_s18  ;;  %s1610_s19 = sphi %s1646_s19, %s14_s19   ;;  %s1606_s18 = sphi %s1644_s18, %s2168_s18   ;;  %s1602_s17 = sphi %s1642_s17, %s2167_s17   ;;  %s1598_s16 = sphi %s1640_s16, %s2166_s16   ;;  %s1594_s15 = sphi %s1638_s15, %s2165_s15  }
   0x4   : > { %p27_p0 = scmp.ge.s32.totalorder %s26_s20, 3  ;;  %p1456_p1 = scmp.ge.s32.totalorder %s1610_s19, 1 }
   0x5   : > { %p223_p2 = scmp.lt.s32.totalorder %s1610_s19, 13 }
   0x6   : > { %s2170_s20 = smov (%p27_p0, %s26_s20), 0  ;;  %s2172_s21 = smov (!%p27_p0, %s29_s21), %s1606_s18 }
   0x7   : > { %p224_p3 = pnand %p1456_p1, %p223_p2  ;;  %p31_p4 = scmp.ge.s32.totalorder %s2172_s21, 4 }
   0x8   : > { %s268_s22 = sadd.s32 (!%p224_p3), %s1594_s15, %s1598_s16  ;;  %p289_p5 = scmp.lt.s32.totalorder (!%p224_p3), %s1594_s15, 2 }
   0x9   : > { %s2174_s21 = smov (%p31_p4, %s2172_s21), 0  ;;  %227 = sbr.rel (%p224_p3) target bundleno = 368 (0x170), region = 36 }
   0xa   : > { %s1672_s23 = sadd.s32 (!%p224_p3), 4294967295, %s268_s22  ;;  %p296_p8 = scmp.lt.s32.totalorder (!%p224_p3), %s1598_s16, 3 }
   0xb   : > { %p270_p6 = scmp.gt.s32.totalorder (!%p224_p3), %s1672_s23, 0  ;;  %p1458_p7 = scmp.lt.s32.totalorder (!%p224_p3), %s1672_s23, 3 }
   0xc   : > { %p1468_p10 = scmp.ne.s32.totalorder (!%p224_p3), %s1594_s15, 0 }
   0xe   : > { %s290_s24 = scalar_select %p289_p5, %s1594_s15, 2 }
   0xf   : > { %s271_s25 = scalar_select %p270_p6, %s1672_s23, 0 }
  0x10   : > { %s1528_s26 = smul.u32 18, %s290_s24  ;;  %s2178_s16 = smov (!%p296_p8, %s1598_s16), 3 }
  0x11   : > { %s2176_s25 = smov (!%p1458_p7, %s271_s25), 3  ;;  %s1524_s30 = sshll.u32 %s2178_s16, 6 }
  0x12   : > { %s1681_s29 = scalar_lea.vmem %s2163_s3, %s1528_s26  ;;  %p276_p9 = scmp.lt.s32.totalorder %s2176_s25, 3 }
  0x13   : > { %s1686_s8 = scalar_lea.vmem %s2164_s4, %s1524_s30  ;;  %307 = sbr.rel (%p1468_p10) target bundleno = 44 (0x2c), region = 40 }
  0x14   : > { %s2180_s25 = smov (!%p276_p9, %s2176_s25), 3 }
  0x15   : > { %s1523_s5 = sshll.u32 %s2180_s25, 6 }
  0x16   : > { %s1691_s11 = scalar_lea.vmem %s2160_s0, %s1523_s5 }
  0x18   : > { %vm308_vm0 = vcmask 31744   ;;  %v1612_v0 = vmov 0.0   ;;  %vm319_vm1 = vcmask 25600  }
  0x19   : > { %309 = vst.msk [vmem:[#allocation2] sm:$0xff] %vm308_vm0, %v1612_v0 }
  0x1a   : > { %310 = vst.msk [vmem:[#allocation2 + $0x8] sm:$0xff] %vm308_vm0, %v1612_v0 }
  0x1b   : > { %311 = vst.msk [vmem:[#allocation2 + $0x10] sm:$0xff] %vm308_vm0, %v1612_v0 }
  0x1c   : > { %312 = vst.msk [vmem:[#allocation2 + $0x18] sm:$0xff] %vm308_vm0, %v1612_v0 }
  0x1d   : > { %313 = vst.msk [vmem:[#allocation2 + $0x20] sm:$0xff] %vm308_vm0, %v1612_v0 }
  0x1e   : > { %314 = vst.msk [vmem:[#allocation2 + $0x28] sm:$0xff] %vm308_vm0, %v1612_v0 }
  0x1f   : > { %315 = vst.msk [vmem:[#allocation2 + $0x30] sm:$0xff] %vm308_vm0, %v1612_v0 }
  0x20   : > { %316 = vst.msk [vmem:[#allocation2 + $0x38] sm:$0xff] %vm308_vm0, %v1612_v0 }
  0x21   : > { %317 = vst.msk [vmem:[#allocation2 + $0x40] sm:$0xff] %vm308_vm0, %v1612_v0 }
  0x22   : > { %318 = vst.msk [vmem:[#allocation2 + $0x48] sm:$0xff] %vm308_vm0, %v1612_v0 }
  0x23   : > { %321 = vst.msk [vmem:[#allocation3] sm:$0xff] %vm308_vm0, %v1612_v0 }
  0x24   : > { %322 = vst.msk [vmem:[#allocation3 + $0x8] sm:$0xff] %vm308_vm0, %v1612_v0 }
  0x25   : > { %323 = vst.msk [vmem:[#allocation3 + $0x10] sm:$0xff] %vm308_vm0, %v1612_v0 }
  0x26   : > { %324 = vst.msk [vmem:[#allocation3 + $0x18] sm:$0xff] %vm308_vm0, %v1612_v0 }
  0x27   : > { %325 = vst.msk [vmem:[#allocation3 + $0x20] sm:$0xff] %vm308_vm0, %v1612_v0 }
  0x28   : > { %326 = vst.msk [vmem:[#allocation3 + $0x28] sm:$0xff] %vm308_vm0, %v1612_v0 }
  0x29   : > { %327 = vst.msk [vmem:[#allocation3 + $0x30] sm:$0xff] %vm308_vm0, %v1612_v0 }
  0x2a   : > { %328 = vst.msk [vmem:[#allocation3 + $0x38] sm:$0xff] %vm308_vm0, %v1612_v0 }
  0x2b   : > { %320 = vst.msk [vmem:[#allocation2 + $0x50] sm:$0x3] %vm319_vm1, %v1612_v0 }
  0x2c PF: > { %p331_p11 = scmp.ge.s32.totalorder %s1672_s23, 0  ;;  %p332_p12 = scmp.lt.s32.totalorder %s1672_s23, 4 }
  0x2e   : > { %p333_p13 = pnand %p332_p12, %p331_p11 }
  0x30   : > { %336 = sbr.rel (%p333_p13) target bundleno = 352 (0x160), region = 44 }
  0x35   : > { %v623_v1 = vld [vmem:[%s1681_s29] sm:$0x3]  ;;  %vm636_vm2 = vcmask 1041408   ;;  %v338_v3 = vld [vmem:[%s1691_s11 + $0x8] sm:$0xff]  ;;  %v386_v4 = vlaneseq  ;;  %v339_v6 = vld [vmem:[%s1691_s11 + $0x10] sm:$0xff]  ;;  %vm377_vm3 = vcmask 31744  }
  0x36   : > { %v337_v2 = vld [vmem:[%s1691_s11] sm:$0xff]  ;;  %v638_v5 = vsel %vm636_vm2, %v623_v1, 0  ;;  %v340_v10 = vld [vmem:[%s1691_s11 + $0x18] sm:$0xff]  ;;  %v342_v27 = vld [vmem:[%s1691_s11 + $0x28] sm:$0xff] }
  0x37   : > { %v1722_v7 = vld [vmem:[%s2161_s1] ss:$0 sm:$0xff]  ;;  %1525 = vmatpush.bf16.msra.mxu1 %v638_v5  ;;  %1526 = vmatpush.bf16.msra.mxu2 %v638_v5  ;;  %v1729_v9 = vshrl.u32 %v386_v4, 7  ;;  %v343_v28 = vld [vmem:[%s1691_s11 + $0x30] sm:$0xff]  ;;  %v1479_v39 = vld [vmem:[%s1681_s29 + $0x4] sm:$0x3] }
  0x38   : > { %v1727_v8 = vld [vmem:[%s2162_s2] ss:$0 sm:$0xff]  ;;  %1527 = vmatpush.bf16.msra.mxu3 %v638_v5  ;;  %647 = vmatpush.bf16.msra.mxu0 %v638_v5  ;;  %v349_v11 = vmul.f32 %v1722_v7, %v337_v2  ;;  %v350_v12 = vmul.f32 %v1722_v7, %v338_v3  ;;  %v351_v13 = vmul.f32 %v1722_v7, %v339_v6  ;;  %v1484_v42 = vld [vmem:[%s1681_s29 + $0x6] sm:$0x3]  ;;  %v1474_v43 = vld [vmem:[%s1681_s29 + $0x2] sm:$0x3] }
  0x39   : > { %v341_v14 = vld [vmem:[%s1691_s11 + $0x20] sm:$0xff]  ;;  %v1737_v15 = vadd.s32 16, %v1729_v9  ;;  %v1740_v16 = vadd.s32 24, %v1729_v9  ;;  %v352_v17 = vmul.f32 %v1722_v7, %v340_v10  ;;  %v1748_v22 = vadd.s32 32, %v1729_v9  ;;  %v1489_v48 = vld [vmem:[%s1681_s29 + $0x8] sm:$0x3] }
  0x3a   : > { %v353_v18 = vmul.f32 %v1722_v7, %v341_v14  ;;  %v361_v19 = vadd.f32 %v1727_v8, %v349_v11  ;;  %v362_v20 = vadd.f32 %v1727_v8, %v350_v12  ;;  %v363_v21 = vadd.f32 %v1727_v8, %v351_v13  ;;  %v587_v1 = vld [vmem:[#allocation2] sm:$0xff]  ;;  %v1499_v5 = vld [vmem:[%s1681_s29 + $0xc] sm:$0x3] }
  0x3b   : > { %v413_v23 = vand.u32 7, %v1737_v15  ;;  %v420_v24 = vand.u32 7, %v1740_v16  ;;  %v364_v25 = vadd.f32 %v1727_v8, %v352_v17  ;;  %v1757_v32 = vadd.s32 40, %v1729_v9 }
  0x3c   : > { %v365_v26 = vadd.f32 %v1727_v8, %v353_v18  ;;  %v369_v29 = vmax.f32 %v361_v19, 0.0  ;;  %v370_v30 = vmax.f32 %v362_v20, 0.0  ;;  %v371_v31 = vmax.f32 %v363_v21, 0.0 }
  0x3d   : > { %v372_v33 = vmax.f32 %v364_v25, 0.0  ;;  %v427_v35 = vand.u32 7, %v1748_v22  ;;  %v434_v36 = vand.u32 7, %v1757_v32  ;;  %v354_v37 = vmul.f32 %v1722_v7, %v342_v27  ;;  %v1494_v27 = vld [vmem:[%s1681_s29 + $0xa] sm:$0x3] }
  0x3e   : > { %v373_v34 = vmax.f32 %v365_v26, 0.0  ;;  %378 = vst.msk [vmem:[#allocation2 + $0x9] sm:$0xff] %vm377_vm3, %v369_v29  ;;  %v355_v38 = vmul.f32 %v1722_v7, %v343_v28  ;;  %v1767_v40 = vadd.s32 48, %v1729_v9  ;;  %v1770_v41 = vadd.s32 56, %v1729_v9  ;;  %v1509_v28 = vld [vmem:[%s1681_s29 + $0x10] sm:$0x3] }
  0x3f   : > { %379 = vst.msk [vmem:[#allocation2 + $0x11] sm:$0xff] %vm377_vm3, %v370_v30  ;;  %v1777_v44 = vadd.s32 4294967295, %v413_v23  ;;  %v1781_v45 = vadd.s32 4294967295, %v420_v24  ;;  %v366_v46 = vadd.f32 %v1727_v8, %v354_v37  ;;  %v1789_v49 = vadd.s32 4294967295, %v427_v35 }
  0x40   : > { %380 = vst.msk [vmem:[#allocation2 + $0x19] sm:$0xff] %vm377_vm3, %v371_v31  ;;  %v367_v47 = vadd.f32 %v1727_v8, %v355_v38  ;;  %v441_v50 = vand.u32 7, %v1767_v40  ;;  %v818_v51 = vsel %vm636_vm2, %v1479_v39, 0  ;;  %v1794_v52 = vadd.s32 8, %v1729_v9 }
  0x41   : > { %381 = vst.msk [vmem:[#allocation2 + $0x21] sm:$0xff] %vm377_vm3, %v372_v33  ;;  %v1799_v53 = vadd.s32 4294967295, %v434_v36  ;;  %v374_v54 = vmax.f32 %v366_v46, 0.0  ;;  %v448_v56 = vand.u32 7, %v1770_v41  ;;  %827 = vmatpush.bf16.msrb.mxu2 %v818_v51  ;;  %v399_v58 = vand.u32 7, %v1729_v9 }
  0x42   : > { %382 = vst.msk [vmem:[#allocation2 + $0x29] sm:$0xff] %vm377_vm3, %v373_v34  ;;  %v375_v55 = vmax.f32 %v367_v47, 0.0  ;;  %v1804_v57 = vadd.s32 4294967295, %v441_v50  ;;  %v406_v59 = vand.u32 7, %v1794_v52  ;;  %vm501_vm4 = vcmp.ge.s32.totalorder %v1777_v44, 0 }
  0x43   : > { %383 = vst.msk [vmem:[#allocation2 + $0x31] sm:$0xff] %vm377_vm3, %v374_v54  ;;  %v892_v60 = vsel %vm636_vm2, %v1484_v42, 0  ;;  %v728_v61 = vsel %vm636_vm2, %v1474_v43, 0  ;;  %v966_v62 = vsel %vm636_vm2, %v1489_v48, 0  ;;  %vm502_vm5 = vcmp.ge.s32.totalorder %v1781_v45, 0  ;;  %v677_v54 = vld [vmem:[#allocation2 + $0x1] sm:$0xff] }
  0x44   : > { %384 = vst.msk [vmem:[#allocation2 + $0x39] sm:$0xff] %vm377_vm3, %v375_v55  ;;  %v1815_v63 = vadd.s32 4294967295, %v399_v58  ;;  %v1817_v0 = vadd.s32 4294967295, %v406_v59  ;;  %901 = vmatpush.bf16.msrb.mxu3 %v892_v60  ;;  %737 = vmatpush.bf16.msrb.mxu1 %v728_v61  ;;  %vm503_vm6 = vcmp.ge.s32.totalorder %v1789_v49, 0  ;;  %vm504_vm7 = vcmp.ge.s32.totalorder %v1799_v53, 0 }
  0x45   : > { %v588_v2 = vld [vmem:[#allocation2 + $0x8] sm:$0xff]  ;;  %v1823_v4 = vadd.s32 4294967295, %v448_v56  ;;  %975 = vmatpush.bf16.msrb.mxu0 %v966_v62  ;;  %vm505_vm8 = vcmp.ge.s32.totalorder %v1804_v57, 0  ;;  %v1114_v31 = vsel %vm636_vm2, %v1499_v5, 0  ;;  %v1040_v39 = vsel %vm636_vm2, %v1494_v27, 0 }
  0x46   : > { %v589_v3 = vld [vmem:[#allocation2 + $0x10] sm:$0xff]  ;;  %vm499_vm9 = vcmp.ge.s32.totalorder %v1815_v63, 0  ;;  %vm500_vm10 = vcmp.ge.s32.totalorder %v1817_v0, 0  ;;  %v1504_v33 = vld [vmem:[%s1681_s29 + $0xe] sm:$0x3]  ;;  %v1262_v42 = vsel %vm636_vm2, %v1509_v28, 0 }
  0x47   : > { %v1826_v6 = vld [vmem:[#allocation2 + $0x18] sm:$0xff]  ;;  %v613_v9 = vsel %vm501_vm4, %v589_v3, 0.0  ;;  %v611_v12 = vsel %vm499_vm9, %v587_v1, 0.0  ;;  %v612_v13 = vsel %vm500_vm10, %v588_v2, 0.0  ;;  %v1844_v14 = vsel %vm499_vm9, %v589_v3, 0.0  ;;  %v767_v51 = vld [vmem:[#allocation2 + $0x2] sm:$0xff] }
  0x48   : > { %v614_v10 = vsel %vm502_vm5, %v1826_v6, 0.0  ;;  %v1836_v11 = vld [vmem:[#allocation2 + $0x20] sm:$0xff]  ;;  %v619_v20 = vpack.c.bf16 %v612_v13, %v611_v12  ;;  %v1854_v21 = vsel %vm500_vm10, %v1826_v6, 0.0  ;;  %vm506_vm11 = vcmp.ge.s32.totalorder %v1823_v4, 0  ;;  %v1889_v52 = vld [vmem:[#allocation2 + $0xa] sm:$0xff]  ;;  %v344_v12 = vld [vmem:[%s1691_s11 + $0x38] sm:$0xff] }
  0x49   : > { %v620_v17 = vpack.c.bf16 %v614_v10, %v613_v9  ;;  %v1846_v18 = vld [vmem:[#allocation2 + $0x28] sm:$0xff]  ;;  %v615_v19 = vsel %vm503_vm6, %v1836_v11, 0.0  ;;  %v1095_v26 = vpack.c.bf16 %v1854_v21, %v1844_v14  ;;  %v1188_v46 = vsel %vm636_vm2, %v1504_v33, 0  ;;  %v932_v60 = vld [vmem:[#allocation2 + $0x11] sm:$0xff] }
  0x4a   : > { %v616_v25 = vsel %vm504_vm7, %v1846_v18, 0.0  ;;  %v1865_v30 = vld [vmem:[#allocation2 + $0x30] sm:$0xff]  ;;  %1470 = vmatmul.msk.bf16.vlgmr.msra.gmra.mxu0 %vm377_vm3, %v619_v20  ;;  %v1882_v47 = vadd.s32 1, %v399_v58  ;;  %v1884_v48 = vadd.s32 1, %v406_v59  ;;  %v865_v5 = vsel %vm499_vm9, %v588_v2, 0.0 }
  0x4b   : > { %1471 = vmatmul.msk.bf16.vlgmr.msra.gmra.mxu1 %vm377_vm3, %v620_v17  ;;  %v621_v29 = vpack.c.bf16 %v616_v25, %v615_v19  ;;  %v1870_v34 = vld [vmem:[#allocation2 + $0x38] sm:$0xff]  ;;  %v617_v37 = vsel %vm505_vm8, %v1865_v30, 0.0  ;;  %1271 = vmatpush.bf16.msra.mxu0 %v1262_v42  ;;  %v678_v55 = vld [vmem:[#allocation2 + $0x9] sm:$0xff]  ;;  %v866_v9 = vsel %vm500_vm10, %v589_v3, 0.0  ;;  %v1906_v13 = vadd.s32 1, %v413_v23  ;;  %v934_v19 = vld [vmem:[#allocation2 + $0x21] sm:$0xff] }
  0x4c   : > { %v618_v38 = vsel %vm506_vm11, %v1870_v34, 0.0  ;;  %1049 = vmatpush.bf16.msra.mxu1 %v1040_v39  ;;  %vm563_vm12 = vcmp.lt.s32.totalorder %v1882_v47, 8  ;;  %vm564_vm13 = vcmp.lt.s32.totalorder %v1884_v48, 8  ;;  %v709_v61 = vpack.c.bf16 %v678_v55, %v677_v54  ;;  %v769_v2 = vld [vmem:[#allocation2 + $0x12] sm:$0xff]  ;;  %v1917_v3 = vld [vmem:[#allocation2 + $0x1a] sm:$0xff]  ;;  %v772_v33 = vld [vmem:[#allocation2 + $0x2a] sm:$0xff] }
  0x4d   : > { %1472 = vmatmul.msk.bf16.vlgmr.msra.gmra.mxu2 %vm377_vm3, %v621_v29  ;;  %v622_v43 = vpack.c.bf16 %v618_v38, %v617_v37  ;;  %v791_v58 = vsel %vm563_vm12, %v767_v51, 0.0  ;;  %v792_v59 = vsel %vm564_vm13, %v1889_v52, 0.0  ;;  %v947_v62 = vpack.c.bf16 %v932_v60, %v678_v55  ;;  %v680_v23 = vld [vmem:[#allocation2 + $0x19] sm:$0xff]  ;;  %v682_v37 = vld [vmem:[#allocation2 + $0x29] sm:$0xff]  ;;  %v936_v38 = vld [vmem:[#allocation2 + $0x31] sm:$0xff] }
  0x4e   : > { %1123 = vmatpush.bf16.msra.mxu2 %v1114_v31  ;;  %v799_v1 = vpack.c.bf16 %v792_v59, %v791_v58  ;;  %v873_v10 = vpack.c.bf16 %v866_v9, %v865_v5  ;;  %v1910_v17 = vadd.s32 1, %v420_v24  ;;  %v356_v63 = vmul.f32 %v1722_v7, %v344_v12  ;;  %v773_v55 = vld [vmem:[#allocation2 + $0x32] sm:$0xff] }
  0x4f   : > { %1473 = vmatmul.msk.bf16.vlgmr.msra.gmra.mxu3 %vm377_vm3, %v622_v43  ;;  %vm565_vm14 = vcmp.lt.s32.totalorder %v1906_v13, 8  ;;  %v948_v24 = vpack.c.bf16 %v934_v19, %v680_v23  ;;  %v867_v25 = vsel %vm501_vm4, %v1826_v6, 0.0  ;;  %v868_v27 = vsel %vm502_vm5, %v1836_v11, 0.0  ;;  %v771_v6 = vld [vmem:[#allocation2 + $0x22] sm:$0xff]  ;;  %v684_v58 = vld [vmem:[#allocation2 + $0x39] sm:$0xff] }
  0x50   : > { %1197 = vmatpush.bf16.msra.mxu3 %v1188_v46  ;;  %v368_v0 = vadd.f32 %v1727_v8, %v356_v63  ;;  %vm566_vm15 = vcmp.lt.s32.totalorder %v1910_v17, 8  ;;  %v793_v16 = vsel %vm565_vm14, %v769_v2, 0.0  ;;  %v710_v8 = vpack.c.bf16 %v680_v23, %v932_v60 }
  0x51   : > { %v794_v7 = vsel %vm566_vm15, %v1917_v3, 0.0  ;;  %v874_v28 = vpack.c.bf16 %v868_v27, %v867_v25  ;;  %v1936_v29 = vadd.s32 1, %v427_v35  ;;  %v1940_v31 = vadd.s32 1, %v434_v36 }
  0x52   : > { %v376_v15 = vmax.f32 %v368_v0, 0.0  ;;  %v800_v20 = vpack.c.bf16 %v794_v7, %v793_v16  ;;  %v711_v35 = vpack.c.bf16 %v682_v37, %v934_v19  ;;  %v949_v32 = vpack.c.bf16 %v936_v38, %v682_v37 }
  0x53   : > { %vm567_vm0 = vcmp.lt.s32.totalorder %v1936_v29, 8  ;;  %vm568_vm1 = vcmp.lt.s32.totalorder %v1940_v31, 8  ;;  %v869_v42 = vsel %vm503_vm6, %v1846_v18, 0.0  ;;  %v870_v43 = vsel %vm504_vm7, %v1865_v30, 0.0 }
  0x54   : > { %385 = vst.msk [vmem:[#allocation2 + $0x41] sm:$0xff] %vm377_vm3, %v376_v15  ;;  %v795_v39 = vsel %vm567_vm0, %v771_v6, 0.0  ;;  %v796_v22 = vsel %vm568_vm1, %v772_v33, 0.0  ;;  %v875_v46 = vpack.c.bf16 %v870_v43, %v869_v42  ;;  %v1960_v51 = vadd.s32 1, %v441_v50 }
  0x55   : > { %v801_v36 = vpack.c.bf16 %v796_v22, %v795_v39  ;;  %v1964_v54 = vadd.s32 1, %v448_v56  ;;  %v712_v56 = vpack.c.bf16 %v684_v58, %v936_v38  ;;  %v1014_v12 = vsel %vm564_vm13, %v769_v2, 0.0  ;;  %v1160_v38 = vld [vmem:[#allocation2 + $0x49] sm:$0xff] }
  0x56   : > { %vm569_vm2 = vcmp.lt.s32.totalorder %v1960_v51, 8  ;;  %v1235_v63 = vsel %vm563_vm12, %v769_v2, 0.0  ;;  %v1236_v0 = vsel %vm564_vm13, %v1917_v3, 0.0  ;;  %v1015_v47 = vsel %vm565_vm14, %v1917_v3, 0.0 }
  0x57   : > { %vm570_vm9 = vcmp.lt.s32.totalorder %v1964_v54, 8  ;;  %v797_v40 = vsel %vm569_vm2, %v773_v55, 0.0  ;;  %v1243_v23 = vpack.c.bf16 %v1236_v0, %v1235_v63  ;;  %v1016_v48 = vsel %vm566_vm15, %v771_v6, 0.0 }
  0x58   : > { %v1238_v2 = vsel %vm566_vm15, %v772_v33, 0.0  ;;  %v1089_v14 = vsel %vm501_vm4, %v1836_v11, 0.0  ;;  %v1090_v21 = vsel %vm502_vm5, %v1846_v18, 0.0  ;;  %v1017_v13 = vsel %vm567_vm0, %v772_v33, 0.0 }
  0x59   : > { %v1096_v3 = vpack.c.bf16 %v1090_v21, %v1089_v14  ;;  %v1018_v44 = vsel %vm568_vm1, %v773_v55, 0.0  ;;  %v1239_v45 = vsel %vm567_vm0, %v773_v55, 0.0  ;;  %v1091_v18 = vsel %vm503_vm6, %v1865_v30, 0.0 }
  0x5a   : > { %1490 = vmatmul.msk.bf16.vlgmr.msrb.gmra.mxu0 %vm377_vm3, %v947_v62  ;;  %v1092_v17 = vsel %vm504_vm7, %v1870_v34, 0.0  ;;  %v1023_v16 = vpack.c.bf16 %v1018_v44, %v1017_v13  ;;  %v580_v44 = vld [vmem:[#allocation3 + $0x8] sm:$0xff] }
  0x5b   : > { %1475 = vmatmul.msk.bf16.vlgmr.msrb.gmra.mxu1 %vm377_vm3, %v709_v61  ;;  %v774_v60 = vld [vmem:[#allocation2 + $0x3a] sm:$0xff]  ;;  %v1086_v25 = vld [vmem:[#allocation2 + $0x48] sm:$0xff] }
  0x5c   : > { %v1969_v59 = vld [vmem:[#allocation2 + $0x41] sm:$0xff]  ;;  %v798_v50 = vsel %vm570_vm9, %v774_v60, 0.0  ;;  %v1240_v11 = vsel %vm568_vm1, %v774_v60, 0.0  ;;  %v1019_v49 = vsel %vm569_vm2, %v774_v60, 0.0 }
  0x5d   : > { %1480 = vmatmul.msk.bf16.vlgmr.msrb.gmra.mxu2 %vm377_vm3, %v799_v1  ;;  %v864_v41 = vld [vmem:[#allocation2 + $0x40] sm:$0xff]  ;;  %v950_v61 = vpack.c.bf16 %v1969_v59, %v684_v58  ;;  %v802_v62 = vpack.c.bf16 %v798_v50, %v797_v40  ;;  %v871_v1 = vsel %vm505_vm8, %v1870_v34, 0.0  ;;  %v1245_v7 = vpack.c.bf16 %v1240_v11, %v1239_v45 }
  0x5e   : > { %v872_v5 = vsel %vm506_vm11, %v864_v41, 0.0  ;;  %v1093_v27 = vsel %vm505_vm8, %v864_v41, 0.0  ;;  %v1172_v39 = vpack.c.bf16 %v1160_v38, %v1969_v59 }
  0x5f   : > { %1485 = vmatmul.msk.bf16.vlgmr.msrb.gmra.mxu3 %vm377_vm3, %v873_v10  ;;  %v876_v9 = vpack.c.bf16 %v872_v5, %v871_v1  ;;  %v1013_v10 = vsel %vm563_vm12, %v1889_v52, 0.0  ;;  %v1237_v52 = vsel %vm565_vm14, %v771_v6, 0.0 }
  0x60   : > { %v1021_v15 = vpack.c.bf16 %v1014_v12, %v1013_v10  ;;  %v1244_v19 = vpack.c.bf16 %v1238_v2, %v1237_v52  ;;  %v579_v52 = vld [vmem:[#allocation3] sm:$0xff] }
  0x6a   : > { %1491 = vmatmul.msk.bf16.gmra.mxu0 %vm377_vm3, %v948_v24  ;;  %v1012_v24 = vld [vmem:[#allocation2 + $0x42] sm:$0xff] }
  0x6b   : > { %1476 = vmatmul.msk.bf16.gmra.mxu1 %vm377_vm3, %v710_v8  ;;  %v1020_v53 = vsel %vm570_vm9, %v1012_v24, 0.0  ;;  %v1241_v30 = vsel %vm569_vm2, %v1012_v24, 0.0 }
  0x6c   : > { %v1024_v29 = vpack.c.bf16 %v1020_v53, %v1019_v49 }
  0x6d   : > { %1481 = vmatmul.msk.bf16.gmra.mxu2 %vm377_vm3, %v800_v20  ;;  %v1234_v20 = vld [vmem:[#allocation2 + $0x4a] sm:$0xff] }
  0x6e   : > { %v1242_v34 = vsel %vm570_vm9, %v1234_v20, 0.0 }
  0x6f   : > { %1486 = vmatmul.msk.bf16.gmra.mxu3 %vm377_vm3, %v874_v28  ;;  %v1094_v28 = vsel %vm506_vm11, %v1086_v25, 0.0  ;;  %v1246_v31 = vpack.c.bf16 %v1242_v34, %v1241_v30  ;;  %v581_v25 = vld [vmem:[#allocation3 + $0x10] sm:$0xff] }
  0x70   : > { %v1098_v37 = vpack.c.bf16 %v1094_v28, %v1093_v27 }
  0x7a   : > { %1492 = vmatmul.msk.bf16.gmra.mxu0 %vm377_vm3, %v949_v32 }
  0x7b   : > { %1477 = vmatmul.msk.bf16.gmra.mxu1 %vm377_vm3, %v711_v35 }
  0x7d   : > { %1482 = vmatmul.msk.bf16.gmra.mxu2 %vm377_vm3, %v801_v36 }
  0x7f   : > { %1487 = vmatmul.msk.bf16.gmra.mxu3 %vm377_vm3, %v875_v46 }
  0x8a   : > { %1493 = vmatmul.msk.bf16.gmra.mxu0 %vm377_vm3, %v950_v61 }
  0x8b   : > { %1478 = vmatmul.msk.bf16.gmra.mxu1 %vm377_vm3, %v712_v56 }
  0x8d   : > { %1483 = vmatmul.msk.bf16.gmra.mxu2 %vm377_vm3, %v802_v62 }
  0x8f   : > { %1488 = vmatmul.msk.bf16.gmra.mxu3 %vm377_vm3, %v876_v9 }
  0x9a   : > { %1510 = vmatmul.msk.bf16.vlgmr.msra.gmra.mxu0 %vm377_vm3, %v1243_v23 }
  0x9b   : > { %1495 = vmatmul.msk.bf16.vlgmr.msra.gmra.mxu1 %vm377_vm3, %v1021_v15 }
  0x9d   : > { %1500 = vmatmul.msk.bf16.vlgmr.msra.gmra.mxu2 %vm377_vm3, %v1095_v26  ;;  %v1022_v26 = vpack.c.bf16 %v1016_v48, %v1015_v47 }
  0x9f   : > { %1505 = vmatmul.msk.bf16.vlgmr.msra.gmra.mxu3 %vm377_vm3, %v710_v8  ;;  %v1097_v8 = vpack.c.bf16 %v1092_v17, %v1091_v18 }
  0xaa   : > { %1511 = vmatmul.msk.bf16.gmra.mxu0 %vm377_vm3, %v1244_v19 }
  0xab   : > { %1496 = vmatmul.msk.bf16.gmra.mxu1 %vm377_vm3, %v1022_v26 }
  0xad   : > { %1501 = vmatmul.msk.bf16.gmra.mxu2 %vm377_vm3, %v1096_v3 }
  0xaf   : > { %1506 = vmatmul.msk.bf16.gmra.mxu3 %vm377_vm3, %v711_v35 }
  0xba   : > { %1512 = vmatmul.msk.bf16.gmra.mxu0 %vm377_vm3, %v1245_v7 }
  0xbb   : > { %1497 = vmatmul.msk.bf16.gmra.mxu1 %vm377_vm3, %v1023_v16 }
  0xbd   : > { %1502 = vmatmul.msk.bf16.gmra.mxu2 %vm377_vm3, %v1097_v8 }
  0xbf   : > { %1507 = vmatmul.msk.bf16.gmra.mxu3 %vm377_vm3, %v712_v56 }
  0xc7   : > { %v649_v33 = vpop.f32.mrf.mxu0 }
  0xc8   : > { %v2051_v6 = vpop.f32.mrf.mxu1  ;;  %v669_v21 = vadd.f32 %v649_v33, %v579_v52 }
  0xc9   : > { %v671_v34 = vadd.f32 %v2051_v6, %v581_v25 }
  0xca   : > { %1513 = vmatmul.msk.bf16.gmra.mxu0 %vm377_vm3, %v1246_v31 }
  0xcb   : > { %1498 = vmatmul.msk.bf16.gmra.mxu1 %vm377_vm3, %v1024_v29 }
  0xcd   : > { %1503 = vmatmul.msk.bf16.gmra.mxu2 %vm377_vm3, %v1098_v37 }
  0xcf   : > { %1508 = vmatmul.msk.bf16.gmra.mxu3 %vm377_vm3, %v1172_v39  ;;  %v651_v22 = vpop.f32.mrf.mxu0 }
  0xd0   : > { %v2058_v57 = vpop.f32.mrf.mxu2  ;;  %v2060_v4 = vpop.f32.mrf.mxu1  ;;  %v670_v18 = vadd.f32 %v651_v22, %v580_v44  ;;  %v582_v22 = vld [vmem:[#allocation3 + $0x18] sm:$0xff] }
  0xd2   : > { %v2062_v35 = vpop.f32.mrf.mxu3 }
  0xd7   : > { %v977_v42 = vpop.f32.mrf.mxu0 }
  0xd8   : > { %v2064_v32 = vpop.f32.mrf.mxu2  ;;  %v739_v36 = vpop.f32.mrf.mxu1 }
  0xd9   : > { %v759_v19 = vadd.f32 %v739_v36, %v669_v21 }
  0xda   : > { %v2066_v43 = vpop.f32.mrf.mxu3 }
  0xdf   : > { %v979_v54 = vpop.f32.mrf.mxu0 }
  0xe0   : > { %v829_v46 = vpop.f32.mrf.mxu2  ;;  %v741_v51 = vpop.f32.mrf.mxu1 }
  0xe1   : > { %v849_v13 = vadd.f32 %v829_v46, %v759_v19  ;;  %v760_v7 = vadd.f32 %v741_v51, %v670_v18 }
  0xe2   : > { %v903_v55 = vpop.f32.mrf.mxu3 }
  0xe3   : > { %v923_v17 = vadd.f32 %v903_v55, %v849_v13  ;;  %v672_v55 = vadd.f32 %v2060_v4, %v582_v22 }
  0xe5   : > { %v997_v20 = vadd.f32 %v977_v42, %v923_v17 }
  0xe7   : > { %v2068_v59 = vpop.f32.mrf.mxu0 }
  0xe8   : > { %v831_v60 = vpop.f32.mrf.mxu2  ;;  %v744_v58 = vpop.f32.mrf.mxu1 }
  0xe9   : > { %v850_v24 = vadd.f32 %v831_v60, %v760_v7  ;;  %v761_v31 = vadd.f32 %v744_v58, %v671_v34 }
  0xea   : > { %v905_v40 = vpop.f32.mrf.mxu3 }
  0xeb   : > { %v924_v27 = vadd.f32 %v905_v40, %v850_v24 }
  0xed   : > { %v998_v39 = vadd.f32 %v979_v54, %v924_v27 }
  0xef   : > { %v2070_v56 = vpop.f32.mrf.mxu0 }
  0xf0   : > { %v834_v50 = vpop.f32.mrf.mxu2  ;;  %v746_v41 = vpop.f32.mrf.mxu1 }
  0xf1   : > { %v851_v38 = vadd.f32 %v834_v50, %v761_v31  ;;  %v762_v6 = vadd.f32 %v746_v41, %v672_v55  ;;  %v583_v50 = vld [vmem:[#allocation3 + $0x20] sm:$0xff] }
  0xf2   : > { %v908_v61 = vpop.f32.mrf.mxu3  ;;  %v673_v17 = vadd.f32 %v2058_v57, %v583_v50 }
  0xf3   : > { %v925_v60 = vadd.f32 %v908_v61, %v851_v38 }
  0xf5   : > { %v999_v13 = vadd.f32 %v2068_v59, %v925_v60 }
  0xf7   : > { %v2074_v5 = vpop.f32.mrf.mxu0 }
  0xf8   : > { %v836_v62 = vpop.f32.mrf.mxu2  ;;  %v2072_v1 = vpop.f32.mrf.mxu1 }
  0xf9   : > { %v852_v58 = vadd.f32 %v836_v62, %v762_v6  ;;  %v763_v61 = vadd.f32 %v2072_v1, %v673_v17 }
  0xfa   : > { %v910_v9 = vpop.f32.mrf.mxu3 }
  0xff   : > { %v2080_v63 = vpop.f32.mrf.mxu0 }
 0x100   : > { %v2076_v10 = vpop.f32.mrf.mxu2  ;;  %v2078_v12 = vpop.f32.mrf.mxu1 }
 0x101   : > { %v853_v24 = vadd.f32 %v2076_v10, %v763_v61 }
 0x102   : > { %v2082_v0 = vpop.f32.mrf.mxu3 }
 0x107   : > { %v2088_v47 = vpop.f32.mrf.mxu0 }
 0x108   : > { %v2084_v15 = vpop.f32.mrf.mxu2  ;;  %v2086_v23 = vpop.f32.mrf.mxu1 }
 0x10a   : > { %v2090_v48 = vpop.f32.mrf.mxu3 }
 0x10f   : > { %v2096_v26 = vpop.f32.mrf.mxu0 }
 0x110   : > { %v2092_v2 = vpop.f32.mrf.mxu2  ;;  %v2094_v14 = vpop.f32.mrf.mxu1 }
 0x112   : > { %v2098_v3 = vpop.f32.mrf.mxu3 }
 0x117   : > { %v1273_v16 = vpop.f32.mrf.mxu0 }
 0x118   : > { %v2100_v45 = vpop.f32.mrf.mxu2  ;;  %v1051_v11 = vpop.f32.mrf.mxu1 }
 0x119   : > { %v1071_v49 = vadd.f32 %v1051_v11, %v997_v20  ;;  %v584_v20 = vld [vmem:[#allocation3 + $0x28] sm:$0xff] }
 0x11a   : > { %v2102_v8 = vpop.f32.mrf.mxu3  ;;  %v674_v57 = vadd.f32 %v2064_v32, %v584_v20 }
 0x11c   : > { %v764_v1 = vadd.f32 %v2078_v12, %v674_v57 }
 0x11e   : > { %v854_v10 = vadd.f32 %v2084_v15, %v764_v1 }
 0x11f   : > { %v1275_v29 = vpop.f32.mrf.mxu0 }
 0x120   : > { %v1125_v53 = vpop.f32.mrf.mxu2  ;;  %v1053_v30 = vpop.f32.mrf.mxu1 }
 0x121   : > { %v1145_v28 = vadd.f32 %v1125_v53, %v1071_v49  ;;  %v1072_v46 = vadd.f32 %v1053_v30, %v998_v39 }
 0x122   : > { %v1199_v33 = vpop.f32.mrf.mxu3 }
 0x123   : > { %v1219_v37 = vadd.f32 %v1199_v33, %v1145_v28 }
 0x125   : > { %v1293_v36 = vadd.f32 %v1273_v16, %v1219_v37  ;;  %v926_v16 = vadd.f32 %v910_v9, %v852_v58  ;;  %v927_v9 = vadd.f32 %v2082_v0, %v853_v24  ;;  %v928_v0 = vadd.f32 %v2090_v48, %v854_v10 }
 0x127   : > { %1301 = vst.msk [vmem:[#allocation3] sm:$0xff] %vm377_vm3, %v1293_v36  ;;  %v1278_v21 = vpop.f32.mrf.mxu0  ;;  %v1000_v62 = vadd.f32 %v2070_v56, %v926_v16  ;;  %v1001_v56 = vadd.f32 %v2074_v5, %v927_v9  ;;  %v1002_v5 = vadd.f32 %v2080_v63, %v928_v0 }
 0x128   : > { %v1127_v42 = vpop.f32.mrf.mxu2  ;;  %v1056_v51 = vpop.f32.mrf.mxu1 }
 0x129   : > { %v1146_v52 = vadd.f32 %v1127_v42, %v1072_v46  ;;  %v1073_v44 = vadd.f32 %v1056_v51, %v999_v13  ;;  %v586_v42 = vld [vmem:[#allocation3 + $0x38] sm:$0xff] }
 0x12a   : > { %v1201_v40 = vpop.f32.mrf.mxu3 }
 0x12b   : > { %v1220_v19 = vadd.f32 %v1201_v40, %v1146_v52  ;;  %v676_v52 = vadd.f32 %v2066_v43, %v586_v42 }
 0x12d   : > { %v1294_v54 = vadd.f32 %v1275_v29, %v1220_v19  ;;  %v585_v29 = vld [vmem:[#allocation3 + $0x30] sm:$0xff] }
 0x12e   : > { %v675_v32 = vadd.f32 %v2062_v35, %v585_v29 }
 0x12f   : > { %1302 = vst.msk [vmem:[#allocation3 + $0x8] sm:$0xff] %vm377_vm3, %v1294_v54  ;;  %v1280_v59 = vpop.f32.mrf.mxu0 }
 0x130   : > { %v1130_v11 = vpop.f32.mrf.mxu2  ;;  %v1058_v18 = vpop.f32.mrf.mxu1  ;;  %v765_v12 = vadd.f32 %v2086_v23, %v675_v32  ;;  %v766_v23 = vadd.f32 %v2094_v14, %v676_v52 }
 0x131   : > { %v1147_v4 = vadd.f32 %v1130_v11, %v1073_v44  ;;  %v1074_v49 = vadd.f32 %v1058_v18, %v1000_v62 }
 0x132   : > { %v1204_v41 = vpop.f32.mrf.mxu3  ;;  %v855_v15 = vadd.f32 %v2092_v2, %v765_v12  ;;  %v856_v2 = vadd.f32 %v2100_v45, %v766_v23 }
 0x133   : > { %v1221_v7 = vadd.f32 %v1204_v41, %v1147_v4 }
 0x134   : > { %v929_v35 = vadd.f32 %v2098_v3, %v855_v15  ;;  %v930_v43 = vadd.f32 %v2102_v8, %v856_v2 }
 0x135   : > { %v1295_v25 = vadd.f32 %v1278_v21, %v1221_v7 }
 0x136   : > { %v1003_v63 = vadd.f32 %v2088_v47, %v929_v35  ;;  %v1004_v14 = vadd.f32 %v2096_v26, %v930_v43 }
 0x137   : > { %1303 = vst.msk [vmem:[#allocation3 + $0x10] sm:$0xff] %vm377_vm3, %v1295_v25  ;;  %v1283_v37 = vpop.f32.mrf.mxu0 }
 0x138   : > { %v1132_v53 = vpop.f32.mrf.mxu2  ;;  %v1061_v30 = vpop.f32.mrf.mxu1 }
 0x139   : > { %v1148_v34 = vadd.f32 %v1132_v53, %v1074_v49  ;;  %v1075_v33 = vadd.f32 %v1061_v30, %v1001_v56 }
 0x13a   : > { %v1206_v27 = vpop.f32.mrf.mxu3 }
 0x13b   : > { %v1222_v28 = vadd.f32 %v1206_v27, %v1148_v34 }
 0x13d   : > { %v1296_v31 = vadd.f32 %v1280_v59, %v1222_v28 }
 0x13f   : > { %1304 = vst.msk [vmem:[#allocation3 + $0x18] sm:$0xff] %vm377_vm3, %v1296_v31  ;;  %v1285_v48 = vpop.f32.mrf.mxu0 }
 0x140   : > { %v1135_v38 = vpop.f32.mrf.mxu2  ;;  %v1063_v39 = vpop.f32.mrf.mxu1 }
 0x141   : > { %v1149_v22 = vadd.f32 %v1135_v38, %v1075_v33  ;;  %v1076_v55 = vadd.f32 %v1063_v39, %v1002_v5 }
 0x142   : > { %v1209_v36 = vpop.f32.mrf.mxu3 }
 0x143   : > { %v1223_v46 = vadd.f32 %v1209_v36, %v1149_v22 }
 0x145   : > { %v1297_v51 = vadd.f32 %v1283_v37, %v1223_v46 }
 0x147   : > { %1305 = vst.msk [vmem:[#allocation3 + $0x20] sm:$0xff] %vm377_vm3, %v1297_v51  ;;  %v1288_v3 = vpop.f32.mrf.mxu0 }
 0x148   : > { %v1137_v60 = vpop.f32.mrf.mxu2  ;;  %v1066_v40 = vpop.f32.mrf.mxu1 }
 0x149   : > { %v1150_v6 = vadd.f32 %v1137_v60, %v1076_v55  ;;  %v1077_v13 = vadd.f32 %v1066_v40, %v1003_v63 }
 0x14a   : > { %v1211_v21 = vpop.f32.mrf.mxu3 }
 0x14b   : > { %v1224_v19 = vadd.f32 %v1211_v21, %v1150_v6 }
 0x14d   : > { %v1298_v58 = vadd.f32 %v1285_v48, %v1224_v19 }
 0x14f   : > { %1306 = vst.msk [vmem:[#allocation3 + $0x28] sm:$0xff] %vm377_vm3, %v1298_v58  ;;  %v1290_v41 = vpop.f32.mrf.mxu0 }
 0x150   : > { %v1140_v50 = vpop.f32.mrf.mxu2  ;;  %v1068_v18 = vpop.f32.mrf.mxu1 }
 0x151   : > { %v1151_v54 = vadd.f32 %v1140_v50, %v1077_v13  ;;  %v1078_v16 = vadd.f32 %v1068_v18, %v1004_v14 }
 0x152   : > { %v1214_v44 = vpop.f32.mrf.mxu3 }
 0x153   : > { %v1225_v11 = vadd.f32 %v1214_v44, %v1151_v54 }
 0x155   : > { %v1299_v17 = vadd.f32 %v1288_v3, %v1225_v11 }
 0x157   : > { %1307 = vst.msk [vmem:[#allocation3 + $0x30] sm:$0xff] %vm377_vm3, %v1299_v17 }
 0x158   : > { %v1142_v45 = vpop.f32.mrf.mxu2 }
 0x159   : > { %v1152_v47 = vadd.f32 %v1142_v45, %v1078_v16 }
 0x15a   : > { %v1216_v4 = vpop.f32.mrf.mxu3 }
 0x15b   : > { %v1226_v61 = vadd.f32 %v1216_v4, %v1152_v47 }
 0x15d   : > { %v1300_v7 = vadd.f32 %v1290_v41, %v1226_v61 }
 0x15f   : > { %1308 = vst.msk [vmem:[#allocation3 + $0x38] sm:$0xff] %vm377_vm3, %v1300_v7 }
 0x160 PF: > { %p1514_p0 = scmp.ne.s32.totalorder %s1594_s15, 2 }
 0x162   : > { %1312 = sbr.rel (%p1514_p0) target bundleno = 368 (0x170), region = 48 }
 0x167   : > { %v1313_v8 = vld [vmem:[#allocation3] sm:$0xff]  ;;  %vm1321_vm4 = vcmask 31744   ;;  %v1314_v26 = vld [vmem:[#allocation3 + $0x8] sm:$0xff]  ;;  %v1315_v24 = vld [vmem:[#allocation3 + $0x10] sm:$0xff] }
 0x168   : > { %1322 = vst.msk [vmem:[%s1686_s8] sm:$0xff] %vm1321_vm4, %v1313_v8  ;;  %v1316_v62 = vld [vmem:[#allocation3 + $0x18] sm:$0xff]  ;;  %v1317_v59 = vld [vmem:[#allocation3 + $0x20] sm:$0xff]  ;;  %v1318_v20 = vld [vmem:[#allocation3 + $0x28] sm:$0xff] }
 0x169   : > { %1323 = vst.msk [vmem:[%s1686_s8 + $0x8] sm:$0xff] %vm1321_vm4, %v1314_v26  ;;  %v1319_v25 = vld [vmem:[#allocation3 + $0x30] sm:$0xff]  ;;  %v1320_v49 = vld [vmem:[#allocation3 + $0x38] sm:$0xff] }
 0x16a   : > { %1324 = vst.msk [vmem:[%s1686_s8 + $0x10] sm:$0xff] %vm1321_vm4, %v1315_v24 }
 0x16b   : > { %1325 = vst.msk [vmem:[%s1686_s8 + $0x18] sm:$0xff] %vm1321_vm4, %v1316_v62 }
 0x16c   : > { %1326 = vst.msk [vmem:[%s1686_s8 + $0x20] sm:$0xff] %vm1321_vm4, %v1317_v59 }
 0x16d   : > { %1327 = vst.msk [vmem:[%s1686_s8 + $0x28] sm:$0xff] %vm1321_vm4, %v1318_v20 }
 0x16e   : > { %1328 = vst.msk [vmem:[%s1686_s8 + $0x30] sm:$0xff] %vm1321_vm4, %v1319_v25 }
 0x16f   : > { %1329 = vst.msk [vmem:[%s1686_s8 + $0x38] sm:$0xff] %vm1321_vm4, %v1320_v49 }
 0x170 PF: > { %s14_s19 = sadd.s32 1, %s1610_s19   ;;  %s2165_s15 = smov %s1602_s17 }
 0x171   : > { %p11_p1 = scmp.ge.s32.totalorder %s14_s19, 14   ;;  %s2166_s16 = smov %s1606_s18 }
 0x172   : > { %s2167_s17 = smov %s2170_s20  ;;  %s2168_s18 = smov %s2174_s21 }
 0x173   :  { %13 = sbr.rel (!%p11_p1) target bundleno = 3 (0x3), region = 89 }

// kernel: module_3d_fwd.7
= control target key start
LH: loop header
LB: loop body
LE: loop exit
PB: predicated region body
PF: predicated region fallthrough
CT: control target
= control target key end

     0   :  { %s1645_s15 = smov 0   ;;  %s1647_s16 = smov 0   ;;  %s2154_s0 = inlined_call_operand.vmem [shape: f32[1,4,64,7], index: 0, kind: input, shape index: {}]   ;;  %s2155_s1 = inlined_call_operand.vmem [shape: f32[1,7], index: 1, kind: input, shape index: {}]   ;;  %s2156_s2 = inlined_call_operand.vmem [shape: f32[1,7], index: 2, kind: input, shape index: {}]   ;;  %s2157_s3 = inlined_call_operand.vmem [shape: bf16[3,9,7,4], index: 3, kind: input, shape index: {}]   ;;  %s2158_s4 = inlined_call_operand.vmem [shape: f32[1,4,64,4], index: 4, kind: output, shape index: {}]  }
   0x1   :  { %s1649_s17 = smov 0   ;;  %s1651_s18 = smov 0  }
   0x2   :  { %s1653_s19 = smov 0  }
   0x3 LB: > { %s26_s20 = sadd.s32 1, %s1608_s17  ;;  %s29_s21 = sadd.s32 1, %s1612_s18  ;;  %s1616_s19 = sphi %s1653_s19, %s14_s19   ;;  %s1612_s18 = sphi %s1651_s18, %s2162_s18   ;;  %s1608_s17 = sphi %s1649_s17, %s2161_s17   ;;  %s1604_s16 = sphi %s1647_s16, %s2160_s16   ;;  %s1600_s15 = sphi %s1645_s15, %s2159_s15  }
   0x4   : > { %p27_p0 = scmp.ge.s32.totalorder %s26_s20, 3  ;;  %p1461_p1 = scmp.ge.s32.totalorder %s1616_s19, 1 }
   0x5   : > { %p223_p2 = scmp.lt.s32.totalorder %s1616_s19, 13 }
   0x6   : > { %s2164_s20 = smov (%p27_p0, %s26_s20), 0  ;;  %s2166_s21 = smov (!%p27_p0, %s29_s21), %s1612_s18 }
   0x7   : > { %p224_p3 = pnand %p1461_p1, %p223_p2  ;;  %p31_p4 = scmp.ge.s32.totalorder %s2166_s21, 4 }
   0x8   : > { %s268_s22 = sadd.s32 (!%p224_p3), %s1600_s15, %s1604_s16  ;;  %p289_p5 = scmp.lt.s32.totalorder (!%p224_p3), %s1600_s15, 2 }
   0x9   : > { %s2168_s21 = smov (%p31_p4, %s2166_s21), 0  ;;  %227 = sbr.rel (%p224_p3) target bundleno = 368 (0x170), region = 36 }
   0xa   : > { %s1679_s23 = sadd.s32 (!%p224_p3), 4294967295, %s268_s22  ;;  %p296_p8 = scmp.lt.s32.totalorder (!%p224_p3), %s1604_s16, 3 }
   0xb   : > { %p270_p6 = scmp.gt.s32.totalorder (!%p224_p3), %s1679_s23, 0  ;;  %p1463_p7 = scmp.lt.s32.totalorder (!%p224_p3), %s1679_s23, 3 }
   0xc   : > { %p1473_p10 = scmp.ne.s32.totalorder (!%p224_p3), %s1600_s15, 0 }
   0xe   : > { %s290_s24 = scalar_select %p289_p5, %s1600_s15, 2 }
   0xf   : > { %s271_s25 = scalar_select %p270_p6, %s1679_s23, 0 }
  0x10   : > { %s1533_s26 = smul.u32 36, %s290_s24  ;;  %s2172_s16 = smov (!%p296_p8, %s1604_s16), 3 }
  0x11   : > { %s2170_s25 = smov (!%p1463_p7, %s271_s25), 3  ;;  %s1529_s30 = sshll.u32 %s2172_s16, 6 }
  0x12   : > { %s1688_s29 = scalar_lea.vmem %s2157_s3, %s1533_s26  ;;  %p276_p9 = scmp.lt.s32.totalorder %s2170_s25, 3 }
  0x13   : > { %s1693_s8 = scalar_lea.vmem %s2158_s4, %s1529_s30  ;;  %307 = sbr.rel (%p1473_p10) target bundleno = 44 (0x2c), region = 40 }
  0x14   : > { %s2174_s25 = smov (!%p276_p9, %s2170_s25), 3 }
  0x15   : > { %s1528_s5 = sshll.u32 %s2174_s25, 6 }
  0x16   : > { %s1698_s11 = scalar_lea.vmem %s2154_s0, %s1528_s5 }
  0x18   : > { %vm308_vm0 = vcmask 56320   ;;  %v1618_v0 = vmov 0.0   ;;  %vm319_vm1 = vcmask 50176   ;;  %vm321_vm2 = vcmask 31744  }
  0x19   : > { %309 = vst.msk [vmem:[#allocation2] sm:$0xff] %vm308_vm0, %v1618_v0 }
  0x1a   : > { %310 = vst.msk [vmem:[#allocation2 + $0x8] sm:$0xff] %vm308_vm0, %v1618_v0 }
  0x1b   : > { %311 = vst.msk [vmem:[#allocation2 + $0x10] sm:$0xff] %vm308_vm0, %v1618_v0 }
  0x1c   : > { %312 = vst.msk [vmem:[#allocation2 + $0x18] sm:$0xff] %vm308_vm0, %v1618_v0 }
  0x1d   : > { %313 = vst.msk [vmem:[#allocation2 + $0x20] sm:$0xff] %vm308_vm0, %v1618_v0 }
  0x1e   : > { %314 = vst.msk [vmem:[#allocation2 + $0x28] sm:$0xff] %vm308_vm0, %v1618_v0 }
  0x1f   : > { %315 = vst.msk [vmem:[#allocation2 + $0x30] sm:$0xff] %vm308_vm0, %v1618_v0 }
  0x20   : > { %316 = vst.msk [vmem:[#allocation2 + $0x38] sm:$0xff] %vm308_vm0, %v1618_v0 }
  0x21   : > { %317 = vst.msk [vmem:[#allocation2 + $0x40] sm:$0xff] %vm308_vm0, %v1618_v0 }
  0x22   : > { %318 = vst.msk [vmem:[#allocation2 + $0x48] sm:$0xff] %vm308_vm0, %v1618_v0 }
  0x23   : > { %320 = vst.msk [vmem:[#allocation2 + $0x50] sm:$0x3] %vm319_vm1, %v1618_v0 }
  0x24   : > { %322 = vst.msk [vmem:[#allocation3] sm:$0xff] %vm321_vm2, %v1618_v0 }
  0x25   : > { %323 = vst.msk [vmem:[#allocation3 + $0x8] sm:$0xff] %vm321_vm2, %v1618_v0 }
  0x26   : > { %324 = vst.msk [vmem:[#allocation3 + $0x10] sm:$0xff] %vm321_vm2, %v1618_v0 }
  0x27   : > { %325 = vst.msk [vmem:[#allocation3 + $0x18] sm:$0xff] %vm321_vm2, %v1618_v0 }
  0x28   : > { %326 = vst.msk [vmem:[#allocation3 + $0x20] sm:$0xff] %vm321_vm2, %v1618_v0 }
  0x29   : > { %327 = vst.msk [vmem:[#allocation3 + $0x28] sm:$0xff] %vm321_vm2, %v1618_v0 }
  0x2a   : > { %328 = vst.msk [vmem:[#allocation3 + $0x30] sm:$0xff] %vm321_vm2, %v1618_v0 }
  0x2b   : > { %329 = vst.msk [vmem:[#allocation3 + $0x38] sm:$0xff] %vm321_vm2, %v1618_v0 }
  0x2c PF: > { %p332_p11 = scmp.ge.s32.totalorder %s1679_s23, 0  ;;  %p333_p12 = scmp.lt.s32.totalorder %s1679_s23, 4 }
  0x2e   : > { %p334_p13 = pnand %p333_p12, %p332_p11 }
  0x30   : > { %337 = sbr.rel (%p334_p13) target bundleno = 352 (0x160), region = 44 }
  0x35   : > { %v624_v1 = vld [vmem:[%s1688_s29] sm:$0xf]  ;;  %vm637_vm3 = vcmask 1042432   ;;  %vm638_vm4 = vcmask 1043456   ;;  %v387_v3 = vlaneseq  ;;  %v1619_v4 = vmov 65535   ;;  %v339_v6 = vld [vmem:[%s1698_s11 + $0x8] sm:$0xff] }
  0x36   : > { %v338_v2 = vld [vmem:[%s1698_s11] sm:$0xff]  ;;  %v639_v5 = vsel %vm637_vm3, 4294967295, %v1619_v4  ;;  %v340_v7 = vld [vmem:[%s1698_s11 + $0x10] sm:$0xff]  ;;  %v341_v13 = vld [vmem:[%s1698_s11 + $0x18] sm:$0xff]  ;;  %vm378_vm5 = vcmask 56320  }
  0x37   : > { %v1707_v8 = vsel %vm638_vm4, %v639_v5, 0  ;;  %v1712_v9 = vld [vmem:[%s2155_s1] ss:$0 sm:$0xff]  ;;  %v1714_v10 = vshrl.u32 %v387_v3, 7  ;;  %v343_v30 = vld [vmem:[%s1698_s11 + $0x28] sm:$0xff]  ;;  %v344_v31 = vld [vmem:[%s1698_s11 + $0x30] sm:$0xff] }
  0x38   : > { %v642_v11 = vand.u32 %v1707_v8, %v624_v1  ;;  %v1720_v12 = vld [vmem:[%s2156_s2] ss:$0 sm:$0xff]  ;;  %v350_v15 = vmul.f32 %v1712_v9, %v338_v2  ;;  %v351_v16 = vmul.f32 %v1712_v9, %v339_v6  ;;  %v352_v17 = vmul.f32 %v1712_v9, %v340_v7  ;;  %v1484_v38 = vld [vmem:[%s1688_s29 + $0x8] sm:$0xf]  ;;  %v1489_v46 = vld [vmem:[%s1688_s29 + $0xc] sm:$0xf] }
  0x39   : > { %v342_v14 = vld [vmem:[%s1698_s11 + $0x20] sm:$0xff]  ;;  %v1728_v18 = vadd.s32 16, %v1714_v10  ;;  %v1731_v19 = vadd.s32 24, %v1714_v10  ;;  %v353_v20 = vmul.f32 %v1712_v9, %v341_v13  ;;  %v1736_v22 = vadd.s32 32, %v1714_v10  ;;  %v1494_v52 = vld [vmem:[%s1688_s29 + $0x10] sm:$0xf] }
  0x3a   : > { %1530 = vmatpush.bf16.msra.mxu1 %v642_v11  ;;  %1531 = vmatpush.bf16.msra.mxu2 %v642_v11  ;;  %v354_v21 = vmul.f32 %v1712_v9, %v342_v14  ;;  %v362_v23 = vadd.f32 %v1720_v12, %v350_v15  ;;  %v363_v24 = vadd.f32 %v1720_v12, %v351_v16  ;;  %v1745_v29 = vadd.s32 40, %v1714_v10  ;;  %v1479_v51 = vld [vmem:[%s1688_s29 + $0x4] sm:$0xf]  ;;  %v1504_v6 = vld [vmem:[%s1688_s29 + $0x18] sm:$0xf] }
  0x3b   : > { %1532 = vmatpush.bf16.msra.mxu3 %v642_v11  ;;  %651 = vmatpush.bf16.msra.mxu0 %v642_v11  ;;  %v364_v25 = vadd.f32 %v1720_v12, %v352_v17  ;;  %v414_v26 = vand.u32 7, %v1728_v18  ;;  %v365_v27 = vadd.f32 %v1720_v12, %v353_v20  ;;  %v421_v35 = vand.u32 7, %v1731_v19  ;;  %v588_v1 = vld [vmem:[#allocation2] sm:$0xff] }
  0x3c   : > { %v366_v28 = vadd.f32 %v1720_v12, %v354_v21  ;;  %v370_v32 = vmax.f32 %v362_v23, 0.0  ;;  %v371_v33 = vmax.f32 %v363_v24, 0.0  ;;  %v428_v37 = vand.u32 7, %v1736_v22 }
  0x3d   : > { %v372_v34 = vmax.f32 %v364_v25, 0.0  ;;  %v373_v36 = vmax.f32 %v365_v27, 0.0  ;;  %v435_v40 = vand.u32 7, %v1745_v29  ;;  %v355_v41 = vmul.f32 %v1712_v9, %v343_v30  ;;  %v1499_v30 = vld [vmem:[%s1688_s29 + $0x14] sm:$0xf] }
  0x3e   : > { %379 = vst.msk [vmem:[#allocation2 + $0x9] sm:$0xff] %vm378_vm5, %v370_v32  ;;  %v374_v39 = vmax.f32 %v366_v28, 0.0  ;;  %v356_v42 = vmul.f32 %v1712_v9, %v344_v31  ;;  %v1759_v43 = vadd.s32 4294967295, %v414_v26  ;;  %v1762_v44 = vadd.s32 48, %v1714_v10 }
  0x3f   : > { %380 = vst.msk [vmem:[#allocation2 + $0x11] sm:$0xff] %vm378_vm5, %v371_v33  ;;  %v1765_v45 = vadd.s32 56, %v1714_v10  ;;  %v1771_v47 = vadd.s32 4294967295, %v421_v35  ;;  %v367_v48 = vadd.f32 %v1720_v12, %v355_v41  ;;  %v822_v50 = vand.u32 %v1484_v38, %v1707_v8  ;;  %v1509_v33 = vld [vmem:[%s1688_s29 + $0x1c] sm:$0xf] }
  0x40   : > { %381 = vst.msk [vmem:[#allocation2 + $0x19] sm:$0xff] %vm378_vm5, %v372_v34  ;;  %v368_v49 = vadd.f32 %v1720_v12, %v356_v42  ;;  %v1781_v53 = vadd.s32 4294967295, %v428_v37  ;;  %v1785_v54 = vadd.s32 4294967295, %v435_v40  ;;  %v442_v55 = vand.u32 7, %v1762_v44  ;;  %v1514_v34 = vld [vmem:[%s1688_s29 + $0x20] sm:$0xf] }
  0x41   : > { %382 = vst.msk [vmem:[#allocation2 + $0x21] sm:$0xff] %vm378_vm5, %v373_v36  ;;  %v1789_v56 = vadd.s32 8, %v1714_v10  ;;  %v375_v57 = vmax.f32 %v367_v48, 0.0  ;;  %v449_v59 = vand.u32 7, %v1765_v45  ;;  %831 = vmatpush.bf16.msrb.mxu2 %v822_v50  ;;  %v400_v60 = vand.u32 7, %v1714_v10 }
  0x42   : > { %383 = vst.msk [vmem:[#allocation2 + $0x29] sm:$0xff] %vm378_vm5, %v374_v39  ;;  %v376_v58 = vmax.f32 %v368_v49, 0.0  ;;  %vm502_vm6 = vcmp.ge.s32.totalorder %v1759_v43, 0  ;;  %v896_v62 = vand.u32 %v1489_v46, %v1707_v8  ;;  %v1800_v63 = vadd.s32 4294967295, %v442_v55 }
  0x43   : > { %v407_v61 = vand.u32 7, %v1789_v56  ;;  %384 = vst.msk [vmem:[#allocation2 + $0x31] sm:$0xff] %vm378_vm5, %v375_v57  ;;  %v1802_v0 = vadd.s32 4294967295, %v400_v60  ;;  %v732_v2 = vand.u32 %v1479_v51, %v1707_v8  ;;  %v970_v3 = vand.u32 %v1494_v52, %v1707_v8 }
  0x44   : > { %vm503_vm7 = vcmp.ge.s32.totalorder %v1771_v47, 0  ;;  %385 = vst.msk [vmem:[#allocation2 + $0x39] sm:$0xff] %vm378_vm5, %v376_v58  ;;  %905 = vmatpush.bf16.msrb.mxu3 %v896_v62  ;;  %vm504_vm8 = vcmp.ge.s32.totalorder %v1781_v53, 0  ;;  %vm505_vm9 = vcmp.ge.s32.totalorder %v1785_v54, 0  ;;  %v1815_v10 = vadd.s32 4294967295, %v449_v59 }
  0x45   : > { %v1808_v4 = vadd.s32 4294967295, %v407_v61  ;;  %v589_v5 = vld [vmem:[#allocation2 + $0x8] sm:$0xff]  ;;  %vm500_vm10 = vcmp.ge.s32.totalorder %v1802_v0, 0  ;;  %741 = vmatpush.bf16.msrb.mxu1 %v732_v2  ;;  %979 = vmatpush.bf16.msrb.mxu0 %v970_v3  ;;  %vm506_vm12 = vcmp.ge.s32.totalorder %v1800_v63, 0  ;;  %v1118_v32 = vand.u32 %v1504_v6, %v1707_v8 }
  0x46   : > { %v590_v7 = vld [vmem:[#allocation2 + $0x10] sm:$0xff]  ;;  %v612_v14 = vsel %vm500_vm10, %v588_v1, 0.0  ;;  %vm507_vm13 = vcmp.ge.s32.totalorder %v1815_v10, 0  ;;  %v1044_v42 = vand.u32 %v1499_v30, %v1707_v8  ;;  %v1192_v48 = vand.u32 %v1509_v33, %v1707_v8  ;;  %v771_v56 = vld [vmem:[#allocation2 + $0x2] sm:$0xff] }
  0x47   : > { %v1818_v11 = vld [vmem:[#allocation2 + $0x18] sm:$0xff]  ;;  %v614_v13 = vsel %vm502_vm6, %v590_v7, 0.0  ;;  %vm501_vm11 = vcmp.ge.s32.totalorder %v1808_v4, 0  ;;  %v1827_v15 = vsel %vm500_vm10, %v590_v7, 0.0  ;;  %v1266_v49 = vand.u32 %v1514_v34, %v1707_v8  ;;  %v1880_v57 = vld [vmem:[#allocation2 + $0xa] sm:$0xff]  ;;  %v681_v8 = vld [vmem:[#allocation2 + $0x1] sm:$0xff] }
  0x48   : > { %v615_v16 = vsel %vm503_vm7, %v1818_v11, 0.0  ;;  %v1832_v17 = vld [vmem:[#allocation2 + $0x20] sm:$0xff]  ;;  %v613_v20 = vsel %vm501_vm11, %v589_v5, 0.0  ;;  %v1840_v21 = vsel %vm501_vm11, %v1818_v11, 0.0  ;;  %v1873_v51 = vadd.s32 1, %v400_v60  ;;  %v682_v58 = vld [vmem:[#allocation2 + $0x9] sm:$0xff] }
  0x49   : > { %v621_v23 = vpack.c.bf16 %v615_v16, %v614_v13  ;;  %v1842_v24 = vld [vmem:[#allocation2 + $0x28] sm:$0xff]  ;;  %v616_v25 = vsel %vm504_vm8, %v1832_v17, 0.0  ;;  %v620_v27 = vpack.c.bf16 %v613_v20, %v612_v14  ;;  %v1099_v28 = vpack.c.bf16 %v1840_v21, %v1827_v15  ;;  %v936_v62 = vld [vmem:[#allocation2 + $0x11] sm:$0xff] }
  0x4a   : > { %v617_v31 = vsel %vm505_vm9, %v1842_v24, 0.0  ;;  %v1858_v38 = vld [vmem:[#allocation2 + $0x30] sm:$0xff]  ;;  %v1875_v52 = vadd.s32 1, %v407_v61  ;;  %vm564_vm14 = vcmp.lt.s32.totalorder %v1873_v51, 8  ;;  %v713_v1 = vpack.c.bf16 %v682_v58, %v681_v8  ;;  %v345_v16 = vld [vmem:[%s1698_s11 + $0x38] sm:$0xff] }
  0x4b   : > { %1476 = vmatmul.msk.bf16.vlgmr.msra.gmra.mxu1 %vm378_vm5, %v621_v23  ;;  %v622_v36 = vpack.c.bf16 %v617_v31, %v616_v25  ;;  %1475 = vmatmul.msk.bf16.vlgmr.msra.gmra.mxu0 %vm378_vm5, %v620_v27  ;;  %v1861_v39 = vld [vmem:[#allocation2 + $0x38] sm:$0xff]  ;;  %v618_v41 = vsel %vm506_vm12, %v1858_v38, 0.0  ;;  %v795_v60 = vsel %vm564_vm14, %v771_v56, 0.0  ;;  %v951_v2 = vpack.c.bf16 %v936_v62, %v682_v58  ;;  %v938_v25 = vld [vmem:[#allocation2 + $0x21] sm:$0xff] }
  0x4c   : > { %v619_v46 = vsel %vm507_vm13, %v1861_v39, 0.0  ;;  %1053 = vmatpush.bf16.msra.mxu1 %v1044_v42  ;;  %1275 = vmatpush.bf16.msra.mxu0 %v1266_v49  ;;  %vm565_vm15 = vcmp.lt.s32.totalorder %v1875_v52, 8  ;;  %v869_v6 = vsel %vm500_vm10, %v589_v5, 0.0  ;;  %v870_v13 = vsel %vm501_vm11, %v590_v7, 0.0  ;;  %v773_v5 = vld [vmem:[#allocation2 + $0x12] sm:$0xff]  ;;  %v1908_v7 = vld [vmem:[#allocation2 + $0x1a] sm:$0xff] }
  0x4d   : > { %1477 = vmatmul.msk.bf16.vlgmr.msra.gmra.mxu2 %vm378_vm5, %v622_v36  ;;  %v623_v50 = vpack.c.bf16 %v619_v46, %v618_v41  ;;  %v796_v61 = vsel %vm565_vm15, %v1880_v57, 0.0  ;;  %v877_v14 = vpack.c.bf16 %v870_v13, %v869_v6  ;;  %v1897_v20 = vadd.s32 1, %v414_v26  ;;  %v684_v26 = vld [vmem:[#allocation2 + $0x19] sm:$0xff]  ;;  %v776_v36 = vld [vmem:[#allocation2 + $0x2a] sm:$0xff] }
  0x4e   : > { %1127 = vmatpush.bf16.msra.mxu2 %v1118_v32  ;;  %v803_v3 = vpack.c.bf16 %v796_v61, %v795_v60  ;;  %v1901_v23 = vadd.s32 1, %v421_v35  ;;  %v357_v0 = vmul.f32 %v1712_v9, %v345_v16  ;;  %v952_v35 = vpack.c.bf16 %v938_v25, %v684_v26  ;;  %v686_v41 = vld [vmem:[#allocation2 + $0x29] sm:$0xff]  ;;  %v940_v42 = vld [vmem:[#allocation2 + $0x31] sm:$0xff]  ;;  %v688_v60 = vld [vmem:[#allocation2 + $0x39] sm:$0xff] }
  0x4f   : > { %1478 = vmatmul.msk.bf16.vlgmr.msra.gmra.mxu3 %vm378_vm5, %v623_v50  ;;  %vm566_vm0 = vcmp.lt.s32.totalorder %v1897_v20, 8  ;;  %v871_v30 = vsel %vm502_vm6, %v1818_v11, 0.0  ;;  %v872_v31 = vsel %vm503_vm7, %v1832_v17, 0.0  ;;  %v1927_v33 = vadd.s32 1, %v428_v37  ;;  %v775_v11 = vld [vmem:[#allocation2 + $0x22] sm:$0xff]  ;;  %v777_v58 = vld [vmem:[#allocation2 + $0x32] sm:$0xff] }
  0x50   : > { %1201 = vmatpush.bf16.msra.mxu3 %v1192_v48  ;;  %v369_v4 = vadd.f32 %v1720_v12, %v357_v0  ;;  %vm567_vm1 = vcmp.lt.s32.totalorder %v1901_v23, 8  ;;  %v797_v19 = vsel %vm566_vm0, %v773_v5, 0.0  ;;  %v714_v12 = vpack.c.bf16 %v684_v26, %v936_v62 }
  0x51   : > { %v798_v9 = vsel %vm567_vm1, %v1908_v7, 0.0  ;;  %v878_v32 = vpack.c.bf16 %v872_v31, %v871_v30  ;;  %v1931_v34 = vadd.s32 1, %v435_v40  ;;  %vm568_vm2 = vcmp.lt.s32.totalorder %v1927_v33, 8 }
  0x52   : > { %v377_v18 = vmax.f32 %v369_v4, 0.0  ;;  %v804_v27 = vpack.c.bf16 %v798_v9, %v797_v19  ;;  %v799_v46 = vsel %vm568_vm2, %v775_v11, 0.0  ;;  %v715_v37 = vpack.c.bf16 %v686_v41, %v938_v25 }
  0x53   : > { %vm569_vm3 = vcmp.lt.s32.totalorder %v1931_v34, 8  ;;  %v953_v29 = vpack.c.bf16 %v940_v42, %v686_v41  ;;  %v873_v48 = vsel %vm504_vm8, %v1842_v24, 0.0  ;;  %v874_v49 = vsel %vm505_vm9, %v1858_v38, 0.0 }
  0x54   : > { %386 = vst.msk [vmem:[#allocation2 + $0x41] sm:$0xff] %vm378_vm5, %v377_v18  ;;  %v800_v22 = vsel %vm569_vm3, %v776_v36, 0.0  ;;  %v879_v50 = vpack.c.bf16 %v874_v49, %v873_v48  ;;  %v1951_v56 = vadd.s32 1, %v442_v55  ;;  %v1955_v8 = vadd.s32 1, %v449_v59 }
  0x55   : > { %v805_v40 = vpack.c.bf16 %v800_v22, %v799_v46  ;;  %v716_v59 = vpack.c.bf16 %v688_v60, %v940_v42  ;;  %v1018_v16 = vsel %vm565_vm15, %v773_v5, 0.0  ;;  %v1239_v0 = vsel %vm564_vm14, %v773_v5, 0.0  ;;  %v1164_v42 = vld [vmem:[#allocation2 + $0x49] sm:$0xff] }
  0x56   : > { %vm570_vm4 = vcmp.lt.s32.totalorder %v1951_v56, 8  ;;  %vm571_vm10 = vcmp.lt.s32.totalorder %v1955_v8, 8  ;;  %v1240_v4 = vsel %vm565_vm15, %v1908_v7, 0.0  ;;  %v1019_v51 = vsel %vm566_vm0, %v1908_v7, 0.0 }
  0x57   : > { %v801_v44 = vsel %vm570_vm4, %v777_v58, 0.0  ;;  %v1247_v26 = vpack.c.bf16 %v1240_v4, %v1239_v0  ;;  %v1020_v52 = vsel %vm567_vm1, %v775_v11, 0.0  ;;  %v1242_v5 = vsel %vm567_vm1, %v776_v36, 0.0 }
  0x58   : > { %v1093_v15 = vsel %vm502_vm6, %v1832_v17, 0.0  ;;  %v1094_v21 = vsel %vm503_vm7, %v1842_v24, 0.0  ;;  %v1021_v20 = vsel %vm568_vm2, %v776_v36, 0.0  ;;  %v1022_v43 = vsel %vm569_vm3, %v777_v58, 0.0 }
  0x59   : > { %v1100_v7 = vpack.c.bf16 %v1094_v21, %v1093_v15  ;;  %v1243_v47 = vsel %vm568_vm2, %v777_v58, 0.0  ;;  %v1095_v24 = vsel %vm504_vm8, %v1858_v38, 0.0  ;;  %v1096_v23 = vsel %vm505_vm9, %v1861_v39, 0.0 }
  0x5a   : > { %v1027_v19 = vpack.c.bf16 %v1022_v43, %v1021_v20  ;;  %v581_v43 = vld [vmem:[#allocation3 + $0x8] sm:$0xff] }
  0x5b   : > { %1480 = vmatmul.msk.bf16.vlgmr.msrb.gmra.mxu1 %vm378_vm5, %v713_v1  ;;  %1495 = vmatmul.msk.bf16.vlgmr.msrb.gmra.mxu0 %vm378_vm5, %v951_v2  ;;  %v778_v62 = vld [vmem:[#allocation2 + $0x3a] sm:$0xff]  ;;  %v1090_v30 = vld [vmem:[#allocation2 + $0x48] sm:$0xff] }
  0x5c   : > { %v1960_v61 = vld [vmem:[#allocation2 + $0x41] sm:$0xff]  ;;  %v802_v55 = vsel %vm571_vm10, %v778_v62, 0.0  ;;  %v1244_v17 = vsel %vm569_vm3, %v778_v62, 0.0  ;;  %v1023_v53 = vsel %vm570_vm4, %v778_v62, 0.0 }
  0x5d   : > { %1485 = vmatmul.msk.bf16.vlgmr.msrb.gmra.mxu2 %vm378_vm5, %v803_v3  ;;  %v868_v45 = vld [vmem:[#allocation2 + $0x40] sm:$0xff]  ;;  %v954_v1 = vpack.c.bf16 %v1960_v61, %v688_v60  ;;  %v806_v2 = vpack.c.bf16 %v802_v55, %v801_v44  ;;  %v875_v3 = vsel %vm506_vm12, %v1861_v39, 0.0  ;;  %v1249_v9 = vpack.c.bf16 %v1244_v17, %v1243_v47 }
  0x5e   : > { %v876_v6 = vsel %vm507_vm13, %v868_v45, 0.0  ;;  %v1097_v31 = vsel %vm506_vm12, %v868_v45, 0.0  ;;  %v1176_v46 = vpack.c.bf16 %v1164_v42, %v1960_v61 }
  0x5f   : > { %1490 = vmatmul.msk.bf16.vlgmr.msrb.gmra.mxu3 %vm378_vm5, %v877_v14  ;;  %v880_v13 = vpack.c.bf16 %v876_v6, %v875_v3  ;;  %v1017_v14 = vsel %vm564_vm14, %v1880_v57, 0.0  ;;  %v1241_v57 = vsel %vm566_vm0, %v775_v11, 0.0 }
  0x60   : > { %v1025_v18 = vpack.c.bf16 %v1018_v16, %v1017_v14  ;;  %v1248_v25 = vpack.c.bf16 %v1242_v5, %v1241_v57  ;;  %v580_v57 = vld [vmem:[#allocation3] sm:$0xff] }
  0x6b   : > { %1481 = vmatmul.msk.bf16.gmra.mxu1 %vm378_vm5, %v714_v12  ;;  %1496 = vmatmul.msk.bf16.gmra.mxu0 %vm378_vm5, %v952_v35  ;;  %v1016_v35 = vld [vmem:[#allocation2 + $0x42] sm:$0xff] }
  0x6c   : > { %v1024_v54 = vsel %vm571_vm10, %v1016_v35, 0.0  ;;  %v1245_v38 = vsel %vm570_vm4, %v1016_v35, 0.0 }
  0x6d   : > { %1486 = vmatmul.msk.bf16.gmra.mxu2 %vm378_vm5, %v804_v27  ;;  %v1238_v27 = vld [vmem:[#allocation2 + $0x4a] sm:$0xff]  ;;  %v1028_v33 = vpack.c.bf16 %v1024_v54, %v1023_v53 }
  0x6e   : > { %v1246_v39 = vsel %vm571_vm10, %v1238_v27, 0.0 }
  0x6f   : > { %1491 = vmatmul.msk.bf16.gmra.mxu3 %vm378_vm5, %v878_v32  ;;  %v1098_v32 = vsel %vm507_vm13, %v1090_v30, 0.0  ;;  %v1250_v34 = vpack.c.bf16 %v1246_v39, %v1245_v38  ;;  %v582_v30 = vld [vmem:[#allocation3 + $0x10] sm:$0xff] }
  0x70   : > { %v1102_v41 = vpack.c.bf16 %v1098_v32, %v1097_v31 }
  0x7b   : > { %1482 = vmatmul.msk.bf16.gmra.mxu1 %vm378_vm5, %v715_v37  ;;  %1497 = vmatmul.msk.bf16.gmra.mxu0 %vm378_vm5, %v953_v29 }
  0x7d   : > { %1487 = vmatmul.msk.bf16.gmra.mxu2 %vm378_vm5, %v805_v40 }
  0x7f   : > { %1492 = vmatmul.msk.bf16.gmra.mxu3 %vm378_vm5, %v879_v50 }
  0x8b   : > { %1483 = vmatmul.msk.bf16.gmra.mxu1 %vm378_vm5, %v716_v59  ;;  %1498 = vmatmul.msk.bf16.gmra.mxu0 %vm378_vm5, %v954_v1 }
  0x8d   : > { %1488 = vmatmul.msk.bf16.gmra.mxu2 %vm378_vm5, %v806_v2 }
  0x8f   : > { %1493 = vmatmul.msk.bf16.gmra.mxu3 %vm378_vm5, %v880_v13 }
  0x9b   : > { %1500 = vmatmul.msk.bf16.vlgmr.msra.gmra.mxu1 %vm378_vm5, %v1025_v18  ;;  %1515 = vmatmul.msk.bf16.vlgmr.msra.gmra.mxu0 %vm378_vm5, %v1247_v26 }
  0x9d   : > { %1505 = vmatmul.msk.bf16.vlgmr.msra.gmra.mxu2 %vm378_vm5, %v1099_v28  ;;  %v1026_v28 = vpack.c.bf16 %v1020_v52, %v1019_v51 }
  0x9f   : > { %1510 = vmatmul.msk.bf16.vlgmr.msra.gmra.mxu3 %vm378_vm5, %v714_v12  ;;  %v1101_v12 = vpack.c.bf16 %v1096_v23, %v1095_v24 }
  0xab   : > { %1501 = vmatmul.msk.bf16.gmra.mxu1 %vm378_vm5, %v1026_v28  ;;  %1516 = vmatmul.msk.bf16.gmra.mxu0 %vm378_vm5, %v1248_v25 }
  0xad   : > { %1506 = vmatmul.msk.bf16.gmra.mxu2 %vm378_vm5, %v1100_v7 }
  0xaf   : > { %1511 = vmatmul.msk.bf16.gmra.mxu3 %vm378_vm5, %v715_v37 }
  0xbb   : > { %1502 = vmatmul.msk.bf16.gmra.mxu1 %vm378_vm5, %v1027_v19  ;;  %1517 = vmatmul.msk.bf16.gmra.mxu0 %vm378_vm5, %v1249_v9 }
  0xbd   : > { %1507 = vmatmul.msk.bf16.gmra.mxu2 %vm378_vm5, %v1101_v12 }
  0xbf   : > { %1512 = vmatmul.msk.bf16.gmra.mxu3 %vm378_vm5, %v716_v59 }
  0xc8   : > { %v2042_v11 = vpop.f32.mrf.mxu1  ;;  %v653_v36 = vpop.f32.mrf.mxu0 }
  0xc9   : > { %v673_v21 = vadd.f32 %v653_v36, %v580_v57  ;;  %v675_v39 = vadd.f32 %v2042_v11, %v582_v30 }
  0xcb   : > { %1503 = vmatmul.msk.bf16.gmra.mxu1 %vm378_vm5, %v1028_v33  ;;  %1518 = vmatmul.msk.bf16.gmra.mxu0 %vm378_vm5, %v1250_v34 }
  0xcd   : > { %1508 = vmatmul.msk.bf16.gmra.mxu2 %vm378_vm5, %v1102_v41 }
  0xcf   : > { %1513 = vmatmul.msk.bf16.gmra.mxu3 %vm378_vm5, %v1176_v46  ;;  %vm1305_vm5 = vcmask 31744  }
  0xd0   : > { %v2049_v63 = vpop.f32.mrf.mxu2  ;;  %v2051_v10 = vpop.f32.mrf.mxu1 }
  0xd1   : > { %v655_v22 = vpop.f32.mrf.mxu0 }
  0xd2   : > { %v2053_v37 = vpop.f32.mrf.mxu3  ;;  %v674_v24 = vadd.f32 %v655_v22, %v581_v43  ;;  %v583_v22 = vld [vmem:[#allocation3 + $0x18] sm:$0xff] }
  0xd8   : > { %v2055_v29 = vpop.f32.mrf.mxu2  ;;  %v743_v40 = vpop.f32.mrf.mxu1 }
  0xd9   : > { %v981_v48 = vpop.f32.mrf.mxu0  ;;  %v763_v25 = vadd.f32 %v743_v40, %v673_v21 }
  0xda   : > { %v2057_v49 = vpop.f32.mrf.mxu3 }
  0xe0   : > { %v833_v50 = vpop.f32.mrf.mxu2  ;;  %v745_v56 = vpop.f32.mrf.mxu1 }
  0xe1   : > { %v983_v8 = vpop.f32.mrf.mxu0  ;;  %v853_v20 = vadd.f32 %v833_v50, %v763_v25  ;;  %v764_v9 = vadd.f32 %v745_v56, %v674_v24 }
  0xe2   : > { %v907_v58 = vpop.f32.mrf.mxu3 }
  0xe3   : > { %v927_v23 = vadd.f32 %v907_v58, %v853_v20  ;;  %v676_v58 = vadd.f32 %v2051_v10, %v583_v22  ;;  %v584_v20 = vld [vmem:[#allocation3 + $0x20] sm:$0xff] }
  0xe5   : > { %v1001_v27 = vadd.f32 %v981_v48, %v927_v23  ;;  %v677_v23 = vadd.f32 %v2049_v63, %v584_v20 }
  0xe8   : > { %v835_v62 = vpop.f32.mrf.mxu2  ;;  %v748_v60 = vpop.f32.mrf.mxu1 }
  0xe9   : > { %v2059_v61 = vpop.f32.mrf.mxu0  ;;  %v854_v35 = vadd.f32 %v835_v62, %v764_v9  ;;  %v765_v34 = vadd.f32 %v748_v60, %v675_v39 }
  0xea   : > { %v909_v44 = vpop.f32.mrf.mxu3 }
  0xeb   : > { %v928_v31 = vadd.f32 %v909_v44, %v854_v35 }
  0xed   : > { %v1002_v46 = vadd.f32 %v983_v8, %v928_v31 }
  0xf0   : > { %v838_v55 = vpop.f32.mrf.mxu2  ;;  %v750_v45 = vpop.f32.mrf.mxu1 }
  0xf1   : > { %v2061_v59 = vpop.f32.mrf.mxu0  ;;  %v855_v42 = vadd.f32 %v838_v55, %v765_v34  ;;  %v766_v44 = vadd.f32 %v750_v45, %v676_v58 }
  0xf2   : > { %v912_v1 = vpop.f32.mrf.mxu3 }
  0xf3   : > { %v929_v62 = vadd.f32 %v912_v1, %v855_v42 }
  0xf5   : > { %v1003_v55 = vadd.f32 %v2059_v61, %v929_v62 }
  0xf8   : > { %v840_v2 = vpop.f32.mrf.mxu2  ;;  %v2063_v3 = vpop.f32.mrf.mxu1 }
  0xf9   : > { %v2065_v6 = vpop.f32.mrf.mxu0  ;;  %v856_v25 = vadd.f32 %v840_v2, %v766_v44  ;;  %v767_v45 = vadd.f32 %v2063_v3, %v677_v23 }
  0xfa   : > { %v2067_v13 = vpop.f32.mrf.mxu3 }
  0xfb   : > { %v930_v10 = vadd.f32 %v2067_v13, %v856_v25 }
  0xfd   : > { %v1004_v61 = vadd.f32 %v2061_v59, %v930_v10 }
 0x100   : > { %v2069_v14 = vpop.f32.mrf.mxu2  ;;  %v2071_v16 = vpop.f32.mrf.mxu1 }
 0x101   : > { %v2073_v0 = vpop.f32.mrf.mxu0  ;;  %v857_v2 = vadd.f32 %v2069_v14, %v767_v45 }
 0x102   : > { %v2075_v4 = vpop.f32.mrf.mxu3 }
 0x103   : > { %v931_v13 = vadd.f32 %v2075_v4, %v857_v2 }
 0x105   : > { %v1005_v59 = vadd.f32 %v2065_v6, %v931_v13 }
 0x108   : > { %v2077_v18 = vpop.f32.mrf.mxu2  ;;  %v2079_v26 = vpop.f32.mrf.mxu1 }
 0x109   : > { %v2081_v51 = vpop.f32.mrf.mxu0 }
 0x10a   : > { %v2083_v52 = vpop.f32.mrf.mxu3 }
 0x110   : > { %v2085_v5 = vpop.f32.mrf.mxu2  ;;  %v2087_v15 = vpop.f32.mrf.mxu1 }
 0x111   : > { %v2089_v28 = vpop.f32.mrf.mxu0 }
 0x112   : > { %v2091_v7 = vpop.f32.mrf.mxu3 }
 0x118   : > { %v2093_v47 = vpop.f32.mrf.mxu2  ;;  %v1055_v17 = vpop.f32.mrf.mxu1 }
 0x119   : > { %v1277_v19 = vpop.f32.mrf.mxu0  ;;  %v1075_v53 = vadd.f32 %v1055_v17, %v1001_v27  ;;  %v585_v27 = vld [vmem:[#allocation3 + $0x28] sm:$0xff] }
 0x11a   : > { %v2095_v12 = vpop.f32.mrf.mxu3  ;;  %v678_v63 = vadd.f32 %v2055_v29, %v585_v27 }
 0x11c   : > { %v768_v3 = vadd.f32 %v2071_v16, %v678_v63 }
 0x11e   : > { %v858_v14 = vadd.f32 %v2077_v18, %v768_v3 }
 0x120   : > { %v1129_v54 = vpop.f32.mrf.mxu2  ;;  %v1057_v38 = vpop.f32.mrf.mxu1  ;;  %v932_v4 = vadd.f32 %v2083_v52, %v858_v14 }
 0x121   : > { %v1149_v32 = vadd.f32 %v1129_v54, %v1075_v53  ;;  %v1279_v33 = vpop.f32.mrf.mxu0  ;;  %v1076_v50 = vadd.f32 %v1057_v38, %v1002_v46 }
 0x122   : > { %v1203_v36 = vpop.f32.mrf.mxu3  ;;  %v1006_v6 = vadd.f32 %v2073_v0, %v932_v4 }
 0x123   : > { %v1223_v41 = vadd.f32 %v1203_v36, %v1149_v32 }
 0x125   : > { %v1297_v40 = vadd.f32 %v1277_v19, %v1223_v41 }
 0x127   : > { %1306 = vst.msk [vmem:[#allocation3] sm:$0xff] %vm1305_vm5, %v1297_v40 }
 0x128   : > { %v1131_v48 = vpop.f32.mrf.mxu2  ;;  %v1060_v56 = vpop.f32.mrf.mxu1 }
 0x129   : > { %v1150_v11 = vadd.f32 %v1131_v48, %v1076_v50  ;;  %v1282_v21 = vpop.f32.mrf.mxu0  ;;  %v1077_v43 = vadd.f32 %v1060_v56, %v1003_v55  ;;  %v587_v48 = vld [vmem:[#allocation3 + $0x38] sm:$0xff] }
 0x12a   : > { %v1205_v57 = vpop.f32.mrf.mxu3 }
 0x12b   : > { %v1224_v60 = vadd.f32 %v1205_v57, %v1150_v11  ;;  %v680_v11 = vadd.f32 %v2057_v49, %v587_v48 }
 0x12d   : > { %v1298_v8 = vadd.f32 %v1279_v33, %v1224_v60  ;;  %v586_v33 = vld [vmem:[#allocation3 + $0x30] sm:$0xff] }
 0x12e   : > { %v679_v29 = vadd.f32 %v2053_v37, %v586_v33 }
 0x12f   : > { %1307 = vst.msk [vmem:[#allocation3 + $0x8] sm:$0xff] %vm1305_vm5, %v1298_v8 }
 0x130   : > { %v1134_v17 = vpop.f32.mrf.mxu2  ;;  %v1062_v24 = vpop.f32.mrf.mxu1  ;;  %v769_v16 = vadd.f32 %v2079_v26, %v679_v29  ;;  %v770_v26 = vadd.f32 %v2087_v15, %v680_v11 }
 0x131   : > { %v1151_v1 = vadd.f32 %v1134_v17, %v1077_v43  ;;  %v1284_v35 = vpop.f32.mrf.mxu0  ;;  %v1078_v53 = vadd.f32 %v1062_v24, %v1004_v61 }
 0x132   : > { %v1208_v19 = vpop.f32.mrf.mxu3  ;;  %v859_v18 = vadd.f32 %v2085_v5, %v769_v16  ;;  %v860_v5 = vadd.f32 %v2093_v47, %v770_v26 }
 0x133   : > { %v1225_v9 = vadd.f32 %v1208_v19, %v1151_v1 }
 0x134   : > { %v933_v37 = vadd.f32 %v2091_v7, %v859_v18  ;;  %v934_v49 = vadd.f32 %v2095_v12, %v860_v5 }
 0x135   : > { %v1299_v30 = vadd.f32 %v1282_v21, %v1225_v9 }
 0x136   : > { %v1007_v0 = vadd.f32 %v2081_v51, %v933_v37  ;;  %v1008_v15 = vadd.f32 %v2089_v28, %v934_v49 }
 0x137   : > { %1308 = vst.msk [vmem:[#allocation3 + $0x10] sm:$0xff] %vm1305_vm5, %v1299_v30 }
 0x138   : > { %v1136_v54 = vpop.f32.mrf.mxu2  ;;  %v1065_v38 = vpop.f32.mrf.mxu1 }
 0x139   : > { %v1152_v39 = vadd.f32 %v1136_v54, %v1078_v53  ;;  %v1079_v36 = vadd.f32 %v1065_v38, %v1005_v59  ;;  %v1287_v41 = vpop.f32.mrf.mxu0 }
 0x13a   : > { %v1210_v31 = vpop.f32.mrf.mxu3 }
 0x13b   : > { %v1226_v32 = vadd.f32 %v1210_v31, %v1152_v39 }
 0x13d   : > { %v1300_v34 = vadd.f32 %v1284_v35, %v1226_v32 }
 0x13f   : > { %1309 = vst.msk [vmem:[#allocation3 + $0x18] sm:$0xff] %vm1305_vm5, %v1300_v34 }
 0x140   : > { %v1139_v42 = vpop.f32.mrf.mxu2  ;;  %v1067_v46 = vpop.f32.mrf.mxu1 }
 0x141   : > { %v1153_v22 = vadd.f32 %v1139_v42, %v1079_v36  ;;  %v1080_v58 = vadd.f32 %v1067_v46, %v1006_v6  ;;  %v1289_v52 = vpop.f32.mrf.mxu0 }
 0x142   : > { %v1213_v40 = vpop.f32.mrf.mxu3 }
 0x143   : > { %v1227_v50 = vadd.f32 %v1213_v40, %v1153_v22 }
 0x145   : > { %v1301_v56 = vadd.f32 %v1287_v41, %v1227_v50 }
 0x147   : > { %1310 = vst.msk [vmem:[#allocation3 + $0x20] sm:$0xff] %vm1305_vm5, %v1301_v56 }
 0x148   : > { %v1141_v62 = vpop.f32.mrf.mxu2  ;;  %v1070_v57 = vpop.f32.mrf.mxu1 }
 0x149   : > { %v1154_v44 = vadd.f32 %v1141_v62, %v1080_v58  ;;  %v1081_v55 = vadd.f32 %v1070_v57, %v1007_v0  ;;  %v1292_v7 = vpop.f32.mrf.mxu0 }
 0x14a   : > { %v1215_v21 = vpop.f32.mrf.mxu3 }
 0x14b   : > { %v1228_v60 = vadd.f32 %v1215_v21, %v1154_v44 }
 0x14d   : > { %v1302_v25 = vadd.f32 %v1289_v52, %v1228_v60 }
 0x14f   : > { %1311 = vst.msk [vmem:[#allocation3 + $0x28] sm:$0xff] %vm1305_vm5, %v1302_v25 }
 0x150   : > { %v1144_v20 = vpop.f32.mrf.mxu2  ;;  %v1072_v24 = vpop.f32.mrf.mxu1 }
 0x151   : > { %v1155_v8 = vadd.f32 %v1144_v20, %v1081_v55  ;;  %v1082_v10 = vadd.f32 %v1072_v24, %v1008_v15  ;;  %v1294_v19 = vpop.f32.mrf.mxu0 }
 0x152   : > { %v1218_v43 = vpop.f32.mrf.mxu3 }
 0x153   : > { %v1229_v17 = vadd.f32 %v1218_v43, %v1155_v8 }
 0x155   : > { %v1303_v23 = vadd.f32 %v1292_v7, %v1229_v17 }
 0x157   : > { %1312 = vst.msk [vmem:[#allocation3 + $0x30] sm:$0xff] %vm1305_vm5, %v1303_v23 }
 0x158   : > { %v1146_v47 = vpop.f32.mrf.mxu2 }
 0x159   : > { %v1156_v51 = vadd.f32 %v1146_v47, %v1082_v10 }
 0x15a   : > { %v1220_v1 = vpop.f32.mrf.mxu3 }
 0x15b   : > { %v1230_v45 = vadd.f32 %v1220_v1, %v1156_v51 }
 0x15d   : > { %v1304_v9 = vadd.f32 %v1294_v19, %v1230_v45 }
 0x15f   : > { %1313 = vst.msk [vmem:[#allocation3 + $0x38] sm:$0xff] %vm1305_vm5, %v1304_v9 }
 0x160 PF: > { %p1519_p0 = scmp.ne.s32.totalorder %s1600_s15, 2 }
 0x162   : > { %1317 = sbr.rel (%p1519_p0) target bundleno = 368 (0x170), region = 48 }
 0x167   : > { %v1318_v12 = vld [vmem:[#allocation3] sm:$0xff]  ;;  %vm1326_vm6 = vcmask 31744   ;;  %v1319_v28 = vld [vmem:[#allocation3 + $0x8] sm:$0xff]  ;;  %v1320_v2 = vld [vmem:[#allocation3 + $0x10] sm:$0xff] }
 0x168   : > { %1327 = vst.msk [vmem:[%s1693_s8] sm:$0xff] %vm1326_vm6, %v1318_v12  ;;  %v1321_v61 = vld [vmem:[#allocation3 + $0x18] sm:$0xff]  ;;  %v1322_v35 = vld [vmem:[#allocation3 + $0x20] sm:$0xff]  ;;  %v1323_v27 = vld [vmem:[#allocation3 + $0x28] sm:$0xff] }
 0x169   : > { %1328 = vst.msk [vmem:[%s1693_s8 + $0x8] sm:$0xff] %vm1326_vm6, %v1319_v28  ;;  %v1324_v30 = vld [vmem:[#allocation3 + $0x30] sm:$0xff]  ;;  %v1325_v53 = vld [vmem:[#allocation3 + $0x38] sm:$0xff] }
 0x16a   : > { %1329 = vst.msk [vmem:[%s1693_s8 + $0x10] sm:$0xff] %vm1326_vm6, %v1320_v2 }
 0x16b   : > { %1330 = vst.msk [vmem:[%s1693_s8 + $0x18] sm:$0xff] %vm1326_vm6, %v1321_v61 }
 0x16c   : > { %1331 = vst.msk [vmem:[%s1693_s8 + $0x20] sm:$0xff] %vm1326_vm6, %v1322_v35 }
 0x16d   : > { %1332 = vst.msk [vmem:[%s1693_s8 + $0x28] sm:$0xff] %vm1326_vm6, %v1323_v27 }
 0x16e   : > { %1333 = vst.msk [vmem:[%s1693_s8 + $0x30] sm:$0xff] %vm1326_vm6, %v1324_v30 }
 0x16f   : > { %1334 = vst.msk [vmem:[%s1693_s8 + $0x38] sm:$0xff] %vm1326_vm6, %v1325_v53 }
 0x170 PF: > { %s14_s19 = sadd.s32 1, %s1616_s19   ;;  %s2159_s15 = smov %s1608_s17 }
 0x171   : > { %p11_p1 = scmp.ge.s32.totalorder %s14_s19, 14   ;;  %s2160_s16 = smov %s1612_s18 }
 0x172   : > { %s2161_s17 = smov %s2164_s20  ;;  %s2162_s18 = smov %s2168_s21 }
 0x173   :  { %13 = sbr.rel (!%p11_p1) target bundleno = 3 (0x3), region = 89 }

// kernel: module_3d_fwd.10
= control target key start
LH: loop header
LB: loop body
LE: loop exit
PB: predicated region body
PF: predicated region fallthrough
CT: control target
= control target key end

     0   :  { %s1638_s15 = smov 0   ;;  %s1640_s16 = smov 0   ;;  %s2160_s0 = inlined_call_operand.vmem [shape: f32[1,4,64,8], index: 0, kind: input, shape index: {}]   ;;  %s2161_s1 = inlined_call_operand.vmem [shape: f32[1,8], index: 1, kind: input, shape index: {}]   ;;  %s2162_s2 = inlined_call_operand.vmem [shape: f32[1,8], index: 2, kind: input, shape index: {}]   ;;  %s2163_s3 = inlined_call_operand.vmem [shape: bf16[3,9,8,8], index: 3, kind: input, shape index: {}]   ;;  %s2164_s4 = inlined_call_operand.vmem [shape: f32[1,4,64,8], index: 4, kind: output, shape index: {}]  }
   0x1   :  { %s1642_s17 = smov 0   ;;  %s1644_s18 = smov 0  }
   0x2   :  { %s1646_s19 = smov 0  }
   0x3 LB: > { %s26_s20 = sadd.s32 1, %s1602_s17  ;;  %s29_s21 = sadd.s32 1, %s1606_s18  ;;  %s1610_s19 = sphi %s1646_s19, %s14_s19   ;;  %s1606_s18 = sphi %s1644_s18, %s2168_s18   ;;  %s1602_s17 = sphi %s1642_s17, %s2167_s17   ;;  %s1598_s16 = sphi %s1640_s16, %s2166_s16   ;;  %s1594_s15 = sphi %s1638_s15, %s2165_s15  }
   0x4   : > { %p27_p0 = scmp.ge.s32.totalorder %s26_s20, 3  ;;  %p1456_p1 = scmp.ge.s32.totalorder %s1610_s19, 1 }
   0x5   : > { %p223_p2 = scmp.lt.s32.totalorder %s1610_s19, 13 }
   0x6   : > { %s2170_s20 = smov (%p27_p0, %s26_s20), 0  ;;  %s2172_s21 = smov (!%p27_p0, %s29_s21), %s1606_s18 }
   0x7   : > { %p224_p3 = pnand %p1456_p1, %p223_p2  ;;  %p31_p4 = scmp.ge.s32.totalorder %s2172_s21, 4 }
   0x8   : > { %s268_s22 = sadd.s32 (!%p224_p3), %s1594_s15, %s1598_s16  ;;  %p289_p5 = scmp.lt.s32.totalorder (!%p224_p3), %s1594_s15, 2 }
   0x9   : > { %s2174_s21 = smov (%p31_p4, %s2172_s21), 0  ;;  %227 = sbr.rel (%p224_p3) target bundleno = 368 (0x170), region = 36 }
   0xa   : > { %s1672_s23 = sadd.s32 (!%p224_p3), 4294967295, %s268_s22  ;;  %p296_p8 = scmp.lt.s32.totalorder (!%p224_p3), %s1598_s16, 3 }
   0xb   : > { %p270_p6 = scmp.gt.s32.totalorder (!%p224_p3), %s1672_s23, 0  ;;  %p1458_p7 = scmp.lt.s32.totalorder (!%p224_p3), %s1672_s23, 3 }
   0xc   : > { %p1468_p10 = scmp.ne.s32.totalorder (!%p224_p3), %s1594_s15, 0 }
   0xe   : > { %s290_s24 = scalar_select %p289_p5, %s1594_s15, 2 }
   0xf   : > { %s271_s25 = scalar_select %p270_p6, %s1672_s23, 0 }
  0x10   : > { %s1528_s26 = smul.u32 36, %s290_s24  ;;  %s2178_s16 = smov (!%p296_p8, %s1598_s16), 3 }
  0x11   : > { %s2176_s25 = smov (!%p1458_p7, %s271_s25), 3  ;;  %s1524_s30 = sshll.u32 %s2178_s16, 6 }
  0x12   : > { %s1681_s29 = scalar_lea.vmem %s2163_s3, %s1528_s26  ;;  %p276_p9 = scmp.lt.s32.totalorder %s2176_s25, 3 }
  0x13   : > { %s1686_s8 = scalar_lea.vmem %s2164_s4, %s1524_s30  ;;  %307 = sbr.rel (%p1468_p10) target bundleno = 44 (0x2c), region = 40 }
  0x14   : > { %s2180_s25 = smov (!%p276_p9, %s2176_s25), 3 }
  0x15   : > { %s1523_s5 = sshll.u32 %s2180_s25, 6 }
  0x16   : > { %s1691_s11 = scalar_lea.vmem %s2160_s0, %s1523_s5 }
  0x18   : > { %vm308_vm0 = vcmask 64512   ;;  %v1612_v0 = vmov 0.0   ;;  %vm319_vm1 = vcmask 58368  }
  0x19   : > { %309 = vst.msk [vmem:[#allocation2] sm:$0xff] %vm308_vm0, %v1612_v0 }
  0x1a   : > { %310 = vst.msk [vmem:[#allocation2 + $0x8] sm:$0xff] %vm308_vm0, %v1612_v0 }
  0x1b   : > { %311 = vst.msk [vmem:[#allocation2 + $0x10] sm:$0xff] %vm308_vm0, %v1612_v0 }
  0x1c   : > { %312 = vst.msk [vmem:[#allocation2 + $0x18] sm:$0xff] %vm308_vm0, %v1612_v0 }
  0x1d   : > { %313 = vst.msk [vmem:[#allocation2 + $0x20] sm:$0xff] %vm308_vm0, %v1612_v0 }
  0x1e   : > { %314 = vst.msk [vmem:[#allocation2 + $0x28] sm:$0xff] %vm308_vm0, %v1612_v0 }
  0x1f   : > { %315 = vst.msk [vmem:[#allocation2 + $0x30] sm:$0xff] %vm308_vm0, %v1612_v0 }
  0x20   : > { %316 = vst.msk [vmem:[#allocation2 + $0x38] sm:$0xff] %vm308_vm0, %v1612_v0 }
  0x21   : > { %317 = vst.msk [vmem:[#allocation2 + $0x40] sm:$0xff] %vm308_vm0, %v1612_v0 }
  0x22   : > { %318 = vst.msk [vmem:[#allocation2 + $0x48] sm:$0xff] %vm308_vm0, %v1612_v0 }
  0x23   : > { %321 = vst.msk [vmem:[#allocation3] sm:$0xff] %vm308_vm0, %v1612_v0 }
  0x24   : > { %322 = vst.msk [vmem:[#allocation3 + $0x8] sm:$0xff] %vm308_vm0, %v1612_v0 }
  0x25   : > { %323 = vst.msk [vmem:[#allocation3 + $0x10] sm:$0xff] %vm308_vm0, %v1612_v0 }
  0x26   : > { %324 = vst.msk [vmem:[#allocation3 + $0x18] sm:$0xff] %vm308_vm0, %v1612_v0 }
  0x27   : > { %325 = vst.msk [vmem:[#allocation3 + $0x20] sm:$0xff] %vm308_vm0, %v1612_v0 }
  0x28   : > { %326 = vst.msk [vmem:[#allocation3 + $0x28] sm:$0xff] %vm308_vm0, %v1612_v0 }
  0x29   : > { %327 = vst.msk [vmem:[#allocation3 + $0x30] sm:$0xff] %vm308_vm0, %v1612_v0 }
  0x2a   : > { %328 = vst.msk [vmem:[#allocation3 + $0x38] sm:$0xff] %vm308_vm0, %v1612_v0 }
  0x2b   : > { %320 = vst.msk [vmem:[#allocation2 + $0x50] sm:$0x3] %vm319_vm1, %v1612_v0 }
  0x2c PF: > { %p331_p11 = scmp.ge.s32.totalorder %s1672_s23, 0  ;;  %p332_p12 = scmp.lt.s32.totalorder %s1672_s23, 4 }
  0x2e   : > { %p333_p13 = pnand %p332_p12, %p331_p11 }
  0x30   : > { %336 = sbr.rel (%p333_p13) target bundleno = 352 (0x160), region = 44 }
  0x35   : > { %v623_v1 = vld [vmem:[%s1681_s29] sm:$0xf]  ;;  %vm636_vm2 = vcmask 1043456   ;;  %v338_v3 = vld [vmem:[%s1691_s11 + $0x8] sm:$0xff]  ;;  %v386_v4 = vlaneseq  ;;  %v339_v6 = vld [vmem:[%s1691_s11 + $0x10] sm:$0xff]  ;;  %vm377_vm3 = vcmask 64512  }
  0x36   : > { %v337_v2 = vld [vmem:[%s1691_s11] sm:$0xff]  ;;  %v638_v5 = vsel %vm636_vm2, %v623_v1, 0  ;;  %v340_v10 = vld [vmem:[%s1691_s11 + $0x18] sm:$0xff]  ;;  %v342_v27 = vld [vmem:[%s1691_s11 + $0x28] sm:$0xff] }
  0x37   : > { %v1722_v7 = vld [vmem:[%s2161_s1] ss:$0 sm:$0xff]  ;;  %1525 = vmatpush.bf16.msra.mxu1 %v638_v5  ;;  %1526 = vmatpush.bf16.msra.mxu2 %v638_v5  ;;  %v1729_v9 = vshrl.u32 %v386_v4, 7  ;;  %v343_v28 = vld [vmem:[%s1691_s11 + $0x30] sm:$0xff]  ;;  %v1479_v39 = vld [vmem:[%s1681_s29 + $0x8] sm:$0xf] }
  0x38   : > { %v1727_v8 = vld [vmem:[%s2162_s2] ss:$0 sm:$0xff]  ;;  %1527 = vmatpush.bf16.msra.mxu3 %v638_v5  ;;  %647 = vmatpush.bf16.msra.mxu0 %v638_v5  ;;  %v349_v11 = vmul.f32 %v1722_v7, %v337_v2  ;;  %v350_v12 = vmul.f32 %v1722_v7, %v338_v3  ;;  %v351_v13 = vmul.f32 %v1722_v7, %v339_v6  ;;  %v1484_v42 = vld [vmem:[%s1681_s29 + $0xc] sm:$0xf]  ;;  %v1474_v43 = vld [vmem:[%s1681_s29 + $0x4] sm:$0xf] }
  0x39   : > { %v341_v14 = vld [vmem:[%s1691_s11 + $0x20] sm:$0xff]  ;;  %v1737_v15 = vadd.s32 16, %v1729_v9  ;;  %v1740_v16 = vadd.s32 24, %v1729_v9  ;;  %v352_v17 = vmul.f32 %v1722_v7, %v340_v10  ;;  %v1748_v22 = vadd.s32 32, %v1729_v9  ;;  %v1489_v48 = vld [vmem:[%s1681_s29 + $0x10] sm:$0xf] }
  0x3a   : > { %v353_v18 = vmul.f32 %v1722_v7, %v341_v14  ;;  %v361_v19 = vadd.f32 %v1727_v8, %v349_v11  ;;  %v362_v20 = vadd.f32 %v1727_v8, %v350_v12  ;;  %v363_v21 = vadd.f32 %v1727_v8, %v351_v13  ;;  %v587_v1 = vld [vmem:[#allocation2] sm:$0xff]  ;;  %v1499_v5 = vld [vmem:[%s1681_s29 + $0x18] sm:$0xf] }
  0x3b   : > { %v413_v23 = vand.u32 7, %v1737_v15  ;;  %v420_v24 = vand.u32 7, %v1740_v16  ;;  %v364_v25 = vadd.f32 %v1727_v8, %v352_v17  ;;  %v1757_v32 = vadd.s32 40, %v1729_v9 }
  0x3c   : > { %v365_v26 = vadd.f32 %v1727_v8, %v353_v18  ;;  %v369_v29 = vmax.f32 %v361_v19, 0.0  ;;  %v370_v30 = vmax.f32 %v362_v20, 0.0  ;;  %v371_v31 = vmax.f32 %v363_v21, 0.0 }
  0x3d   : > { %v372_v33 = vmax.f32 %v364_v25, 0.0  ;;  %v427_v35 = vand.u32 7, %v1748_v22  ;;  %v434_v36 = vand.u32 7, %v1757_v32  ;;  %v354_v37 = vmul.f32 %v1722_v7, %v342_v27  ;;  %v1494_v27 = vld [vmem:[%s1681_s29 + $0x14] sm:$0xf] }
  0x3e   : > { %v373_v34 = vmax.f32 %v365_v26, 0.0  ;;  %378 = vst.msk [vmem:[#allocation2 + $0x9] sm:$0xff] %vm377_vm3, %v369_v29  ;;  %v355_v38 = vmul.f32 %v1722_v7, %v343_v28  ;;  %v1767_v40 = vadd.s32 48, %v1729_v9  ;;  %v1770_v41 = vadd.s32 56, %v1729_v9  ;;  %v1509_v28 = vld [vmem:[%s1681_s29 + $0x20] sm:$0xf] }
  0x3f   : > { %379 = vst.msk [vmem:[#allocation2 + $0x11] sm:$0xff] %vm377_vm3, %v370_v30  ;;  %v1777_v44 = vadd.s32 4294967295, %v413_v23  ;;  %v1781_v45 = vadd.s32 4294967295, %v420_v24  ;;  %v366_v46 = vadd.f32 %v1727_v8, %v354_v37  ;;  %v1789_v49 = vadd.s32 4294967295, %v427_v35 }
  0x40   : > { %380 = vst.msk [vmem:[#allocation2 + $0x19] sm:$0xff] %vm377_vm3, %v371_v31  ;;  %v367_v47 = vadd.f32 %v1727_v8, %v355_v38  ;;  %v441_v50 = vand.u32 7, %v1767_v40  ;;  %v818_v51 = vsel %vm636_vm2, %v1479_v39, 0  ;;  %v1794_v52 = vadd.s32 8, %v1729_v9 }
  0x41   : > { %381 = vst.msk [vmem:[#allocation2 + $0x21] sm:$0xff] %vm377_vm3, %v372_v33  ;;  %v1799_v53 = vadd.s32 4294967295, %v434_v36  ;;  %v374_v54 = vmax.f32 %v366_v46, 0.0  ;;  %v448_v56 = vand.u32 7, %v1770_v41  ;;  %827 = vmatpush.bf16.msrb.mxu2 %v818_v51  ;;  %v399_v58 = vand.u32 7, %v1729_v9 }
  0x42   : > { %382 = vst.msk [vmem:[#allocation2 + $0x29] sm:$0xff] %vm377_vm3, %v373_v34  ;;  %v375_v55 = vmax.f32 %v367_v47, 0.0  ;;  %v1804_v57 = vadd.s32 4294967295, %v441_v50  ;;  %v406_v59 = vand.u32 7, %v1794_v52  ;;  %vm501_vm4 = vcmp.ge.s32.totalorder %v1777_v44, 0 }
  0x43   : > { %383 = vst.msk [vmem:[#allocation2 + $0x31] sm:$0xff] %vm377_vm3, %v374_v54  ;;  %v892_v60 = vsel %vm636_vm2, %v1484_v42, 0  ;;  %v728_v61 = vsel %vm636_vm2, %v1474_v43, 0  ;;  %v966_v62 = vsel %vm636_vm2, %v1489_v48, 0  ;;  %vm502_vm5 = vcmp.ge.s32.totalorder %v1781_v45, 0  ;;  %v677_v54 = vld [vmem:[#allocation2 + $0x1] sm:$0xff] }
  0x44   : > { %384 = vst.msk [vmem:[#allocation2 + $0x39] sm:$0xff] %vm377_vm3, %v375_v55  ;;  %v1815_v63 = vadd.s32 4294967295, %v399_v58  ;;  %v1817_v0 = vadd.s32 4294967295, %v406_v59  ;;  %901 = vmatpush.bf16.msrb.mxu3 %v892_v60  ;;  %737 = vmatpush.bf16.msrb.mxu1 %v728_v61  ;;  %vm503_vm6 = vcmp.ge.s32.totalorder %v1789_v49, 0  ;;  %vm504_vm7 = vcmp.ge.s32.totalorder %v1799_v53, 0 }
  0x45   : > { %v588_v2 = vld [vmem:[#allocation2 + $0x8] sm:$0xff]  ;;  %v1823_v4 = vadd.s32 4294967295, %v448_v56  ;;  %975 = vmatpush.bf16.msrb.mxu0 %v966_v62  ;;  %vm505_vm8 = vcmp.ge.s32.totalorder %v1804_v57, 0  ;;  %v1114_v31 = vsel %vm636_vm2, %v1499_v5, 0  ;;  %v1504_v33 = vld [vmem:[%s1681_s29 + $0x1c] sm:$0xf] }
  0x46   : > { %v589_v3 = vld [vmem:[#allocation2 + $0x10] sm:$0xff]  ;;  %vm499_vm9 = vcmp.ge.s32.totalorder %v1815_v63, 0  ;;  %vm500_vm10 = vcmp.ge.s32.totalorder %v1817_v0, 0  ;;  %v1040_v39 = vsel %vm636_vm2, %v1494_v27, 0  ;;  %v1262_v42 = vsel %vm636_vm2, %v1509_v28, 0  ;;  %v767_v51 = vld [vmem:[#allocation2 + $0x2] sm:$0xff] }
  0x47   : > { %v1826_v6 = vld [vmem:[#allocation2 + $0x18] sm:$0xff]  ;;  %v613_v9 = vsel %vm501_vm4, %v589_v3, 0.0  ;;  %v611_v12 = vsel %vm499_vm9, %v587_v1, 0.0  ;;  %v612_v13 = vsel %vm500_vm10, %v588_v2, 0.0  ;;  %v1844_v14 = vsel %vm499_vm9, %v589_v3, 0.0  ;;  %v1889_v52 = vld [vmem:[#allocation2 + $0xa] sm:$0xff] }
  0x48   : > { %v614_v10 = vsel %vm502_vm5, %v1826_v6, 0.0  ;;  %v1836_v11 = vld [vmem:[#allocation2 + $0x20] sm:$0xff]  ;;  %v619_v20 = vpack.c.bf16 %v612_v13, %v611_v12  ;;  %v1854_v21 = vsel %vm500_vm10, %v1826_v6, 0.0  ;;  %vm506_vm11 = vcmp.ge.s32.totalorder %v1823_v4, 0  ;;  %v678_v55 = vld [vmem:[#allocation2 + $0x9] sm:$0xff]  ;;  %v932_v60 = vld [vmem:[#allocation2 + $0x11] sm:$0xff] }
  0x49   : > { %v620_v17 = vpack.c.bf16 %v614_v10, %v613_v9  ;;  %v1846_v18 = vld [vmem:[#allocation2 + $0x28] sm:$0xff]  ;;  %v615_v19 = vsel %vm503_vm6, %v1836_v11, 0.0  ;;  %v1095_v26 = vpack.c.bf16 %v1854_v21, %v1844_v14  ;;  %v1188_v46 = vsel %vm636_vm2, %v1504_v33, 0  ;;  %v344_v12 = vld [vmem:[%s1691_s11 + $0x38] sm:$0xff] }
  0x4a   : > { %v616_v25 = vsel %vm504_vm7, %v1846_v18, 0.0  ;;  %v1865_v30 = vld [vmem:[#allocation2 + $0x30] sm:$0xff]  ;;  %1470 = vmatmul.msk.bf16.vlgmr.msra.gmra.mxu0 %vm377_vm3, %v619_v20  ;;  %v1882_v47 = vadd.s32 1, %v399_v58  ;;  %v1884_v48 = vadd.s32 1, %v406_v59  ;;  %v709_v61 = vpack.c.bf16 %v678_v55, %v677_v54 }
  0x4b   : > { %1471 = vmatmul.msk.bf16.vlgmr.msra.gmra.mxu1 %vm377_vm3, %v620_v17  ;;  %v621_v29 = vpack.c.bf16 %v616_v25, %v615_v19  ;;  %v1870_v34 = vld [vmem:[#allocation2 + $0x38] sm:$0xff]  ;;  %v617_v37 = vsel %vm505_vm8, %v1865_v30, 0.0  ;;  %1271 = vmatpush.bf16.msra.mxu0 %v1262_v42  ;;  %v947_v62 = vpack.c.bf16 %v932_v60, %v678_v55  ;;  %v865_v5 = vsel %vm499_vm9, %v588_v2, 0.0  ;;  %v934_v19 = vld [vmem:[#allocation2 + $0x21] sm:$0xff]  ;;  %v772_v33 = vld [vmem:[#allocation2 + $0x2a] sm:$0xff] }
  0x4c   : > { %v618_v38 = vsel %vm506_vm11, %v1870_v34, 0.0  ;;  %1049 = vmatpush.bf16.msra.mxu1 %v1040_v39  ;;  %vm563_vm12 = vcmp.lt.s32.totalorder %v1882_v47, 8  ;;  %vm564_vm13 = vcmp.lt.s32.totalorder %v1884_v48, 8  ;;  %v866_v9 = vsel %vm500_vm10, %v589_v3, 0.0  ;;  %v769_v2 = vld [vmem:[#allocation2 + $0x12] sm:$0xff]  ;;  %v1917_v3 = vld [vmem:[#allocation2 + $0x1a] sm:$0xff] }
  0x4d   : > { %1472 = vmatmul.msk.bf16.vlgmr.msra.gmra.mxu2 %vm377_vm3, %v621_v29  ;;  %v622_v43 = vpack.c.bf16 %v618_v38, %v617_v37  ;;  %v791_v58 = vsel %vm563_vm12, %v767_v51, 0.0  ;;  %v792_v59 = vsel %vm564_vm13, %v1889_v52, 0.0  ;;  %v873_v10 = vpack.c.bf16 %v866_v9, %v865_v5  ;;  %v682_v37 = vld [vmem:[#allocation2 + $0x29] sm:$0xff]  ;;  %v936_v38 = vld [vmem:[#allocation2 + $0x31] sm:$0xff] }
  0x4e   : > { %1123 = vmatpush.bf16.msra.mxu2 %v1114_v31  ;;  %v799_v1 = vpack.c.bf16 %v792_v59, %v791_v58  ;;  %v1906_v13 = vadd.s32 1, %v413_v23  ;;  %v1910_v17 = vadd.s32 1, %v420_v24  ;;  %v356_v63 = vmul.f32 %v1722_v7, %v344_v12  ;;  %v680_v23 = vld [vmem:[#allocation2 + $0x19] sm:$0xff] }
  0x4f   : > { %1473 = vmatmul.msk.bf16.vlgmr.msra.gmra.mxu3 %vm377_vm3, %v622_v43  ;;  %v948_v24 = vpack.c.bf16 %v934_v19, %v680_v23  ;;  %v867_v25 = vsel %vm501_vm4, %v1826_v6, 0.0  ;;  %v868_v27 = vsel %vm502_vm5, %v1836_v11, 0.0  ;;  %v1936_v29 = vadd.s32 1, %v427_v35  ;;  %v771_v6 = vld [vmem:[#allocation2 + $0x22] sm:$0xff]  ;;  %v773_v55 = vld [vmem:[#allocation2 + $0x32] sm:$0xff] }
  0x50   : > { %1197 = vmatpush.bf16.msra.mxu3 %v1188_v46  ;;  %v368_v0 = vadd.f32 %v1727_v8, %v356_v63  ;;  %vm565_vm14 = vcmp.lt.s32.totalorder %v1906_v13, 8  ;;  %vm566_vm15 = vcmp.lt.s32.totalorder %v1910_v17, 8  ;;  %v710_v8 = vpack.c.bf16 %v680_v23, %v932_v60  ;;  %v684_v58 = vld [vmem:[#allocation2 + $0x39] sm:$0xff] }
  0x51   : > { %v793_v16 = vsel %vm565_vm14, %v769_v2, 0.0  ;;  %v794_v7 = vsel %vm566_vm15, %v1917_v3, 0.0  ;;  %v874_v28 = vpack.c.bf16 %v868_v27, %v867_v25  ;;  %v1940_v31 = vadd.s32 1, %v434_v36 }
  0x52   : > { %v376_v15 = vmax.f32 %v368_v0, 0.0  ;;  %v800_v20 = vpack.c.bf16 %v794_v7, %v793_v16  ;;  %vm567_vm0 = vcmp.lt.s32.totalorder %v1936_v29, 8  ;;  %v711_v35 = vpack.c.bf16 %v682_v37, %v934_v19 }
  0x53   : > { %vm568_vm1 = vcmp.lt.s32.totalorder %v1940_v31, 8  ;;  %v795_v39 = vsel %vm567_vm0, %v771_v6, 0.0  ;;  %v949_v32 = vpack.c.bf16 %v936_v38, %v682_v37  ;;  %v869_v42 = vsel %vm503_vm6, %v1846_v18, 0.0 }
  0x54   : > { %385 = vst.msk [vmem:[#allocation2 + $0x41] sm:$0xff] %vm377_vm3, %v376_v15  ;;  %v796_v22 = vsel %vm568_vm1, %v772_v33, 0.0  ;;  %v870_v43 = vsel %vm504_vm7, %v1865_v30, 0.0  ;;  %v1960_v51 = vadd.s32 1, %v441_v50  ;;  %v1964_v54 = vadd.s32 1, %v448_v56 }
  0x55   : > { %v801_v36 = vpack.c.bf16 %v796_v22, %v795_v39  ;;  %v875_v46 = vpack.c.bf16 %v870_v43, %v869_v42  ;;  %v712_v56 = vpack.c.bf16 %v684_v58, %v936_v38  ;;  %v1014_v12 = vsel %vm564_vm13, %v769_v2, 0.0  ;;  %v1160_v38 = vld [vmem:[#allocation2 + $0x49] sm:$0xff] }
  0x56   : > { %vm569_vm2 = vcmp.lt.s32.totalorder %v1960_v51, 8  ;;  %vm570_vm9 = vcmp.lt.s32.totalorder %v1964_v54, 8  ;;  %v1235_v63 = vsel %vm563_vm12, %v769_v2, 0.0  ;;  %v1236_v0 = vsel %vm564_vm13, %v1917_v3, 0.0 }
  0x57   : > { %v797_v40 = vsel %vm569_vm2, %v773_v55, 0.0  ;;  %v1243_v23 = vpack.c.bf16 %v1236_v0, %v1235_v63  ;;  %v1015_v47 = vsel %vm565_vm14, %v1917_v3, 0.0  ;;  %v1016_v48 = vsel %vm566_vm15, %v771_v6, 0.0 }
  0x58   : > { %v1238_v2 = vsel %vm566_vm15, %v772_v33, 0.0  ;;  %v1089_v14 = vsel %vm501_vm4, %v1836_v11, 0.0  ;;  %v1090_v21 = vsel %vm502_vm5, %v1846_v18, 0.0  ;;  %v1017_v13 = vsel %vm567_vm0, %v772_v33, 0.0 }
  0x59   : > { %v1096_v3 = vpack.c.bf16 %v1090_v21, %v1089_v14  ;;  %v1018_v44 = vsel %vm568_vm1, %v773_v55, 0.0  ;;  %v1239_v45 = vsel %vm567_vm0, %v773_v55, 0.0  ;;  %v1091_v18 = vsel %vm503_vm6, %v1865_v30, 0.0 }
  0x5a   : > { %1490 = vmatmul.msk.bf16.vlgmr.msrb.gmra.mxu0 %vm377_vm3, %v947_v62  ;;  %v1092_v17 = vsel %vm504_vm7, %v1870_v34, 0.0  ;;  %v1023_v16 = vpack.c.bf16 %v1018_v44, %v1017_v13  ;;  %v580_v44 = vld [vmem:[#allocation3 + $0x8] sm:$0xff] }
  0x5b   : > { %1475 = vmatmul.msk.bf16.vlgmr.msrb.gmra.mxu1 %vm377_vm3, %v709_v61  ;;  %v774_v60 = vld [vmem:[#allocation2 + $0x3a] sm:$0xff]  ;;  %v1086_v25 = vld [vmem:[#allocation2 + $0x48] sm:$0xff] }
  0x5c   : > { %v1969_v59 = vld [vmem:[#allocation2 + $0x41] sm:$0xff]  ;;  %v798_v50 = vsel %vm570_vm9, %v774_v60, 0.0  ;;  %v1240_v11 = vsel %vm568_vm1, %v774_v60, 0.0  ;;  %v1019_v49 = vsel %vm569_vm2, %v774_v60, 0.0 }
  0x5d   : > { %1480 = vmatmul.msk.bf16.vlgmr.msrb.gmra.mxu2 %vm377_vm3, %v799_v1  ;;  %v864_v41 = vld [vmem:[#allocation2 + $0x40] sm:$0xff]  ;;  %v950_v61 = vpack.c.bf16 %v1969_v59, %v684_v58  ;;  %v802_v62 = vpack.c.bf16 %v798_v50, %v797_v40  ;;  %v871_v1 = vsel %vm505_vm8, %v1870_v34, 0.0  ;;  %v1245_v7 = vpack.c.bf16 %v1240_v11, %v1239_v45 }
  0x5e   : > { %v872_v5 = vsel %vm506_vm11, %v864_v41, 0.0  ;;  %v1093_v27 = vsel %vm505_vm8, %v864_v41, 0.0  ;;  %v1172_v39 = vpack.c.bf16 %v1160_v38, %v1969_v59 }
  0x5f   : > { %1485 = vmatmul.msk.bf16.vlgmr.msrb.gmra.mxu3 %vm377_vm3, %v873_v10  ;;  %v876_v9 = vpack.c.bf16 %v872_v5, %v871_v1  ;;  %v1013_v10 = vsel %vm563_vm12, %v1889_v52, 0.0  ;;  %v1237_v52 = vsel %vm565_vm14, %v771_v6, 0.0 }
  0x60   : > { %v1021_v15 = vpack.c.bf16 %v1014_v12, %v1013_v10  ;;  %v1244_v19 = vpack.c.bf16 %v1238_v2, %v1237_v52  ;;  %v579_v52 = vld [vmem:[#allocation3] sm:$0xff] }
  0x6a   : > { %1491 = vmatmul.msk.bf16.gmra.mxu0 %vm377_vm3, %v948_v24  ;;  %v1012_v24 = vld [vmem:[#allocation2 + $0x42] sm:$0xff] }
  0x6b   : > { %1476 = vmatmul.msk.bf16.gmra.mxu1 %vm377_vm3, %v710_v8  ;;  %v1020_v53 = vsel %vm570_vm9, %v1012_v24, 0.0  ;;  %v1241_v30 = vsel %vm569_vm2, %v1012_v24, 0.0 }
  0x6c   : > { %v1024_v29 = vpack.c.bf16 %v1020_v53, %v1019_v49 }
  0x6d   : > { %1481 = vmatmul.msk.bf16.gmra.mxu2 %vm377_vm3, %v800_v20  ;;  %v1234_v20 = vld [vmem:[#allocation2 + $0x4a] sm:$0xff] }
  0x6e   : > { %v1242_v34 = vsel %vm570_vm9, %v1234_v20, 0.0 }
  0x6f   : > { %1486 = vmatmul.msk.bf16.gmra.mxu3 %vm377_vm3, %v874_v28  ;;  %v1094_v28 = vsel %vm506_vm11, %v1086_v25, 0.0  ;;  %v1246_v31 = vpack.c.bf16 %v1242_v34, %v1241_v30  ;;  %v581_v25 = vld [vmem:[#allocation3 + $0x10] sm:$0xff] }
  0x70   : > { %v1098_v37 = vpack.c.bf16 %v1094_v28, %v1093_v27 }
  0x7a   : > { %1492 = vmatmul.msk.bf16.gmra.mxu0 %vm377_vm3, %v949_v32 }
  0x7b   : > { %1477 = vmatmul.msk.bf16.gmra.mxu1 %vm377_vm3, %v711_v35 }
  0x7d   : > { %1482 = vmatmul.msk.bf16.gmra.mxu2 %vm377_vm3, %v801_v36 }
  0x7f   : > { %1487 = vmatmul.msk.bf16.gmra.mxu3 %vm377_vm3, %v875_v46 }
  0x8a   : > { %1493 = vmatmul.msk.bf16.gmra.mxu0 %vm377_vm3, %v950_v61 }
  0x8b   : > { %1478 = vmatmul.msk.bf16.gmra.mxu1 %vm377_vm3, %v712_v56 }
  0x8d   : > { %1483 = vmatmul.msk.bf16.gmra.mxu2 %vm377_vm3, %v802_v62 }
  0x8f   : > { %1488 = vmatmul.msk.bf16.gmra.mxu3 %vm377_vm3, %v876_v9 }
  0x9a   : > { %1510 = vmatmul.msk.bf16.vlgmr.msra.gmra.mxu0 %vm377_vm3, %v1243_v23 }
  0x9b   : > { %1495 = vmatmul.msk.bf16.vlgmr.msra.gmra.mxu1 %vm377_vm3, %v1021_v15 }
  0x9d   : > { %1500 = vmatmul.msk.bf16.vlgmr.msra.gmra.mxu2 %vm377_vm3, %v1095_v26  ;;  %v1022_v26 = vpack.c.bf16 %v1016_v48, %v1015_v47 }
  0x9f   : > { %1505 = vmatmul.msk.bf16.vlgmr.msra.gmra.mxu3 %vm377_vm3, %v710_v8  ;;  %v1097_v8 = vpack.c.bf16 %v1092_v17, %v1091_v18 }
  0xaa   : > { %1511 = vmatmul.msk.bf16.gmra.mxu0 %vm377_vm3, %v1244_v19 }
  0xab   : > { %1496 = vmatmul.msk.bf16.gmra.mxu1 %vm377_vm3, %v1022_v26 }
  0xad   : > { %1501 = vmatmul.msk.bf16.gmra.mxu2 %vm377_vm3, %v1096_v3 }
  0xaf   : > { %1506 = vmatmul.msk.bf16.gmra.mxu3 %vm377_vm3, %v711_v35 }
  0xba   : > { %1512 = vmatmul.msk.bf16.gmra.mxu0 %vm377_vm3, %v1245_v7 }
  0xbb   : > { %1497 = vmatmul.msk.bf16.gmra.mxu1 %vm377_vm3, %v1023_v16 }
  0xbd   : > { %1502 = vmatmul.msk.bf16.gmra.mxu2 %vm377_vm3, %v1097_v8 }
  0xbf   : > { %1507 = vmatmul.msk.bf16.gmra.mxu3 %vm377_vm3, %v712_v56 }
  0xc7   : > { %v649_v33 = vpop.f32.mrf.mxu0 }
  0xc8   : > { %v2051_v6 = vpop.f32.mrf.mxu1  ;;  %v669_v21 = vadd.f32 %v649_v33, %v579_v52 }
  0xc9   : > { %v671_v34 = vadd.f32 %v2051_v6, %v581_v25 }
  0xca   : > { %1513 = vmatmul.msk.bf16.gmra.mxu0 %vm377_vm3, %v1246_v31 }
  0xcb   : > { %1498 = vmatmul.msk.bf16.gmra.mxu1 %vm377_vm3, %v1024_v29 }
  0xcd   : > { %1503 = vmatmul.msk.bf16.gmra.mxu2 %vm377_vm3, %v1098_v37 }
  0xcf   : > { %1508 = vmatmul.msk.bf16.gmra.mxu3 %vm377_vm3, %v1172_v39  ;;  %v651_v22 = vpop.f32.mrf.mxu0 }
  0xd0   : > { %v2058_v57 = vpop.f32.mrf.mxu2  ;;  %v2060_v4 = vpop.f32.mrf.mxu1  ;;  %v670_v18 = vadd.f32 %v651_v22, %v580_v44  ;;  %v582_v22 = vld [vmem:[#allocation3 + $0x18] sm:$0xff] }
  0xd2   : > { %v2062_v35 = vpop.f32.mrf.mxu3 }
  0xd7   : > { %v977_v42 = vpop.f32.mrf.mxu0 }
  0xd8   : > { %v2064_v32 = vpop.f32.mrf.mxu2  ;;  %v739_v36 = vpop.f32.mrf.mxu1 }
  0xd9   : > { %v759_v19 = vadd.f32 %v739_v36, %v669_v21 }
  0xda   : > { %v2066_v43 = vpop.f32.mrf.mxu3 }
  0xdf   : > { %v979_v54 = vpop.f32.mrf.mxu0 }
  0xe0   : > { %v829_v46 = vpop.f32.mrf.mxu2  ;;  %v741_v51 = vpop.f32.mrf.mxu1 }
  0xe1   : > { %v849_v13 = vadd.f32 %v829_v46, %v759_v19  ;;  %v760_v7 = vadd.f32 %v741_v51, %v670_v18 }
  0xe2   : > { %v903_v55 = vpop.f32.mrf.mxu3 }
  0xe3   : > { %v923_v17 = vadd.f32 %v903_v55, %v849_v13  ;;  %v672_v55 = vadd.f32 %v2060_v4, %v582_v22 }
  0xe5   : > { %v997_v20 = vadd.f32 %v977_v42, %v923_v17 }
  0xe7   : > { %v2068_v59 = vpop.f32.mrf.mxu0 }
  0xe8   : > { %v831_v60 = vpop.f32.mrf.mxu2  ;;  %v744_v58 = vpop.f32.mrf.mxu1 }
  0xe9   : > { %v850_v24 = vadd.f32 %v831_v60, %v760_v7  ;;  %v761_v31 = vadd.f32 %v744_v58, %v671_v34 }
  0xea   : > { %v905_v40 = vpop.f32.mrf.mxu3 }
  0xeb   : > { %v924_v27 = vadd.f32 %v905_v40, %v850_v24 }
  0xed   : > { %v998_v39 = vadd.f32 %v979_v54, %v924_v27 }
  0xef   : > { %v2070_v56 = vpop.f32.mrf.mxu0 }
  0xf0   : > { %v834_v50 = vpop.f32.mrf.mxu2  ;;  %v746_v41 = vpop.f32.mrf.mxu1 }
  0xf1   : > { %v851_v38 = vadd.f32 %v834_v50, %v761_v31  ;;  %v762_v6 = vadd.f32 %v746_v41, %v672_v55  ;;  %v583_v50 = vld [vmem:[#allocation3 + $0x20] sm:$0xff] }
  0xf2   : > { %v908_v61 = vpop.f32.mrf.mxu3  ;;  %v673_v17 = vadd.f32 %v2058_v57, %v583_v50 }
  0xf3   : > { %v925_v60 = vadd.f32 %v908_v61, %v851_v38 }
  0xf5   : > { %v999_v13 = vadd.f32 %v2068_v59, %v925_v60 }
  0xf7   : > { %v2074_v5 = vpop.f32.mrf.mxu0 }
  0xf8   : > { %v836_v62 = vpop.f32.mrf.mxu2  ;;  %v2072_v1 = vpop.f32.mrf.mxu1 }
  0xf9   : > { %v852_v58 = vadd.f32 %v836_v62, %v762_v6  ;;  %v763_v61 = vadd.f32 %v2072_v1, %v673_v17 }
  0xfa   : > { %v910_v9 = vpop.f32.mrf.mxu3 }
  0xff   : > { %v2080_v63 = vpop.f32.mrf.mxu0 }
 0x100   : > { %v2076_v10 = vpop.f32.mrf.mxu2  ;;  %v2078_v12 = vpop.f32.mrf.mxu1 }
 0x101   : > { %v853_v24 = vadd.f32 %v2076_v10, %v763_v61 }
 0x102   : > { %v2082_v0 = vpop.f32.mrf.mxu3 }
 0x107   : > { %v2088_v47 = vpop.f32.mrf.mxu0 }
 0x108   : > { %v2084_v15 = vpop.f32.mrf.mxu2  ;;  %v2086_v23 = vpop.f32.mrf.mxu1 }
 0x10a   : > { %v2090_v48 = vpop.f32.mrf.mxu3 }
 0x10f   : > { %v2096_v26 = vpop.f32.mrf.mxu0 }
 0x110   : > { %v2092_v2 = vpop.f32.mrf.mxu2  ;;  %v2094_v14 = vpop.f32.mrf.mxu1 }
 0x112   : > { %v2098_v3 = vpop.f32.mrf.mxu3 }
 0x117   : > { %v1273_v16 = vpop.f32.mrf.mxu0 }
 0x118   : > { %v2100_v45 = vpop.f32.mrf.mxu2  ;;  %v1051_v11 = vpop.f32.mrf.mxu1 }
 0x119   : > { %v1071_v49 = vadd.f32 %v1051_v11, %v997_v20  ;;  %v584_v20 = vld [vmem:[#allocation3 + $0x28] sm:$0xff] }
 0x11a   : > { %v2102_v8 = vpop.f32.mrf.mxu3  ;;  %v674_v57 = vadd.f32 %v2064_v32, %v584_v20 }
 0x11c   : > { %v764_v1 = vadd.f32 %v2078_v12, %v674_v57 }
 0x11e   : > { %v854_v10 = vadd.f32 %v2084_v15, %v764_v1 }
 0x11f   : > { %v1275_v29 = vpop.f32.mrf.mxu0 }
 0x120   : > { %v1125_v53 = vpop.f32.mrf.mxu2  ;;  %v1053_v30 = vpop.f32.mrf.mxu1 }
 0x121   : > { %v1145_v28 = vadd.f32 %v1125_v53, %v1071_v49  ;;  %v1072_v46 = vadd.f32 %v1053_v30, %v998_v39 }
 0x122   : > { %v1199_v33 = vpop.f32.mrf.mxu3 }
 0x123   : > { %v1219_v37 = vadd.f32 %v1199_v33, %v1145_v28 }
 0x125   : > { %v1293_v36 = vadd.f32 %v1273_v16, %v1219_v37  ;;  %v926_v16 = vadd.f32 %v910_v9, %v852_v58  ;;  %v927_v9 = vadd.f32 %v2082_v0, %v853_v24  ;;  %v928_v0 = vadd.f32 %v2090_v48, %v854_v10 }
 0x127   : > { %1301 = vst.msk [vmem:[#allocation3] sm:$0xff] %vm377_vm3, %v1293_v36  ;;  %v1278_v21 = vpop.f32.mrf.mxu0  ;;  %v1000_v62 = vadd.f32 %v2070_v56, %v926_v16  ;;  %v1001_v56 = vadd.f32 %v2074_v5, %v927_v9  ;;  %v1002_v5 = vadd.f32 %v2080_v63, %v928_v0 }
 0x128   : > { %v1127_v42 = vpop.f32.mrf.mxu2  ;;  %v1056_v51 = vpop.f32.mrf.mxu1 }
 0x129   : > { %v1146_v52 = vadd.f32 %v1127_v42, %v1072_v46  ;;  %v1073_v44 = vadd.f32 %v1056_v51, %v999_v13  ;;  %v586_v42 = vld [vmem:[#allocation3 + $0x38] sm:$0xff] }
 0x12a   : > { %v1201_v40 = vpop.f32.mrf.mxu3 }
 0x12b   : > { %v1220_v19 = vadd.f32 %v1201_v40, %v1146_v52  ;;  %v676_v52 = vadd.f32 %v2066_v43, %v586_v42 }
 0x12d   : > { %v1294_v54 = vadd.f32 %v1275_v29, %v1220_v19  ;;  %v585_v29 = vld [vmem:[#allocation3 + $0x30] sm:$0xff] }
 0x12e   : > { %v675_v32 = vadd.f32 %v2062_v35, %v585_v29 }
 0x12f   : > { %1302 = vst.msk [vmem:[#allocation3 + $0x8] sm:$0xff] %vm377_vm3, %v1294_v54  ;;  %v1280_v59 = vpop.f32.mrf.mxu0 }
 0x130   : > { %v1130_v11 = vpop.f32.mrf.mxu2  ;;  %v1058_v18 = vpop.f32.mrf.mxu1  ;;  %v765_v12 = vadd.f32 %v2086_v23, %v675_v32  ;;  %v766_v23 = vadd.f32 %v2094_v14, %v676_v52 }
 0x131   : > { %v1147_v4 = vadd.f32 %v1130_v11, %v1073_v44  ;;  %v1074_v49 = vadd.f32 %v1058_v18, %v1000_v62 }
 0x132   : > { %v1204_v41 = vpop.f32.mrf.mxu3  ;;  %v855_v15 = vadd.f32 %v2092_v2, %v765_v12  ;;  %v856_v2 = vadd.f32 %v2100_v45, %v766_v23 }
 0x133   : > { %v1221_v7 = vadd.f32 %v1204_v41, %v1147_v4 }
 0x134   : > { %v929_v35 = vadd.f32 %v2098_v3, %v855_v15  ;;  %v930_v43 = vadd.f32 %v2102_v8, %v856_v2 }
 0x135   : > { %v1295_v25 = vadd.f32 %v1278_v21, %v1221_v7 }
 0x136   : > { %v1003_v63 = vadd.f32 %v2088_v47, %v929_v35  ;;  %v1004_v14 = vadd.f32 %v2096_v26, %v930_v43 }
 0x137   : > { %1303 = vst.msk [vmem:[#allocation3 + $0x10] sm:$0xff] %vm377_vm3, %v1295_v25  ;;  %v1283_v37 = vpop.f32.mrf.mxu0 }
 0x138   : > { %v1132_v53 = vpop.f32.mrf.mxu2  ;;  %v1061_v30 = vpop.f32.mrf.mxu1 }
 0x139   : > { %v1148_v34 = vadd.f32 %v1132_v53, %v1074_v49  ;;  %v1075_v33 = vadd.f32 %v1061_v30, %v1001_v56 }
 0x13a   : > { %v1206_v27 = vpop.f32.mrf.mxu3 }
 0x13b   : > { %v1222_v28 = vadd.f32 %v1206_v27, %v1148_v34 }
 0x13d   : > { %v1296_v31 = vadd.f32 %v1280_v59, %v1222_v28 }
 0x13f   : > { %1304 = vst.msk [vmem:[#allocation3 + $0x18] sm:$0xff] %vm377_vm3, %v1296_v31  ;;  %v1285_v48 = vpop.f32.mrf.mxu0 }
 0x140   : > { %v1135_v38 = vpop.f32.mrf.mxu2  ;;  %v1063_v39 = vpop.f32.mrf.mxu1 }
 0x141   : > { %v1149_v22 = vadd.f32 %v1135_v38, %v1075_v33  ;;  %v1076_v55 = vadd.f32 %v1063_v39, %v1002_v5 }
 0x142   : > { %v1209_v36 = vpop.f32.mrf.mxu3 }
 0x143   : > { %v1223_v46 = vadd.f32 %v1209_v36, %v1149_v22 }
 0x145   : > { %v1297_v51 = vadd.f32 %v1283_v37, %v1223_v46 }
 0x147   : > { %1305 = vst.msk [vmem:[#allocation3 + $0x20] sm:$0xff] %vm377_vm3, %v1297_v51  ;;  %v1288_v3 = vpop.f32.mrf.mxu0 }
 0x148   : > { %v1137_v60 = vpop.f32.mrf.mxu2  ;;  %v1066_v40 = vpop.f32.mrf.mxu1 }
 0x149   : > { %v1150_v6 = vadd.f32 %v1137_v60, %v1076_v55  ;;  %v1077_v13 = vadd.f32 %v1066_v40, %v1003_v63 }
 0x14a   : > { %v1211_v21 = vpop.f32.mrf.mxu3 }
 0x14b   : > { %v1224_v19 = vadd.f32 %v1211_v21, %v1150_v6 }
 0x14d   : > { %v1298_v58 = vadd.f32 %v1285_v48, %v1224_v19 }
 0x14f   : > { %1306 = vst.msk [vmem:[#allocation3 + $0x28] sm:$0xff] %vm377_vm3, %v1298_v58  ;;  %v1290_v41 = vpop.f32.mrf.mxu0 }
 0x150   : > { %v1140_v50 = vpop.f32.mrf.mxu2  ;;  %v1068_v18 = vpop.f32.mrf.mxu1 }
 0x151   : > { %v1151_v54 = vadd.f32 %v1140_v50, %v1077_v13  ;;  %v1078_v16 = vadd.f32 %v1068_v18, %v1004_v14 }
 0x152   : > { %v1214_v44 = vpop.f32.mrf.mxu3 }
 0x153   : > { %v1225_v11 = vadd.f32 %v1214_v44, %v1151_v54 }
 0x155   : > { %v1299_v17 = vadd.f32 %v1288_v3, %v1225_v11 }
 0x157   : > { %1307 = vst.msk [vmem:[#allocation3 + $0x30] sm:$0xff] %vm377_vm3, %v1299_v17 }
 0x158   : > { %v1142_v45 = vpop.f32.mrf.mxu2 }
 0x159   : > { %v1152_v47 = vadd.f32 %v1142_v45, %v1078_v16 }
 0x15a   : > { %v1216_v4 = vpop.f32.mrf.mxu3 }
 0x15b   : > { %v1226_v61 = vadd.f32 %v1216_v4, %v1152_v47 }
 0x15d   : > { %v1300_v7 = vadd.f32 %v1290_v41, %v1226_v61 }
 0x15f   : > { %1308 = vst.msk [vmem:[#allocation3 + $0x38] sm:$0xff] %vm377_vm3, %v1300_v7 }
 0x160 PF: > { %p1514_p0 = scmp.ne.s32.totalorder %s1594_s15, 2 }
 0x162   : > { %1312 = sbr.rel (%p1514_p0) target bundleno = 368 (0x170), region = 48 }
 0x167   : > { %v1313_v8 = vld [vmem:[#allocation3] sm:$0xff]  ;;  %vm1321_vm4 = vcmask 64512   ;;  %v1314_v26 = vld [vmem:[#allocation3 + $0x8] sm:$0xff]  ;;  %v1315_v24 = vld [vmem:[#allocation3 + $0x10] sm:$0xff] }
 0x168   : > { %1322 = vst.msk [vmem:[%s1686_s8] sm:$0xff] %vm1321_vm4, %v1313_v8  ;;  %v1316_v62 = vld [vmem:[#allocation3 + $0x18] sm:$0xff]  ;;  %v1317_v59 = vld [vmem:[#allocation3 + $0x20] sm:$0xff]  ;;  %v1318_v20 = vld [vmem:[#allocation3 + $0x28] sm:$0xff] }
 0x169   : > { %1323 = vst.msk [vmem:[%s1686_s8 + $0x8] sm:$0xff] %vm1321_vm4, %v1314_v26  ;;  %v1319_v25 = vld [vmem:[#allocation3 + $0x30] sm:$0xff]  ;;  %v1320_v49 = vld [vmem:[#allocation3 + $0x38] sm:$0xff] }
 0x16a   : > { %1324 = vst.msk [vmem:[%s1686_s8 + $0x10] sm:$0xff] %vm1321_vm4, %v1315_v24 }
 0x16b   : > { %1325 = vst.msk [vmem:[%s1686_s8 + $0x18] sm:$0xff] %vm1321_vm4, %v1316_v62 }
 0x16c   : > { %1326 = vst.msk [vmem:[%s1686_s8 + $0x20] sm:$0xff] %vm1321_vm4, %v1317_v59 }
 0x16d   : > { %1327 = vst.msk [vmem:[%s1686_s8 + $0x28] sm:$0xff] %vm1321_vm4, %v1318_v20 }
 0x16e   : > { %1328 = vst.msk [vmem:[%s1686_s8 + $0x30] sm:$0xff] %vm1321_vm4, %v1319_v25 }
 0x16f   : > { %1329 = vst.msk [vmem:[%s1686_s8 + $0x38] sm:$0xff] %vm1321_vm4, %v1320_v49 }
 0x170 PF: > { %s14_s19 = sadd.s32 1, %s1610_s19   ;;  %s2165_s15 = smov %s1602_s17 }
 0x171   : > { %p11_p1 = scmp.ge.s32.totalorder %s14_s19, 14   ;;  %s2166_s16 = smov %s1606_s18 }
 0x172   : > { %s2167_s17 = smov %s2170_s20  ;;  %s2168_s18 = smov %s2174_s21 }
 0x173   :  { %13 = sbr.rel (!%p11_p1) target bundleno = 3 (0x3), region = 89 }

// kernel: module_3d_fwd.11
= control target key start
LH: loop header
LB: loop body
LE: loop exit
PB: predicated region body
PF: predicated region fallthrough
CT: control target
= control target key end

     0   :  { %s1640_s15 = smov 0   ;;  %s1642_s16 = smov 0   ;;  %s2147_s0 = inlined_call_operand.vmem [shape: f32[1,4,64,8], index: 0, kind: input, shape index: {}]   ;;  %s2148_s1 = inlined_call_operand.vmem [shape: f32[1,8], index: 1, kind: input, shape index: {}]   ;;  %s2149_s2 = inlined_call_operand.vmem [shape: f32[1,8], index: 2, kind: input, shape index: {}]   ;;  %s2150_s3 = inlined_call_operand.vmem [shape: bf16[3,9,8,4], index: 3, kind: input, shape index: {}]   ;;  %s2151_s4 = inlined_call_operand.vmem [shape: f32[1,4,64,4], index: 4, kind: output, shape index: {}]  }
   0x1   :  { %s1644_s17 = smov 0   ;;  %s1646_s18 = smov 0  }
   0x2   :  { %s1648_s19 = smov 0  }
   0x3 LB: > { %s26_s20 = sadd.s32 1, %s1604_s17  ;;  %s29_s21 = sadd.s32 1, %s1608_s18  ;;  %s1612_s19 = sphi %s1648_s19, %s14_s19   ;;  %s1608_s18 = sphi %s1646_s18, %s2155_s18   ;;  %s1604_s17 = sphi %s1644_s17, %s2154_s17   ;;  %s1600_s16 = sphi %s1642_s16, %s2153_s16   ;;  %s1596_s15 = sphi %s1640_s15, %s2152_s15  }
   0x4   : > { %p27_p0 = scmp.ge.s32.totalorder %s26_s20, 3  ;;  %p1458_p1 = scmp.ge.s32.totalorder %s1612_s19, 1 }
   0x5   : > { %p223_p2 = scmp.lt.s32.totalorder %s1612_s19, 13 }
   0x6   : > { %s2157_s20 = smov (%p27_p0, %s26_s20), 0  ;;  %s2159_s21 = smov (!%p27_p0, %s29_s21), %s1608_s18 }
   0x7   : > { %p224_p3 = pnand %p1458_p1, %p223_p2  ;;  %p31_p4 = scmp.ge.s32.totalorder %s2159_s21, 4 }
   0x8   : > { %s268_s22 = sadd.s32 (!%p224_p3), %s1596_s15, %s1600_s16  ;;  %p289_p5 = scmp.lt.s32.totalorder (!%p224_p3), %s1596_s15, 2 }
   0x9   : > { %s2161_s21 = smov (%p31_p4, %s2159_s21), 0  ;;  %227 = sbr.rel (%p224_p3) target bundleno = 368 (0x170), region = 36 }
   0xa   : > { %s1674_s23 = sadd.s32 (!%p224_p3), 4294967295, %s268_s22  ;;  %p296_p8 = scmp.lt.s32.totalorder (!%p224_p3), %s1600_s16, 3 }
   0xb   : > { %p270_p6 = scmp.gt.s32.totalorder (!%p224_p3), %s1674_s23, 0  ;;  %p1460_p7 = scmp.lt.s32.totalorder (!%p224_p3), %s1674_s23, 3 }
   0xc   : > { %p1470_p10 = scmp.ne.s32.totalorder (!%p224_p3), %s1596_s15, 0 }
   0xe   : > { %s290_s24 = scalar_select %p289_p5, %s1596_s15, 2 }
   0xf   : > { %s271_s25 = scalar_select %p270_p6, %s1674_s23, 0 }
  0x10   : > { %s1530_s26 = smul.u32 36, %s290_s24  ;;  %s2165_s16 = smov (!%p296_p8, %s1600_s16), 3 }
  0x11   : > { %s2163_s25 = smov (!%p1460_p7, %s271_s25), 3  ;;  %s1526_s30 = sshll.u32 %s2165_s16, 6 }
  0x12   : > { %s1683_s29 = scalar_lea.vmem %s2150_s3, %s1530_s26  ;;  %p276_p9 = scmp.lt.s32.totalorder %s2163_s25, 3 }
  0x13   : > { %s1688_s8 = scalar_lea.vmem %s2151_s4, %s1526_s30  ;;  %307 = sbr.rel (%p1470_p10) target bundleno = 44 (0x2c), region = 40 }
  0x14   : > { %s2167_s25 = smov (!%p276_p9, %s2163_s25), 3 }
  0x15   : > { %s1525_s5 = sshll.u32 %s2167_s25, 6 }
  0x16   : > { %s1693_s11 = scalar_lea.vmem %s2147_s0, %s1525_s5 }
  0x18   : > { %vm308_vm0 = vcmask 64512   ;;  %v1614_v0 = vmov 0.0   ;;  %vm319_vm1 = vcmask 58368   ;;  %vm321_vm2 = vcmask 31744  }
  0x19   : > { %309 = vst.msk [vmem:[#allocation2] sm:$0xff] %vm308_vm0, %v1614_v0 }
  0x1a   : > { %310 = vst.msk [vmem:[#allocation2 + $0x8] sm:$0xff] %vm308_vm0, %v1614_v0 }
  0x1b   : > { %311 = vst.msk [vmem:[#allocation2 + $0x10] sm:$0xff] %vm308_vm0, %v1614_v0 }
  0x1c   : > { %312 = vst.msk [vmem:[#allocation2 + $0x18] sm:$0xff] %vm308_vm0, %v1614_v0 }
  0x1d   : > { %313 = vst.msk [vmem:[#allocation2 + $0x20] sm:$0xff] %vm308_vm0, %v1614_v0 }
  0x1e   : > { %314 = vst.msk [vmem:[#allocation2 + $0x28] sm:$0xff] %vm308_vm0, %v1614_v0 }
  0x1f   : > { %315 = vst.msk [vmem:[#allocation2 + $0x30] sm:$0xff] %vm308_vm0, %v1614_v0 }
  0x20   : > { %316 = vst.msk [vmem:[#allocation2 + $0x38] sm:$0xff] %vm308_vm0, %v1614_v0 }
  0x21   : > { %317 = vst.msk [vmem:[#allocation2 + $0x40] sm:$0xff] %vm308_vm0, %v1614_v0 }
  0x22   : > { %318 = vst.msk [vmem:[#allocation2 + $0x48] sm:$0xff] %vm308_vm0, %v1614_v0 }
  0x23   : > { %320 = vst.msk [vmem:[#allocation2 + $0x50] sm:$0x3] %vm319_vm1, %v1614_v0 }
  0x24   : > { %322 = vst.msk [vmem:[#allocation3] sm:$0xff] %vm321_vm2, %v1614_v0 }
  0x25   : > { %323 = vst.msk [vmem:[#allocation3 + $0x8] sm:$0xff] %vm321_vm2, %v1614_v0 }
  0x26   : > { %324 = vst.msk [vmem:[#allocation3 + $0x10] sm:$0xff] %vm321_vm2, %v1614_v0 }
  0x27   : > { %325 = vst.msk [vmem:[#allocation3 + $0x18] sm:$0xff] %vm321_vm2, %v1614_v0 }
  0x28   : > { %326 = vst.msk [vmem:[#allocation3 + $0x20] sm:$0xff] %vm321_vm2, %v1614_v0 }
  0x29   : > { %327 = vst.msk [vmem:[#allocation3 + $0x28] sm:$0xff] %vm321_vm2, %v1614_v0 }
  0x2a   : > { %328 = vst.msk [vmem:[#allocation3 + $0x30] sm:$0xff] %vm321_vm2, %v1614_v0 }
  0x2b   : > { %329 = vst.msk [vmem:[#allocation3 + $0x38] sm:$0xff] %vm321_vm2, %v1614_v0 }
  0x2c PF: > { %p332_p11 = scmp.ge.s32.totalorder %s1674_s23, 0  ;;  %p333_p12 = scmp.lt.s32.totalorder %s1674_s23, 4 }
  0x2e   : > { %p334_p13 = pnand %p333_p12, %p332_p11 }
  0x30   : > { %337 = sbr.rel (%p334_p13) target bundleno = 352 (0x160), region = 44 }
  0x35   : > { %v624_v1 = vld [vmem:[%s1683_s29] sm:$0xf]  ;;  %vm637_vm3 = vcmask 1043456   ;;  %v339_v3 = vld [vmem:[%s1693_s11 + $0x8] sm:$0xff]  ;;  %v387_v4 = vlaneseq  ;;  %v340_v6 = vld [vmem:[%s1693_s11 + $0x10] sm:$0xff]  ;;  %vm378_vm4 = vcmask 64512  }
  0x36   : > { %v338_v2 = vld [vmem:[%s1693_s11] sm:$0xff]  ;;  %v639_v5 = vsel %vm637_vm3, %v624_v1, 0  ;;  %v341_v10 = vld [vmem:[%s1693_s11 + $0x18] sm:$0xff]  ;;  %v343_v27 = vld [vmem:[%s1693_s11 + $0x28] sm:$0xff] }
  0x37   : > { %v1706_v7 = vld [vmem:[%s2148_s1] ss:$0 sm:$0xff]  ;;  %1527 = vmatpush.bf16.msra.mxu1 %v639_v5  ;;  %1528 = vmatpush.bf16.msra.mxu2 %v639_v5  ;;  %v1713_v9 = vshrl.u32 %v387_v4, 7  ;;  %v344_v28 = vld [vmem:[%s1693_s11 + $0x30] sm:$0xff]  ;;  %v1481_v39 = vld [vmem:[%s1683_s29 + $0x8] sm:$0xf] }
  0x38   : > { %v1711_v8 = vld [vmem:[%s2149_s2] ss:$0 sm:$0xff]  ;;  %1529 = vmatpush.bf16.msra.mxu3 %v639_v5  ;;  %648 = vmatpush.bf16.msra.mxu0 %v639_v5  ;;  %v350_v11 = vmul.f32 %v1706_v7, %v338_v2  ;;  %v351_v12 = vmul.f32 %v1706_v7, %v339_v3  ;;  %v352_v13 = vmul.f32 %v1706_v7, %v340_v6  ;;  %v1486_v42 = vld [vmem:[%s1683_s29 + $0xc] sm:$0xf]  ;;  %v1476_v43 = vld [vmem:[%s1683_s29 + $0x4] sm:$0xf] }
  0x39   : > { %v342_v14 = vld [vmem:[%s1693_s11 + $0x20] sm:$0xff]  ;;  %v1721_v15 = vadd.s32 16, %v1713_v9  ;;  %v1724_v16 = vadd.s32 24, %v1713_v9  ;;  %v353_v17 = vmul.f32 %v1706_v7, %v341_v10  ;;  %v1732_v22 = vadd.s32 32, %v1713_v9  ;;  %v1491_v48 = vld [vmem:[%s1683_s29 + $0x10] sm:$0xf] }
  0x3a   : > { %v354_v18 = vmul.f32 %v1706_v7, %v342_v14  ;;  %v362_v19 = vadd.f32 %v1711_v8, %v350_v11  ;;  %v363_v20 = vadd.f32 %v1711_v8, %v351_v12  ;;  %v364_v21 = vadd.f32 %v1711_v8, %v352_v13  ;;  %v588_v1 = vld [vmem:[#allocation2] sm:$0xff]  ;;  %v1501_v5 = vld [vmem:[%s1683_s29 + $0x18] sm:$0xf] }
  0x3b   : > { %v414_v23 = vand.u32 7, %v1721_v15  ;;  %v421_v24 = vand.u32 7, %v1724_v16  ;;  %v365_v25 = vadd.f32 %v1711_v8, %v353_v17  ;;  %v1741_v32 = vadd.s32 40, %v1713_v9 }
  0x3c   : > { %v366_v26 = vadd.f32 %v1711_v8, %v354_v18  ;;  %v370_v29 = vmax.f32 %v362_v19, 0.0  ;;  %v371_v30 = vmax.f32 %v363_v20, 0.0  ;;  %v372_v31 = vmax.f32 %v364_v21, 0.0 }
  0x3d   : > { %v373_v33 = vmax.f32 %v365_v25, 0.0  ;;  %v428_v35 = vand.u32 7, %v1732_v22  ;;  %v435_v36 = vand.u32 7, %v1741_v32  ;;  %v355_v37 = vmul.f32 %v1706_v7, %v343_v27  ;;  %v1496_v27 = vld [vmem:[%s1683_s29 + $0x14] sm:$0xf] }
  0x3e   : > { %v374_v34 = vmax.f32 %v366_v26, 0.0  ;;  %379 = vst.msk [vmem:[#allocation2 + $0x9] sm:$0xff] %vm378_vm4, %v370_v29  ;;  %v356_v38 = vmul.f32 %v1706_v7, %v344_v28  ;;  %v1751_v40 = vadd.s32 48, %v1713_v9  ;;  %v1754_v41 = vadd.s32 56, %v1713_v9  ;;  %v1511_v28 = vld [vmem:[%s1683_s29 + $0x20] sm:$0xf] }
  0x3f   : > { %380 = vst.msk [vmem:[#allocation2 + $0x11] sm:$0xff] %vm378_vm4, %v371_v30  ;;  %v1761_v44 = vadd.s32 4294967295, %v414_v23  ;;  %v1765_v45 = vadd.s32 4294967295, %v421_v24  ;;  %v367_v46 = vadd.f32 %v1711_v8, %v355_v37  ;;  %v1773_v49 = vadd.s32 4294967295, %v428_v35 }
  0x40   : > { %381 = vst.msk [vmem:[#allocation2 + $0x19] sm:$0xff] %vm378_vm4, %v372_v31  ;;  %v368_v47 = vadd.f32 %v1711_v8, %v356_v38  ;;  %v442_v50 = vand.u32 7, %v1751_v40  ;;  %v819_v51 = vsel %vm637_vm3, %v1481_v39, 0  ;;  %v1778_v52 = vadd.s32 8, %v1713_v9 }
  0x41   : > { %382 = vst.msk [vmem:[#allocation2 + $0x21] sm:$0xff] %vm378_vm4, %v373_v33  ;;  %v1783_v53 = vadd.s32 4294967295, %v435_v36  ;;  %v375_v54 = vmax.f32 %v367_v46, 0.0  ;;  %v449_v56 = vand.u32 7, %v1754_v41  ;;  %828 = vmatpush.bf16.msrb.mxu2 %v819_v51  ;;  %v400_v58 = vand.u32 7, %v1713_v9 }
  0x42   : > { %383 = vst.msk [vmem:[#allocation2 + $0x29] sm:$0xff] %vm378_vm4, %v374_v34  ;;  %v376_v55 = vmax.f32 %v368_v47, 0.0  ;;  %v1788_v57 = vadd.s32 4294967295, %v442_v50  ;;  %v407_v59 = vand.u32 7, %v1778_v52  ;;  %vm502_vm5 = vcmp.ge.s32.totalorder %v1761_v44, 0 }
  0x43   : > { %384 = vst.msk [vmem:[#allocation2 + $0x31] sm:$0xff] %vm378_vm4, %v375_v54  ;;  %v893_v60 = vsel %vm637_vm3, %v1486_v42, 0  ;;  %v729_v61 = vsel %vm637_vm3, %v1476_v43, 0  ;;  %v967_v62 = vsel %vm637_vm3, %v1491_v48, 0  ;;  %vm503_vm6 = vcmp.ge.s32.totalorder %v1765_v45, 0  ;;  %v678_v54 = vld [vmem:[#allocation2 + $0x1] sm:$0xff] }
  0x44   : > { %385 = vst.msk [vmem:[#allocation2 + $0x39] sm:$0xff] %vm378_vm4, %v376_v55  ;;  %v1799_v63 = vadd.s32 4294967295, %v400_v58  ;;  %v1801_v0 = vadd.s32 4294967295, %v407_v59  ;;  %902 = vmatpush.bf16.msrb.mxu3 %v893_v60  ;;  %738 = vmatpush.bf16.msrb.mxu1 %v729_v61  ;;  %vm504_vm7 = vcmp.ge.s32.totalorder %v1773_v49, 0  ;;  %vm505_vm8 = vcmp.ge.s32.totalorder %v1783_v53, 0 }
  0x45   : > { %v589_v2 = vld [vmem:[#allocation2 + $0x8] sm:$0xff]  ;;  %v1807_v4 = vadd.s32 4294967295, %v449_v56  ;;  %976 = vmatpush.bf16.msrb.mxu0 %v967_v62  ;;  %vm506_vm9 = vcmp.ge.s32.totalorder %v1788_v57, 0  ;;  %v1115_v31 = vsel %vm637_vm3, %v1501_v5, 0  ;;  %v1506_v33 = vld [vmem:[%s1683_s29 + $0x1c] sm:$0xf] }
  0x46   : > { %v590_v3 = vld [vmem:[#allocation2 + $0x10] sm:$0xff]  ;;  %vm500_vm10 = vcmp.ge.s32.totalorder %v1799_v63, 0  ;;  %vm501_vm11 = vcmp.ge.s32.totalorder %v1801_v0, 0  ;;  %v1041_v39 = vsel %vm637_vm3, %v1496_v27, 0  ;;  %v1263_v42 = vsel %vm637_vm3, %v1511_v28, 0  ;;  %v768_v51 = vld [vmem:[#allocation2 + $0x2] sm:$0xff] }
  0x47   : > { %v1810_v6 = vld [vmem:[#allocation2 + $0x18] sm:$0xff]  ;;  %v614_v9 = vsel %vm502_vm5, %v590_v3, 0.0  ;;  %v612_v12 = vsel %vm500_vm10, %v588_v1, 0.0  ;;  %v613_v13 = vsel %vm501_vm11, %v589_v2, 0.0  ;;  %v1828_v14 = vsel %vm500_vm10, %v590_v3, 0.0  ;;  %v1873_v52 = vld [vmem:[#allocation2 + $0xa] sm:$0xff] }
  0x48   : > { %v615_v10 = vsel %vm503_vm6, %v1810_v6, 0.0  ;;  %v1820_v11 = vld [vmem:[#allocation2 + $0x20] sm:$0xff]  ;;  %v620_v20 = vpack.c.bf16 %v613_v13, %v612_v12  ;;  %v1838_v21 = vsel %vm501_vm11, %v1810_v6, 0.0  ;;  %vm507_vm12 = vcmp.ge.s32.totalorder %v1807_v4, 0  ;;  %v679_v55 = vld [vmem:[#allocation2 + $0x9] sm:$0xff]  ;;  %v933_v60 = vld [vmem:[#allocation2 + $0x11] sm:$0xff] }
  0x49   : > { %v621_v17 = vpack.c.bf16 %v615_v10, %v614_v9  ;;  %v1830_v18 = vld [vmem:[#allocation2 + $0x28] sm:$0xff]  ;;  %v616_v19 = vsel %vm504_vm7, %v1820_v11, 0.0  ;;  %v1096_v26 = vpack.c.bf16 %v1838_v21, %v1828_v14  ;;  %v1189_v46 = vsel %vm637_vm3, %v1506_v33, 0  ;;  %v345_v12 = vld [vmem:[%s1693_s11 + $0x38] sm:$0xff] }
  0x4a   : > { %v617_v25 = vsel %vm505_vm8, %v1830_v18, 0.0  ;;  %v1849_v30 = vld [vmem:[#allocation2 + $0x30] sm:$0xff]  ;;  %1472 = vmatmul.msk.bf16.vlgmr.msra.gmra.mxu0 %vm378_vm4, %v620_v20  ;;  %v1866_v47 = vadd.s32 1, %v400_v58  ;;  %v1868_v48 = vadd.s32 1, %v407_v59  ;;  %v710_v61 = vpack.c.bf16 %v679_v55, %v678_v54 }
  0x4b   : > { %1473 = vmatmul.msk.bf16.vlgmr.msra.gmra.mxu1 %vm378_vm4, %v621_v17  ;;  %v622_v29 = vpack.c.bf16 %v617_v25, %v616_v19  ;;  %v1854_v34 = vld [vmem:[#allocation2 + $0x38] sm:$0xff]  ;;  %v618_v37 = vsel %vm506_vm9, %v1849_v30, 0.0  ;;  %1272 = vmatpush.bf16.msra.mxu0 %v1263_v42  ;;  %v948_v62 = vpack.c.bf16 %v933_v60, %v679_v55  ;;  %v866_v5 = vsel %vm500_vm10, %v589_v2, 0.0  ;;  %v935_v19 = vld [vmem:[#allocation2 + $0x21] sm:$0xff]  ;;  %v773_v33 = vld [vmem:[#allocation2 + $0x2a] sm:$0xff] }
  0x4c   : > { %v619_v38 = vsel %vm507_vm12, %v1854_v34, 0.0  ;;  %1050 = vmatpush.bf16.msra.mxu1 %v1041_v39  ;;  %vm564_vm13 = vcmp.lt.s32.totalorder %v1866_v47, 8  ;;  %vm565_vm14 = vcmp.lt.s32.totalorder %v1868_v48, 8  ;;  %v867_v9 = vsel %vm501_vm11, %v590_v3, 0.0  ;;  %v770_v2 = vld [vmem:[#allocation2 + $0x12] sm:$0xff]  ;;  %v1901_v3 = vld [vmem:[#allocation2 + $0x1a] sm:$0xff] }
  0x4d   : > { %1474 = vmatmul.msk.bf16.vlgmr.msra.gmra.mxu2 %vm378_vm4, %v622_v29  ;;  %v623_v43 = vpack.c.bf16 %v619_v38, %v618_v37  ;;  %v792_v58 = vsel %vm564_vm13, %v768_v51, 0.0  ;;  %v793_v59 = vsel %vm565_vm14, %v1873_v52, 0.0  ;;  %v874_v10 = vpack.c.bf16 %v867_v9, %v866_v5  ;;  %v683_v37 = vld [vmem:[#allocation2 + $0x29] sm:$0xff]  ;;  %v937_v38 = vld [vmem:[#allocation2 + $0x31] sm:$0xff] }
  0x4e   : > { %1124 = vmatpush.bf16.msra.mxu2 %v1115_v31  ;;  %v800_v1 = vpack.c.bf16 %v793_v59, %v792_v58  ;;  %v1890_v13 = vadd.s32 1, %v414_v23  ;;  %v1894_v17 = vadd.s32 1, %v421_v24  ;;  %v357_v63 = vmul.f32 %v1706_v7, %v345_v12  ;;  %v681_v23 = vld [vmem:[#allocation2 + $0x19] sm:$0xff] }
  0x4f   : > { %1475 = vmatmul.msk.bf16.vlgmr.msra.gmra.mxu3 %vm378_vm4, %v623_v43  ;;  %v949_v24 = vpack.c.bf16 %v935_v19, %v681_v23  ;;  %v868_v25 = vsel %vm502_vm5, %v1810_v6, 0.0  ;;  %v869_v27 = vsel %vm503_vm6, %v1820_v11, 0.0  ;;  %v1920_v29 = vadd.s32 1, %v428_v35  ;;  %v772_v6 = vld [vmem:[#allocation2 + $0x22] sm:$0xff]  ;;  %v774_v55 = vld [vmem:[#allocation2 + $0x32] sm:$0xff] }
  0x50   : > { %1198 = vmatpush.bf16.msra.mxu3 %v1189_v46  ;;  %v369_v0 = vadd.f32 %v1711_v8, %v357_v63  ;;  %vm566_vm15 = vcmp.lt.s32.totalorder %v1890_v13, 8  ;;  %vm567_vm0 = vcmp.lt.s32.totalorder %v1894_v17, 8  ;;  %v711_v8 = vpack.c.bf16 %v681_v23, %v933_v60  ;;  %v685_v58 = vld [vmem:[#allocation2 + $0x39] sm:$0xff] }
  0x51   : > { %v794_v16 = vsel %vm566_vm15, %v770_v2, 0.0  ;;  %v795_v7 = vsel %vm567_vm0, %v1901_v3, 0.0  ;;  %v875_v28 = vpack.c.bf16 %v869_v27, %v868_v25  ;;  %v1924_v31 = vadd.s32 1, %v435_v36 }
  0x52   : > { %v377_v15 = vmax.f32 %v369_v0, 0.0  ;;  %v801_v20 = vpack.c.bf16 %v795_v7, %v794_v16  ;;  %vm568_vm1 = vcmp.lt.s32.totalorder %v1920_v29, 8  ;;  %v712_v35 = vpack.c.bf16 %v683_v37, %v935_v19 }
  0x53   : > { %vm569_vm2 = vcmp.lt.s32.totalorder %v1924_v31, 8  ;;  %v796_v39 = vsel %vm568_vm1, %v772_v6, 0.0  ;;  %v950_v32 = vpack.c.bf16 %v937_v38, %v683_v37  ;;  %v870_v42 = vsel %vm504_vm7, %v1830_v18, 0.0 }
  0x54   : > { %386 = vst.msk [vmem:[#allocation2 + $0x41] sm:$0xff] %vm378_vm4, %v377_v15  ;;  %v797_v22 = vsel %vm569_vm2, %v773_v33, 0.0  ;;  %v871_v43 = vsel %vm505_vm8, %v1849_v30, 0.0  ;;  %v1944_v51 = vadd.s32 1, %v442_v50  ;;  %v1948_v54 = vadd.s32 1, %v449_v56 }
  0x55   : > { %v802_v36 = vpack.c.bf16 %v797_v22, %v796_v39  ;;  %v876_v46 = vpack.c.bf16 %v871_v43, %v870_v42  ;;  %v713_v56 = vpack.c.bf16 %v685_v58, %v937_v38  ;;  %v1015_v12 = vsel %vm565_vm14, %v770_v2, 0.0  ;;  %v1161_v38 = vld [vmem:[#allocation2 + $0x49] sm:$0xff] }
  0x56   : > { %vm570_vm3 = vcmp.lt.s32.totalorder %v1944_v51, 8  ;;  %vm571_vm10 = vcmp.lt.s32.totalorder %v1948_v54, 8  ;;  %v1236_v63 = vsel %vm564_vm13, %v770_v2, 0.0  ;;  %v1237_v0 = vsel %vm565_vm14, %v1901_v3, 0.0 }
  0x57   : > { %v798_v40 = vsel %vm570_vm3, %v774_v55, 0.0  ;;  %v1244_v23 = vpack.c.bf16 %v1237_v0, %v1236_v63  ;;  %v1016_v47 = vsel %vm566_vm15, %v1901_v3, 0.0  ;;  %v1017_v48 = vsel %vm567_vm0, %v772_v6, 0.0 }
  0x58   : > { %v1239_v2 = vsel %vm567_vm0, %v773_v33, 0.0  ;;  %v1090_v14 = vsel %vm502_vm5, %v1820_v11, 0.0  ;;  %v1091_v21 = vsel %vm503_vm6, %v1830_v18, 0.0  ;;  %v1018_v13 = vsel %vm568_vm1, %v773_v33, 0.0 }
  0x59   : > { %v1097_v3 = vpack.c.bf16 %v1091_v21, %v1090_v14  ;;  %v1019_v44 = vsel %vm569_vm2, %v774_v55, 0.0  ;;  %v1240_v45 = vsel %vm568_vm1, %v774_v55, 0.0  ;;  %v1092_v18 = vsel %vm504_vm7, %v1849_v30, 0.0 }
  0x5a   : > { %1492 = vmatmul.msk.bf16.vlgmr.msrb.gmra.mxu0 %vm378_vm4, %v948_v62  ;;  %v1093_v17 = vsel %vm505_vm8, %v1854_v34, 0.0  ;;  %v1024_v16 = vpack.c.bf16 %v1019_v44, %v1018_v13  ;;  %v581_v44 = vld [vmem:[#allocation3 + $0x8] sm:$0xff] }
  0x5b   : > { %1477 = vmatmul.msk.bf16.vlgmr.msrb.gmra.mxu1 %vm378_vm4, %v710_v61  ;;  %v775_v60 = vld [vmem:[#allocation2 + $0x3a] sm:$0xff]  ;;  %v1087_v25 = vld [vmem:[#allocation2 + $0x48] sm:$0xff] }
  0x5c   : > { %v1953_v59 = vld [vmem:[#allocation2 + $0x41] sm:$0xff]  ;;  %v799_v50 = vsel %vm571_vm10, %v775_v60, 0.0  ;;  %v1241_v11 = vsel %vm569_vm2, %v775_v60, 0.0  ;;  %v1020_v49 = vsel %vm570_vm3, %v775_v60, 0.0 }
  0x5d   : > { %1482 = vmatmul.msk.bf16.vlgmr.msrb.gmra.mxu2 %vm378_vm4, %v800_v1  ;;  %v865_v41 = vld [vmem:[#allocation2 + $0x40] sm:$0xff]  ;;  %v951_v61 = vpack.c.bf16 %v1953_v59, %v685_v58  ;;  %v803_v62 = vpack.c.bf16 %v799_v50, %v798_v40  ;;  %v872_v1 = vsel %vm506_vm9, %v1854_v34, 0.0  ;;  %v1246_v7 = vpack.c.bf16 %v1241_v11, %v1240_v45 }
  0x5e   : > { %v873_v5 = vsel %vm507_vm12, %v865_v41, 0.0  ;;  %v1094_v27 = vsel %vm506_vm9, %v865_v41, 0.0  ;;  %v1173_v39 = vpack.c.bf16 %v1161_v38, %v1953_v59 }
  0x5f   : > { %1487 = vmatmul.msk.bf16.vlgmr.msrb.gmra.mxu3 %vm378_vm4, %v874_v10  ;;  %v877_v9 = vpack.c.bf16 %v873_v5, %v872_v1  ;;  %v1014_v10 = vsel %vm564_vm13, %v1873_v52, 0.0  ;;  %v1238_v52 = vsel %vm566_vm15, %v772_v6, 0.0 }
  0x60   : > { %v1022_v15 = vpack.c.bf16 %v1015_v12, %v1014_v10  ;;  %v1245_v19 = vpack.c.bf16 %v1239_v2, %v1238_v52  ;;  %v580_v52 = vld [vmem:[#allocation3] sm:$0xff] }
  0x6a   : > { %1493 = vmatmul.msk.bf16.gmra.mxu0 %vm378_vm4, %v949_v24  ;;  %v1013_v24 = vld [vmem:[#allocation2 + $0x42] sm:$0xff] }
  0x6b   : > { %1478 = vmatmul.msk.bf16.gmra.mxu1 %vm378_vm4, %v711_v8  ;;  %v1021_v53 = vsel %vm571_vm10, %v1013_v24, 0.0  ;;  %v1242_v30 = vsel %vm570_vm3, %v1013_v24, 0.0 }
  0x6c   : > { %v1025_v29 = vpack.c.bf16 %v1021_v53, %v1020_v49 }
  0x6d   : > { %1483 = vmatmul.msk.bf16.gmra.mxu2 %vm378_vm4, %v801_v20  ;;  %v1235_v20 = vld [vmem:[#allocation2 + $0x4a] sm:$0xff] }
  0x6e   : > { %v1243_v34 = vsel %vm571_vm10, %v1235_v20, 0.0 }
  0x6f   : > { %1488 = vmatmul.msk.bf16.gmra.mxu3 %vm378_vm4, %v875_v28  ;;  %v1095_v28 = vsel %vm507_vm12, %v1087_v25, 0.0  ;;  %v1247_v31 = vpack.c.bf16 %v1243_v34, %v1242_v30  ;;  %v582_v25 = vld [vmem:[#allocation3 + $0x10] sm:$0xff] }
  0x70   : > { %v1099_v37 = vpack.c.bf16 %v1095_v28, %v1094_v27 }
  0x7a   : > { %1494 = vmatmul.msk.bf16.gmra.mxu0 %vm378_vm4, %v950_v32 }
  0x7b   : > { %1479 = vmatmul.msk.bf16.gmra.mxu1 %vm378_vm4, %v712_v35 }
  0x7d   : > { %1484 = vmatmul.msk.bf16.gmra.mxu2 %vm378_vm4, %v802_v36 }
  0x7f   : > { %1489 = vmatmul.msk.bf16.gmra.mxu3 %vm378_vm4, %v876_v46 }
  0x8a   : > { %1495 = vmatmul.msk.bf16.gmra.mxu0 %vm378_vm4, %v951_v61 }
  0x8b   : > { %1480 = vmatmul.msk.bf16.gmra.mxu1 %vm378_vm4, %v713_v56 }
  0x8d   : > { %1485 = vmatmul.msk.bf16.gmra.mxu2 %vm378_vm4, %v803_v62 }
  0x8f   : > { %1490 = vmatmul.msk.bf16.gmra.mxu3 %vm378_vm4, %v877_v9 }
  0x9a   : > { %1512 = vmatmul.msk.bf16.vlgmr.msra.gmra.mxu0 %vm378_vm4, %v1244_v23 }
  0x9b   : > { %1497 = vmatmul.msk.bf16.vlgmr.msra.gmra.mxu1 %vm378_vm4, %v1022_v15 }
  0x9d   : > { %1502 = vmatmul.msk.bf16.vlgmr.msra.gmra.mxu2 %vm378_vm4, %v1096_v26  ;;  %v1023_v26 = vpack.c.bf16 %v1017_v48, %v1016_v47 }
  0x9f   : > { %1507 = vmatmul.msk.bf16.vlgmr.msra.gmra.mxu3 %vm378_vm4, %v711_v8  ;;  %v1098_v8 = vpack.c.bf16 %v1093_v17, %v1092_v18 }
  0xaa   : > { %1513 = vmatmul.msk.bf16.gmra.mxu0 %vm378_vm4, %v1245_v19 }
  0xab   : > { %1498 = vmatmul.msk.bf16.gmra.mxu1 %vm378_vm4, %v1023_v26 }
  0xad   : > { %1503 = vmatmul.msk.bf16.gmra.mxu2 %vm378_vm4, %v1097_v3 }
  0xaf   : > { %1508 = vmatmul.msk.bf16.gmra.mxu3 %vm378_vm4, %v712_v35 }
  0xba   : > { %1514 = vmatmul.msk.bf16.gmra.mxu0 %vm378_vm4, %v1246_v7 }
  0xbb   : > { %1499 = vmatmul.msk.bf16.gmra.mxu1 %vm378_vm4, %v1024_v16 }
  0xbd   : > { %1504 = vmatmul.msk.bf16.gmra.mxu2 %vm378_vm4, %v1098_v8 }
  0xbf   : > { %1509 = vmatmul.msk.bf16.gmra.mxu3 %vm378_vm4, %v713_v56 }
  0xc7   : > { %v650_v33 = vpop.f32.mrf.mxu0 }
  0xc8   : > { %v2035_v6 = vpop.f32.mrf.mxu1  ;;  %v670_v21 = vadd.f32 %v650_v33, %v580_v52 }
  0xc9   : > { %v672_v34 = vadd.f32 %v2035_v6, %v582_v25 }
  0xca   : > { %1515 = vmatmul.msk.bf16.gmra.mxu0 %vm378_vm4, %v1247_v31 }
  0xcb   : > { %1500 = vmatmul.msk.bf16.gmra.mxu1 %vm378_vm4, %v1025_v29 }
  0xcd   : > { %1505 = vmatmul.msk.bf16.gmra.mxu2 %vm378_vm4, %v1099_v37 }
  0xcf   : > { %1510 = vmatmul.msk.bf16.gmra.mxu3 %vm378_vm4, %v1173_v39  ;;  %v652_v22 = vpop.f32.mrf.mxu0  ;;  %vm1302_vm4 = vcmask 31744  }
  0xd0   : > { %v2042_v57 = vpop.f32.mrf.mxu2  ;;  %v2044_v4 = vpop.f32.mrf.mxu1  ;;  %v671_v18 = vadd.f32 %v652_v22, %v581_v44  ;;  %v583_v22 = vld [vmem:[#allocation3 + $0x18] sm:$0xff] }
  0xd2   : > { %v2046_v35 = vpop.f32.mrf.mxu3 }
  0xd7   : > { %v978_v42 = vpop.f32.mrf.mxu0 }
  0xd8   : > { %v2048_v32 = vpop.f32.mrf.mxu2  ;;  %v740_v36 = vpop.f32.mrf.mxu1 }
  0xd9   : > { %v760_v19 = vadd.f32 %v740_v36, %v670_v21 }
  0xda   : > { %v2050_v43 = vpop.f32.mrf.mxu3 }
  0xdf   : > { %v980_v54 = vpop.f32.mrf.mxu0 }
  0xe0   : > { %v830_v46 = vpop.f32.mrf.mxu2  ;;  %v742_v51 = vpop.f32.mrf.mxu1 }
  0xe1   : > { %v850_v13 = vadd.f32 %v830_v46, %v760_v19  ;;  %v761_v7 = vadd.f32 %v742_v51, %v671_v18 }
  0xe2   : > { %v904_v55 = vpop.f32.mrf.mxu3 }
  0xe3   : > { %v924_v17 = vadd.f32 %v904_v55, %v850_v13  ;;  %v673_v55 = vadd.f32 %v2044_v4, %v583_v22  ;;  %v584_v13 = vld [vmem:[#allocation3 + $0x20] sm:$0xff] }
  0xe5   : > { %v998_v20 = vadd.f32 %v978_v42, %v924_v17  ;;  %v674_v17 = vadd.f32 %v2042_v57, %v584_v13 }
  0xe7   : > { %v2052_v59 = vpop.f32.mrf.mxu0 }
  0xe8   : > { %v832_v60 = vpop.f32.mrf.mxu2  ;;  %v745_v58 = vpop.f32.mrf.mxu1 }
  0xe9   : > { %v851_v24 = vadd.f32 %v832_v60, %v761_v7  ;;  %v762_v31 = vadd.f32 %v745_v58, %v672_v34 }
  0xea   : > { %v906_v40 = vpop.f32.mrf.mxu3 }
  0xeb   : > { %v925_v27 = vadd.f32 %v906_v40, %v851_v24 }
  0xed   : > { %v999_v39 = vadd.f32 %v980_v54, %v925_v27 }
  0xef   : > { %v2054_v56 = vpop.f32.mrf.mxu0 }
  0xf0   : > { %v835_v50 = vpop.f32.mrf.mxu2  ;;  %v747_v41 = vpop.f32.mrf.mxu1 }
  0xf1   : > { %v852_v38 = vadd.f32 %v835_v50, %v762_v31  ;;  %v763_v40 = vadd.f32 %v747_v41, %v673_v55 }
  0xf2   : > { %v909_v61 = vpop.f32.mrf.mxu3 }
  0xf3   : > { %v926_v60 = vadd.f32 %v909_v61, %v852_v38 }
  0xf5   : > { %v1000_v50 = vadd.f32 %v2052_v59, %v926_v60 }
  0xf7   : > { %v2058_v5 = vpop.f32.mrf.mxu0 }
  0xf8   : > { %v837_v62 = vpop.f32.mrf.mxu2  ;;  %v2056_v1 = vpop.f32.mrf.mxu1 }
  0xf9   : > { %v853_v19 = vadd.f32 %v837_v62, %v763_v40  ;;  %v764_v41 = vadd.f32 %v2056_v1, %v674_v17 }
  0xfa   : > { %v2060_v9 = vpop.f32.mrf.mxu3 }
  0xfb   : > { %v927_v4 = vadd.f32 %v2060_v9, %v853_v19 }
  0xfd   : > { %v1001_v59 = vadd.f32 %v2054_v56, %v927_v4 }
  0xff   : > { %v2066_v63 = vpop.f32.mrf.mxu0 }
 0x100   : > { %v2062_v10 = vpop.f32.mrf.mxu2  ;;  %v2064_v12 = vpop.f32.mrf.mxu1 }
 0x101   : > { %v854_v62 = vadd.f32 %v2062_v10, %v764_v41 }
 0x102   : > { %v2068_v0 = vpop.f32.mrf.mxu3 }
 0x103   : > { %v928_v9 = vadd.f32 %v2068_v0, %v854_v62 }
 0x105   : > { %v1002_v56 = vadd.f32 %v2058_v5, %v928_v9 }
 0x107   : > { %v2074_v47 = vpop.f32.mrf.mxu0 }
 0x108   : > { %v2070_v15 = vpop.f32.mrf.mxu2  ;;  %v2072_v23 = vpop.f32.mrf.mxu1 }
 0x10a   : > { %v2076_v48 = vpop.f32.mrf.mxu3 }
 0x10f   : > { %v2082_v26 = vpop.f32.mrf.mxu0 }
 0x110   : > { %v2078_v2 = vpop.f32.mrf.mxu2  ;;  %v2080_v14 = vpop.f32.mrf.mxu1 }
 0x112   : > { %v2084_v3 = vpop.f32.mrf.mxu3 }
 0x117   : > { %v1274_v16 = vpop.f32.mrf.mxu0 }
 0x118   : > { %v2086_v45 = vpop.f32.mrf.mxu2  ;;  %v1052_v11 = vpop.f32.mrf.mxu1 }
 0x119   : > { %v1072_v49 = vadd.f32 %v1052_v11, %v998_v20  ;;  %v585_v20 = vld [vmem:[#allocation3 + $0x28] sm:$0xff] }
 0x11a   : > { %v2088_v8 = vpop.f32.mrf.mxu3  ;;  %v675_v57 = vadd.f32 %v2048_v32, %v585_v20 }
 0x11c   : > { %v765_v1 = vadd.f32 %v2064_v12, %v675_v57 }
 0x11e   : > { %v855_v10 = vadd.f32 %v2070_v15, %v765_v1 }
 0x11f   : > { %v1276_v29 = vpop.f32.mrf.mxu0 }
 0x120   : > { %v1126_v53 = vpop.f32.mrf.mxu2  ;;  %v1054_v30 = vpop.f32.mrf.mxu1  ;;  %v929_v0 = vadd.f32 %v2076_v48, %v855_v10 }
 0x121   : > { %v1146_v28 = vadd.f32 %v1126_v53, %v1072_v49  ;;  %v1073_v46 = vadd.f32 %v1054_v30, %v999_v39 }
 0x122   : > { %v1200_v33 = vpop.f32.mrf.mxu3  ;;  %v1003_v5 = vadd.f32 %v2066_v63, %v929_v0 }
 0x123   : > { %v1220_v37 = vadd.f32 %v1200_v33, %v1146_v28 }
 0x125   : > { %v1294_v36 = vadd.f32 %v1274_v16, %v1220_v37 }
 0x127   : > { %1303 = vst.msk [vmem:[#allocation3] sm:$0xff] %vm1302_vm4, %v1294_v36  ;;  %v1279_v21 = vpop.f32.mrf.mxu0 }
 0x128   : > { %v1128_v42 = vpop.f32.mrf.mxu2  ;;  %v1057_v51 = vpop.f32.mrf.mxu1 }
 0x129   : > { %v1147_v6 = vadd.f32 %v1128_v42, %v1073_v46  ;;  %v1074_v44 = vadd.f32 %v1057_v51, %v1000_v50  ;;  %v587_v42 = vld [vmem:[#allocation3 + $0x38] sm:$0xff] }
 0x12a   : > { %v1202_v52 = vpop.f32.mrf.mxu3 }
 0x12b   : > { %v1221_v58 = vadd.f32 %v1202_v52, %v1147_v6  ;;  %v677_v6 = vadd.f32 %v2050_v43, %v587_v42 }
 0x12d   : > { %v1295_v54 = vadd.f32 %v1276_v29, %v1221_v58  ;;  %v586_v29 = vld [vmem:[#allocation3 + $0x30] sm:$0xff] }
 0x12e   : > { %v676_v32 = vadd.f32 %v2046_v35, %v586_v29 }
 0x12f   : > { %1304 = vst.msk [vmem:[#allocation3 + $0x8] sm:$0xff] %vm1302_vm4, %v1295_v54  ;;  %v1281_v24 = vpop.f32.mrf.mxu0 }
 0x130   : > { %v1131_v11 = vpop.f32.mrf.mxu2  ;;  %v1059_v18 = vpop.f32.mrf.mxu1  ;;  %v766_v12 = vadd.f32 %v2072_v23, %v676_v32  ;;  %v767_v23 = vadd.f32 %v2080_v14, %v677_v6 }
 0x131   : > { %v1148_v61 = vadd.f32 %v1131_v11, %v1074_v44  ;;  %v1075_v49 = vadd.f32 %v1059_v18, %v1001_v59 }
 0x132   : > { %v1205_v16 = vpop.f32.mrf.mxu3  ;;  %v856_v15 = vadd.f32 %v2078_v2, %v766_v12  ;;  %v857_v2 = vadd.f32 %v2086_v45, %v767_v23 }
 0x133   : > { %v1222_v7 = vadd.f32 %v1205_v16, %v1148_v61 }
 0x134   : > { %v930_v35 = vadd.f32 %v2084_v3, %v856_v15  ;;  %v931_v43 = vadd.f32 %v2088_v8, %v857_v2 }
 0x135   : > { %v1296_v25 = vadd.f32 %v1279_v21, %v1222_v7 }
 0x136   : > { %v1004_v63 = vadd.f32 %v2074_v47, %v930_v35  ;;  %v1005_v14 = vadd.f32 %v2082_v26, %v931_v43 }
 0x137   : > { %1305 = vst.msk [vmem:[#allocation3 + $0x10] sm:$0xff] %vm1302_vm4, %v1296_v25  ;;  %v1284_v37 = vpop.f32.mrf.mxu0 }
 0x138   : > { %v1133_v53 = vpop.f32.mrf.mxu2  ;;  %v1062_v30 = vpop.f32.mrf.mxu1 }
 0x139   : > { %v1149_v34 = vadd.f32 %v1133_v53, %v1075_v49  ;;  %v1076_v33 = vadd.f32 %v1062_v30, %v1002_v56 }
 0x13a   : > { %v1207_v27 = vpop.f32.mrf.mxu3 }
 0x13b   : > { %v1223_v28 = vadd.f32 %v1207_v27, %v1149_v34 }
 0x13d   : > { %v1297_v31 = vadd.f32 %v1281_v24, %v1223_v28 }
 0x13f   : > { %1306 = vst.msk [vmem:[#allocation3 + $0x18] sm:$0xff] %vm1302_vm4, %v1297_v31  ;;  %v1286_v48 = vpop.f32.mrf.mxu0 }
 0x140   : > { %v1136_v38 = vpop.f32.mrf.mxu2  ;;  %v1064_v39 = vpop.f32.mrf.mxu1 }
 0x141   : > { %v1150_v22 = vadd.f32 %v1136_v38, %v1076_v33  ;;  %v1077_v55 = vadd.f32 %v1064_v39, %v1003_v5 }
 0x142   : > { %v1210_v36 = vpop.f32.mrf.mxu3 }
 0x143   : > { %v1224_v46 = vadd.f32 %v1210_v36, %v1150_v22 }
 0x145   : > { %v1298_v51 = vadd.f32 %v1284_v37, %v1224_v46 }
 0x147   : > { %1307 = vst.msk [vmem:[#allocation3 + $0x20] sm:$0xff] %vm1302_vm4, %v1298_v51  ;;  %v1289_v3 = vpop.f32.mrf.mxu0 }
 0x148   : > { %v1138_v60 = vpop.f32.mrf.mxu2  ;;  %v1067_v52 = vpop.f32.mrf.mxu1 }
 0x149   : > { %v1151_v40 = vadd.f32 %v1138_v60, %v1077_v55  ;;  %v1078_v50 = vadd.f32 %v1067_v52, %v1004_v63 }
 0x14a   : > { %v1212_v21 = vpop.f32.mrf.mxu3 }
 0x14b   : > { %v1225_v58 = vadd.f32 %v1212_v21, %v1151_v40 }
 0x14d   : > { %v1299_v19 = vadd.f32 %v1286_v48, %v1225_v58 }
 0x14f   : > { %1308 = vst.msk [vmem:[#allocation3 + $0x28] sm:$0xff] %vm1302_vm4, %v1299_v19  ;;  %v1291_v16 = vpop.f32.mrf.mxu0 }
 0x150   : > { %v1141_v13 = vpop.f32.mrf.mxu2  ;;  %v1069_v18 = vpop.f32.mrf.mxu1 }
 0x151   : > { %v1152_v54 = vadd.f32 %v1141_v13, %v1078_v50  ;;  %v1079_v4 = vadd.f32 %v1069_v18, %v1005_v14 }
 0x152   : > { %v1215_v44 = vpop.f32.mrf.mxu3 }
 0x153   : > { %v1226_v11 = vadd.f32 %v1215_v44, %v1152_v54 }
 0x155   : > { %v1300_v17 = vadd.f32 %v1289_v3, %v1226_v11 }
 0x157   : > { %1309 = vst.msk [vmem:[#allocation3 + $0x30] sm:$0xff] %vm1302_vm4, %v1300_v17 }
 0x158   : > { %v1143_v45 = vpop.f32.mrf.mxu2 }
 0x159   : > { %v1153_v47 = vadd.f32 %v1143_v45, %v1079_v4 }
 0x15a   : > { %v1217_v61 = vpop.f32.mrf.mxu3 }
 0x15b   : > { %v1227_v41 = vadd.f32 %v1217_v61, %v1153_v47 }
 0x15d   : > { %v1301_v7 = vadd.f32 %v1291_v16, %v1227_v41 }
 0x15f   : > { %1310 = vst.msk [vmem:[#allocation3 + $0x38] sm:$0xff] %vm1302_vm4, %v1301_v7 }
 0x160 PF: > { %p1516_p0 = scmp.ne.s32.totalorder %s1596_s15, 2 }
 0x162   : > { %1314 = sbr.rel (%p1516_p0) target bundleno = 368 (0x170), region = 48 }
 0x167   : > { %v1315_v8 = vld [vmem:[#allocation3] sm:$0xff]  ;;  %vm1323_vm5 = vcmask 31744   ;;  %v1316_v26 = vld [vmem:[#allocation3 + $0x8] sm:$0xff]  ;;  %v1317_v62 = vld [vmem:[#allocation3 + $0x10] sm:$0xff] }
 0x168   : > { %1324 = vst.msk [vmem:[%s1688_s8] sm:$0xff] %vm1323_vm5, %v1315_v8  ;;  %v1318_v59 = vld [vmem:[#allocation3 + $0x18] sm:$0xff]  ;;  %v1319_v24 = vld [vmem:[#allocation3 + $0x20] sm:$0xff]  ;;  %v1320_v20 = vld [vmem:[#allocation3 + $0x28] sm:$0xff] }
 0x169   : > { %1325 = vst.msk [vmem:[%s1688_s8 + $0x8] sm:$0xff] %vm1323_vm5, %v1316_v26  ;;  %v1321_v25 = vld [vmem:[#allocation3 + $0x30] sm:$0xff]  ;;  %v1322_v49 = vld [vmem:[#allocation3 + $0x38] sm:$0xff] }
 0x16a   : > { %1326 = vst.msk [vmem:[%s1688_s8 + $0x10] sm:$0xff] %vm1323_vm5, %v1317_v62 }
 0x16b   : > { %1327 = vst.msk [vmem:[%s1688_s8 + $0x18] sm:$0xff] %vm1323_vm5, %v1318_v59 }
 0x16c   : > { %1328 = vst.msk [vmem:[%s1688_s8 + $0x20] sm:$0xff] %vm1323_vm5, %v1319_v24 }
 0x16d   : > { %1329 = vst.msk [vmem:[%s1688_s8 + $0x28] sm:$0xff] %vm1323_vm5, %v1320_v20 }
 0x16e   : > { %1330 = vst.msk [vmem:[%s1688_s8 + $0x30] sm:$0xff] %vm1323_vm5, %v1321_v25 }
 0x16f   : > { %1331 = vst.msk [vmem:[%s1688_s8 + $0x38] sm:$0xff] %vm1323_vm5, %v1322_v49 }
 0x170 PF: > { %s14_s19 = sadd.s32 1, %s1612_s19   ;;  %s2152_s15 = smov %s1604_s17 }
 0x171   : > { %p11_p1 = scmp.ge.s32.totalorder %s14_s19, 14   ;;  %s2153_s16 = smov %s1608_s18 }
 0x172   : > { %s2154_s17 = smov %s2157_s20  ;;  %s2155_s18 = smov %s2161_s21 }
 0x173   :  { %13 = sbr.rel (!%p11_p1) target bundleno = 3 (0x3), region = 89 }

</bundles_post_ra>
